<compile_context>
chip_gen: v5e
topology: v5e:2x2
jax: 0.10.0
libtpu: 0.0.40
codegen_flags: <defaults>
</compile_context>

<pallas_src>
import jax
import jax.numpy as jnp
from jax.experimental import pallas as pl
from jax.experimental.pallas import tpu as pltpu

EPS = 1e-5


# --------------------------------------------------------------------------- #
# Kernel
# --------------------------------------------------------------------------- #
def rn_kernel(x_ref,                       # [5, TB, 1280]  bf16 (row, batch, col*ci)
              w1_ref,                      # [3, 768, 128]  bf16 (ky, kx*ci, co), BN1 scale folded
              t1_ref,                      # [1, 128] f32   folded BN1 shift
              w2_ref,                      # [1152, 64]     bf16 (pixel*ci, co), BN2 scale folded
              t2_ref,                      # [1, 64]  f32   folded BN2 shift
              fc1w_ref, fc1b_ref,          # [64, 16] bf16, [1, 16] f32
              fc2w_ref, fc2b_ref,          # [16, 128] bf16 (col 0 real), [1, 128] f32
              out_ref,                     # [TB, 128] f32  logits (col 0 real)
              y1_scr):                     # VMEM scratch [TB, 1152] bf16
    t1 = t1_ref[...]
    cdt = w2_ref.dtype                     # bf16 compute dtype for MXU operands

    # conv1: for each of the 9 output pixels, 3 accumulating K=768 matmuls
    # (one per kernel row); BN1 shift + ReLU; stash bf16 result in scratch.
    for p in range(9):
        oy, ox = divmod(p, 3)
        col = ox * 256                     # 128-aligned lane offset
        acc = None
        for ky in range(3):
            xs = x_ref[oy + ky, :, pl.ds(col, 768)]          # [TB, 768] bf16
            c = jnp.dot(xs, w1_ref[ky], preferred_element_type=jnp.float32)
            acc = c if acc is None else acc + c
        y1p = jnp.maximum(acc + t1, 0.0)                     # [TB, 128] f32
        y1_scr[:, pl.ds(p * 128, 128)] = y1p.astype(cdt)

    # conv2 as one K=1152 matmul (receptive field == whole 3x3 map), shift, ReLU
    y2 = jnp.dot(y1_scr[...], w2_ref[...], preferred_element_type=jnp.float32)
    y2 = jnp.maximum(y2 + t2_ref[...], 0.0)                  # [TB, 64] f32

    # fc1 + ReLU; dropout(p=0.5) is identity in eval mode
    h = jnp.dot(y2.astype(cdt), fc1w_ref[...],
                preferred_element_type=jnp.float32) + fc1b_ref[...]
    h = jnp.maximum(h, 0.0)                                   # [TB, 16]

    # fc2 (zero-padded to 128 lanes for an unmasked, lane-dense store)
    logits = jnp.dot(h.astype(cdt), fc2w_ref[...],
                     preferred_element_type=jnp.float32) + fc2b_ref[...]
    out_ref[...] = logits                                     # sigmoid in wrapper


# --------------------------------------------------------------------------- #
# Helpers
# --------------------------------------------------------------------------- #
def fold_bn(conv_bias, gamma, beta, mean, var):
    s = gamma / jnp.sqrt(var + EPS)
    t = (conv_bias - mean) * s + beta
    return s, t


def _round_up(x, m):
    return (x + m - 1) // m * m


def _pick_batch_tile(b):
    """Fixed batch tile: 128 for large B, ~B/2 rounded to 16 for small B."""
    if b >= 256:
        return 128
    return max(16, _round_up((b + 1) // 2, 16))


def prep_weights(params):
    """Weight prep shared by the Pallas wrapper and the pure-JAX reference."""
    s1, t1 = fold_bn(params["b1"], params["g1"], params["be1"], params["m1"], params["v1"])
    s2, t2 = fold_bn(params["b2"], params["g2"], params["be2"], params["m2"], params["v2"])
    # conv1: [co,ci,ky,kx] -> [ky, kx*ci, co], BN1 scale folded over co, bf16
    w1r = jnp.transpose(params["w1"], (2, 3, 1, 0)).reshape(3, 3 * 256, 128)
    w1r = (w1r * s1).astype(jnp.bfloat16)
    # conv2: [co,ci,ky,kx] -> [(3*ky+kx)*128 + ci, co], BN2 scale folded, bf16
    w2r = jnp.transpose(params["w2"], (2, 3, 1, 0)).reshape(9 * 128, 64)
    w2r = (w2r * s2).astype(jnp.bfloat16)
    fc1w = params["fc1w"].T.astype(jnp.bfloat16)              # [64, 16]
    fc1b = params["fc1b"].reshape(1, 16).astype(jnp.float32)
    # fc2: pad the single output column to 128 lanes for a lane-dense store
    fc2w_pad = jnp.zeros((16, 128), jnp.float32).at[:, 0].set(params["fc2w"][0])
    fc2w_pad = fc2w_pad.astype(jnp.bfloat16)
    fc2b_pad = jnp.zeros((1, 128), jnp.float32).at[0, 0].set(params["fc2b"][0])
    return dict(w1r=w1r, t1=t1.reshape(1, 128).astype(jnp.float32),
                w2r=w2r, t2=t2.reshape(1, 64).astype(jnp.float32),
                fc1w=fc1w, fc1b=fc1b, fc2w_pad=fc2w_pad, fc2b_pad=fc2b_pad)


def im2col_3x3(x_nhwc):
    """[B,H,W,C] -> [B*OH*OW, 9*C] patches, col order (ky, kx, c). Reference only."""
    B, H, W, C = x_nhwc.shape
    OH, OW = H - 2, W - 2
    cols = []
    for ky in range(3):
        for kx in range(3):
            cols.append(x_nhwc[:, ky:ky + OH, kx:kx + OW, :])
    p = jnp.stack(cols, axis=3)                               # [B,OH,OW,9,C]
    return p.reshape(B * OH * OW, 9 * C)


# --------------------------------------------------------------------------- #
# Wrapper
# --------------------------------------------------------------------------- #
def relation_network_forward(x_nchw, params):
    """x_nchw: [B, 256, 5, 5] float32 (PyTorch NCHW convention) -> [B, 1] f32."""
    B = x_nchw.shape[0]
    TB = _pick_batch_tile(B)
    B_pad = max(_round_up(B, TB), 2 * TB)                     # grid >= 2 (v7x megacore)

    # row-major layout: x5[row, b, col*256 + ci] = x[b, ci, row, col]  (bf16)
    x5 = jnp.transpose(x_nchw, (2, 0, 3, 1)).reshape(5, B, 5 * 256)
    if B_pad != B:
        x5 = jnp.pad(x5, ((0, 0), (0, B_pad - B), (0, 0)))
    x5 = x5.astype(jnp.bfloat16)

    w = prep_weights(params)
    args = (x5, w["w1r"], w["t1"], w["w2r"], w["t2"],
            w["fc1w"], w["fc1b"], w["fc2w_pad"], w["fc2b_pad"])

    grid = (B_pad // TB,)
    const2 = lambda i: (0, 0)
    const3 = lambda i: (0, 0, 0)
    in_specs = [
        pl.BlockSpec((5, TB, 1280), lambda i: (0, i, 0)),     # x (batch-tiled)
        pl.BlockSpec((3, 768, 128), const3),                  # w1 (VMEM-resident)
        pl.BlockSpec((1, 128), const2),                       # t1
        pl.BlockSpec((1152, 64), const2),                     # w2
        pl.BlockSpec((1, 64), const2),                        # t2
        pl.BlockSpec((64, 16), const2),                       # fc1w
        pl.BlockSpec((1, 16), const2),                        # fc1b
        pl.BlockSpec((16, 128), const2),                      # fc2w (padded)
        pl.BlockSpec((1, 128), const2),                       # fc2b (padded)
    ]
    out_specs = pl.BlockSpec((TB, 128), lambda i: (i, 0))

    flops_per_sample = 2 * (27 * 768 * 128 + 1152 * 64 + 64 * 16 + 16 * 128)
    cost = pl.CostEstimate(
        flops=flops_per_sample * B_pad,
        transcendentals=0,
        bytes_accessed=(B_pad * 5 * 1280 * 2                          # x (bf16)
                        + (3 * 768 * 128 + 1152 * 64 + 64 * 16 + 16 * 128) * 2
                        + B_pad * 128 * 4),                           # output
    )

    out_full = pl.pallas_call(
        rn_kernel,
        out_shape=jax.ShapeDtypeStruct((B_pad, 128), jnp.float32),
        grid_spec=pltpu.PrefetchScalarGridSpec(
            num_scalar_prefetch=0,
            grid=grid,
            in_specs=in_specs,
            out_specs=out_specs,
            scratch_shapes=[pltpu.VMEM((TB, 9 * 128), jnp.bfloat16)],
        ),
        compiler_params=pltpu.CompilerParams(
            dimension_semantics=("parallel",),
            vmem_limit_bytes=32 * 1024 * 1024,
        ),
        cost_estimate=cost,
    )(*args)

    return jax.nn.sigmoid(out_full[:B, 0:1])


# --------------------------------------------------------------------------- #
# Pure-JAX reference (same eval-mode, folded-BN, mixed-precision semantics)
# --------------------------------------------------------------------------- #
def reference_forward(x_nchw, params):
    w = prep_weights(params)
    B = x_nchw.shape[0]
    x = jnp.transpose(x_nchw, (0, 2, 3, 1)).astype(jnp.bfloat16)       # [B,5,5,256]
    p1 = im2col_3x3(x)                                                 # [B*9, 2304]
    w1m = w["w1r"].reshape(9 * 256, 128)                               # (ky,kx,ci) order
    y1 = jnp.maximum(jnp.dot(p1, w1m, preferred_element_type=jnp.float32) + w["t1"], 0.0)
    y1 = y1.reshape(B, 9 * 128).astype(jnp.bfloat16)                   # (pixel, ci) order
    y2 = jnp.maximum(jnp.dot(y1, w["w2r"], preferred_element_type=jnp.float32) + w["t2"], 0.0)
    h = jnp.maximum(jnp.dot(y2.astype(jnp.bfloat16), w["fc1w"],
                            preferred_element_type=jnp.float32) + w["fc1b"], 0.0)
    logits = jnp.dot(h.astype(jnp.bfloat16), w["fc2w_pad"],
                     preferred_element_type=jnp.float32) + w["fc2b_pad"]
    return jax.nn.sigmoid(logits[:, 0:1])


def init_params(key):
    ks = jax.random.split(key, 12)
    f32 = jnp.float32
    return {
        # Conv2d(256,128,3)
        "w1": jax.random.normal(ks[0], (128, 256, 3, 3), f32) * 0.02,
        "b1": jax.random.normal(ks[1], (128,), f32) * 0.01,
        # BatchNorm2d(128)
        "g1": 1.0 + 0.1 * jax.random.normal(ks[2], (128,), f32),
        "be1": 0.1 * jax.random.normal(ks[3], (128,), f32),
        "m1": 0.05 * jax.random.normal(ks[4], (128,), f32),
        "v1": 0.5 + jnp.abs(jax.random.normal(ks[5], (128,), f32)) * 0.1,
        # Conv2d(128,64,3)
        "w2": jax.random.normal(ks[6], (64, 128, 3, 3), f32) * 0.02,
        "b2": jax.random.normal(ks[7], (64,), f32) * 0.01,
        # BatchNorm2d(64)
        "g2": 1.0 + 0.1 * jax.random.normal(ks[8], (64,), f32),
        "be2": 0.1 * jax.random.normal(ks[9], (64,), f32),
        "m2": 0.05 * jax.random.normal(ks[10], (64,), f32),
        "v2": 0.5 + jnp.abs(jax.random.normal(ks[11], (64,), f32)) * 0.1,
        # Linear(64,16), Linear(16,1)
        "fc1w": jax.random.normal(jax.random.PRNGKey(100), (16, 64), f32) * 0.1,
        "fc1b": jax.random.normal(jax.random.PRNGKey(101), (16,), f32) * 0.01,
        "fc2w": jax.random.normal(jax.random.PRNGKey(102), (1, 16), f32) * 0.1,
        "fc2b": jax.random.normal(jax.random.PRNGKey(103), (1,), f32) * 0.01,
    }


if __name__ == "__main__":
    key = jax.random.PRNGKey(0)
    kx, kp = jax.random.split(key)
    # Spatial must be 5x5: 5 -(k3)-> 3 -(k3)-> 1, so flatten gives 64 == fc1 in-features.
    B = 2
    x = jax.random.normal(kx, (B, 256, 5, 5), jnp.float32)
    params = init_params(kp)

    out = jax.block_until_ready(relation_network_forward(x, params))
    ref = jax.block_until_ready(reference_forward(x, params))

    assert out.shape == (B, 1)
    assert jnp.allclose(out, ref, rtol=1e-3, atol=1e-3), (out, ref)

    print("KERNEL_OK")
</pallas_src>

<mosaic_0001>
module attributes {stable_mosaic.version = 11 : i64} {
  func.func @rn_kernel(%arg0: i32, %arg1: memref<5x16x1280xbf16, #tpu.memory_space<vmem>>, %arg2: memref<3x768x128xbf16, #tpu.memory_space<vmem>>, %arg3: memref<1x128xf32, #tpu.memory_space<vmem>>, %arg4: memref<1152x64xbf16, #tpu.memory_space<vmem>>, %arg5: memref<1x64xf32, #tpu.memory_space<vmem>>, %arg6: memref<64x16xbf16, #tpu.memory_space<vmem>>, %arg7: memref<1x16xf32, #tpu.memory_space<vmem>>, %arg8: memref<16x128xbf16, #tpu.memory_space<vmem>>, %arg9: memref<1x128xf32, #tpu.memory_space<vmem>>, %arg10: memref<16x128xf32, #tpu.memory_space<vmem>>, %arg11: memref<16x1152xbf16, #tpu.memory_space<vmem>>) attributes {dimension_semantics = [#tpu.dimension_semantics<parallel>], iteration_bounds = array<i64: 2>, scalar_prefetch = 0 : i64, scratch_operands = 1 : i64, tpu.core_type = #tpu.core_type<tc>, window_params = [{transform_indices = @transform_0, window_bounds = array<i64: 5, 16, 1280>}, {pipeline_mode = #tpu.pipeline_mode<synchronous>, transform_indices = @transform_1, window_bounds = array<i64: 3, 768, 128>}, {pipeline_mode = #tpu.pipeline_mode<synchronous>, transform_indices = @transform_2, window_bounds = array<i64: 1, 128>}, {pipeline_mode = #tpu.pipeline_mode<synchronous>, transform_indices = @transform_3, window_bounds = array<i64: 1152, 64>}, {pipeline_mode = #tpu.pipeline_mode<synchronous>, transform_indices = @transform_4, window_bounds = array<i64: 1, 64>}, {pipeline_mode = #tpu.pipeline_mode<synchronous>, transform_indices = @transform_5, window_bounds = array<i64: 64, 16>}, {pipeline_mode = #tpu.pipeline_mode<synchronous>, transform_indices = @transform_6, window_bounds = array<i64: 1, 16>}, {pipeline_mode = #tpu.pipeline_mode<synchronous>, transform_indices = @transform_7, window_bounds = array<i64: 16, 128>}, {pipeline_mode = #tpu.pipeline_mode<synchronous>, transform_indices = @transform_8, window_bounds = array<i64: 1, 128>}, {transform_indices = @transform_9, window_bounds = array<i64: 16, 128>}]} {
    %c0 = arith.constant 0 : index
    %c0_0 = arith.constant 0 : index
    %0 = vector.load %arg3[%c0, %c0_0] : memref<1x128xf32, #tpu.memory_space<vmem>>, vector<1x128xf32>
    %c0_1 = arith.constant 0 : index
    %c0_2 = arith.constant 0 : index
    %c0_3 = arith.constant 0 : index
    %1 = vector.load %arg1[%c0_1, %c0_2, %c0_3] : memref<5x16x1280xbf16, #tpu.memory_space<vmem>>, vector<1x16x768xbf16>
    %2 = vector.shape_cast %1 : vector<1x16x768xbf16> to vector<16x768xbf16>
    %c0_4 = arith.constant 0 : index
    %c0_5 = arith.constant 0 : index
    %c0_6 = arith.constant 0 : index
    %3 = vector.load %arg2[%c0_4, %c0_5, %c0_6] : memref<3x768x128xbf16, #tpu.memory_space<vmem>>, vector<1x768x128xbf16>
    %4 = vector.shape_cast %3 : vector<1x768x128xbf16> to vector<768x128xbf16>
    %cst = arith.constant dense<0.000000e+00> : vector<16x128xf32>
    %5 = tpu.matmul %2, %4, %cst {dimension_numbers = #tpu.dot_dimension_numbers<[1], [0], [0], [1], [0, 0, 1, 1], [], []>} : vector<16x768xbf16>, vector<768x128xbf16>, vector<16x128xf32> -> vector<16x128xf32>
    %c1 = arith.constant 1 : index
    %c0_7 = arith.constant 0 : index
    %c0_8 = arith.constant 0 : index
    %6 = vector.load %arg1[%c1, %c0_7, %c0_8] : memref<5x16x1280xbf16, #tpu.memory_space<vmem>>, vector<1x16x768xbf16>
    %7 = vector.shape_cast %6 : vector<1x16x768xbf16> to vector<16x768xbf16>
    %c1_9 = arith.constant 1 : index
    %c0_10 = arith.constant 0 : index
    %c0_11 = arith.constant 0 : index
    %8 = vector.load %arg2[%c1_9, %c0_10, %c0_11] : memref<3x768x128xbf16, #tpu.memory_space<vmem>>, vector<1x768x128xbf16>
    %9 = vector.shape_cast %8 : vector<1x768x128xbf16> to vector<768x128xbf16>
    %cst_12 = arith.constant dense<0.000000e+00> : vector<16x128xf32>
    %10 = tpu.matmul %7, %9, %cst_12 {dimension_numbers = #tpu.dot_dimension_numbers<[1], [0], [0], [1], [0, 0, 1, 1], [], []>} : vector<16x768xbf16>, vector<768x128xbf16>, vector<16x128xf32> -> vector<16x128xf32>
    %11 = arith.addf %5, %10 : vector<16x128xf32>
    %c2 = arith.constant 2 : index
    %c0_13 = arith.constant 0 : index
    %c0_14 = arith.constant 0 : index
    %12 = vector.load %arg1[%c2, %c0_13, %c0_14] : memref<5x16x1280xbf16, #tpu.memory_space<vmem>>, vector<1x16x768xbf16>
    %13 = vector.shape_cast %12 : vector<1x16x768xbf16> to vector<16x768xbf16>
    %c2_15 = arith.constant 2 : index
    %c0_16 = arith.constant 0 : index
    %c0_17 = arith.constant 0 : index
    %14 = vector.load %arg2[%c2_15, %c0_16, %c0_17] : memref<3x768x128xbf16, #tpu.memory_space<vmem>>, vector<1x768x128xbf16>
    %15 = vector.shape_cast %14 : vector<1x768x128xbf16> to vector<768x128xbf16>
    %cst_18 = arith.constant dense<0.000000e+00> : vector<16x128xf32>
    %16 = tpu.matmul %13, %15, %cst_18 {dimension_numbers = #tpu.dot_dimension_numbers<[1], [0], [0], [1], [0, 0, 1, 1], [], []>} : vector<16x768xbf16>, vector<768x128xbf16>, vector<16x128xf32> -> vector<16x128xf32>
    %17 = arith.addf %11, %16 : vector<16x128xf32>
    %18 = vector.broadcast %0 : vector<1x128xf32> to vector<16x128xf32>
    %19 = arith.addf %17, %18 : vector<16x128xf32>
    %cst_19 = arith.constant 0.000000e+00 : f32
    %20 = vector.broadcast %cst_19 : f32 to vector<16x128xf32>
    %21 = arith.maximumf %19, %20 : vector<16x128xf32>
    %22 = arith.truncf %21 : vector<16x128xf32> to vector<16x128xbf16>
    %c0_20 = arith.constant 0 : index
    %c0_21 = arith.constant 0 : index
    %23 = vector.load %arg11[%c0_20, %c0_21] : memref<16x1152xbf16, #tpu.memory_space<vmem>>, vector<16x128xbf16>
    tpu.vector_store %arg11[%c0_20, %c0_21], %22 {strides = array<i32>} : memref<16x1152xbf16, #tpu.memory_space<vmem>>, vector<16x128xbf16>,
    %c0_22 = arith.constant 0 : index
    %c0_23 = arith.constant 0 : index
    %c256 = arith.constant 256 : index
    %24 = vector.load %arg1[%c0_22, %c0_23, %c256] : memref<5x16x1280xbf16, #tpu.memory_space<vmem>>, vector<1x16x768xbf16>
    %25 = vector.shape_cast %24 : vector<1x16x768xbf16> to vector<16x768xbf16>
    %c0_24 = arith.constant 0 : index
    %c0_25 = arith.constant 0 : index
    %c0_26 = arith.constant 0 : index
    %26 = vector.load %arg2[%c0_24, %c0_25, %c0_26] : memref<3x768x128xbf16, #tpu.memory_space<vmem>>, vector<1x768x128xbf16>
    %27 = vector.shape_cast %26 : vector<1x768x128xbf16> to vector<768x128xbf16>
    %cst_27 = arith.constant dense<0.000000e+00> : vector<16x128xf32>
    %28 = tpu.matmul %25, %27, %cst_27 {dimension_numbers = #tpu.dot_dimension_numbers<[1], [0], [0], [1], [0, 0, 1, 1], [], []>} : vector<16x768xbf16>, vector<768x128xbf16>, vector<16x128xf32> -> vector<16x128xf32>
    %c1_28 = arith.constant 1 : index
    %c0_29 = arith.constant 0 : index
    %c256_30 = arith.constant 256 : index
    %29 = vector.load %arg1[%c1_28, %c0_29, %c256_30] : memref<5x16x1280xbf16, #tpu.memory_space<vmem>>, vector<1x16x768xbf16>
    %30 = vector.shape_cast %29 : vector<1x16x768xbf16> to vector<16x768xbf16>
    %c1_31 = arith.constant 1 : index
    %c0_32 = arith.constant 0 : index
    %c0_33 = arith.constant 0 : index
    %31 = vector.load %arg2[%c1_31, %c0_32, %c0_33] : memref<3x768x128xbf16, #tpu.memory_space<vmem>>, vector<1x768x128xbf16>
    %32 = vector.shape_cast %31 : vector<1x768x128xbf16> to vector<768x128xbf16>
    %cst_34 = arith.constant dense<0.000000e+00> : vector<16x128xf32>
    %33 = tpu.matmul %30, %32, %cst_34 {dimension_numbers = #tpu.dot_dimension_numbers<[1], [0], [0], [1], [0, 0, 1, 1], [], []>} : vector<16x768xbf16>, vector<768x128xbf16>, vector<16x128xf32> -> vector<16x128xf32>
    %34 = arith.addf %28, %33 : vector<16x128xf32>
    %c2_35 = arith.constant 2 : index
    %c0_36 = arith.constant 0 : index
    %c256_37 = arith.constant 256 : index
    %35 = vector.load %arg1[%c2_35, %c0_36, %c256_37] : memref<5x16x1280xbf16, #tpu.memory_space<vmem>>, vector<1x16x768xbf16>
    %36 = vector.shape_cast %35 : vector<1x16x768xbf16> to vector<16x768xbf16>
    %c2_38 = arith.constant 2 : index
    %c0_39 = arith.constant 0 : index
    %c0_40 = arith.constant 0 : index
    %37 = vector.load %arg2[%c2_38, %c0_39, %c0_40] : memref<3x768x128xbf16, #tpu.memory_space<vmem>>, vector<1x768x128xbf16>
    %38 = vector.shape_cast %37 : vector<1x768x128xbf16> to vector<768x128xbf16>
    %cst_41 = arith.constant dense<0.000000e+00> : vector<16x128xf32>
    %39 = tpu.matmul %36, %38, %cst_41 {dimension_numbers = #tpu.dot_dimension_numbers<[1], [0], [0], [1], [0, 0, 1, 1], [], []>} : vector<16x768xbf16>, vector<768x128xbf16>, vector<16x128xf32> -> vector<16x128xf32>
    %40 = arith.addf %34, %39 : vector<16x128xf32>
    %41 = vector.broadcast %0 : vector<1x128xf32> to vector<16x128xf32>
    %42 = arith.addf %40, %41 : vector<16x128xf32>
    %cst_42 = arith.constant 0.000000e+00 : f32
    %43 = vector.broadcast %cst_42 : f32 to vector<16x128xf32>
    %44 = arith.maximumf %42, %43 : vector<16x128xf32>
    %45 = arith.truncf %44 : vector<16x128xf32> to vector<16x128xbf16>
    %c0_43 = arith.constant 0 : index
    %c128 = arith.constant 128 : index
    %46 = vector.load %arg11[%c0_43, %c128] : memref<16x1152xbf16, #tpu.memory_space<vmem>>, vector<16x128xbf16>
    tpu.vector_store %arg11[%c0_43, %c128], %45 {strides = array<i32>} : memref<16x1152xbf16, #tpu.memory_space<vmem>>, vector<16x128xbf16>,
    %c0_44 = arith.constant 0 : index
    %c0_45 = arith.constant 0 : index
    %c512 = arith.constant 512 : index
    %47 = vector.load %arg1[%c0_44, %c0_45, %c512] : memref<5x16x1280xbf16, #tpu.memory_space<vmem>>, vector<1x16x768xbf16>
    %48 = vector.shape_cast %47 : vector<1x16x768xbf16> to vector<16x768xbf16>
    %c0_46 = arith.constant 0 : index
    %c0_47 = arith.constant 0 : index
    %c0_48 = arith.constant 0 : index
    %49 = vector.load %arg2[%c0_46, %c0_47, %c0_48] : memref<3x768x128xbf16, #tpu.memory_space<vmem>>, vector<1x768x128xbf16>
    %50 = vector.shape_cast %49 : vector<1x768x128xbf16> to vector<768x128xbf16>
    %cst_49 = arith.constant dense<0.000000e+00> : vector<16x128xf32>
    %51 = tpu.matmul %48, %50, %cst_49 {dimension_numbers = #tpu.dot_dimension_numbers<[1], [0], [0], [1], [0, 0, 1, 1], [], []>} : vector<16x768xbf16>, vector<768x128xbf16>, vector<16x128xf32> -> vector<16x128xf32>
    %c1_50 = arith.constant 1 : index
    %c0_51 = arith.constant 0 : index
    %c512_52 = arith.constant 512 : index
    %52 = vector.load %arg1[%c1_50, %c0_51, %c512_52] : memref<5x16x1280xbf16, #tpu.memory_space<vmem>>, vector<1x16x768xbf16>
    %53 = vector.shape_cast %52 : vector<1x16x768xbf16> to vector<16x768xbf16>
    %c1_53 = arith.constant 1 : index
    %c0_54 = arith.constant 0 : index
    %c0_55 = arith.constant 0 : index
    %54 = vector.load %arg2[%c1_53, %c0_54, %c0_55] : memref<3x768x128xbf16, #tpu.memory_space<vmem>>, vector<1x768x128xbf16>
    %55 = vector.shape_cast %54 : vector<1x768x128xbf16> to vector<768x128xbf16>
    %cst_56 = arith.constant dense<0.000000e+00> : vector<16x128xf32>
    %56 = tpu.matmul %53, %55, %cst_56 {dimension_numbers = #tpu.dot_dimension_numbers<[1], [0], [0], [1], [0, 0, 1, 1], [], []>} : vector<16x768xbf16>, vector<768x128xbf16>, vector<16x128xf32> -> vector<16x128xf32>
    %57 = arith.addf %51, %56 : vector<16x128xf32>
    %c2_57 = arith.constant 2 : index
    %c0_58 = arith.constant 0 : index
    %c512_59 = arith.constant 512 : index
    %58 = vector.load %arg1[%c2_57, %c0_58, %c512_59] : memref<5x16x1280xbf16, #tpu.memory_space<vmem>>, vector<1x16x768xbf16>
    %59 = vector.shape_cast %58 : vector<1x16x768xbf16> to vector<16x768xbf16>
    %c2_60 = arith.constant 2 : index
    %c0_61 = arith.constant 0 : index
    %c0_62 = arith.constant 0 : index
    %60 = vector.load %arg2[%c2_60, %c0_61, %c0_62] : memref<3x768x128xbf16, #tpu.memory_space<vmem>>, vector<1x768x128xbf16>
    %61 = vector.shape_cast %60 : vector<1x768x128xbf16> to vector<768x128xbf16>
    %cst_63 = arith.constant dense<0.000000e+00> : vector<16x128xf32>
    %62 = tpu.matmul %59, %61, %cst_63 {dimension_numbers = #tpu.dot_dimension_numbers<[1], [0], [0], [1], [0, 0, 1, 1], [], []>} : vector<16x768xbf16>, vector<768x128xbf16>, vector<16x128xf32> -> vector<16x128xf32>
    %63 = arith.addf %57, %62 : vector<16x128xf32>
    %64 = vector.broadcast %0 : vector<1x128xf32> to vector<16x128xf32>
    %65 = arith.addf %63, %64 : vector<16x128xf32>
    %cst_64 = arith.constant 0.000000e+00 : f32
    %66 = vector.broadcast %cst_64 : f32 to vector<16x128xf32>
    %67 = arith.maximumf %65, %66 : vector<16x128xf32>
    %68 = arith.truncf %67 : vector<16x128xf32> to vector<16x128xbf16>
    %c0_65 = arith.constant 0 : index
    %c256_66 = arith.constant 256 : index
    %69 = vector.load %arg11[%c0_65, %c256_66] : memref<16x1152xbf16, #tpu.memory_space<vmem>>, vector<16x128xbf16>
    tpu.vector_store %arg11[%c0_65, %c256_66], %68 {strides = array<i32>} : memref<16x1152xbf16, #tpu.memory_space<vmem>>, vector<16x128xbf16>,
    %c1_67 = arith.constant 1 : index
    %c0_68 = arith.constant 0 : index
    %c0_69 = arith.constant 0 : index
    %70 = vector.load %arg1[%c1_67, %c0_68, %c0_69] : memref<5x16x1280xbf16, #tpu.memory_space<vmem>>, vector<1x16x768xbf16>
    %71 = vector.shape_cast %70 : vector<1x16x768xbf16> to vector<16x768xbf16>
    %c0_70 = arith.constant 0 : index
    %c0_71 = arith.constant 0 : index
    %c0_72 = arith.constant 0 : index
    %72 = vector.load %arg2[%c0_70, %c0_71, %c0_72] : memref<3x768x128xbf16, #tpu.memory_space<vmem>>, vector<1x768x128xbf16>
    %73 = vector.shape_cast %72 : vector<1x768x128xbf16> to vector<768x128xbf16>
    %cst_73 = arith.constant dense<0.000000e+00> : vector<16x128xf32>
    %74 = tpu.matmul %71, %73, %cst_73 {dimension_numbers = #tpu.dot_dimension_numbers<[1], [0], [0], [1], [0, 0, 1, 1], [], []>} : vector<16x768xbf16>, vector<768x128xbf16>, vector<16x128xf32> -> vector<16x128xf32>
    %c2_74 = arith.constant 2 : index
    %c0_75 = arith.constant 0 : index
    %c0_76 = arith.constant 0 : index
    %75 = vector.load %arg1[%c2_74, %c0_75, %c0_76] : memref<5x16x1280xbf16, #tpu.memory_space<vmem>>, vector<1x16x768xbf16>
    %76 = vector.shape_cast %75 : vector<1x16x768xbf16> to vector<16x768xbf16>
    %c1_77 = arith.constant 1 : index
    %c0_78 = arith.constant 0 : index
    %c0_79 = arith.constant 0 : index
    %77 = vector.load %arg2[%c1_77, %c0_78, %c0_79] : memref<3x768x128xbf16, #tpu.memory_space<vmem>>, vector<1x768x128xbf16>
    %78 = vector.shape_cast %77 : vector<1x768x128xbf16> to vector<768x128xbf16>
    %cst_80 = arith.constant dense<0.000000e+00> : vector<16x128xf32>
    %79 = tpu.matmul %76, %78, %cst_80 {dimension_numbers = #tpu.dot_dimension_numbers<[1], [0], [0], [1], [0, 0, 1, 1], [], []>} : vector<16x768xbf16>, vector<768x128xbf16>, vector<16x128xf32> -> vector<16x128xf32>
    %80 = arith.addf %74, %79 : vector<16x128xf32>
    %c3 = arith.constant 3 : index
    %c0_81 = arith.constant 0 : index
    %c0_82 = arith.constant 0 : index
    %81 = vector.load %arg1[%c3, %c0_81, %c0_82] : memref<5x16x1280xbf16, #tpu.memory_space<vmem>>, vector<1x16x768xbf16>
    %82 = vector.shape_cast %81 : vector<1x16x768xbf16> to vector<16x768xbf16>
    %c2_83 = arith.constant 2 : index
    %c0_84 = arith.constant 0 : index
    %c0_85 = arith.constant 0 : index
    %83 = vector.load %arg2[%c2_83, %c0_84, %c0_85] : memref<3x768x128xbf16, #tpu.memory_space<vmem>>, vector<1x768x128xbf16>
    %84 = vector.shape_cast %83 : vector<1x768x128xbf16> to vector<768x128xbf16>
    %cst_86 = arith.constant dense<0.000000e+00> : vector<16x128xf32>
    %85 = tpu.matmul %82, %84, %cst_86 {dimension_numbers = #tpu.dot_dimension_numbers<[1], [0], [0], [1], [0, 0, 1, 1], [], []>} : vector<16x768xbf16>, vector<768x128xbf16>, vector<16x128xf32> -> vector<16x128xf32>
    %86 = arith.addf %80, %85 : vector<16x128xf32>
    %87 = vector.broadcast %0 : vector<1x128xf32> to vector<16x128xf32>
    %88 = arith.addf %86, %87 : vector<16x128xf32>
    %cst_87 = arith.constant 0.000000e+00 : f32
    %89 = vector.broadcast %cst_87 : f32 to vector<16x128xf32>
    %90 = arith.maximumf %88, %89 : vector<16x128xf32>
    %91 = arith.truncf %90 : vector<16x128xf32> to vector<16x128xbf16>
    %c0_88 = arith.constant 0 : index
    %c384 = arith.constant 384 : index
    %92 = vector.load %arg11[%c0_88, %c384] : memref<16x1152xbf16, #tpu.memory_space<vmem>>, vector<16x128xbf16>
    tpu.vector_store %arg11[%c0_88, %c384], %91 {strides = array<i32>} : memref<16x1152xbf16, #tpu.memory_space<vmem>>, vector<16x128xbf16>,
    %c1_89 = arith.constant 1 : index
    %c0_90 = arith.constant 0 : index
    %c256_91 = arith.constant 256 : index
    %93 = vector.load %arg1[%c1_89, %c0_90, %c256_91] : memref<5x16x1280xbf16, #tpu.memory_space<vmem>>, vector<1x16x768xbf16>
    %94 = vector.shape_cast %93 : vector<1x16x768xbf16> to vector<16x768xbf16>
    %c0_92 = arith.constant 0 : index
    %c0_93 = arith.constant 0 : index
    %c0_94 = arith.constant 0 : index
    %95 = vector.load %arg2[%c0_92, %c0_93, %c0_94] : memref<3x768x128xbf16, #tpu.memory_space<vmem>>, vector<1x768x128xbf16>
    %96 = vector.shape_cast %95 : vector<1x768x128xbf16> to vector<768x128xbf16>
    %cst_95 = arith.constant dense<0.000000e+00> : vector<16x128xf32>
    %97 = tpu.matmul %94, %96, %cst_95 {dimension_numbers = #tpu.dot_dimension_numbers<[1], [0], [0], [1], [0, 0, 1, 1], [], []>} : vector<16x768xbf16>, vector<768x128xbf16>, vector<16x128xf32> -> vector<16x128xf32>
    %c2_96 = arith.constant 2 : index
    %c0_97 = arith.constant 0 : index
    %c256_98 = arith.constant 256 : index
    %98 = vector.load %arg1[%c2_96, %c0_97, %c256_98] : memref<5x16x1280xbf16, #tpu.memory_space<vmem>>, vector<1x16x768xbf16>
    %99 = vector.shape_cast %98 : vector<1x16x768xbf16> to vector<16x768xbf16>
    %c1_99 = arith.constant 1 : index
    %c0_100 = arith.constant 0 : index
    %c0_101 = arith.constant 0 : index
    %100 = vector.load %arg2[%c1_99, %c0_100, %c0_101] : memref<3x768x128xbf16, #tpu.memory_space<vmem>>, vector<1x768x128xbf16>
    %101 = vector.shape_cast %100 : vector<1x768x128xbf16> to vector<768x128xbf16>
    %cst_102 = arith.constant dense<0.000000e+00> : vector<16x128xf32>
    %102 = tpu.matmul %99, %101, %cst_102 {dimension_numbers = #tpu.dot_dimension_numbers<[1], [0], [0], [1], [0, 0, 1, 1], [], []>} : vector<16x768xbf16>, vector<768x128xbf16>, vector<16x128xf32> -> vector<16x128xf32>
    %103 = arith.addf %97, %102 : vector<16x128xf32>
    %c3_103 = arith.constant 3 : index
    %c0_104 = arith.constant 0 : index
    %c256_105 = arith.constant 256 : index
    %104 = vector.load %arg1[%c3_103, %c0_104, %c256_105] : memref<5x16x1280xbf16, #tpu.memory_space<vmem>>, vector<1x16x768xbf16>
    %105 = vector.shape_cast %104 : vector<1x16x768xbf16> to vector<16x768xbf16>
    %c2_106 = arith.constant 2 : index
    %c0_107 = arith.constant 0 : index
    %c0_108 = arith.constant 0 : index
    %106 = vector.load %arg2[%c2_106, %c0_107, %c0_108] : memref<3x768x128xbf16, #tpu.memory_space<vmem>>, vector<1x768x128xbf16>
    %107 = vector.shape_cast %106 : vector<1x768x128xbf16> to vector<768x128xbf16>
    %cst_109 = arith.constant dense<0.000000e+00> : vector<16x128xf32>
    %108 = tpu.matmul %105, %107, %cst_109 {dimension_numbers = #tpu.dot_dimension_numbers<[1], [0], [0], [1], [0, 0, 1, 1], [], []>} : vector<16x768xbf16>, vector<768x128xbf16>, vector<16x128xf32> -> vector<16x128xf32>
    %109 = arith.addf %103, %108 : vector<16x128xf32>
    %110 = vector.broadcast %0 : vector<1x128xf32> to vector<16x128xf32>
    %111 = arith.addf %109, %110 : vector<16x128xf32>
    %cst_110 = arith.constant 0.000000e+00 : f32
    %112 = vector.broadcast %cst_110 : f32 to vector<16x128xf32>
    %113 = arith.maximumf %111, %112 : vector<16x128xf32>
    %114 = arith.truncf %113 : vector<16x128xf32> to vector<16x128xbf16>
    %c0_111 = arith.constant 0 : index
    %c512_112 = arith.constant 512 : index
    %115 = vector.load %arg11[%c0_111, %c512_112] : memref<16x1152xbf16, #tpu.memory_space<vmem>>, vector<16x128xbf16>
    tpu.vector_store %arg11[%c0_111, %c512_112], %114 {strides = array<i32>} : memref<16x1152xbf16, #tpu.memory_space<vmem>>, vector<16x128xbf16>,
    %c1_113 = arith.constant 1 : index
    %c0_114 = arith.constant 0 : index
    %c512_115 = arith.constant 512 : index
    %116 = vector.load %arg1[%c1_113, %c0_114, %c512_115] : memref<5x16x1280xbf16, #tpu.memory_space<vmem>>, vector<1x16x768xbf16>
    %117 = vector.shape_cast %116 : vector<1x16x768xbf16> to vector<16x768xbf16>
    %c0_116 = arith.constant 0 : index
    %c0_117 = arith.constant 0 : index
    %c0_118 = arith.constant 0 : index
    %118 = vector.load %arg2[%c0_116, %c0_117, %c0_118] : memref<3x768x128xbf16, #tpu.memory_space<vmem>>, vector<1x768x128xbf16>
    %119 = vector.shape_cast %118 : vector<1x768x128xbf16> to vector<768x128xbf16>
    %cst_119 = arith.constant dense<0.000000e+00> : vector<16x128xf32>
    %120 = tpu.matmul %117, %119, %cst_119 {dimension_numbers = #tpu.dot_dimension_numbers<[1], [0], [0], [1], [0, 0, 1, 1], [], []>} : vector<16x768xbf16>, vector<768x128xbf16>, vector<16x128xf32> -> vector<16x128xf32>
    %c2_120 = arith.constant 2 : index
    %c0_121 = arith.constant 0 : index
    %c512_122 = arith.constant 512 : index
    %121 = vector.load %arg1[%c2_120, %c0_121, %c512_122] : memref<5x16x1280xbf16, #tpu.memory_space<vmem>>, vector<1x16x768xbf16>
    %122 = vector.shape_cast %121 : vector<1x16x768xbf16> to vector<16x768xbf16>
    %c1_123 = arith.constant 1 : index
    %c0_124 = arith.constant 0 : index
    %c0_125 = arith.constant 0 : index
    %123 = vector.load %arg2[%c1_123, %c0_124, %c0_125] : memref<3x768x128xbf16, #tpu.memory_space<vmem>>, vector<1x768x128xbf16>
    %124 = vector.shape_cast %123 : vector<1x768x128xbf16> to vector<768x128xbf16>
    %cst_126 = arith.constant dense<0.000000e+00> : vector<16x128xf32>
    %125 = tpu.matmul %122, %124, %cst_126 {dimension_numbers = #tpu.dot_dimension_numbers<[1], [0], [0], [1], [0, 0, 1, 1], [], []>} : vector<16x768xbf16>, vector<768x128xbf16>, vector<16x128xf32> -> vector<16x128xf32>
    %126 = arith.addf %120, %125 : vector<16x128xf32>
    %c3_127 = arith.constant 3 : index
    %c0_128 = arith.constant 0 : index
    %c512_129 = arith.constant 512 : index
    %127 = vector.load %arg1[%c3_127, %c0_128, %c512_129] : memref<5x16x1280xbf16, #tpu.memory_space<vmem>>, vector<1x16x768xbf16>
    %128 = vector.shape_cast %127 : vector<1x16x768xbf16> to vector<16x768xbf16>
    %c2_130 = arith.constant 2 : index
    %c0_131 = arith.constant 0 : index
    %c0_132 = arith.constant 0 : index
    %129 = vector.load %arg2[%c2_130, %c0_131, %c0_132] : memref<3x768x128xbf16, #tpu.memory_space<vmem>>, vector<1x768x128xbf16>
    %130 = vector.shape_cast %129 : vector<1x768x128xbf16> to vector<768x128xbf16>
    %cst_133 = arith.constant dense<0.000000e+00> : vector<16x128xf32>
    %131 = tpu.matmul %128, %130, %cst_133 {dimension_numbers = #tpu.dot_dimension_numbers<[1], [0], [0], [1], [0, 0, 1, 1], [], []>} : vector<16x768xbf16>, vector<768x128xbf16>, vector<16x128xf32> -> vector<16x128xf32>
    %132 = arith.addf %126, %131 : vector<16x128xf32>
    %133 = vector.broadcast %0 : vector<1x128xf32> to vector<16x128xf32>
    %134 = arith.addf %132, %133 : vector<16x128xf32>
    %cst_134 = arith.constant 0.000000e+00 : f32
    %135 = vector.broadcast %cst_134 : f32 to vector<16x128xf32>
    %136 = arith.maximumf %134, %135 : vector<16x128xf32>
    %137 = arith.truncf %136 : vector<16x128xf32> to vector<16x128xbf16>
    %c0_135 = arith.constant 0 : index
    %c640 = arith.constant 640 : index
    %138 = vector.load %arg11[%c0_135, %c640] : memref<16x1152xbf16, #tpu.memory_space<vmem>>, vector<16x128xbf16>
    tpu.vector_store %arg11[%c0_135, %c640], %137 {strides = array<i32>} : memref<16x1152xbf16, #tpu.memory_space<vmem>>, vector<16x128xbf16>,
    %c2_136 = arith.constant 2 : index
    %c0_137 = arith.constant 0 : index
    %c0_138 = arith.constant 0 : index
    %139 = vector.load %arg1[%c2_136, %c0_137, %c0_138] : memref<5x16x1280xbf16, #tpu.memory_space<vmem>>, vector<1x16x768xbf16>
    %140 = vector.shape_cast %139 : vector<1x16x768xbf16> to vector<16x768xbf16>
    %c0_139 = arith.constant 0 : index
    %c0_140 = arith.constant 0 : index
    %c0_141 = arith.constant 0 : index
    %141 = vector.load %arg2[%c0_139, %c0_140, %c0_141] : memref<3x768x128xbf16, #tpu.memory_space<vmem>>, vector<1x768x128xbf16>
    %142 = vector.shape_cast %141 : vector<1x768x128xbf16> to vector<768x128xbf16>
    %cst_142 = arith.constant dense<0.000000e+00> : vector<16x128xf32>
    %143 = tpu.matmul %140, %142, %cst_142 {dimension_numbers = #tpu.dot_dimension_numbers<[1], [0], [0], [1], [0, 0, 1, 1], [], []>} : vector<16x768xbf16>, vector<768x128xbf16>, vector<16x128xf32> -> vector<16x128xf32>
    %c3_143 = arith.constant 3 : index
    %c0_144 = arith.constant 0 : index
    %c0_145 = arith.constant 0 : index
    %144 = vector.load %arg1[%c3_143, %c0_144, %c0_145] : memref<5x16x1280xbf16, #tpu.memory_space<vmem>>, vector<1x16x768xbf16>
    %145 = vector.shape_cast %144 : vector<1x16x768xbf16> to vector<16x768xbf16>
    %c1_146 = arith.constant 1 : index
    %c0_147 = arith.constant 0 : index
    %c0_148 = arith.constant 0 : index
    %146 = vector.load %arg2[%c1_146, %c0_147, %c0_148] : memref<3x768x128xbf16, #tpu.memory_space<vmem>>, vector<1x768x128xbf16>
    %147 = vector.shape_cast %146 : vector<1x768x128xbf16> to vector<768x128xbf16>
    %cst_149 = arith.constant dense<0.000000e+00> : vector<16x128xf32>
    %148 = tpu.matmul %145, %147, %cst_149 {dimension_numbers = #tpu.dot_dimension_numbers<[1], [0], [0], [1], [0, 0, 1, 1], [], []>} : vector<16x768xbf16>, vector<768x128xbf16>, vector<16x128xf32> -> vector<16x128xf32>
    %149 = arith.addf %143, %148 : vector<16x128xf32>
    %c4 = arith.constant 4 : index
    %c0_150 = arith.constant 0 : index
    %c0_151 = arith.constant 0 : index
    %150 = vector.load %arg1[%c4, %c0_150, %c0_151] : memref<5x16x1280xbf16, #tpu.memory_space<vmem>>, vector<1x16x768xbf16>
    %151 = vector.shape_cast %150 : vector<1x16x768xbf16> to vector<16x768xbf16>
    %c2_152 = arith.constant 2 : index
    %c0_153 = arith.constant 0 : index
    %c0_154 = arith.constant 0 : index
    %152 = vector.load %arg2[%c2_152, %c0_153, %c0_154] : memref<3x768x128xbf16, #tpu.memory_space<vmem>>, vector<1x768x128xbf16>
    %153 = vector.shape_cast %152 : vector<1x768x128xbf16> to vector<768x128xbf16>
    %cst_155 = arith.constant dense<0.000000e+00> : vector<16x128xf32>
    %154 = tpu.matmul %151, %153, %cst_155 {dimension_numbers = #tpu.dot_dimension_numbers<[1], [0], [0], [1], [0, 0, 1, 1], [], []>} : vector<16x768xbf16>, vector<768x128xbf16>, vector<16x128xf32> -> vector<16x128xf32>
    %155 = arith.addf %149, %154 : vector<16x128xf32>
    %156 = vector.broadcast %0 : vector<1x128xf32> to vector<16x128xf32>
    %157 = arith.addf %155, %156 : vector<16x128xf32>
    %cst_156 = arith.constant 0.000000e+00 : f32
    %158 = vector.broadcast %cst_156 : f32 to vector<16x128xf32>
    %159 = arith.maximumf %157, %158 : vector<16x128xf32>
    %160 = arith.truncf %159 : vector<16x128xf32> to vector<16x128xbf16>
    %c0_157 = arith.constant 0 : index
    %c768 = arith.constant 768 : index
    %161 = vector.load %arg11[%c0_157, %c768] : memref<16x1152xbf16, #tpu.memory_space<vmem>>, vector<16x128xbf16>
    tpu.vector_store %arg11[%c0_157, %c768], %160 {strides = array<i32>} : memref<16x1152xbf16, #tpu.memory_space<vmem>>, vector<16x128xbf16>,
    %c2_158 = arith.constant 2 : index
    %c0_159 = arith.constant 0 : index
    %c256_160 = arith.constant 256 : index
    %162 = vector.load %arg1[%c2_158, %c0_159, %c256_160] : memref<5x16x1280xbf16, #tpu.memory_space<vmem>>, vector<1x16x768xbf16>
    %163 = vector.shape_cast %162 : vector<1x16x768xbf16> to vector<16x768xbf16>
    %c0_161 = arith.constant 0 : index
    %c0_162 = arith.constant 0 : index
    %c0_163 = arith.constant 0 : index
    %164 = vector.load %arg2[%c0_161, %c0_162, %c0_163] : memref<3x768x128xbf16, #tpu.memory_space<vmem>>, vector<1x768x128xbf16>
    %165 = vector.shape_cast %164 : vector<1x768x128xbf16> to vector<768x128xbf16>
    %cst_164 = arith.constant dense<0.000000e+00> : vector<16x128xf32>
    %166 = tpu.matmul %163, %165, %cst_164 {dimension_numbers = #tpu.dot_dimension_numbers<[1], [0], [0], [1], [0, 0, 1, 1], [], []>} : vector<16x768xbf16>, vector<768x128xbf16>, vector<16x128xf32> -> vector<16x128xf32>
    %c3_165 = arith.constant 3 : index
    %c0_166 = arith.constant 0 : index
    %c256_167 = arith.constant 256 : index
    %167 = vector.load %arg1[%c3_165, %c0_166, %c256_167] : memref<5x16x1280xbf16, #tpu.memory_space<vmem>>, vector<1x16x768xbf16>
    %168 = vector.shape_cast %167 : vector<1x16x768xbf16> to vector<16x768xbf16>
    %c1_168 = arith.constant 1 : index
    %c0_169 = arith.constant 0 : index
    %c0_170 = arith.constant 0 : index
    %169 = vector.load %arg2[%c1_168, %c0_169, %c0_170] : memref<3x768x128xbf16, #tpu.memory_space<vmem>>, vector<1x768x128xbf16>
    %170 = vector.shape_cast %169 : vector<1x768x128xbf16> to vector<768x128xbf16>
    %cst_171 = arith.constant dense<0.000000e+00> : vector<16x128xf32>
    %171 = tpu.matmul %168, %170, %cst_171 {dimension_numbers = #tpu.dot_dimension_numbers<[1], [0], [0], [1], [0, 0, 1, 1], [], []>} : vector<16x768xbf16>, vector<768x128xbf16>, vector<16x128xf32> -> vector<16x128xf32>
    %172 = arith.addf %166, %171 : vector<16x128xf32>
    %c4_172 = arith.constant 4 : index
    %c0_173 = arith.constant 0 : index
    %c256_174 = arith.constant 256 : index
    %173 = vector.load %arg1[%c4_172, %c0_173, %c256_174] : memref<5x16x1280xbf16, #tpu.memory_space<vmem>>, vector<1x16x768xbf16>
    %174 = vector.shape_cast %173 : vector<1x16x768xbf16> to vector<16x768xbf16>
    %c2_175 = arith.constant 2 : index
    %c0_176 = arith.constant 0 : index
    %c0_177 = arith.constant 0 : index
    %175 = vector.load %arg2[%c2_175, %c0_176, %c0_177] : memref<3x768x128xbf16, #tpu.memory_space<vmem>>, vector<1x768x128xbf16>
    %176 = vector.shape_cast %175 : vector<1x768x128xbf16> to vector<768x128xbf16>
    %cst_178 = arith.constant dense<0.000000e+00> : vector<16x128xf32>
    %177 = tpu.matmul %174, %176, %cst_178 {dimension_numbers = #tpu.dot_dimension_numbers<[1], [0], [0], [1], [0, 0, 1, 1], [], []>} : vector<16x768xbf16>, vector<768x128xbf16>, vector<16x128xf32> -> vector<16x128xf32>
    %178 = arith.addf %172, %177 : vector<16x128xf32>
    %179 = vector.broadcast %0 : vector<1x128xf32> to vector<16x128xf32>
    %180 = arith.addf %178, %179 : vector<16x128xf32>
    %cst_179 = arith.constant 0.000000e+00 : f32
    %181 = vector.broadcast %cst_179 : f32 to vector<16x128xf32>
    %182 = arith.maximumf %180, %181 : vector<16x128xf32>
    %183 = arith.truncf %182 : vector<16x128xf32> to vector<16x128xbf16>
    %c0_180 = arith.constant 0 : index
    %c896 = arith.constant 896 : index
    %184 = vector.load %arg11[%c0_180, %c896] : memref<16x1152xbf16, #tpu.memory_space<vmem>>, vector<16x128xbf16>
    tpu.vector_store %arg11[%c0_180, %c896], %183 {strides = array<i32>} : memref<16x1152xbf16, #tpu.memory_space<vmem>>, vector<16x128xbf16>,
    %c2_181 = arith.constant 2 : index
    %c0_182 = arith.constant 0 : index
    %c512_183 = arith.constant 512 : index
    %185 = vector.load %arg1[%c2_181, %c0_182, %c512_183] : memref<5x16x1280xbf16, #tpu.memory_space<vmem>>, vector<1x16x768xbf16>
    %186 = vector.shape_cast %185 : vector<1x16x768xbf16> to vector<16x768xbf16>
    %c0_184 = arith.constant 0 : index
    %c0_185 = arith.constant 0 : index
    %c0_186 = arith.constant 0 : index
    %187 = vector.load %arg2[%c0_184, %c0_185, %c0_186] : memref<3x768x128xbf16, #tpu.memory_space<vmem>>, vector<1x768x128xbf16>
    %188 = vector.shape_cast %187 : vector<1x768x128xbf16> to vector<768x128xbf16>
    %cst_187 = arith.constant dense<0.000000e+00> : vector<16x128xf32>
    %189 = tpu.matmul %186, %188, %cst_187 {dimension_numbers = #tpu.dot_dimension_numbers<[1], [0], [0], [1], [0, 0, 1, 1], [], []>} : vector<16x768xbf16>, vector<768x128xbf16>, vector<16x128xf32> -> vector<16x128xf32>
    %c3_188 = arith.constant 3 : index
    %c0_189 = arith.constant 0 : index
    %c512_190 = arith.constant 512 : index
    %190 = vector.load %arg1[%c3_188, %c0_189, %c512_190] : memref<5x16x1280xbf16, #tpu.memory_space<vmem>>, vector<1x16x768xbf16>
    %191 = vector.shape_cast %190 : vector<1x16x768xbf16> to vector<16x768xbf16>
    %c1_191 = arith.constant 1 : index
    %c0_192 = arith.constant 0 : index
    %c0_193 = arith.constant 0 : index
    %192 = vector.load %arg2[%c1_191, %c0_192, %c0_193] : memref<3x768x128xbf16, #tpu.memory_space<vmem>>, vector<1x768x128xbf16>
    %193 = vector.shape_cast %192 : vector<1x768x128xbf16> to vector<768x128xbf16>
    %cst_194 = arith.constant dense<0.000000e+00> : vector<16x128xf32>
    %194 = tpu.matmul %191, %193, %cst_194 {dimension_numbers = #tpu.dot_dimension_numbers<[1], [0], [0], [1], [0, 0, 1, 1], [], []>} : vector<16x768xbf16>, vector<768x128xbf16>, vector<16x128xf32> -> vector<16x128xf32>
    %195 = arith.addf %189, %194 : vector<16x128xf32>
    %c4_195 = arith.constant 4 : index
    %c0_196 = arith.constant 0 : index
    %c512_197 = arith.constant 512 : index
    %196 = vector.load %arg1[%c4_195, %c0_196, %c512_197] : memref<5x16x1280xbf16, #tpu.memory_space<vmem>>, vector<1x16x768xbf16>
    %197 = vector.shape_cast %196 : vector<1x16x768xbf16> to vector<16x768xbf16>
    %c2_198 = arith.constant 2 : index
    %c0_199 = arith.constant 0 : index
    %c0_200 = arith.constant 0 : index
    %198 = vector.load %arg2[%c2_198, %c0_199, %c0_200] : memref<3x768x128xbf16, #tpu.memory_space<vmem>>, vector<1x768x128xbf16>
    %199 = vector.shape_cast %198 : vector<1x768x128xbf16> to vector<768x128xbf16>
    %cst_201 = arith.constant dense<0.000000e+00> : vector<16x128xf32>
    %200 = tpu.matmul %197, %199, %cst_201 {dimension_numbers = #tpu.dot_dimension_numbers<[1], [0], [0], [1], [0, 0, 1, 1], [], []>} : vector<16x768xbf16>, vector<768x128xbf16>, vector<16x128xf32> -> vector<16x128xf32>
    %201 = arith.addf %195, %200 : vector<16x128xf32>
    %202 = vector.broadcast %0 : vector<1x128xf32> to vector<16x128xf32>
    %203 = arith.addf %201, %202 : vector<16x128xf32>
    %cst_202 = arith.constant 0.000000e+00 : f32
    %204 = vector.broadcast %cst_202 : f32 to vector<16x128xf32>
    %205 = arith.maximumf %203, %204 : vector<16x128xf32>
    %206 = arith.truncf %205 : vector<16x128xf32> to vector<16x128xbf16>
    %c0_203 = arith.constant 0 : index
    %c1024 = arith.constant 1024 : index
    %207 = vector.load %arg11[%c0_203, %c1024] : memref<16x1152xbf16, #tpu.memory_space<vmem>>, vector<16x128xbf16>
    tpu.vector_store %arg11[%c0_203, %c1024], %206 {strides = array<i32>} : memref<16x1152xbf16, #tpu.memory_space<vmem>>, vector<16x128xbf16>,
    %c0_204 = arith.constant 0 : index
    %c0_205 = arith.constant 0 : index
    %208 = vector.load %arg11[%c0_204, %c0_205] : memref<16x1152xbf16, #tpu.memory_space<vmem>>, vector<16x1152xbf16>
    %c0_206 = arith.constant 0 : index
    %c0_207 = arith.constant 0 : index
    %209 = vector.load %arg4[%c0_206, %c0_207] : memref<1152x64xbf16, #tpu.memory_space<vmem>>, vector<1152x64xbf16>
    %cst_208 = arith.constant dense<0.000000e+00> : vector<16x64xf32>
    %210 = tpu.matmul %208, %209, %cst_208 {dimension_numbers = #tpu.dot_dimension_numbers<[1], [0], [0], [1], [0, 0, 1, 1], [], []>} : vector<16x1152xbf16>, vector<1152x64xbf16>, vector<16x64xf32> -> vector<16x64xf32>
    %c0_209 = arith.constant 0 : index
    %c0_210 = arith.constant 0 : index
    %211 = vector.load %arg5[%c0_209, %c0_210] : memref<1x64xf32, #tpu.memory_space<vmem>>, vector<1x64xf32>
    %212 = vector.broadcast %211 : vector<1x64xf32> to vector<16x64xf32>
    %213 = arith.addf %210, %212 : vector<16x64xf32>
    %cst_211 = arith.constant 0.000000e+00 : f32
    %214 = vector.broadcast %cst_211 : f32 to vector<16x64xf32>
    %215 = arith.maximumf %213, %214 : vector<16x64xf32>
    %216 = arith.truncf %215 : vector<16x64xf32> to vector<16x64xbf16>
    %c0_212 = arith.constant 0 : index
    %c0_213 = arith.constant 0 : index
    %217 = vector.load %arg6[%c0_212, %c0_213] : memref<64x16xbf16, #tpu.memory_space<vmem>>, vector<64x16xbf16>
    %cst_214 = arith.constant dense<0.000000e+00> : vector<16x16xf32>
    %218 = tpu.matmul %216, %217, %cst_214 {dimension_numbers = #tpu.dot_dimension_numbers<[1], [0], [0], [1], [0, 0, 1, 1], [], []>} : vector<16x64xbf16>, vector<64x16xbf16>, vector<16x16xf32> -> vector<16x16xf32>
    %c0_215 = arith.constant 0 : index
    %c0_216 = arith.constant 0 : index
    %219 = vector.load %arg7[%c0_215, %c0_216] : memref<1x16xf32, #tpu.memory_space<vmem>>, vector<1x16xf32>
    %220 = vector.broadcast %219 : vector<1x16xf32> to vector<16x16xf32>
    %221 = arith.addf %218, %220 : vector<16x16xf32>
    %cst_217 = arith.constant 0.000000e+00 : f32
    %222 = vector.broadcast %cst_217 : f32 to vector<16x16xf32>
    %223 = arith.maximumf %221, %222 : vector<16x16xf32>
    %224 = arith.truncf %223 : vector<16x16xf32> to vector<16x16xbf16>
    %c0_218 = arith.constant 0 : index
    %c0_219 = arith.constant 0 : index
    %225 = vector.load %arg8[%c0_218, %c0_219] : memref<16x128xbf16, #tpu.memory_space<vmem>>, vector<16x128xbf16>
    %cst_220 = arith.constant dense<0.000000e+00> : vector<16x128xf32>
    %226 = tpu.matmul %224, %225, %cst_220 {dimension_numbers = #tpu.dot_dimension_numbers<[1], [0], [0], [1], [0, 0, 1, 1], [], []>} : vector<16x16xbf16>, vector<16x128xbf16>, vector<16x128xf32> -> vector<16x128xf32>
    %c0_221 = arith.constant 0 : index
    %c0_222 = arith.constant 0 : index
    %227 = vector.load %arg9[%c0_221, %c0_222] : memref<1x128xf32, #tpu.memory_space<vmem>>, vector<1x128xf32>
    %228 = vector.broadcast %227 : vector<1x128xf32> to vector<16x128xf32>
    %229 = arith.addf %226, %228 : vector<16x128xf32>
    %c0_223 = arith.constant 0 : index
    %c0_224 = arith.constant 0 : index
    %230 = vector.load %arg10[%c0_223, %c0_224] : memref<16x128xf32, #tpu.memory_space<vmem>>, vector<16x128xf32>
    tpu.vector_store %arg10[%c0_223, %c0_224], %229 {strides = array<i32>} : memref<16x128xf32, #tpu.memory_space<vmem>>, vector<16x128xf32>,
    return
  }
  func.func @transform_0(%arg0: i32) -> (i32, i32, i32) {
    %c0_i32 = arith.constant 0 : i32
    %c0_i32_0 = arith.constant 0 : i32
    %c0_i32_1 = arith.constant 0 : i32
    return %c0_i32, %arg0, %c0_i32_0 : i32, i32, i32
  }
  func.func @transform_1(%arg0: i32) -> (i32, i32, i32) {
    %c0_i32 = arith.constant 0 : i32
    %c0_i32_0 = arith.constant 0 : i32
    %c0_i32_1 = arith.constant 0 : i32
    %c0_i32_2 = arith.constant 0 : i32
    return %c0_i32, %c0_i32_0, %c0_i32_1 : i32, i32, i32
  }
  func.func @transform_2(%arg0: i32) -> (i32, i32) {
    %c0_i32 = arith.constant 0 : i32
    %c0_i32_0 = arith.constant 0 : i32
    %c0_i32_1 = arith.constant 0 : i32
    return %c0_i32, %c0_i32_0 : i32, i32
  }
  func.func @transform_3(%arg0: i32) -> (i32, i32) {
    %c0_i32 = arith.constant 0 : i32
    %c0_i32_0 = arith.constant 0 : i32
    %c0_i32_1 = arith.constant 0 : i32
    return %c0_i32, %c0_i32_0 : i32, i32
  }
  func.func @transform_4(%arg0: i32) -> (i32, i32) {
    %c0_i32 = arith.constant 0 : i32
    %c0_i32_0 = arith.constant 0 : i32
    %c0_i32_1 = arith.constant 0 : i32
    return %c0_i32, %c0_i32_0 : i32, i32
  }
  func.func @transform_5(%arg0: i32) -> (i32, i32) {
    %c0_i32 = arith.constant 0 : i32
    %c0_i32_0 = arith.constant 0 : i32
    %c0_i32_1 = arith.constant 0 : i32
    return %c0_i32, %c0_i32_0 : i32, i32
  }
  func.func @transform_6(%arg0: i32) -> (i32, i32) {
    %c0_i32 = arith.constant 0 : i32
    %c0_i32_0 = arith.constant 0 : i32
    %c0_i32_1 = arith.constant 0 : i32
    return %c0_i32, %c0_i32_0 : i32, i32
  }
  func.func @transform_7(%arg0: i32) -> (i32, i32) {
    %c0_i32 = arith.constant 0 : i32
    %c0_i32_0 = arith.constant 0 : i32
    %c0_i32_1 = arith.constant 0 : i32
    return %c0_i32, %c0_i32_0 : i32, i32
  }
  func.func @transform_8(%arg0: i32) -> (i32, i32) {
    %c0_i32 = arith.constant 0 : i32
    %c0_i32_0 = arith.constant 0 : i32
    %c0_i32_1 = arith.constant 0 : i32
    return %c0_i32, %c0_i32_0 : i32, i32
  }
  func.func @transform_9(%arg0: i32) -> (i32, i32) {
    %c0_i32 = arith.constant 0 : i32
    %c0_i32_0 = arith.constant 0 : i32
    return %arg0, %c0_i32 : i32, i32
  }
}

</mosaic_0001>

<bundles_post_ra>
// kernel: tpu_custom_call.1
= control target key start
LH: loop header
LB: loop body
LE: loop exit
PB: predicated region body
PF: predicated region fallthrough
CT: control target
= control target key end

     0   :  { %14 = vsyncpa [#allocation5], 0  ;;  %s24632_s0 = inlined_call_operand.vmem [shape: bf16[5,32,1280], index: 0, kind: input, shape index: {}]   ;;  %s24633_s1 = inlined_call_operand.hbm [shape: bf16[3,768,128], index: 1, kind: input, shape index: {}]   ;;  %s24634_s2 = inlined_call_operand.vmem [shape: f32[1,128], index: 2, kind: input, shape index: {}]   ;;  %s24635_s3 = inlined_call_operand.vmem [shape: bf16[1152,64], index: 3, kind: input, shape index: {}]   ;;  %s24636_s4 = inlined_call_operand.vmem [shape: f32[1,64], index: 4, kind: input, shape index: {}]   ;;  %s24637_s5 = inlined_call_operand.vmem [shape: bf16[64,16], index: 5, kind: input, shape index: {}]   ;;  %s24638_s6 = inlined_call_operand.vmem [shape: f32[1,16], index: 6, kind: input, shape index: {}]   ;;  %s24639_s7 = inlined_call_operand.vmem [shape: bf16[16,128], index: 7, kind: input, shape index: {}]   ;;  %s24640_s8 = inlined_call_operand.vmem [shape: f32[1,128], index: 8, kind: input, shape index: {}]   ;;  %s24641_s9 = inlined_call_operand.hbm [shape: f32[32,128], index: 9, kind: output, shape index: {}]  }
   0x1   :  { %15 = vsyncpa [#allocation6], 0 }
   0x2   :  { %17 = vsyncpa [#allocation6 + $0x1], 0  ;;  %s23228_s30 = smov 0   ;;  %s23230_s10 = smov 0  }
   0x3   :  { %s23232_s11 = smov 0   ;;  %s23234_s12 = smov 0  }
   0x4 LB: > { %s23249_s13 = sadd.s32 4294967295, %s23171_s12   ;;  %s15128_s14 = sadd.s32 4294967294, %s23171_s12   ;;  %s23171_s12 = sphi %s23234_s12, %s24649_s12   ;;  %s23167_s11 = sphi %s23232_s11, %s24648_s11   ;;  %s23163_s10 = sphi %s23230_s10, %s24647_s10   ;;  %s23159_s30 = sphi %s23228_s30, %s24646_s30  }
   0x5   : > { %s23253_s15 = sadd.s32 1, %s23171_s12   ;;  %s30_s16 = sadd.s32 1, %s23167_s11 }
   0x6   : > { %s27_s17 = ssub.s32 %s23171_s12, %s23253_s15  ;;  %p37_p0 = scmp.ne.s32.totalorder %s23167_s11, %s23163_s10 }
   0x7   : > { %p28_p1 = scmp.eq.s32.totalorder %s27_s17, 0  ;;  %p38_p2 = scmp.eq.s32.totalorder %s23171_s12, 0 }
   0x8   : > { %p235_p3 = scmp.eq.s32.totalorder %s23249_s13, 1  ;;  %p240_p4 = scmp.ne.s32.totalorder %s23163_s10, %s23159_s30 }
   0x9   : > { %s23265_s18 = scalar_select %p28_p1, %s23167_s11, %s30_s16  }
   0xa   : > { %p23267_p5 = por %p38_p2, %p37_p0  ;;  %p23271_p6 = por %p235_p3, %p37_p0 }
   0xb   : > { %p241_p7 = scmp.eq.s32.totalorder %s15128_s14, 1  ;;  %p15129_p8 = scmp.ge.s32.totalorder %s23171_s12, 1 }
   0xc   : > { %p248_p9 = scmp.lt.s32.totalorder %s23171_s12, 3  ;;  %p23027_p11 = scmp.eq.s32.totalorder %s23249_s13, 0 }
   0xd   : > { %p23277_p10 = por %p241_p7, %p240_p4  ;;  %s259_s25 = sshll.u32 %s24633_s1, 4  ;;  %s260_s25 = int_to_ptr.hbm [resolvable:$true] %s259_s25 }
   0xe   : > { %p23282_p12 = pnand %p15129_p8, %p248_p9  ;;  %s23173_s26 = smov [#allocation4]  }
   0xf   : > { %s261_s27 = sshll.u32 %s23173_s26, 4  ;;  %s23174_s28 = smov 64   ;;  %s262_s27 = int_to_ptr.vmem [resolvable:$true] %s261_s27 }
  0x10   : > { %p23019_p13 = pneg %p23282_p12  ;;  %s23175_s29 = smov 4  }
  0x11   : > { %p15131_p1 = scmp.ge.s32.totalorder %s23171_s12, 2 }
  0x12   : > { %p23020_p0 = pnand %p23027_p11, %p23019_p13 }
  0x13   : > { %292 = sbr.rel (%p15131_p1) target bundleno = 79 (0x4f), region = 48 }
  0x14   : > { %23022 = dma.hbm_to_vmem [thread:$0]  (!%p23020_p0), %s260_s25, 18432, %s262_s27, [#allocation5], %s23174_s28, %s23174_s28, %s23175_s29  }
  0x18   : > { %295 = sbr.rel (!%p23267_p5) target bundleno = 79 (0x4f), region = 52  ;;  %s297_s14 = sand.u32 (%p23267_p5), 1, %s23167_s11  }
  0x19   : > { %s23011_s16 = smul.u32 (%p23267_p5), 80, %s23171_s12 }
  0x1a   : > { %s23010_s17 = smul.u32 (%p23267_p5), 400, %s297_s14 }
  0x1b   : > { %s23303_s26 = scalar_lea.vmem (%p23267_p5), %s24632_s0, %s23011_s16 }
  0x1c   : > { %v316_v0 = vld [vmem:[%s23303_s26] sm:$0xff] (%p23267_p5)  ;;  %v318_v1 = vld [vmem:[%s23303_s26 + $0x8] sm:$0xff] (%p23267_p5)  ;;  %v320_v2 = vld [vmem:[%s23303_s26 + $0x10] sm:$0xff] (%p23267_p5)  ;;  %s23308_s19 = scalar_lea.vmem (%p23267_p5), [#allocation3], %s23010_s17 }
  0x1d   : > { %317 = vst [vmem:[%s23308_s19] sm:$0xff] %v316_v0  ;;  %v322_v3 = vld [vmem:[%s23303_s26 + $0x18] sm:$0xff]  ;;  %v324_v4 = vld [vmem:[%s23303_s26 + $0x20] sm:$0xff]  ;;  %v326_v5 = vld [vmem:[%s23303_s26 + $0x28] sm:$0xff] }
  0x1e   : > { %319 = vst [vmem:[%s23308_s19 + $0x8] sm:$0xff] %v318_v1  ;;  %v328_v6 = vld [vmem:[%s23303_s26 + $0x30] sm:$0xff]  ;;  %v330_v7 = vld [vmem:[%s23303_s26 + $0x38] sm:$0xff]  ;;  %v332_v8 = vld [vmem:[%s23303_s26 + $0x40] sm:$0xff] }
  0x1f   : > { %321 = vst [vmem:[%s23308_s19 + $0x10] sm:$0xff] %v320_v2  ;;  %v334_v9 = vld [vmem:[%s23303_s26 + $0x48] sm:$0xff]  ;;  %v336_v10 = vld [vmem:[%s23303_s26 + $0xa0] sm:$0xff]  ;;  %v340_v12 = vld [vmem:[%s23303_s26 + $0xb0] sm:$0xff] }
  0x20   : > { %323 = vst [vmem:[%s23308_s19 + $0x18] sm:$0xff] %v322_v3  ;;  %v338_v11 = vld [vmem:[%s23303_s26 + $0xa8] sm:$0xff]  ;;  %v342_v13 = vld [vmem:[%s23303_s26 + $0xb8] sm:$0xff]  ;;  %v344_v14 = vld [vmem:[%s23303_s26 + $0xc0] sm:$0xff] }
  0x21   : > { %325 = vst [vmem:[%s23308_s19 + $0x20] sm:$0xff] %v324_v4  ;;  %v346_v15 = vld [vmem:[%s23303_s26 + $0xc8] sm:$0xff]  ;;  %v348_v16 = vld [vmem:[%s23303_s26 + $0xd0] sm:$0xff]  ;;  %v350_v17 = vld [vmem:[%s23303_s26 + $0xd8] sm:$0xff] }
  0x22   : > { %327 = vst [vmem:[%s23308_s19 + $0x28] sm:$0xff] %v326_v5  ;;  %v352_v18 = vld [vmem:[%s23303_s26 + $0xe0] sm:$0xff]  ;;  %v354_v19 = vld [vmem:[%s23303_s26 + $0xe8] sm:$0xff]  ;;  %v360_v22 = vld [vmem:[%s23303_s26 + $0x150] sm:$0xff] }
  0x23   : > { %329 = vst [vmem:[%s23308_s19 + $0x30] sm:$0xff] %v328_v6  ;;  %v356_v20 = vld [vmem:[%s23303_s26 + $0x140] sm:$0xff]  ;;  %v358_v21 = vld [vmem:[%s23303_s26 + $0x148] sm:$0xff]  ;;  %v362_v23 = vld [vmem:[%s23303_s26 + $0x158] sm:$0xff] }
  0x24   : > { %331 = vst [vmem:[%s23308_s19 + $0x38] sm:$0xff] %v330_v7  ;;  %v364_v24 = vld [vmem:[%s23303_s26 + $0x160] sm:$0xff]  ;;  %v366_v25 = vld [vmem:[%s23303_s26 + $0x168] sm:$0xff]  ;;  %v368_v26 = vld [vmem:[%s23303_s26 + $0x170] sm:$0xff] }
  0x25   : > { %333 = vst [vmem:[%s23308_s19 + $0x40] sm:$0xff] %v332_v8  ;;  %v370_v27 = vld [vmem:[%s23303_s26 + $0x178] sm:$0xff]  ;;  %v372_v28 = vld [vmem:[%s23303_s26 + $0x180] sm:$0xff]  ;;  %v374_v29 = vld [vmem:[%s23303_s26 + $0x188] sm:$0xff] }
  0x26   : > { %335 = vst [vmem:[%s23308_s19 + $0x48] sm:$0xff] %v334_v9  ;;  %v376_v30 = vld [vmem:[%s23303_s26 + $0x1e0] sm:$0xff]  ;;  %v378_v31 = vld [vmem:[%s23303_s26 + $0x1e8] sm:$0xff]  ;;  %v380_v32 = vld [vmem:[%s23303_s26 + $0x1f0] sm:$0xff] }
  0x27   : > { %337 = vst [vmem:[%s23308_s19 + $0x50] sm:$0xff] %v336_v10  ;;  %v382_v33 = vld [vmem:[%s23303_s26 + $0x1f8] sm:$0xff]  ;;  %v384_v34 = vld [vmem:[%s23303_s26 + $0x200] sm:$0xff]  ;;  %v386_v35 = vld [vmem:[%s23303_s26 + $0x208] sm:$0xff] }
  0x28   : > { %339 = vst [vmem:[%s23308_s19 + $0x58] sm:$0xff] %v338_v11  ;;  %v388_v36 = vld [vmem:[%s23303_s26 + $0x210] sm:$0xff]  ;;  %v390_v37 = vld [vmem:[%s23303_s26 + $0x218] sm:$0xff]  ;;  %v392_v38 = vld [vmem:[%s23303_s26 + $0x220] sm:$0xff] }
  0x29   : > { %341 = vst [vmem:[%s23308_s19 + $0x60] sm:$0xff] %v340_v12  ;;  %v394_v39 = vld [vmem:[%s23303_s26 + $0x228] sm:$0xff]  ;;  %v396_v40 = vld [vmem:[%s23303_s26 + $0x280] sm:$0xff]  ;;  %v400_v42 = vld [vmem:[%s23303_s26 + $0x290] sm:$0xff] }
  0x2a   : > { %343 = vst [vmem:[%s23308_s19 + $0x68] sm:$0xff] %v342_v13  ;;  %v398_v41 = vld [vmem:[%s23303_s26 + $0x288] sm:$0xff]  ;;  %v402_v43 = vld [vmem:[%s23303_s26 + $0x298] sm:$0xff]  ;;  %v404_v44 = vld [vmem:[%s23303_s26 + $0x2a0] sm:$0xff] }
  0x2b   : > { %345 = vst [vmem:[%s23308_s19 + $0x70] sm:$0xff] %v344_v14  ;;  %v406_v45 = vld [vmem:[%s23303_s26 + $0x2a8] sm:$0xff]  ;;  %v408_v46 = vld [vmem:[%s23303_s26 + $0x2b0] sm:$0xff]  ;;  %v410_v47 = vld [vmem:[%s23303_s26 + $0x2b8] sm:$0xff] }
  0x2c   : > { %347 = vst [vmem:[%s23308_s19 + $0x78] sm:$0xff] %v346_v15  ;;  %v412_v48 = vld [vmem:[%s23303_s26 + $0x2c0] sm:$0xff]  ;;  %v414_v49 = vld [vmem:[%s23303_s26 + $0x2c8] sm:$0xff] }
  0x2d   : > { %349 = vst [vmem:[%s23308_s19 + $0x80] sm:$0xff] %v348_v16 }
  0x2e   : > { %351 = vst [vmem:[%s23308_s19 + $0x88] sm:$0xff] %v350_v17 }
  0x2f   : > { %353 = vst [vmem:[%s23308_s19 + $0x90] sm:$0xff] %v352_v18 }
  0x30   : > { %355 = vst [vmem:[%s23308_s19 + $0x98] sm:$0xff] %v354_v19 }
  0x31   : > { %357 = vst [vmem:[%s23308_s19 + $0xa0] sm:$0xff] %v356_v20 }
  0x32   : > { %359 = vst [vmem:[%s23308_s19 + $0xa8] sm:$0xff] %v358_v21 }
  0x33   : > { %361 = vst [vmem:[%s23308_s19 + $0xb0] sm:$0xff] %v360_v22 }
  0x34   : > { %363 = vst [vmem:[%s23308_s19 + $0xb8] sm:$0xff] %v362_v23 }
  0x35   : > { %365 = vst [vmem:[%s23308_s19 + $0xc0] sm:$0xff] %v364_v24 }
  0x36   : > { %367 = vst [vmem:[%s23308_s19 + $0xc8] sm:$0xff] %v366_v25 }
  0x37   : > { %369 = vst [vmem:[%s23308_s19 + $0xd0] sm:$0xff] %v368_v26 }
  0x38   : > { %371 = vst [vmem:[%s23308_s19 + $0xd8] sm:$0xff] %v370_v27 }
  0x39   : > { %373 = vst [vmem:[%s23308_s19 + $0xe0] sm:$0xff] %v372_v28 }
  0x3a   : > { %375 = vst [vmem:[%s23308_s19 + $0xe8] sm:$0xff] %v374_v29 }
  0x3b   : > { %377 = vst [vmem:[%s23308_s19 + $0xf0] sm:$0xff] %v376_v30 }
  0x3c   : > { %379 = vst [vmem:[%s23308_s19 + $0xf8] sm:$0xff] %v378_v31 }
  0x3d   : > { %381 = vst [vmem:[%s23308_s19 + $0x100] sm:$0xff] %v380_v32 }
  0x3e   : > { %383 = vst [vmem:[%s23308_s19 + $0x108] sm:$0xff] %v382_v33 }
  0x3f   : > { %385 = vst [vmem:[%s23308_s19 + $0x110] sm:$0xff] %v384_v34 }
  0x40   : > { %387 = vst [vmem:[%s23308_s19 + $0x118] sm:$0xff] %v386_v35 }
  0x41   : > { %389 = vst [vmem:[%s23308_s19 + $0x120] sm:$0xff] %v388_v36 }
  0x42   : > { %391 = vst [vmem:[%s23308_s19 + $0x128] sm:$0xff] %v390_v37 }
  0x43   : > { %393 = vst [vmem:[%s23308_s19 + $0x130] sm:$0xff] %v392_v38 }
  0x44   : > { %395 = vst [vmem:[%s23308_s19 + $0x138] sm:$0xff] %v394_v39 }
  0x45   : > { %397 = vst [vmem:[%s23308_s19 + $0x140] sm:$0xff] %v396_v40 }
  0x46   : > { %399 = vst [vmem:[%s23308_s19 + $0x148] sm:$0xff] %v398_v41 }
  0x47   : > { %401 = vst [vmem:[%s23308_s19 + $0x150] sm:$0xff] %v400_v42 }
  0x48   : > { %403 = vst [vmem:[%s23308_s19 + $0x158] sm:$0xff] %v402_v43 }
  0x49   : > { %405 = vst [vmem:[%s23308_s19 + $0x160] sm:$0xff] %v404_v44 }
  0x4a   : > { %407 = vst [vmem:[%s23308_s19 + $0x168] sm:$0xff] %v406_v45 }
  0x4b   : > { %409 = vst [vmem:[%s23308_s19 + $0x170] sm:$0xff] %v408_v46 }
  0x4c   : > { %411 = vst [vmem:[%s23308_s19 + $0x178] sm:$0xff] %v410_v47 }
  0x4d   : > { %413 = vst [vmem:[%s23308_s19 + $0x180] sm:$0xff] %v412_v48 }
  0x4e   : > { %415 = vst [vmem:[%s23308_s19 + $0x188] sm:$0xff] %v414_v49 }
  0x4f PF: > { %424 = sbr.rel (%p23282_p12) target bundleno = 1991 (0x7c7), region = 75  ;;  %s23410_s25 = sand.u32 (!%p23282_p12), 1, %s23163_s10  }
  0x50   : > { %s23012_s27 = smul.u32 (!%p23282_p12), 400, %s23410_s25 }
  0x52   : > { %s23413_s28 = scalar_lea.vmem (!%p23282_p12), [#allocation3], %s23012_s27 }
  0x54   : > { %23150 = dma.done.wait (%p23027_p11), [#allocation5], 18432  }
  0x55   : > { %23152 = vsyncadd (%p23027_p11), [#allocation5], 4294948864  ;;  %v21532_v50 = vld [vmem:[#allocation4 + $0x1b8] sm:$0xff]  ;;  %v21531_v54 = vld [vmem:[#allocation4 + $0x1b0] sm:$0xff]  ;;  %vm14979_vm0 = vcmask 523264   ;;  %vm15012_vm1 = vcmask 130048  }
  0x56   : > { %v21540_v51 = vld [vmem:[#allocation4 + $0x1f8] sm:$0xff]  ;;  %995 = vmatpush.bf16.msra.mxu0 %v21532_v50  ;;  %v21539_v55 = vld [vmem:[#allocation4 + $0x1f0] sm:$0xff]  ;;  %v21530_v58 = vld [vmem:[#allocation4 + $0x1a8] sm:$0xff]  ;;  %s15137_s26 = sshll.u32 %s23410_s25, 4  ;;  %s23009_s27 = sshll.u32 %s23249_s13, 4 }
  0x57   : > { %v21548_v52 = vld [vmem:[#allocation4 + $0x238] sm:$0xff]  ;;  %1009 = vmatpush.bf16.msra.mxu1 %v21540_v51  ;;  %v21547_v56 = vld [vmem:[#allocation4 + $0x230] sm:$0xff]  ;;  %v21538_v59 = vld [vmem:[#allocation4 + $0x1e8] sm:$0xff]  ;;  %s15044_s14 = scalar_lea.hbm %s24641_s9, %s23009_s27  ;;  %s466_s16 = scalar_lea.vmem [#allocation7], %s15137_s26 }
  0x58   : > { %v21556_v53 = vld [vmem:[#allocation4 + $0x278] sm:$0xff]  ;;  %1023 = vmatpush.bf16.msra.mxu2 %v21548_v52  ;;  %v21555_v57 = vld [vmem:[#allocation4 + $0x270] sm:$0xff]  ;;  %v21546_v60 = vld [vmem:[#allocation4 + $0x228] sm:$0xff]  ;;  %s15045_s17 = sshll.u32 %s466_s16, 4  ;;  %s15047_s23 = sshll.u32 %s15044_s14, 4  ;;  %s15046_s17 = int_to_ptr.vmem [resolvable:$true] %s15045_s17  ;;  %s15048_s23 = int_to_ptr.hbm [resolvable:$true] %s15047_s23 }
  0x59   : > { %1037 = vmatpush.bf16.msra.mxu3 %v21556_v53  ;;  %v21554_v61 = vld [vmem:[#allocation4 + $0x268] sm:$0xff]  ;;  %v21529_v62 = vld [vmem:[#allocation4 + $0x1a0] sm:$0xff]  ;;  %v21528_v2 = vld [vmem:[#allocation4 + $0x198] sm:$0xff]  ;;  %s15033_s24 = scalar_lea.sflag [#allocation6], %s23410_s25  ;;  %s23125_s26 = scalar_lea.hbm %s24641_s9, 32 }
  0x5a   : > { %996 = vmatpush.bf16.msra.mxu0 %v21531_v54  ;;  %v21537_v63 = vld [vmem:[#allocation4 + $0x1e0] sm:$0xff]  ;;  %v21536_v3 = vld [vmem:[#allocation4 + $0x1d8] sm:$0xff]  ;;  %v21527_v6 = vld [vmem:[#allocation4 + $0x190] sm:$0xff] }
  0x5b   : > { %1010 = vmatpush.bf16.msra.mxu1 %v21539_v55  ;;  %v21545_v0 = vld [vmem:[#allocation4 + $0x220] sm:$0xff]  ;;  %v21544_v4 = vld [vmem:[#allocation4 + $0x218] sm:$0xff]  ;;  %v21535_v7 = vld [vmem:[#allocation4 + $0x1d0] sm:$0xff] }
  0x5c   : > { %1024 = vmatpush.bf16.msra.mxu2 %v21547_v56  ;;  %v21553_v1 = vld [vmem:[#allocation4 + $0x260] sm:$0xff]  ;;  %v21552_v5 = vld [vmem:[#allocation4 + $0x258] sm:$0xff]  ;;  %v21543_v8 = vld [vmem:[#allocation4 + $0x210] sm:$0xff] }
  0x5d   : > { %1038 = vmatpush.bf16.msra.mxu3 %v21555_v57  ;;  %v21551_v9 = vld [vmem:[#allocation4 + $0x250] sm:$0xff]  ;;  %v21526_v10 = vld [vmem:[#allocation4 + $0x188] sm:$0xff]  ;;  %v21525_v14 = vld [vmem:[#allocation4 + $0x180] sm:$0xff] }
  0x5e   : > { %997 = vmatpush.bf16.msra.mxu0 %v21530_v58  ;;  %v21534_v11 = vld [vmem:[#allocation4 + $0x1c8] sm:$0xff]  ;;  %v21533_v15 = vld [vmem:[#allocation4 + $0x1c0] sm:$0xff]  ;;  %v21564_v18 = vld [vmem:[#allocation4 + $0x2b8] sm:$0xff] }
  0x5f   : > { %1011 = vmatpush.bf16.msra.mxu1 %v21538_v59  ;;  %v21542_v12 = vld [vmem:[#allocation4 + $0x208] sm:$0xff]  ;;  %v21541_v16 = vld [vmem:[#allocation4 + $0x200] sm:$0xff]  ;;  %v21572_v19 = vld [vmem:[#allocation4 + $0x2f8] sm:$0xff] }
  0x60   : > { %1025 = vmatpush.bf16.msra.mxu2 %v21546_v60  ;;  %v21550_v13 = vld [vmem:[#allocation4 + $0x248] sm:$0xff]  ;;  %v21549_v17 = vld [vmem:[#allocation4 + $0x240] sm:$0xff]  ;;  %v21478_v28 = vld [vmem:[#allocation4 + $0x38] sm:$0xff] }
  0x61   : > { %1039 = vmatpush.bf16.msra.mxu3 %v21554_v61  ;;  %v15146_v20 = vld [vmem:[%s23413_s28 + $0x50] sm:$0xf]  ;;  %v21522_v21 = vld [vmem:[%s23413_s28 + $0x74] sm:$0xf0]  ;;  %v21523_v23 = vld [vmem:[%s23413_s28 + $0x7c] sm:$0xf0] }
  0x62   : > { %998 = vmatpush.bf16.msra.mxu0 %v21529_v62  ;;  %v15154_v22 = vld [vmem:[%s23413_s28 + $0x58] sm:$0xf]  ;;  %v21519_v24 = vld [vmem:[%s23413_s28 + $0x54] sm:$0xf]  ;;  %v15148_v25 = vld [vmem:[%s23413_s28 + $0x78] sm:$0xf0]  ;;  %v15147_v30 = vor.u32 %v21522_v21, %v15146_v20 }
  0x63   : > { %1012 = vmatpush.bf16.msra.mxu1 %v21537_v63  ;;  %v21520_v26 = vld [vmem:[%s23413_s28 + $0x5c] sm:$0xf]  ;;  %v15156_v27 = vld [vmem:[%s23413_s28 + $0x80] sm:$0xf0]  ;;  %v15155_v31 = vor.u32 %v21523_v23, %v15154_v22  ;;  %v15151_v32 = vor.u32 %v21519_v24, %v15148_v25 }
  0x64   : > { %1026 = vmatpush.bf16.msra.mxu2 %v21545_v0  ;;  %v21486_v29 = vld [vmem:[#allocation4 + $0x78] sm:$0xff]  ;;  %v15159_v33 = vor.u32 %v21520_v26, %v15156_v27  ;;  %v21563_v34 = vld [vmem:[#allocation4 + $0x2b0] sm:$0xff]  ;;  %v21562_v38 = vld [vmem:[#allocation4 + $0x2a8] sm:$0xff] }
  0x65   : > { %1040 = vmatpush.bf16.msra.mxu3 %v21553_v1  ;;  %v21571_v35 = vld [vmem:[#allocation4 + $0x2f0] sm:$0xff]  ;;  %v21570_v39 = vld [vmem:[#allocation4 + $0x2e8] sm:$0xff]  ;;  %v21561_v42 = vld [vmem:[#allocation4 + $0x2a0] sm:$0xff] }
  0x66   : > { %999 = vmatpush.bf16.msra.mxu0 %v21528_v2  ;;  %v21477_v36 = vld [vmem:[#allocation4 + $0x30] sm:$0xff]  ;;  %v21476_v40 = vld [vmem:[#allocation4 + $0x28] sm:$0xff]  ;;  %v21569_v43 = vld [vmem:[#allocation4 + $0x2e0] sm:$0xff] }
  0x67   : > { %1013 = vmatpush.bf16.msra.mxu1 %v21536_v3  ;;  %v21485_v37 = vld [vmem:[#allocation4 + $0x70] sm:$0xff]  ;;  %v21484_v41 = vld [vmem:[#allocation4 + $0x68] sm:$0xff]  ;;  %v21475_v44 = vld [vmem:[#allocation4 + $0x20] sm:$0xff] }
  0x68   : > { %1027 = vmatpush.bf16.msra.mxu2 %v21544_v4  ;;  %v21483_v45 = vld [vmem:[#allocation4 + $0x60] sm:$0xff]  ;;  %v21560_v46 = vld [vmem:[#allocation4 + $0x298] sm:$0xff]  ;;  %v21559_v50 = vld [vmem:[#allocation4 + $0x290] sm:$0xff] }
  0x69   : > { %1041 = vmatpush.bf16.msra.mxu3 %v21552_v5  ;;  %v21568_v47 = vld [vmem:[#allocation4 + $0x2d8] sm:$0xff]  ;;  %v21567_v51 = vld [vmem:[#allocation4 + $0x2d0] sm:$0xff]  ;;  %v21558_v54 = vld [vmem:[#allocation4 + $0x288] sm:$0xff] }
  0x6a   : > { %1000 = vmatpush.bf16.msra.mxu0 %v21527_v6  ;;  %v21474_v48 = vld [vmem:[#allocation4 + $0x18] sm:$0xff]  ;;  %v21473_v52 = vld [vmem:[#allocation4 + $0x10] sm:$0xff]  ;;  %v21566_v55 = vld [vmem:[#allocation4 + $0x2c8] sm:$0xff] }
  0x6b   : > { %1014 = vmatpush.bf16.msra.mxu1 %v21535_v7  ;;  %v21482_v49 = vld [vmem:[#allocation4 + $0x58] sm:$0xff]  ;;  %v21481_v53 = vld [vmem:[#allocation4 + $0x50] sm:$0xff]  ;;  %v21472_v56 = vld [vmem:[#allocation4 + $0x8] sm:$0xff] }
  0x6c   : > { %1028 = vmatpush.bf16.msra.mxu2 %v21543_v8  ;;  %v21480_v57 = vld [vmem:[#allocation4 + $0x48] sm:$0xff]  ;;  %v21557_v58 = vld [vmem:[#allocation4 + $0x280] sm:$0xff]  ;;  %v21494_v62 = vld [vmem:[#allocation4 + $0xb8] sm:$0xff] }
  0x6d   : > { %1042 = vmatpush.bf16.msra.mxu3 %v21551_v9  ;;  %v21565_v59 = vld [vmem:[#allocation4 + $0x2c0] sm:$0xff]  ;;  %v21502_v63 = vld [vmem:[#allocation4 + $0xf8] sm:$0xff]  ;;  %v21508_v20 = vld [vmem:[#allocation4 + $0x128] sm:$0xff] }
  0x6e   : > { %1001 = vmatpush.bf16.msra.mxu0 %v21526_v10  ;;  %v21471_v60 = vld [vmem:[#allocation4] sm:$0xff]  ;;  %v21524_v1 = vld [vmem:[%s23413_s28 + $0x84] sm:$0xf0]  ;;  %v15164_v5 = vld [vmem:[%s23413_s28 + $0x88] sm:$0xf0] }
  0x6f   : > { %1015 = vmatpush.bf16.msra.mxu1 %v21534_v11  ;;  %v21479_v61 = vld [vmem:[#allocation4 + $0x40] sm:$0xff]  ;;  %v21468_v3 = vld [vmem:[%s23413_s28 + $0x24] sm:$0xf0]  ;;  %v15364_v7 = vld [vmem:[%s23413_s28 + $0x28] sm:$0xf0] }
  0x70   : > { %1029 = vmatpush.bf16.msra.mxu2 %v21542_v12  ;;  %v15162_v0 = vld [vmem:[%s23413_s28 + $0x60] sm:$0xf]  ;;  %v21521_v4 = vld [vmem:[%s23413_s28 + $0x64] sm:$0xf]  ;;  %v21510_v8 = vld [vmem:[#allocation4 + $0x138] sm:$0xff] }
  0x71   : > { %1043 = vmatpush.bf16.msra.mxu3 %v21550_v13  ;;  %v15362_v2 = vld [vmem:[%s23413_s28] sm:$0xf]  ;;  %v21465_v6 = vld [vmem:[%s23413_s28 + $0x4] sm:$0xf]  ;;  %v21518_v9 = vld [vmem:[#allocation4 + $0x178] sm:$0xff]  ;;  %v15163_v10 = vor.u32 %v21524_v1, %v15162_v0  ;;  %v15167_v12 = vor.u32 %v21521_v4, %v15164_v5 }
  0x72   : > { %1002 = vmatpush.bf16.msra.mxu0 %v21525_v14  ;;  %v15363_v11 = vor.u32 %v21468_v3, %v15362_v2  ;;  %v15367_v13 = vor.u32 %v21465_v6, %v15364_v7  ;;  %v21493_v14 = vld [vmem:[#allocation4 + $0xb0] sm:$0xff]  ;;  %v21516_v21 = vld [vmem:[#allocation4 + $0x168] sm:$0xff]  ;;  %v21491_v22 = vld [vmem:[#allocation4 + $0xa0] sm:$0xff] }
  0x73   : > { %1016 = vmatpush.bf16.msra.mxu1 %v21533_v15  ;;  %v21501_v15 = vld [vmem:[#allocation4 + $0xf0] sm:$0xff]  ;;  %v21499_v23 = vld [vmem:[#allocation4 + $0xe0] sm:$0xff]  ;;  %v21490_v26 = vld [vmem:[#allocation4 + $0x98] sm:$0xff] }
  0x74   : > { %1030 = vmatpush.bf16.msra.mxu2 %v21541_v16  ;;  %v21509_v16 = vld [vmem:[#allocation4 + $0x130] sm:$0xff]  ;;  %v21507_v24 = vld [vmem:[#allocation4 + $0x120] sm:$0xff]  ;;  %v21498_v27 = vld [vmem:[#allocation4 + $0xd8] sm:$0xff] }
  0x75   : > { %1044 = vmatpush.bf16.msra.mxu3 %v21549_v17  ;;  %1003 = vmatmul.bf16.vlgmr.msra.gmra.mxu0 %v15147_v30  ;;  %v21517_v17 = vld [vmem:[#allocation4 + $0x170] sm:$0xff]  ;;  %v21515_v25 = vld [vmem:[#allocation4 + $0x160] sm:$0xff]  ;;  %v21600_v0 = vld [vmem:[#allocation4 + $0x3a8] sm:$0xff] }
  0x76   : > { %1051 = vmatpush.bf16.msrb.mxu0 %v21564_v18  ;;  %1017 = vmatmul.bf16.vlgmr.msra.gmra.mxu1 %v15151_v32  ;;  %v21492_v18 = vld [vmem:[#allocation4 + $0xa8] sm:$0xff]  ;;  %v21489_v30 = vld [vmem:[#allocation4 + $0x90] sm:$0xff]  ;;  %v21583_v2 = vld [vmem:[#allocation4 + $0x320] sm:$0xff] }
  0x77   : > { %1065 = vmatpush.bf16.msrb.mxu1 %v21572_v19  ;;  %1031 = vmatmul.bf16.vlgmr.msra.gmra.mxu2 %v15155_v31  ;;  %v21500_v19 = vld [vmem:[#allocation4 + $0xe8] sm:$0xff]  ;;  %v21497_v31 = vld [vmem:[#allocation4 + $0xd0] sm:$0xff]  ;;  %v21591_v3 = vld [vmem:[#allocation4 + $0x360] sm:$0xff] }
  0x78   : > { %1397 = vmatpush.bf16.msrb.mxu2 %v21478_v28  ;;  %1045 = vmatmul.bf16.vlgmr.msra.gmra.mxu3 %v15159_v33  ;;  %v21506_v28 = vld [vmem:[#allocation4 + $0x118] sm:$0xff]  ;;  %v21505_v32 = vld [vmem:[#allocation4 + $0x110] sm:$0xff]  ;;  %v21608_v1 = vld [vmem:[#allocation4 + $0x3e8] sm:$0xff] }
  0x79   : > { %1411 = vmatpush.bf16.msrb.mxu3 %v21486_v29  ;;  %v21514_v29 = vld [vmem:[#allocation4 + $0x158] sm:$0xff]  ;;  %v21513_v33 = vld [vmem:[#allocation4 + $0x150] sm:$0xff]  ;;  %v21599_v4 = vld [vmem:[#allocation4 + $0x3a0] sm:$0xff] }
  0x7a   : > { %1052 = vmatpush.bf16.msrb.mxu0 %v21563_v34  ;;  %v21488_v34 = vld [vmem:[#allocation4 + $0x88] sm:$0xff]  ;;  %v21607_v5 = vld [vmem:[#allocation4 + $0x3e0] sm:$0xff]  ;;  %v21582_v6 = vld [vmem:[#allocation4 + $0x318] sm:$0xff] }
  0x7b   : > { %1066 = vmatpush.bf16.msrb.mxu1 %v21571_v35  ;;  %v21496_v35 = vld [vmem:[#allocation4 + $0xc8] sm:$0xff]  ;;  %v21590_v7 = vld [vmem:[#allocation4 + $0x358] sm:$0xff] }
  0x7c   : > { %1398 = vmatpush.bf16.msrb.mxu2 %v21477_v36  ;;  %v21504_v36 = vld [vmem:[#allocation4 + $0x108] sm:$0xff] }
  0x7d   : > { %1412 = vmatpush.bf16.msrb.mxu3 %v21485_v37  ;;  %v21512_v37 = vld [vmem:[#allocation4 + $0x148] sm:$0xff] }
  0x7e   : > { %1053 = vmatpush.bf16.msrb.mxu0 %v21562_v38  ;;  %v21487_v38 = vld [vmem:[#allocation4 + $0x80] sm:$0xff] }
  0x7f   : > { %1067 = vmatpush.bf16.msrb.mxu1 %v21570_v39  ;;  %v21495_v39 = vld [vmem:[#allocation4 + $0xc0] sm:$0xff] }
  0x80   : > { %1399 = vmatpush.bf16.msrb.mxu2 %v21476_v40  ;;  %v21503_v40 = vld [vmem:[#allocation4 + $0x100] sm:$0xff] }
  0x81   : > { %1413 = vmatpush.bf16.msrb.mxu3 %v21484_v41  ;;  %v21511_v41 = vld [vmem:[#allocation4 + $0x140] sm:$0xff] }
  0x82   : > { %1054 = vmatpush.bf16.msrb.mxu0 %v21561_v42  ;;  %v21586_v42 = vld [vmem:[#allocation4 + $0x338] sm:$0xff] }
  0x83   : > { %1068 = vmatpush.bf16.msrb.mxu1 %v21569_v43  ;;  %v21594_v43 = vld [vmem:[#allocation4 + $0x378] sm:$0xff] }
  0x84   : > { %1400 = vmatpush.bf16.msrb.mxu2 %v21475_v44  ;;  %v15370_v44 = vld [vmem:[%s23413_s28 + $0x8] sm:$0xf] }
  0x85   : > { %1414 = vmatpush.bf16.msrb.mxu3 %v21483_v45  ;;  %v21469_v45 = vld [vmem:[%s23413_s28 + $0x2c] sm:$0xf0] }
  0x86   : > { %1055 = vmatpush.bf16.msrb.mxu0 %v21560_v46  ;;  %v15378_v46 = vld [vmem:[%s23413_s28 + $0x10] sm:$0xf] }
  0x87   : > { %1069 = vmatpush.bf16.msrb.mxu1 %v21568_v47  ;;  %v21470_v47 = vld [vmem:[%s23413_s28 + $0x34] sm:$0xf0] }
  0x88   : > { %1401 = vmatpush.bf16.msrb.mxu2 %v21474_v48  ;;  %v21466_v48 = vld [vmem:[%s23413_s28 + $0xc] sm:$0xf] }
  0x89   : > { %1415 = vmatpush.bf16.msrb.mxu3 %v21482_v49  ;;  %v15372_v49 = vld [vmem:[%s23413_s28 + $0x30] sm:$0xf0] }
  0x8a   : > { %1056 = vmatpush.bf16.msrb.mxu0 %v21559_v50  ;;  %v21467_v50 = vld [vmem:[%s23413_s28 + $0x14] sm:$0xf] }
  0x8b   : > { %1070 = vmatpush.bf16.msrb.mxu1 %v21567_v51  ;;  %v15380_v51 = vld [vmem:[%s23413_s28 + $0x38] sm:$0xf0] }
  0x8c   : > { %1402 = vmatpush.bf16.msrb.mxu2 %v21473_v52  ;;  %v21602_v52 = vld [vmem:[#allocation4 + $0x3b8] sm:$0xff] }
  0x8d   : > { %1416 = vmatpush.bf16.msrb.mxu3 %v21481_v53  ;;  %v21610_v53 = vld [vmem:[#allocation4 + $0x3f8] sm:$0xff] }
  0x8e   : > { %1057 = vmatpush.bf16.msrb.mxu0 %v21558_v54  ;;  %v15371_v54 = vor.u32 %v21469_v45, %v15370_v44  ;;  %v21692_v44 = vld [vmem:[#allocation4 + $0x1a8] sm:$0xff] }
  0x8f   : > { %1071 = vmatpush.bf16.msrb.mxu1 %v21566_v55  ;;  %v15379_v55 = vor.u32 %v21470_v47, %v15378_v46  ;;  %v21700_v45 = vld [vmem:[#allocation4 + $0x1e8] sm:$0xff]  ;;  %v21615_v46 = vld [vmem:[#allocation4 + $0x420] sm:$0xff] }
  0x90   : > { %1403 = vmatpush.bf16.msrb.mxu2 %v21472_v56  ;;  %v15375_v56 = vor.u32 %v21466_v48, %v15372_v49  ;;  %v21623_v47 = vld [vmem:[#allocation4 + $0x460] sm:$0xff] }
  0x91   : > { %1417 = vmatpush.bf16.msrb.mxu3 %v21480_v57  ;;  %v15383_v57 = vor.u32 %v21467_v50, %v15380_v51  ;;  %v21691_v48 = vld [vmem:[#allocation4 + $0x1a0] sm:$0xff]  ;;  %v21614_v50 = vld [vmem:[#allocation4 + $0x418] sm:$0xff] }
  0x92   : > { %1058 = vmatpush.bf16.msrb.mxu0 %v21557_v58  ;;  %v21585_v58 = vld [vmem:[#allocation4 + $0x330] sm:$0xff]  ;;  %v21699_v49 = vld [vmem:[#allocation4 + $0x1e0] sm:$0xff]  ;;  %v21622_v51 = vld [vmem:[#allocation4 + $0x458] sm:$0xff] }
  0x93   : > { %1072 = vmatpush.bf16.msrb.mxu1 %v21565_v59  ;;  %v21593_v59 = vld [vmem:[#allocation4 + $0x370] sm:$0xff] }
  0x94   : > { %1404 = vmatpush.bf16.msrb.mxu2 %v21471_v60  ;;  %v21601_v60 = vld [vmem:[#allocation4 + $0x3b0] sm:$0xff] }
  0x95   : > { %1418 = vmatpush.bf16.msrb.mxu3 %v21479_v61  ;;  %1059 = vmatmul.bf16.vlgmr.msrb.gmra.mxu0 %v15163_v10  ;;  %v21609_v61 = vld [vmem:[#allocation4 + $0x3f0] sm:$0xff] }
  0x96   : > { %1425 = vmatpush.bf16.msra.mxu0 %v21494_v62  ;;  %1073 = vmatmul.bf16.vlgmr.msrb.gmra.mxu1 %v15167_v12  ;;  %v21584_v62 = vld [vmem:[#allocation4 + $0x328] sm:$0xff]  ;;  %v21581_v10 = vld [vmem:[#allocation4 + $0x310] sm:$0xff] }
  0x97   : > { %1439 = vmatpush.bf16.msra.mxu1 %v21502_v63  ;;  %1405 = vmatmul.bf16.vlgmr.msrb.gmra.mxu2 %v15363_v11  ;;  %v21592_v63 = vld [vmem:[#allocation4 + $0x368] sm:$0xff]  ;;  %v21589_v11 = vld [vmem:[#allocation4 + $0x350] sm:$0xff] }
  0x98   : > { %1453 = vmatpush.bf16.msra.mxu2 %v21510_v8  ;;  %1419 = vmatmul.bf16.vlgmr.msrb.gmra.mxu3 %v15367_v13  ;;  %v21598_v8 = vld [vmem:[#allocation4 + $0x398] sm:$0xff]  ;;  %v21597_v12 = vld [vmem:[#allocation4 + $0x390] sm:$0xff] }
  0x99   : > { %1467 = vmatpush.bf16.msra.mxu3 %v21518_v9  ;;  %v21606_v9 = vld [vmem:[#allocation4 + $0x3d8] sm:$0xff]  ;;  %v21605_v13 = vld [vmem:[#allocation4 + $0x3d0] sm:$0xff] }
  0x9a   : > { %1426 = vmatpush.bf16.msra.mxu0 %v21493_v14  ;;  %v21580_v14 = vld [vmem:[#allocation4 + $0x308] sm:$0xff] }
  0x9b   : > { %1440 = vmatpush.bf16.msra.mxu1 %v21501_v15  ;;  %v21588_v15 = vld [vmem:[#allocation4 + $0x348] sm:$0xff] }
  0x9c   : > { %1454 = vmatpush.bf16.msra.mxu2 %v21509_v16  ;;  %v21596_v16 = vld [vmem:[#allocation4 + $0x388] sm:$0xff] }
  0x9d   : > { %1468 = vmatpush.bf16.msra.mxu3 %v21517_v17  ;;  %v21604_v17 = vld [vmem:[#allocation4 + $0x3c8] sm:$0xff] }
  0x9e   : > { %1427 = vmatpush.bf16.msra.mxu0 %v21492_v18  ;;  %v21579_v18 = vld [vmem:[#allocation4 + $0x300] sm:$0xff] }
  0x9f   : > { %1441 = vmatpush.bf16.msra.mxu1 %v21500_v19  ;;  %v21587_v19 = vld [vmem:[#allocation4 + $0x340] sm:$0xff] }
  0xa0   : > { %1455 = vmatpush.bf16.msra.mxu2 %v21508_v20  ;;  %v21595_v20 = vld [vmem:[#allocation4 + $0x380] sm:$0xff] }
  0xa1   : > { %1469 = vmatpush.bf16.msra.mxu3 %v21516_v21  ;;  %v21603_v21 = vld [vmem:[#allocation4 + $0x3c0] sm:$0xff] }
  0xa2   : > { %1428 = vmatpush.bf16.msra.mxu0 %v21491_v22  ;;  %v21618_v22 = vld [vmem:[#allocation4 + $0x438] sm:$0xff] }
  0xa3   : > { %1442 = vmatpush.bf16.msra.mxu1 %v21499_v23  ;;  %v21626_v23 = vld [vmem:[#allocation4 + $0x478] sm:$0xff] }
  0xa4   : > { %1456 = vmatpush.bf16.msra.mxu2 %v21507_v24  ;;  %v15584_v24 = vld [vmem:[%s23413_s28 + $0xa0] sm:$0xf] }
  0xa5   : > { %1470 = vmatpush.bf16.msra.mxu3 %v21515_v25  ;;  %v21576_v25 = vld [vmem:[%s23413_s28 + $0xc4] sm:$0xf0] }
  0xa6   : > { %1429 = vmatpush.bf16.msra.mxu0 %v21490_v26  ;;  %v21573_v26 = vld [vmem:[%s23413_s28 + $0xa4] sm:$0xf] }
  0xa7   : > { %1443 = vmatpush.bf16.msra.mxu1 %v21498_v27  ;;  %v15586_v27 = vld [vmem:[%s23413_s28 + $0xc8] sm:$0xf0] }
  0xa8   : > { %1457 = vmatpush.bf16.msra.mxu2 %v21506_v28  ;;  %v15592_v28 = vld [vmem:[%s23413_s28 + $0xa8] sm:$0xf] }
  0xa9   : > { %1471 = vmatpush.bf16.msra.mxu3 %v21514_v29  ;;  %v21577_v29 = vld [vmem:[%s23413_s28 + $0xcc] sm:$0xf0] }
  0xaa   : > { %1430 = vmatpush.bf16.msra.mxu0 %v21489_v30  ;;  %v21574_v30 = vld [vmem:[%s23413_s28 + $0xac] sm:$0xf] }
  0xab   : > { %1444 = vmatpush.bf16.msra.mxu1 %v21497_v31  ;;  %v15594_v31 = vld [vmem:[%s23413_s28 + $0xd0] sm:$0xf0] }
  0xac   : > { %1458 = vmatpush.bf16.msra.mxu2 %v21505_v32  ;;  %v21694_v32 = vld [vmem:[#allocation4 + $0x1b8] sm:$0xff] }
  0xad   : > { %1472 = vmatpush.bf16.msra.mxu3 %v21513_v33  ;;  %v21702_v33 = vld [vmem:[#allocation4 + $0x1f8] sm:$0xff] }
  0xae   : > { %1431 = vmatpush.bf16.msra.mxu0 %v21488_v34  ;;  %v15585_v34 = vor.u32 %v21576_v25, %v15584_v24  ;;  %v21724_v24 = vld [vmem:[#allocation4 + $0x2a8] sm:$0xff] }
  0xaf   : > { %1445 = vmatpush.bf16.msra.mxu1 %v21496_v35  ;;  %v15589_v35 = vor.u32 %v21573_v26, %v15586_v27  ;;  %v21732_v25 = vld [vmem:[#allocation4 + $0x2e8] sm:$0xff]  ;;  %v21707_v26 = vld [vmem:[#allocation4 + $0x220] sm:$0xff] }
  0xb0   : > { %1459 = vmatpush.bf16.msra.mxu2 %v21504_v36  ;;  %v15593_v36 = vor.u32 %v21577_v29, %v15592_v28  ;;  %v21715_v27 = vld [vmem:[#allocation4 + $0x260] sm:$0xff] }
  0xb1   : > { %1473 = vmatpush.bf16.msra.mxu3 %v21512_v37  ;;  %v15597_v37 = vor.u32 %v21574_v30, %v15594_v31  ;;  %v21723_v28 = vld [vmem:[#allocation4 + $0x2a0] sm:$0xff]  ;;  %v21706_v30 = vld [vmem:[#allocation4 + $0x218] sm:$0xff] }
  0xb2   : > { %1432 = vmatpush.bf16.msra.mxu0 %v21487_v38  ;;  %v21617_v38 = vld [vmem:[#allocation4 + $0x430] sm:$0xff]  ;;  %v21731_v29 = vld [vmem:[#allocation4 + $0x2e0] sm:$0xff]  ;;  %v21714_v31 = vld [vmem:[#allocation4 + $0x258] sm:$0xff] }
  0xb3   : > { %1446 = vmatpush.bf16.msra.mxu1 %v21495_v39  ;;  %v21625_v39 = vld [vmem:[#allocation4 + $0x470] sm:$0xff] }
  0xb4   : > { %1460 = vmatpush.bf16.msra.mxu2 %v21503_v40  ;;  %v21693_v40 = vld [vmem:[#allocation4 + $0x1b0] sm:$0xff] }
  0xb5   : > { %1474 = vmatpush.bf16.msra.mxu3 %v21511_v41  ;;  %1433 = vmatmul.bf16.vlgmr.msra.gmra.mxu0 %v15371_v54  ;;  %v21701_v41 = vld [vmem:[#allocation4 + $0x1f0] sm:$0xff] }
  0xb6   : > { %1903 = vmatpush.bf16.msrb.mxu0 %v21586_v42  ;;  %1447 = vmatmul.bf16.vlgmr.msra.gmra.mxu1 %v15375_v56  ;;  %v21616_v42 = vld [vmem:[#allocation4 + $0x428] sm:$0xff]  ;;  %v21613_v54 = vld [vmem:[#allocation4 + $0x410] sm:$0xff] }
  0xb7   : > { %1917 = vmatpush.bf16.msrb.mxu1 %v21594_v43  ;;  %1461 = vmatmul.bf16.vlgmr.msra.gmra.mxu2 %v15379_v55  ;;  %v21624_v43 = vld [vmem:[#allocation4 + $0x468] sm:$0xff]  ;;  %v21621_v55 = vld [vmem:[#allocation4 + $0x450] sm:$0xff] }
  0xb8   : > { %1931 = vmatpush.bf16.msrb.mxu2 %v21602_v52  ;;  %1475 = vmatmul.bf16.vlgmr.msra.gmra.mxu3 %v15383_v57  ;;  %v21690_v52 = vld [vmem:[#allocation4 + $0x198] sm:$0xff]  ;;  %v21689_v56 = vld [vmem:[#allocation4 + $0x190] sm:$0xff] }
  0xb9   : > { %1945 = vmatpush.bf16.msrb.mxu3 %v21610_v53  ;;  %v21698_v53 = vld [vmem:[#allocation4 + $0x1d8] sm:$0xff]  ;;  %v21697_v57 = vld [vmem:[#allocation4 + $0x1d0] sm:$0xff] }
  0xba   : > { %1904 = vmatpush.bf16.msrb.mxu0 %v21585_v58  ;;  %v21612_v58 = vld [vmem:[#allocation4 + $0x408] sm:$0xff] }
  0xbb   : > { %1918 = vmatpush.bf16.msrb.mxu1 %v21593_v59  ;;  %v21620_v59 = vld [vmem:[#allocation4 + $0x448] sm:$0xff] }
  0xbc   : > { %1932 = vmatpush.bf16.msrb.mxu2 %v21601_v60  ;;  %v21688_v60 = vld [vmem:[#allocation4 + $0x188] sm:$0xff] }
  0xbd   : > { %1946 = vmatpush.bf16.msrb.mxu3 %v21609_v61  ;;  %v21696_v61 = vld [vmem:[#allocation4 + $0x1c8] sm:$0xff] }
  0xbe   : > { %1905 = vmatpush.bf16.msrb.mxu0 %v21584_v62  ;;  %v21611_v62 = vld [vmem:[#allocation4 + $0x400] sm:$0xff] }
  0xbf   : > { %1919 = vmatpush.bf16.msrb.mxu1 %v21592_v63  ;;  %v21619_v63 = vld [vmem:[#allocation4 + $0x440] sm:$0xff] }
  0xc0   : > { %1933 = vmatpush.bf16.msrb.mxu2 %v21600_v0  ;;  %v21687_v0 = vld [vmem:[#allocation4 + $0x180] sm:$0xff] }
  0xc1   : > { %1947 = vmatpush.bf16.msrb.mxu3 %v21608_v1  ;;  %v21695_v1 = vld [vmem:[#allocation4 + $0x1c0] sm:$0xff] }
  0xc2   : > { %1906 = vmatpush.bf16.msrb.mxu0 %v21583_v2  ;;  %v21710_v2 = vld [vmem:[#allocation4 + $0x238] sm:$0xff] }
  0xc3   : > { %1920 = vmatpush.bf16.msrb.mxu1 %v21591_v3  ;;  %v21718_v3 = vld [vmem:[#allocation4 + $0x278] sm:$0xff] }
  0xc4   : > { %1934 = vmatpush.bf16.msrb.mxu2 %v21599_v4  ;;  %v15600_v4 = vld [vmem:[%s23413_s28 + $0xb0] sm:$0xf] }
  0xc5   : > { %1948 = vmatpush.bf16.msrb.mxu3 %v21607_v5  ;;  %v21578_v5 = vld [vmem:[%s23413_s28 + $0xd4] sm:$0xf0] }
  0xc6   : > { %1907 = vmatpush.bf16.msrb.mxu0 %v21582_v6  ;;  %v21575_v6 = vld [vmem:[%s23413_s28 + $0xb4] sm:$0xf] }
  0xc7   : > { %1921 = vmatpush.bf16.msrb.mxu1 %v21590_v7  ;;  %v15602_v7 = vld [vmem:[%s23413_s28 + $0xd8] sm:$0xf0] }
  0xc8   : > { %1935 = vmatpush.bf16.msrb.mxu2 %v21598_v8  ;;  %v15806_v8 = vld [vmem:[%s23413_s28 + $0x58] sm:$0xf] }
  0xc9   : > { %1949 = vmatpush.bf16.msrb.mxu3 %v21606_v9  ;;  %v21684_v9 = vld [vmem:[%s23413_s28 + $0x7c] sm:$0xf0] }
  0xca   : > { %1908 = vmatpush.bf16.msrb.mxu0 %v21581_v10  ;;  %v21681_v10 = vld [vmem:[%s23413_s28 + $0x5c] sm:$0xf] }
  0xcb   : > { %1922 = vmatpush.bf16.msrb.mxu1 %v21589_v11  ;;  %v15808_v11 = vld [vmem:[%s23413_s28 + $0x80] sm:$0xf0] }
  0xcc   : > { %1936 = vmatpush.bf16.msrb.mxu2 %v21597_v12  ;;  %v21726_v12 = vld [vmem:[#allocation4 + $0x2b8] sm:$0xff] }
  0xcd   : > { %1950 = vmatpush.bf16.msrb.mxu3 %v21605_v13  ;;  %v21734_v13 = vld [vmem:[#allocation4 + $0x2f8] sm:$0xff] }
  0xce   : > { %1909 = vmatpush.bf16.msrb.mxu0 %v21580_v14  ;;  %v15601_v14 = vor.u32 %v21578_v5, %v15600_v4  ;;  %v21654_v4 = vld [vmem:[#allocation4 + $0xa8] sm:$0xff] }
  0xcf   : > { %1923 = vmatpush.bf16.msrb.mxu1 %v21588_v15  ;;  %v15605_v15 = vor.u32 %v21575_v6, %v15602_v7  ;;  %v21662_v5 = vld [vmem:[#allocation4 + $0xe8] sm:$0xff]  ;;  %v21637_v6 = vld [vmem:[#allocation4 + $0x20] sm:$0xff] }
  0xd0   : > { %1937 = vmatpush.bf16.msrb.mxu2 %v21596_v16  ;;  %v15807_v16 = vor.u32 %v21684_v9, %v15806_v8  ;;  %v21645_v7 = vld [vmem:[#allocation4 + $0x60] sm:$0xff] }
  0xd1   : > { %1951 = vmatpush.bf16.msrb.mxu3 %v21604_v17  ;;  %v15811_v17 = vor.u32 %v21681_v10, %v15808_v11  ;;  %v21653_v8 = vld [vmem:[#allocation4 + $0xa0] sm:$0xff]  ;;  %v21636_v10 = vld [vmem:[#allocation4 + $0x18] sm:$0xff] }
  0xd2   : > { %1910 = vmatpush.bf16.msrb.mxu0 %v21579_v18  ;;  %v21709_v18 = vld [vmem:[#allocation4 + $0x230] sm:$0xff]  ;;  %v21661_v9 = vld [vmem:[#allocation4 + $0xe0] sm:$0xff]  ;;  %v21644_v11 = vld [vmem:[#allocation4 + $0x58] sm:$0xff] }
  0xd3   : > { %1924 = vmatpush.bf16.msrb.mxu1 %v21587_v19  ;;  %v21717_v19 = vld [vmem:[#allocation4 + $0x270] sm:$0xff] }
  0xd4   : > { %1938 = vmatpush.bf16.msrb.mxu2 %v21595_v20  ;;  %v21725_v20 = vld [vmem:[#allocation4 + $0x2b0] sm:$0xff] }
  0xd5   : > { %1952 = vmatpush.bf16.msrb.mxu3 %v21603_v21  ;;  %1911 = vmatmul.bf16.vlgmr.msrb.gmra.mxu0 %v15585_v34  ;;  %v21733_v21 = vld [vmem:[#allocation4 + $0x2f0] sm:$0xff] }
  0xd6   : > { %1959 = vmatpush.bf16.msra.mxu0 %v21618_v22  ;;  %1925 = vmatmul.bf16.vlgmr.msrb.gmra.mxu1 %v15589_v35  ;;  %v21708_v22 = vld [vmem:[#allocation4 + $0x228] sm:$0xff]  ;;  %v21705_v34 = vld [vmem:[#allocation4 + $0x210] sm:$0xff] }
  0xd7   : > { %1973 = vmatpush.bf16.msra.mxu1 %v21626_v23  ;;  %1939 = vmatmul.bf16.vlgmr.msrb.gmra.mxu2 %v15593_v36  ;;  %v21716_v23 = vld [vmem:[#allocation4 + $0x268] sm:$0xff]  ;;  %v21713_v35 = vld [vmem:[#allocation4 + $0x250] sm:$0xff] }
  0xd8   : > { %2522 = vmatpush.bf16.msra.mxu2 %v21694_v32  ;;  %1953 = vmatmul.bf16.vlgmr.msrb.gmra.mxu3 %v15597_v37  ;;  %v21722_v32 = vld [vmem:[#allocation4 + $0x298] sm:$0xff]  ;;  %v21721_v36 = vld [vmem:[#allocation4 + $0x290] sm:$0xff] }
  0xd9   : > { %2536 = vmatpush.bf16.msra.mxu3 %v21702_v33  ;;  %v21730_v33 = vld [vmem:[#allocation4 + $0x2d8] sm:$0xff]  ;;  %v21729_v37 = vld [vmem:[#allocation4 + $0x2d0] sm:$0xff] }
  0xda   : > { %1960 = vmatpush.bf16.msra.mxu0 %v21617_v38  ;;  %v21704_v38 = vld [vmem:[#allocation4 + $0x208] sm:$0xff] }
  0xdb   : > { %1974 = vmatpush.bf16.msra.mxu1 %v21625_v39  ;;  %v21712_v39 = vld [vmem:[#allocation4 + $0x248] sm:$0xff] }
  0xdc   : > { %2523 = vmatpush.bf16.msra.mxu2 %v21693_v40  ;;  %v21720_v40 = vld [vmem:[#allocation4 + $0x288] sm:$0xff] }
  0xdd   : > { %2537 = vmatpush.bf16.msra.mxu3 %v21701_v41  ;;  %v21728_v41 = vld [vmem:[#allocation4 + $0x2c8] sm:$0xff] }
  0xde   : > { %1961 = vmatpush.bf16.msra.mxu0 %v21616_v42  ;;  %v21703_v42 = vld [vmem:[#allocation4 + $0x200] sm:$0xff] }
  0xdf   : > { %1975 = vmatpush.bf16.msra.mxu1 %v21624_v43  ;;  %v21711_v43 = vld [vmem:[#allocation4 + $0x240] sm:$0xff] }
  0xe0   : > { %2524 = vmatpush.bf16.msra.mxu2 %v21692_v44  ;;  %v21719_v44 = vld [vmem:[#allocation4 + $0x280] sm:$0xff] }
  0xe1   : > { %2538 = vmatpush.bf16.msra.mxu3 %v21700_v45  ;;  %v21727_v45 = vld [vmem:[#allocation4 + $0x2c0] sm:$0xff] }
  0xe2   : > { %1962 = vmatpush.bf16.msra.mxu0 %v21615_v46  ;;  %v21640_v46 = vld [vmem:[#allocation4 + $0x38] sm:$0xff] }
  0xe3   : > { %1976 = vmatpush.bf16.msra.mxu1 %v21623_v47  ;;  %v21648_v47 = vld [vmem:[#allocation4 + $0x78] sm:$0xff] }
  0xe4   : > { %2525 = vmatpush.bf16.msra.mxu2 %v21691_v48  ;;  %v15814_v48 = vld [vmem:[%s23413_s28 + $0x60] sm:$0xf] }
  0xe5   : > { %2539 = vmatpush.bf16.msra.mxu3 %v21699_v49  ;;  %v21685_v49 = vld [vmem:[%s23413_s28 + $0x84] sm:$0xf0] }
  0xe6   : > { %1963 = vmatpush.bf16.msra.mxu0 %v21614_v50  ;;  %v15822_v50 = vld [vmem:[%s23413_s28 + $0x68] sm:$0xf] }
  0xe7   : > { %1977 = vmatpush.bf16.msra.mxu1 %v21622_v51  ;;  %v21686_v51 = vld [vmem:[%s23413_s28 + $0x8c] sm:$0xf0] }
  0xe8   : > { %2526 = vmatpush.bf16.msra.mxu2 %v21690_v52  ;;  %v21682_v52 = vld [vmem:[%s23413_s28 + $0x64] sm:$0xf] }
  0xe9   : > { %2540 = vmatpush.bf16.msra.mxu3 %v21698_v53  ;;  %v15816_v53 = vld [vmem:[%s23413_s28 + $0x88] sm:$0xf0] }
  0xea   : > { %1964 = vmatpush.bf16.msra.mxu0 %v21613_v54  ;;  %v21683_v54 = vld [vmem:[%s23413_s28 + $0x6c] sm:$0xf] }
  0xeb   : > { %1978 = vmatpush.bf16.msra.mxu1 %v21621_v55  ;;  %v15824_v55 = vld [vmem:[%s23413_s28 + $0x90] sm:$0xf0] }
  0xec   : > { %2527 = vmatpush.bf16.msra.mxu2 %v21689_v56  ;;  %v21656_v56 = vld [vmem:[#allocation4 + $0xb8] sm:$0xff] }
  0xed   : > { %2541 = vmatpush.bf16.msra.mxu3 %v21697_v57  ;;  %v21664_v57 = vld [vmem:[#allocation4 + $0xf8] sm:$0xff] }
  0xee   : > { %1965 = vmatpush.bf16.msra.mxu0 %v21612_v58  ;;  %v15815_v58 = vor.u32 %v21685_v49, %v15814_v48  ;;  %v21747_v49 = vld [vmem:[#allocation4 + $0x330] sm:$0xff] }
  0xef   : > { %1979 = vmatpush.bf16.msra.mxu1 %v21620_v59  ;;  %v15823_v59 = vor.u32 %v21686_v51, %v15822_v50  ;;  %v21755_v50 = vld [vmem:[#allocation4 + $0x370] sm:$0xff]  ;;  %v21670_v51 = vld [vmem:[#allocation4 + $0x128] sm:$0xff] }
  0xf0   : > { %2528 = vmatpush.bf16.msra.mxu2 %v21688_v60  ;;  %v15819_v60 = vor.u32 %v21682_v52, %v15816_v53  ;;  %v21678_v52 = vld [vmem:[#allocation4 + $0x168] sm:$0xff] }
  0xf1   : > { %2542 = vmatpush.bf16.msra.mxu3 %v21696_v61  ;;  %v15827_v61 = vor.u32 %v21683_v54, %v15824_v55  ;;  %v21746_v54 = vld [vmem:[#allocation4 + $0x328] sm:$0xff] }
  0xf2   : > { %1966 = vmatpush.bf16.msra.mxu0 %v21611_v62  ;;  %v21639_v62 = vld [vmem:[#allocation4 + $0x30] sm:$0xff]  ;;  %v21754_v55 = vld [vmem:[#allocation4 + $0x368] sm:$0xff] }
  0xf3   : > { %1980 = vmatpush.bf16.msra.mxu1 %v21619_v63  ;;  %v21647_v63 = vld [vmem:[#allocation4 + $0x70] sm:$0xff] }
  0xf4   : > { %2529 = vmatpush.bf16.msra.mxu2 %v21687_v0  ;;  %v21655_v0 = vld [vmem:[#allocation4 + $0xb0] sm:$0xff] }
  0xf5   : > { %2543 = vmatpush.bf16.msra.mxu3 %v21695_v1  ;;  %1967 = vmatmul.bf16.vlgmr.msra.gmra.mxu0 %v15601_v14  ;;  %v21663_v1 = vld [vmem:[#allocation4 + $0xf0] sm:$0xff] }
  0xf6   : > { %2550 = vmatpush.bf16.msrb.mxu0 %v21710_v2  ;;  %1981 = vmatmul.bf16.vlgmr.msra.gmra.mxu1 %v15605_v15  ;;  %v21638_v2 = vld [vmem:[#allocation4 + $0x28] sm:$0xff]  ;;  %v21635_v14 = vld [vmem:[#allocation4 + $0x10] sm:$0xff] }
  0xf7   : > { %2564 = vmatpush.bf16.msrb.mxu1 %v21718_v3  ;;  %2530 = vmatmul.bf16.vlgmr.msra.gmra.mxu2 %v15807_v16  ;;  %v21646_v3 = vld [vmem:[#allocation4 + $0x68] sm:$0xff]  ;;  %v21643_v15 = vld [vmem:[#allocation4 + $0x50] sm:$0xff] }
  0xf8   : > { %2578 = vmatpush.bf16.msrb.mxu2 %v21726_v12  ;;  %2544 = vmatmul.bf16.vlgmr.msra.gmra.mxu3 %v15811_v17  ;;  %v21652_v12 = vld [vmem:[#allocation4 + $0x98] sm:$0xff]  ;;  %v21651_v16 = vld [vmem:[#allocation4 + $0x90] sm:$0xff] }
  0xf9   : > { %2592 = vmatpush.bf16.msrb.mxu3 %v21734_v13  ;;  %v21660_v13 = vld [vmem:[#allocation4 + $0xd8] sm:$0xff]  ;;  %v21659_v17 = vld [vmem:[#allocation4 + $0xd0] sm:$0xff] }
  0xfa   : > { %2551 = vmatpush.bf16.msrb.mxu0 %v21709_v18  ;;  %v21634_v18 = vld [vmem:[#allocation4 + $0x8] sm:$0xff] }
  0xfb   : > { %2565 = vmatpush.bf16.msrb.mxu1 %v21717_v19  ;;  %v21642_v19 = vld [vmem:[#allocation4 + $0x48] sm:$0xff]  ;;  %v23485_v53 = vpop.f32.mrf.mxu3 }
  0xfc   : > { %2579 = vmatpush.bf16.msrb.mxu2 %v21725_v20  ;;  %v23467_v20 = vpop.f32.mrf.mxu0 }
  0xfd   : > { %2593 = vmatpush.bf16.msrb.mxu3 %v21733_v21  ;;  %v23469_v21 = vpop.f32.mrf.mxu1 }
  0xfe   : > { %2552 = vmatpush.bf16.msrb.mxu0 %v21708_v22  ;;  %v21650_v22 = vld [vmem:[#allocation4 + $0x88] sm:$0xff] }
  0xff   : > { %2566 = vmatpush.bf16.msrb.mxu1 %v21716_v23  ;;  %v21658_v23 = vld [vmem:[#allocation4 + $0xc8] sm:$0xff] }
 0x100   : > { %2580 = vmatpush.bf16.msrb.mxu2 %v21724_v24  ;;  %v21633_v24 = vld [vmem:[#allocation4] sm:$0xff] }
 0x101   : > { %2594 = vmatpush.bf16.msrb.mxu3 %v21732_v25  ;;  %v21641_v25 = vld [vmem:[#allocation4 + $0x40] sm:$0xff] }
 0x102   : > { %2553 = vmatpush.bf16.msrb.mxu0 %v21707_v26  ;;  %v21649_v26 = vld [vmem:[#allocation4 + $0x80] sm:$0xff] }
 0x103   : > { %2567 = vmatpush.bf16.msrb.mxu1 %v21715_v27  ;;  %v21657_v27 = vld [vmem:[#allocation4 + $0xc0] sm:$0xff] }
 0x104   : > { %2581 = vmatpush.bf16.msrb.mxu2 %v21723_v28  ;;  %v21672_v28 = vld [vmem:[#allocation4 + $0x138] sm:$0xff] }
 0x105   : > { %2595 = vmatpush.bf16.msrb.mxu3 %v21731_v29  ;;  %v21680_v29 = vld [vmem:[#allocation4 + $0x178] sm:$0xff]  ;;  %v23483_v48 = vpop.f32.mrf.mxu1 }
 0x106   : > { %2554 = vmatpush.bf16.msrb.mxu0 %v21706_v30  ;;  %v16022_v30 = vld [vmem:[%s23413_s28 + $0x8] sm:$0xf] }
 0x107   : > { %2568 = vmatpush.bf16.msrb.mxu1 %v21714_v31  ;;  %v21630_v31 = vld [vmem:[%s23413_s28 + $0x2c] sm:$0xf0] }
 0x108   : > { %2582 = vmatpush.bf16.msrb.mxu2 %v21722_v32  ;;  %v16030_v32 = vld [vmem:[%s23413_s28 + $0x10] sm:$0xf] }
 0x109   : > { %2596 = vmatpush.bf16.msrb.mxu3 %v21730_v33  ;;  %v21631_v33 = vld [vmem:[%s23413_s28 + $0x34] sm:$0xf0] }
 0x10a   : > { %2555 = vmatpush.bf16.msrb.mxu0 %v21705_v34  ;;  %v21627_v34 = vld [vmem:[%s23413_s28 + $0xc] sm:$0xf] }
 0x10b   : > { %2569 = vmatpush.bf16.msrb.mxu1 %v21713_v35  ;;  %v16024_v35 = vld [vmem:[%s23413_s28 + $0x30] sm:$0xf0] }
 0x10c   : > { %2583 = vmatpush.bf16.msrb.mxu2 %v21721_v36  ;;  %v21628_v36 = vld [vmem:[%s23413_s28 + $0x14] sm:$0xf] }
 0x10d   : > { %2597 = vmatpush.bf16.msrb.mxu3 %v21729_v37  ;;  %v16032_v37 = vld [vmem:[%s23413_s28 + $0x38] sm:$0xf0] }
 0x10e   : > { %2556 = vmatpush.bf16.msrb.mxu0 %v21704_v38  ;;  %v21748_v38 = vld [vmem:[#allocation4 + $0x338] sm:$0xff] }
 0x10f   : > { %2570 = vmatpush.bf16.msrb.mxu1 %v21712_v39  ;;  %v21756_v39 = vld [vmem:[#allocation4 + $0x378] sm:$0xff] }
 0x110   : > { %2584 = vmatpush.bf16.msrb.mxu2 %v21720_v40  ;;  %v16023_v40 = vor.u32 %v21630_v31, %v16022_v30  ;;  %v21735_v30 = vld [vmem:[%s23413_s28 + $0xac] sm:$0xf]  ;;  %v16246_v31 = vld [vmem:[%s23413_s28 + $0xd0] sm:$0xf0] }
 0x111   : > { %2598 = vmatpush.bf16.msrb.mxu3 %v21728_v41  ;;  %v16031_v41 = vor.u32 %v21631_v33, %v16030_v32  ;;  %v21780_v32 = vld [vmem:[#allocation4 + $0x438] sm:$0xff] }
 0x112   : > { %2557 = vmatpush.bf16.msrb.mxu0 %v21703_v42  ;;  %v16027_v42 = vor.u32 %v21627_v34, %v16024_v35  ;;  %v21788_v33 = vld [vmem:[#allocation4 + $0x478] sm:$0xff] }
 0x113   : > { %2571 = vmatpush.bf16.msrb.mxu1 %v21711_v43  ;;  %v16035_v43 = vor.u32 %v21628_v36, %v16032_v37 }
 0x114   : > { %2585 = vmatpush.bf16.msrb.mxu2 %v21719_v44  ;;  %v23479_v44 = vpop.f32.mrf.mxu2 }
 0x115   : > { %2599 = vmatpush.bf16.msrb.mxu3 %v21727_v45  ;;  %2558 = vmatmul.bf16.vlgmr.msrb.gmra.mxu0 %v15815_v58  ;;  %v21671_v45 = vld [vmem:[#allocation4 + $0x130] sm:$0xff]  ;;  %v21745_v58 = vld [vmem:[#allocation4 + $0x320] sm:$0xff] }
 0x116   : > { %2924 = vmatpush.bf16.msra.mxu0 %v21640_v46  ;;  %2572 = vmatmul.bf16.vlgmr.msrb.gmra.mxu1 %v15819_v60  ;;  %v21679_v46 = vld [vmem:[#allocation4 + $0x170] sm:$0xff] }
 0x117   : > { %2938 = vmatpush.bf16.msra.mxu1 %v21648_v47  ;;  %2586 = vmatmul.bf16.vlgmr.msrb.gmra.mxu2 %v15823_v59  ;;  %v23481_v47 = vpop.f32.mrf.mxu0  ;;  %v21753_v59 = vld [vmem:[#allocation4 + $0x360] sm:$0xff] }
 0x118   : > { %2952 = vmatpush.bf16.msra.mxu2 %v21656_v56  ;;  %2600 = vmatmul.bf16.vlgmr.msrb.gmra.mxu3 %v15827_v61  ;;  %v21669_v56 = vld [vmem:[#allocation4 + $0x120] sm:$0xff] }
 0x119   : > { %2966 = vmatpush.bf16.msra.mxu3 %v21664_v57  ;;  %v21677_v57 = vld [vmem:[#allocation4 + $0x160] sm:$0xff] }
 0x11a   : > { %2925 = vmatpush.bf16.msra.mxu0 %v21639_v62  ;;  %v23491_v62 = vpop.f32.mrf.mxu1 }
 0x11b   : > { %2939 = vmatpush.bf16.msra.mxu1 %v21647_v63  ;;  %v21668_v63 = vld [vmem:[#allocation4 + $0x118] sm:$0xff] }
 0x11c   : > { %2953 = vmatpush.bf16.msra.mxu2 %v21655_v0  ;;  %v23487_v60 = vpop.f32.mrf.mxu2  ;;  %v21676_v0 = vld [vmem:[#allocation4 + $0x158] sm:$0xff] }
 0x11d   : > { %2967 = vmatpush.bf16.msra.mxu3 %v21663_v1  ;;  %v21744_v1 = vld [vmem:[#allocation4 + $0x318] sm:$0xff] }
 0x11e   : > { %2926 = vmatpush.bf16.msra.mxu0 %v21638_v2  ;;  %v21752_v2 = vld [vmem:[#allocation4 + $0x358] sm:$0xff] }
 0x11f   : > { %2940 = vmatpush.bf16.msra.mxu1 %v21646_v3  ;;  %v23489_v61 = vpop.f32.mrf.mxu0  ;;  %v23493_v3 = vpop.f32.mrf.mxu3 }
 0x120   : > { %2954 = vmatpush.bf16.msra.mxu2 %v21654_v4  ;;  %v21667_v4 = vld [vmem:[#allocation4 + $0x110] sm:$0xff] }
 0x121   : > { %2968 = vmatpush.bf16.msra.mxu3 %v21662_v5  ;;  %v21675_v5 = vld [vmem:[#allocation4 + $0x150] sm:$0xff] }
 0x122   : > { %2927 = vmatpush.bf16.msra.mxu0 %v21637_v6  ;;  %v21743_v6 = vld [vmem:[#allocation4 + $0x310] sm:$0xff] }
 0x123   : > { %2941 = vmatpush.bf16.msra.mxu1 %v21645_v7  ;;  %v21751_v7 = vld [vmem:[#allocation4 + $0x350] sm:$0xff] }
 0x124   : > { %2955 = vmatpush.bf16.msra.mxu2 %v21653_v8  ;;  %v23495_v8 = vpop.f32.mrf.mxu2 }
 0x125   : > { %2969 = vmatpush.bf16.msra.mxu3 %v21661_v9  ;;  %v21666_v9 = vld [vmem:[#allocation4 + $0x108] sm:$0xff] }
 0x126   : > { %2928 = vmatpush.bf16.msra.mxu0 %v21636_v10  ;;  %v21674_v10 = vld [vmem:[#allocation4 + $0x148] sm:$0xff] }
 0x127   : > { %2942 = vmatpush.bf16.msra.mxu1 %v21644_v11  ;;  %v23497_v11 = vpop.f32.mrf.mxu0 }
 0x128   : > { %2956 = vmatpush.bf16.msra.mxu2 %v21652_v12  ;;  %v23499_v12 = vpop.f32.mrf.mxu1 }
 0x129   : > { %2970 = vmatpush.bf16.msra.mxu3 %v21660_v13  ;;  %v21742_v13 = vld [vmem:[#allocation4 + $0x308] sm:$0xff] }
 0x12a   : > { %2929 = vmatpush.bf16.msra.mxu0 %v21635_v14  ;;  %v21750_v14 = vld [vmem:[#allocation4 + $0x348] sm:$0xff] }
 0x12b   : > { %2943 = vmatpush.bf16.msra.mxu1 %v21643_v15  ;;  %v21665_v15 = vld [vmem:[#allocation4 + $0x100] sm:$0xff] }
 0x12c   : > { %2957 = vmatpush.bf16.msra.mxu2 %v21651_v16  ;;  %v21673_v16 = vld [vmem:[#allocation4 + $0x140] sm:$0xff] }
 0x12d   : > { %2971 = vmatpush.bf16.msra.mxu3 %v21659_v17  ;;  %v21741_v17 = vld [vmem:[#allocation4 + $0x300] sm:$0xff] }
 0x12e   : > { %2930 = vmatpush.bf16.msra.mxu0 %v21634_v18  ;;  %v21749_v18 = vld [vmem:[#allocation4 + $0x340] sm:$0xff] }
 0x12f   : > { %2944 = vmatpush.bf16.msra.mxu1 %v21642_v19  ;;  %v21764_v19 = vld [vmem:[#allocation4 + $0x3b8] sm:$0xff] }
 0x130   : > { %2958 = vmatpush.bf16.msra.mxu2 %v21650_v22  ;;  %v21772_v22 = vld [vmem:[#allocation4 + $0x3f8] sm:$0xff] }
 0x131   : > { %2972 = vmatpush.bf16.msra.mxu3 %v21658_v23  ;;  %v16038_v23 = vld [vmem:[%s23413_s28 + $0x18] sm:$0xf] }
 0x132   : > { %2931 = vmatpush.bf16.msra.mxu0 %v21633_v24  ;;  %v21632_v24 = vld [vmem:[%s23413_s28 + $0x3c] sm:$0xf0]  ;;  %v23511_v36 = vpop.f32.mrf.mxu0 }
 0x133   : > { %2945 = vmatpush.bf16.msra.mxu1 %v21641_v25  ;;  %v23503_v25 = vpop.f32.mrf.mxu3  ;;  %v16039_v34 = vor.u32 %v21632_v24, %v16038_v23  ;;  %v23513_v37 = vpop.f32.mrf.mxu1  ;;  %v21765_v24 = vld [vmem:[#allocation4 + $0x3c0] sm:$0xff] }
 0x134   : > { %2959 = vmatpush.bf16.msra.mxu2 %v21649_v26  ;;  %v21629_v26 = vld [vmem:[%s23413_s28 + $0x1c] sm:$0xf] }
 0x135   : > { %2973 = vmatpush.bf16.msra.mxu3 %v21657_v27  ;;  %2932 = vmatmul.bf16.vlgmr.msra.gmra.mxu0 %v16023_v40  ;;  %v16040_v27 = vld [vmem:[%s23413_s28 + $0x40] sm:$0xf0]  ;;  %v23515_v40 = vpop.f32.mrf.mxu2 }
 0x136   : > { %2980 = vmatpush.bf16.msrb.mxu0 %v21672_v28  ;;  %2946 = vmatmul.bf16.vlgmr.msra.gmra.mxu1 %v16027_v42  ;;  %v16244_v28 = vld [vmem:[%s23413_s28 + $0xa8] sm:$0xf]  ;;  %v16043_v35 = vor.u32 %v21629_v26, %v16040_v27  ;;  %v21771_v42 = vld [vmem:[#allocation4 + $0x3f0] sm:$0xff]  ;;  %v21781_v26 = vld [vmem:[#allocation4 + $0x440] sm:$0xff] }
 0x137   : > { %2994 = vmatpush.bf16.msrb.mxu1 %v21680_v29  ;;  %2960 = vmatmul.bf16.vlgmr.msra.gmra.mxu2 %v16031_v41  ;;  %v21738_v29 = vld [vmem:[%s23413_s28 + $0xcc] sm:$0xf0] }
 0x138   : > { %3428 = vmatpush.bf16.msrb.mxu2 %v21748_v38  ;;  %2974 = vmatmul.bf16.vlgmr.msra.gmra.mxu3 %v16035_v43  ;;  %v16245_v38 = vor.u32 %v21738_v29, %v16244_v28  ;;  %v21763_v41 = vld [vmem:[#allocation4 + $0x3b0] sm:$0xff]  ;;  %v21856_v28 = vld [vmem:[#allocation4 + $0x1b8] sm:$0xff] }
 0x139   : > { %3442 = vmatpush.bf16.msrb.mxu3 %v21756_v39  ;;  %v16249_v39 = vor.u32 %v21735_v30, %v16246_v31  ;;  %v21779_v43 = vld [vmem:[#allocation4 + $0x430] sm:$0xff]  ;;  %v21864_v29 = vld [vmem:[#allocation4 + $0x1f8] sm:$0xff] }
 0x13a   : > { %2981 = vmatpush.bf16.msrb.mxu0 %v21671_v45  ;;  %v21787_v45 = vld [vmem:[#allocation4 + $0x470] sm:$0xff]  ;;  %v16260_v30 = vld [vmem:[%s23413_s28 + $0xb8] sm:$0xf] }
 0x13b   : > { %2995 = vmatpush.bf16.msrb.mxu1 %v21679_v46  ;;  %v1019_v46 = vadd.f32 %v23469_v21, %v23467_v20  ;;  %v23526_v20 = vpop.f32.mrf.mxu1  ;;  %v21777_v21 = vld [vmem:[#allocation4 + $0x420] sm:$0xff] }
 0x13c   : > { %3429 = vmatpush.bf16.msrb.mxu2 %v21747_v49  ;;  %v21762_v49 = vld [vmem:[#allocation4 + $0x3a8] sm:$0xff]  ;;  %v21740_v31 = vld [vmem:[%s23413_s28 + $0xdc] sm:$0xf0] }
 0x13d   : > { %3443 = vmatpush.bf16.msrb.mxu3 %v21755_v50  ;;  %v21770_v50 = vld [vmem:[#allocation4 + $0x3e8] sm:$0xff] }
 0x13e   : > { %2982 = vmatpush.bf16.msrb.mxu0 %v21670_v51  ;;  %v23519_v51 = vpop.f32.mrf.mxu3 }
 0x13f   : > { %2996 = vmatpush.bf16.msrb.mxu1 %v21678_v52  ;;  %v21778_v52 = vld [vmem:[#allocation4 + $0x428] sm:$0xff] }
 0x140   : > { %3430 = vmatpush.bf16.msrb.mxu2 %v21746_v54  ;;  %v21786_v54 = vld [vmem:[#allocation4 + $0x468] sm:$0xff] }
 0x141   : > { %3444 = vmatpush.bf16.msrb.mxu3 %v21754_v55  ;;  %v1033_v55 = vadd.f32 %v23479_v44, %v1019_v46  ;;  %v21768_v44 = vld [vmem:[#allocation4 + $0x3d8] sm:$0xff] }
 0x142   : > { %2983 = vmatpush.bf16.msrb.mxu0 %v21669_v56  ;;  %v23522_v56 = vpop.f32.mrf.mxu2 }
 0x143   : > { %2997 = vmatpush.bf16.msrb.mxu1 %v21677_v57  ;;  %v21761_v57 = vld [vmem:[#allocation4 + $0x3a0] sm:$0xff] }
 0x144   : > { %3431 = vmatpush.bf16.msrb.mxu2 %v21745_v58  ;;  %v21769_v58 = vld [vmem:[#allocation4 + $0x3e0] sm:$0xff] }
 0x145   : > { %3445 = vmatpush.bf16.msrb.mxu3 %v21753_v59  ;;  %v23524_v59 = vpop.f32.mrf.mxu0 }
 0x146   : > { %2984 = vmatpush.bf16.msrb.mxu0 %v21668_v63  ;;  %v21785_v63 = vld [vmem:[#allocation4 + $0x460] sm:$0xff] }
 0x147   : > { %2998 = vmatpush.bf16.msrb.mxu1 %v21676_v0  ;;  %v1047_v0 = vadd.f32 %v23485_v53, %v1033_v55  ;;  %v21775_v53 = vld [vmem:[#allocation4 + $0x410] sm:$0xff] }
 0x148   : > { %3432 = vmatpush.bf16.msrb.mxu2 %v21744_v1  ;;  %v21760_v1 = vld [vmem:[#allocation4 + $0x398] sm:$0xff] }
 0x149   : > { %3446 = vmatpush.bf16.msrb.mxu3 %v21752_v2  ;;  %v23529_v2 = vpop.f32.mrf.mxu3 }
 0x14a   : > { %2985 = vmatpush.bf16.msrb.mxu0 %v21667_v4  ;;  %v21776_v4 = vld [vmem:[#allocation4 + $0x418] sm:$0xff] }
 0x14b   : > { %2999 = vmatpush.bf16.msrb.mxu1 %v21675_v5  ;;  %v21784_v5 = vld [vmem:[#allocation4 + $0x458] sm:$0xff] }
 0x14c   : > { %3433 = vmatpush.bf16.msrb.mxu2 %v21743_v6  ;;  %v1021_v6 = vadd.f32 %v23483_v48, %v23481_v47  ;;  %v21758_v47 = vld [vmem:[#allocation4 + $0x388] sm:$0xff] }
 0x14d   : > { %3447 = vmatpush.bf16.msrb.mxu3 %v21751_v7  ;;  %v1061_v7 = vadd.f32 %v23489_v61, %v1047_v0  ;;  %v21766_v48 = vld [vmem:[#allocation4 + $0x3c8] sm:$0xff]  ;;  %v21879_v0 = vld [vmem:[#allocation4 + $0x270] sm:$0xff] }
 0x14e   : > { %2986 = vmatpush.bf16.msrb.mxu0 %v21666_v9  ;;  %v21759_v9 = vld [vmem:[#allocation4 + $0x390] sm:$0xff]  ;;  %v21774_v61 = vld [vmem:[#allocation4 + $0x408] sm:$0xff] }
 0x14f   : > { %3000 = vmatpush.bf16.msrb.mxu1 %v21674_v10  ;;  %v21767_v10 = vld [vmem:[#allocation4 + $0x3d0] sm:$0xff] }
 0x150   : > { %3434 = vmatpush.bf16.msrb.mxu2 %v21742_v13  ;;  %v21783_v13 = vld [vmem:[#allocation4 + $0x450] sm:$0xff] }
 0x151   : > { %3448 = vmatpush.bf16.msrb.mxu3 %v21750_v14  ;;  %v23538_v23 = vpop.f32.mrf.mxu3 }
 0x152   : > { %2987 = vmatpush.bf16.msrb.mxu0 %v21665_v15  ;;  %v1912_v14 = vpop.f32.mrf.mxu0 }
 0x153   : > { %3001 = vmatpush.bf16.msrb.mxu1 %v21673_v16  ;;  %v1926_v15 = vpop.f32.mrf.mxu1  ;;  %v23534_v16 = vpop.f32.mrf.mxu2 }
 0x154   : > { %3435 = vmatpush.bf16.msrb.mxu2 %v21741_v17  ;;  %v1035_v17 = vadd.f32 %v23487_v60, %v1021_v6  ;;  %v21773_v60 = vld [vmem:[#allocation4 + $0x400] sm:$0xff]  ;;  %v21870_v6 = vld [vmem:[#allocation4 + $0x228] sm:$0xff] }
 0x155   : > { %3449 = vmatpush.bf16.msrb.mxu3 %v21749_v18  ;;  %2988 = vmatmul.bf16.vlgmr.msrb.gmra.mxu0 %v16039_v34  ;;  %v1075_v18 = vadd.f32 %v23491_v62, %v1061_v7  ;;  %v21737_v34 = vld [vmem:[%s23413_s28 + $0xbc] sm:$0xf] }
 0x156   : > { %3456 = vmatpush.bf16.msra.mxu0 %v21764_v19  ;;  %3002 = vmatmul.bf16.vlgmr.msrb.gmra.mxu1 %v16043_v35  ;;  %v21782_v19 = vld [vmem:[#allocation4 + $0x448] sm:$0xff]  ;;  %v1049_v62 = vadd.f32 %v23493_v3, %v1035_v17  ;;  %v21853_v17 = vld [vmem:[#allocation4 + $0x1a0] sm:$0xff] }
 0x157   : > { %3470 = vmatpush.bf16.msra.mxu1 %v21772_v22  ;;  %3436 = vmatmul.bf16.vlgmr.msrb.gmra.mxu2 %v16245_v38  ;;  %v21757_v22 = vld [vmem:[#allocation4 + $0x380] sm:$0xff]  ;;  %v1407_v27 = vadd.f32 %v23495_v8, %v1075_v18  ;;  %v1927_v38 = vadd.f32 %v1926_v15, %v1912_v14  ;;  %v16254_v8 = vld [vmem:[%s23413_s28 + $0xd8] sm:$0xf0] }
 0x158   : > { %3484 = vmatpush.bf16.msra.mxu2 %v21780_v32  ;;  %3450 = vmatmul.bf16.vlgmr.msrb.gmra.mxu3 %v16249_v39  ;;  %v16252_v32 = vld [vmem:[%s23413_s28 + $0xb0] sm:$0xf]  ;;  %v1063_v35 = vadd.f32 %v23497_v11, %v1049_v62  ;;  %v16262_v39 = vld [vmem:[%s23413_s28 + $0xe0] sm:$0xf0]  ;;  %v21878_v7 = vld [vmem:[#allocation4 + $0x268] sm:$0xff] }
 0x159   : > { %3498 = vmatpush.bf16.msra.mxu3 %v21788_v33  ;;  %v21739_v33 = vld [vmem:[%s23413_s28 + $0xd4] sm:$0xf0]  ;;  %v21861_v18 = vld [vmem:[#allocation4 + $0x1e0] sm:$0xff] }
 0x15a   : > { %3457 = vmatpush.bf16.msra.mxu0 %v21763_v41  ;;  %v21736_v41 = vld [vmem:[%s23413_s28 + $0xb4] sm:$0xf]  ;;  %v1077_v11 = vadd.f32 %v23499_v12, %v1063_v35  ;;  %v21868_v62 = vld [vmem:[#allocation4 + $0x218] sm:$0xff] }
 0x15b   : > { %3471 = vmatpush.bf16.msra.mxu1 %v21771_v42  ;;  %v1940_v3 = vpop.f32.mrf.mxu2  ;;  %v21872_v42 = vld [vmem:[#allocation4 + $0x238] sm:$0xff]  ;;  %v1928_v46 = vpop.f32.mrf.mxu1  ;;  %v16257_v55 = vor.u32 %v21736_v41, %v16254_v8  ;;  %v21867_v35 = vld [vmem:[#allocation4 + $0x210] sm:$0xff]  ;;  %v21850_v8 = vld [vmem:[#allocation4 + $0x188] sm:$0xff] }
 0x15c   : > { %3485 = vmatpush.bf16.msra.mxu2 %v21779_v43  ;;  %v21880_v43 = vld [vmem:[#allocation4 + $0x278] sm:$0xff] }
 0x15d   : > { %3499 = vmatpush.bf16.msra.mxu3 %v21787_v45  ;;  %v1914_v45 = vpop.f32.mrf.mxu0 }
 0x15e   : > { %3458 = vmatpush.bf16.msra.mxu0 %v21762_v49  ;;  %v1421_v49 = vadd.f32 %v23503_v25, %v1407_v27  ;;  %v21871_v25 = vld [vmem:[#allocation4 + $0x230] sm:$0xff]  ;;  %v21876_v27 = vld [vmem:[#allocation4 + $0x258] sm:$0xff] }
 0x15f   : > { %3472 = vmatpush.bf16.msra.mxu1 %v21770_v50  ;;  %v16261_v50 = vor.u32 %v21740_v31, %v16260_v30 }
 0x160   : > { %3486 = vmatpush.bf16.msra.mxu2 %v21778_v52  ;;  %v16253_v52 = vor.u32 %v21739_v33, %v16252_v32  ;;  %v21851_v33 = vld [vmem:[#allocation4 + $0x190] sm:$0xff] }
 0x161   : > { %3500 = vmatpush.bf16.msra.mxu3 %v21786_v54  ;;  %v16265_v54 = vor.u32 %v21737_v34, %v16262_v39  ;;  %v21859_v34 = vld [vmem:[#allocation4 + $0x1d0] sm:$0xff] }
 0x162   : > { %3459 = vmatpush.bf16.msra.mxu0 %v21761_v57  ;;  %v1435_v57 = vadd.f32 %v23511_v36, %v1421_v49  ;;  %v21857_v49 = vld [vmem:[#allocation4 + $0x1c0] sm:$0xff] }
 0x163   : > { %3473 = vmatpush.bf16.msra.mxu1 %v21769_v58  ;;  %v1941_v58 = vadd.f32 %v1940_v3, %v1927_v38  ;;  %v21875_v38 = vld [vmem:[#allocation4 + $0x250] sm:$0xff] }
 0x164   : > { %3487 = vmatpush.bf16.msra.mxu2 %v21777_v21  ;;  %v21855_v21 = vld [vmem:[#allocation4 + $0x1b0] sm:$0xff]  ;;  %v1449_v12 = vadd.f32 %v23513_v37, %v1435_v57 }
 0x165   : > { %3501 = vmatpush.bf16.msra.mxu3 %v21785_v63  ;;  %v21863_v63 = vld [vmem:[#allocation4 + $0x1f0] sm:$0xff] }
 0x166   : > { %3460 = vmatpush.bf16.msra.mxu0 %v21760_v1  ;;  %v1954_v1 = vpop.f32.mrf.mxu3  ;;  %v16466_v57 = vld [vmem:[%s23413_s28 + $0x60] sm:$0xf] }
 0x167   : > { %3474 = vmatpush.bf16.msra.mxu1 %v21768_v44  ;;  %v1409_v44 = vadd.f32 %v23515_v40, %v1077_v11  ;;  %v1955_v36 = vadd.f32 %v1954_v1, %v1941_v58  ;;  %v1929_v40 = vadd.f32 %v1928_v46, %v1914_v45  ;;  %v21874_v45 = vld [vmem:[#allocation4 + $0x248] sm:$0xff]  ;;  %v21896_v11 = vld [vmem:[#allocation4 + $0x2f8] sm:$0xff] }
 0x168   : > { %3488 = vmatpush.bf16.msra.mxu2 %v21776_v4  ;;  %v21854_v4 = vld [vmem:[#allocation4 + $0x1a8] sm:$0xff] }
 0x169   : > { %3502 = vmatpush.bf16.msra.mxu3 %v21784_v5  ;;  %v21862_v5 = vld [vmem:[#allocation4 + $0x1e8] sm:$0xff] }
 0x16a   : > { %3461 = vmatpush.bf16.msra.mxu0 %v21759_v9  ;;  %v1423_v9 = vadd.f32 %v23519_v51, %v1409_v44  ;;  %v21846_v58 = vld [vmem:[%s23413_s28 + $0x84] sm:$0xf0]  ;;  %v16468_v1 = vld [vmem:[%s23413_s28 + $0x88] sm:$0xf0] }
 0x16b   : > { %3475 = vmatpush.bf16.msra.mxu1 %v21767_v10  ;;  %v1463_v10 = vadd.f32 %v23522_v56, %v1449_v12  ;;  %v23563_v56 = vld [vmem:[%s24634_s2] ss:$0 sm:$0xff]  ;;  %v21844_v44 = vld [vmem:[%s23413_s28 + $0x6c] sm:$0xf]  ;;  %v16476_v12 = vld [vmem:[%s23413_s28 + $0x90] sm:$0xf0] }
 0x16c   : > { %3489 = vmatpush.bf16.msra.mxu2 %v21775_v53  ;;  %v1942_v53 = vpop.f32.mrf.mxu2  ;;  %v1437_v15 = vadd.f32 %v23524_v59, %v1423_v9  ;;  %v16479_v9 = vor.u32 %v21844_v44, %v16476_v12  ;;  %v21815_v12 = vld [vmem:[#allocation4 + $0xa0] sm:$0xff] }
 0x16d   : > { %3503 = vmatpush.bf16.msra.mxu3 %v21783_v13  ;;  %v1943_v51 = vadd.f32 %v1942_v53, %v1929_v40  ;;  %v21895_v40 = vld [vmem:[#allocation4 + $0x2f0] sm:$0xff] }
 0x16e   : > { %3462 = vmatpush.bf16.msra.mxu0 %v21758_v47  ;;  %v21869_v47 = vld [vmem:[#allocation4 + $0x220] sm:$0xff]  ;;  %v1451_v59 = vadd.f32 %v23526_v20, %v1437_v15  ;;  %v21801_v53 = vld [vmem:[#allocation4 + $0x30] sm:$0xff]  ;;  %v21894_v15 = vld [vmem:[#allocation4 + $0x2e8] sm:$0xff] }
 0x16f   : > { %3476 = vmatpush.bf16.msra.mxu1 %v21766_v48  ;;  %v21877_v48 = vld [vmem:[#allocation4 + $0x260] sm:$0xff] }
 0x170   : > { %3490 = vmatpush.bf16.msra.mxu2 %v21774_v61  ;;  %v1477_v61 = vadd.f32 %v23529_v2, %v1463_v10  ;;  %v1465_v2 = vadd.f32 %v23534_v16, %v1451_v59  ;;  %v21887_v10 = vld [vmem:[#allocation4 + $0x2b0] sm:$0xff]  ;;  %v21806_v59 = vld [vmem:[#allocation4 + $0x58] sm:$0xff] }
 0x171   : > { %3504 = vmatpush.bf16.msra.mxu3 %v21782_v19 }
 0x172   : > { %3463 = vmatpush.bf16.msra.mxu0 %v21757_v22  ;;  %v1968_v13 = vpop.f32.mrf.mxu0  ;;  %v1956_v22 = vpop.f32.mrf.mxu3  ;;  %v1479_v3 = vadd.f32 %v23538_v23, %v1465_v2  ;;  %v21849_v23 = vld [vmem:[#allocation4 + $0x180] sm:$0xff]  ;;  %v21890_v2 = vld [vmem:[#allocation4 + $0x2c8] sm:$0xff] }
 0x173   : > { %3477 = vmatpush.bf16.msra.mxu1 %v21765_v24  ;;  %v1982_v14 = vpop.f32.mrf.mxu1  ;;  %v1969_v37 = vadd.f32 %v1968_v13, %v1955_v36  ;;  %v21802_v36 = vld [vmem:[#allocation4 + $0x38] sm:$0xff]  ;;  %v21809_v13 = vld [vmem:[#allocation4 + $0x70] sm:$0xff] }
 0x174   : > { %3491 = vmatpush.bf16.msra.mxu2 %v21773_v60  ;;  %v21852_v60 = vld [vmem:[#allocation4 + $0x198] sm:$0xff] }
 0x175   : > { %3505 = vmatpush.bf16.msra.mxu3 %v21781_v26  ;;  %3464 = vmatmul.bf16.vlgmr.msra.gmra.mxu0 %v16253_v52  ;;  %v1983_v19 = vadd.f32 %v1982_v14, %v1969_v37  ;;  %v21860_v26 = vld [vmem:[#allocation4 + $0x1d8] sm:$0xff]  ;;  %v21873_v52 = vld [vmem:[#allocation4 + $0x240] sm:$0xff]  ;;  %v21886_v14 = vld [vmem:[#allocation4 + $0x2a8] sm:$0xff] }
 0x176   : > { %4044 = vmatpush.bf16.msrb.mxu0 %v21856_v28  ;;  %3478 = vmatmul.bf16.vlgmr.msra.gmra.mxu1 %v16257_v55  ;;  %v1957_v28 = vadd.f32 %v1956_v22, %v1943_v51  ;;  %v21888_v55 = vld [vmem:[#allocation4 + $0x2b8] sm:$0xff]  ;;  %v21800_v37 = vld [vmem:[#allocation4 + $0x28] sm:$0xff] }
 0x177   : > { %4058 = vmatpush.bf16.msrb.mxu1 %v21864_v29  ;;  %3492 = vmatmul.bf16.vlgmr.msra.gmra.mxu2 %v16261_v50  ;;  %v1987_v24 = vadd.f32 %v1983_v19, %v1477_v61  ;;  %v21865_v50 = vld [vmem:[#allocation4 + $0x200] sm:$0xff]  ;;  %v21884_v51 = vld [vmem:[#allocation4 + $0x298] sm:$0xff] }
 0x178   : > { %4072 = vmatpush.bf16.msrb.mxu2 %v21872_v42  ;;  %3506 = vmatmul.bf16.vlgmr.msra.gmra.mxu3 %v16265_v54  ;;  %v21858_v42 = vld [vmem:[#allocation4 + $0x1c8] sm:$0xff]  ;;  %v21807_v61 = vld [vmem:[#allocation4 + $0x60] sm:$0xff]  ;;  %v21892_v19 = vld [vmem:[#allocation4 + $0x2d8] sm:$0xff] }
 0x179   : > { %4086 = vmatpush.bf16.msrb.mxu3 %v21880_v43  ;;  %v1992_v29 = vadd.f32 %v23563_v56, %v1987_v24  ;;  %v21866_v43 = vld [vmem:[#allocation4 + $0x208] sm:$0xff]  ;;  %v21798_v22 = vld [vmem:[#allocation4 + $0x18] sm:$0xff]  ;;  %v21883_v24 = vld [vmem:[#allocation4 + $0x290] sm:$0xff] }
 0x17a   : > { %4045 = vmatpush.bf16.msrb.mxu0 %v21855_v21  ;;  %v1970_v30 = vpop.f32.mrf.mxu0  ;;  %v16474_v21 = vld [vmem:[%s23413_s28 + $0x68] sm:$0xf] }
 0x17b   : > { %4059 = vmatpush.bf16.msrb.mxu1 %v21863_v63  ;;  %v1984_v31 = vpop.f32.mrf.mxu1  ;;  %v1994_v32 = vmax.f32 %v1992_v29, 0.0  ;;  %v1971_v20 = vadd.f32 %v1970_v30, %v1957_v28  ;;  %v21847_v63 = vld [vmem:[%s23413_s28 + $0x8c] sm:$0xf0]  ;;  %v21796_v28 = vld [vmem:[#allocation4 + $0x8] sm:$0xff] }
 0x17c   : > { %4073 = vmatpush.bf16.msrb.mxu2 %v21871_v25  ;;  %v21843_v25 = vld [vmem:[%s23413_s28 + $0x64] sm:$0xf]  ;;  %v21804_v29 = vld [vmem:[#allocation4 + $0x48] sm:$0xff] }
 0x17d   : > { %4087 = vmatpush.bf16.msrb.mxu3 %v21879_v0  ;;  %v1996_v39 = vpack.c.bf16 %v1994_v32, %v1994_v32  ;;  %v1985_v41 = vadd.f32 %v1984_v31, %v1971_v20  ;;  %v21881_v30 = vld [vmem:[#allocation4 + $0x280] sm:$0xff] }
 0x17e   : > { %4046 = vmatpush.bf16.msrb.mxu0 %v21854_v4  ;;  %v21810_v4 = vld [vmem:[#allocation4 + $0x78] sm:$0xff]  ;;  %v21889_v31 = vld [vmem:[#allocation4 + $0x2c0] sm:$0xff] }
 0x17f   : > { %4060 = vmatpush.bf16.msrb.mxu1 %v21862_v5  ;;  %1998 = vst [vmem:[#allocation2] sm:$0xf] %v1996_v39  ;;  %v1988_v16 = vadd.f32 %v1985_v41, %v1479_v3  ;;  %v16467_v5 = vor.u32 %v21846_v58, %v16466_v57  ;;  %v21795_v32 = vld [vmem:[#allocation4] sm:$0xff]  ;;  %v23580_v3 = vpop.f32.mrf.mxu2  ;;  %v21792_v41 = vld [vmem:[%s23413_s28 + $0x34] sm:$0xf0]  ;;  %v21833_v57 = vld [vmem:[#allocation4 + $0x130] sm:$0xff] }
 0x180   : > { %4074 = vmatpush.bf16.msrb.mxu2 %v21870_v6  ;;  %v16475_v6 = vor.u32 %v21847_v63, %v16474_v21  ;;  %v21803_v20 = vld [vmem:[#allocation4 + $0x40] sm:$0xff]  ;;  %v21841_v58 = vld [vmem:[#allocation4 + $0x170] sm:$0xff]  ;;  %v21816_v21 = vld [vmem:[#allocation4 + $0xa8] sm:$0xff] }
 0x181   : > { %4088 = vmatpush.bf16.msrb.mxu3 %v21878_v7  ;;  %v1993_v46 = vadd.f32 %v23563_v56, %v1988_v16  ;;  %v16471_v7 = vor.u32 %v21843_v25, %v16468_v1  ;;  %v16682_v39 = vld [vmem:[%s23413_s28 + $0x10] sm:$0xf]  ;;  %v21845_v16 = vld [vmem:[%s23413_s28 + $0x74] sm:$0xf]  ;;  %v21824_v63 = vld [vmem:[#allocation4 + $0xe8] sm:$0xff] }
 0x182   : > { %4047 = vmatpush.bf16.msrb.mxu0 %v21853_v17  ;;  %v21808_v17 = vld [vmem:[#allocation4 + $0x68] sm:$0xff] }
 0x183   : > { %4061 = vmatpush.bf16.msrb.mxu1 %v21861_v18  ;;  %v1995_v54 = vmax.f32 %v1993_v46, 0.0  ;;  %v21885_v18 = vld [vmem:[#allocation4 + $0x2a0] sm:$0xff]  ;;  %v21834_v46 = vld [vmem:[#allocation4 + $0x138] sm:$0xff]  ;;  %v21840_v1 = vld [vmem:[#allocation4 + $0x168] sm:$0xff] }
 0x184   : > { %4075 = vmatpush.bf16.msrb.mxu2 %v21869_v47  ;;  %v21893_v47 = vld [vmem:[#allocation4 + $0x2e0] sm:$0xff] }
 0x185   : > { %4089 = vmatpush.bf16.msrb.mxu3 %v21877_v48  ;;  %v1997_v0 = vpack.c.bf16 %v1995_v54, %v1995_v54  ;;  %v21799_v48 = vld [vmem:[#allocation4 + $0x20] sm:$0xff] }
 0x186   : > { %4048 = vmatpush.bf16.msrb.mxu0 %v21852_v60  ;;  %v21891_v60 = vld [vmem:[#allocation4 + $0x2d0] sm:$0xff] }
 0x187   : > { %4062 = vmatpush.bf16.msrb.mxu1 %v21860_v26  ;;  %1999 = vst [vmem:[#allocation2 + $0x24] sm:$0xf] %v1997_v0  ;;  %v21797_v26 = vld [vmem:[#allocation4 + $0x10] sm:$0xff]  ;;  %v23590_v25 = vpop.f32.mrf.mxu2  ;;  %v21832_v0 = vld [vmem:[#allocation4 + $0x128] sm:$0xff] }
 0x188   : > { %4076 = vmatpush.bf16.msrb.mxu2 %v21868_v62  ;;  %v21805_v62 = vld [vmem:[#allocation4 + $0x50] sm:$0xff] }
 0x189   : > { %4090 = vmatpush.bf16.msrb.mxu3 %v21876_v27  ;;  %v21882_v27 = vld [vmem:[#allocation4 + $0x288] sm:$0xff] }
 0x18a   : > { %4049 = vmatpush.bf16.msrb.mxu0 %v21851_v33  ;;  %v21818_v33 = vld [vmem:[#allocation4 + $0xb8] sm:$0xff] }
 0x18b   : > { %4063 = vmatpush.bf16.msrb.mxu1 %v21859_v34  ;;  %v21826_v34 = vld [vmem:[#allocation4 + $0xf8] sm:$0xff] }
 0x18c   : > { %4077 = vmatpush.bf16.msrb.mxu2 %v21867_v35  ;;  %v16482_v35 = vld [vmem:[%s23413_s28 + $0x70] sm:$0xf] }
 0x18d   : > { %4091 = vmatpush.bf16.msrb.mxu3 %v21875_v38  ;;  %v21848_v38 = vld [vmem:[%s23413_s28 + $0x94] sm:$0xf0] }
 0x18e   : > { %4050 = vmatpush.bf16.msrb.mxu0 %v21850_v8  ;;  %v23585_v8 = vpop.f32.mrf.mxu3 }
 0x18f   : > { %4064 = vmatpush.bf16.msrb.mxu1 %v21858_v42  ;;  %v16484_v42 = vld [vmem:[%s23413_s28 + $0x98] sm:$0xf0] }
 0x190   : > { %4078 = vmatpush.bf16.msrb.mxu2 %v21866_v43  ;;  %v21789_v43 = vld [vmem:[%s23413_s28 + $0x14] sm:$0xf] }
 0x191   : > { %4092 = vmatpush.bf16.msrb.mxu3 %v21874_v45  ;;  %v16684_v45 = vld [vmem:[%s23413_s28 + $0x38] sm:$0xf0] }
 0x192   : > { %4051 = vmatpush.bf16.msrb.mxu0 %v21849_v23  ;;  %v21842_v23 = vld [vmem:[#allocation4 + $0x178] sm:$0xff]  ;;  %v16687_v54 = vor.u32 %v21789_v43, %v16684_v45  ;;  %v21909_v45 = vld [vmem:[#allocation4 + $0x330] sm:$0xff] }
 0x193   : > { %4065 = vmatpush.bf16.msrb.mxu1 %v21857_v49  ;;  %v16483_v49 = vor.u32 %v21848_v38, %v16482_v35  ;;  %v16700_v35 = vld [vmem:[%s23413_s28 + $0x48] sm:$0xf0] }
 0x194   : > { %4079 = vmatpush.bf16.msrb.mxu2 %v21865_v50  ;;  %v16683_v50 = vor.u32 %v21792_v41, %v16682_v39  ;;  %v21926_v38 = vld [vmem:[#allocation4 + $0x3b8] sm:$0xff] }
 0x195   : > { %4093 = vmatpush.bf16.msrb.mxu3 %v21873_v52  ;;  %4052 = vmatmul.bf16.vlgmr.msrb.gmra.mxu0 %v16467_v5  ;;  %v16487_v52 = vor.u32 %v21845_v16, %v16484_v42  ;;  %v21839_v5 = vld [vmem:[#allocation4 + $0x160] sm:$0xff]  ;;  %v21934_v39 = vld [vmem:[#allocation4 + $0x3f8] sm:$0xff] }
 0x196   : > { %4100 = vmatpush.bf16.msra.mxu0 %v21888_v55  ;;  %4066 = vmatmul.bf16.vlgmr.msrb.gmra.mxu1 %v16471_v7  ;;  %v21817_v55 = vld [vmem:[#allocation4 + $0xb0] sm:$0xff]  ;;  %v23592_v44 = vpop.f32.mrf.mxu3  ;;  %v23596_v7 = vpop.f32.mrf.mxu1 }
 0x197   : > { %4114 = vmatpush.bf16.msra.mxu1 %v21896_v11  ;;  %4080 = vmatmul.bf16.vlgmr.msrb.gmra.mxu2 %v16475_v6  ;;  %v21825_v11 = vld [vmem:[#allocation4 + $0xf0] sm:$0xff]  ;;  %v23594_v6 = vpop.f32.mrf.mxu0 }
 0x198   : > { %4446 = vmatpush.bf16.msra.mxu2 %v21802_v36  ;;  %4094 = vmatmul.bf16.vlgmr.msrb.gmra.mxu3 %v16479_v9  ;;  %v21823_v36 = vld [vmem:[#allocation4 + $0xe0] sm:$0xff]  ;;  %v21814_v9 = vld [vmem:[#allocation4 + $0x98] sm:$0xff] }
 0x199   : > { %4460 = vmatpush.bf16.msra.mxu3 %v21810_v4  ;;  %v21831_v4 = vld [vmem:[#allocation4 + $0x120] sm:$0xff] }
 0x19a   : > { %4101 = vmatpush.bf16.msra.mxu0 %v21887_v10  ;;  %v21822_v10 = vld [vmem:[#allocation4 + $0xd8] sm:$0xff] }
 0x19b   : > { %4115 = vmatpush.bf16.msra.mxu1 %v21895_v40  ;;  %v21830_v40 = vld [vmem:[#allocation4 + $0x118] sm:$0xff] }
 0x19c   : > { %4447 = vmatpush.bf16.msra.mxu2 %v21801_v53  ;;  %v21838_v53 = vld [vmem:[#allocation4 + $0x158] sm:$0xff] }
 0x19d   : > { %4461 = vmatpush.bf16.msra.mxu3 %v21809_v13  ;;  %v23598_v13 = vpop.f32.mrf.mxu2 }
 0x19e   : > { %4102 = vmatpush.bf16.msra.mxu0 %v21886_v14  ;;  %v23600_v14 = vpop.f32.mrf.mxu3 }
 0x19f   : > { %4116 = vmatpush.bf16.msra.mxu1 %v21894_v15  ;;  %v21813_v15 = vld [vmem:[#allocation4 + $0x90] sm:$0xff] }
 0x1a0   : > { %4448 = vmatpush.bf16.msra.mxu2 %v21800_v37  ;;  %v21821_v37 = vld [vmem:[#allocation4 + $0xd0] sm:$0xff] }
 0x1a1   : > { %4462 = vmatpush.bf16.msra.mxu3 %v21808_v17  ;;  %v21829_v17 = vld [vmem:[#allocation4 + $0x110] sm:$0xff] }
 0x1a2   : > { %4103 = vmatpush.bf16.msra.mxu0 %v21885_v18  ;;  %v21837_v18 = vld [vmem:[#allocation4 + $0x150] sm:$0xff] }
 0x1a3   : > { %4117 = vmatpush.bf16.msra.mxu1 %v21893_v47  ;;  %v21812_v47 = vld [vmem:[#allocation4 + $0x88] sm:$0xff] }
 0x1a4   : > { %4449 = vmatpush.bf16.msra.mxu2 %v21799_v48  ;;  %v21820_v48 = vld [vmem:[#allocation4 + $0xc8] sm:$0xff] }
 0x1a5   : > { %4463 = vmatpush.bf16.msra.mxu3 %v21807_v61  ;;  %v23602_v61 = vpop.f32.mrf.mxu0 }
 0x1a6   : > { %4104 = vmatpush.bf16.msra.mxu0 %v21884_v51  ;;  %v21828_v51 = vld [vmem:[#allocation4 + $0x108] sm:$0xff] }
 0x1a7   : > { %4118 = vmatpush.bf16.msra.mxu1 %v21892_v19  ;;  %v21836_v19 = vld [vmem:[#allocation4 + $0x148] sm:$0xff] }
 0x1a8   : > { %4450 = vmatpush.bf16.msra.mxu2 %v21798_v22  ;;  %v23604_v22 = vpop.f32.mrf.mxu1 }
 0x1a9   : > { %4464 = vmatpush.bf16.msra.mxu3 %v21806_v59  ;;  %v21811_v59 = vld [vmem:[#allocation4 + $0x80] sm:$0xff] }
 0x1aa   : > { %4105 = vmatpush.bf16.msra.mxu0 %v21883_v24  ;;  %v21819_v24 = vld [vmem:[#allocation4 + $0xc0] sm:$0xff] }
 0x1ab   : > { %4119 = vmatpush.bf16.msra.mxu1 %v21891_v60  ;;  %v21827_v60 = vld [vmem:[#allocation4 + $0x100] sm:$0xff] }
 0x1ac   : > { %4451 = vmatpush.bf16.msra.mxu2 %v21797_v26  ;;  %v21835_v26 = vld [vmem:[#allocation4 + $0x140] sm:$0xff] }
 0x1ad   : > { %4465 = vmatpush.bf16.msra.mxu3 %v21805_v62  ;;  %v21910_v62 = vld [vmem:[#allocation4 + $0x338] sm:$0xff] }
 0x1ae   : > { %4106 = vmatpush.bf16.msra.mxu0 %v21882_v27  ;;  %v21918_v27 = vld [vmem:[#allocation4 + $0x378] sm:$0xff] }
 0x1af   : > { %4120 = vmatpush.bf16.msra.mxu1 %v21890_v2  ;;  %v16690_v2 = vld [vmem:[%s23413_s28 + $0x18] sm:$0xf] }
 0x1b0   : > { %4452 = vmatpush.bf16.msra.mxu2 %v21796_v28  ;;  %v21793_v28 = vld [vmem:[%s23413_s28 + $0x3c] sm:$0xf0] }
 0x1b1   : > { %4466 = vmatpush.bf16.msra.mxu3 %v21804_v29  ;;  %v23608_v29 = vpop.f32.mrf.mxu2  ;;  %v16691_v41 = vor.u32 %v21793_v28, %v16690_v2 }
 0x1b2   : > { %4107 = vmatpush.bf16.msra.mxu0 %v21881_v30  ;;  %v16698_v30 = vld [vmem:[%s23413_s28 + $0x20] sm:$0xf] }
 0x1b3   : > { %4121 = vmatpush.bf16.msra.mxu1 %v21889_v31  ;;  %v21794_v31 = vld [vmem:[%s23413_s28 + $0x44] sm:$0xf0] }
 0x1b4   : > { %4453 = vmatpush.bf16.msra.mxu2 %v21795_v32  ;;  %v21790_v32 = vld [vmem:[%s23413_s28 + $0x1c] sm:$0xf]  ;;  %v16699_v16 = vor.u32 %v21794_v31, %v16698_v30 }
 0x1b5   : > { %4467 = vmatpush.bf16.msra.mxu3 %v21803_v20  ;;  %4108 = vmatmul.bf16.vlgmr.msra.gmra.mxu0 %v16483_v49  ;;  %v23613_v20 = vpop.f32.mrf.mxu3  ;;  %v21925_v49 = vld [vmem:[#allocation4 + $0x3b0] sm:$0xff]  ;;  %v21942_v30 = vld [vmem:[#allocation4 + $0x438] sm:$0xff] }
 0x1b6   : > { %4474 = vmatpush.bf16.msrb.mxu0 %v21818_v33  ;;  %4122 = vmatmul.bf16.vlgmr.msra.gmra.mxu1 %v16487_v52  ;;  %v16692_v33 = vld [vmem:[%s23413_s28 + $0x40] sm:$0xf0]  ;;  %v23620_v52 = vpop.f32.mrf.mxu1  ;;  %v21950_v31 = vld [vmem:[#allocation4 + $0x478] sm:$0xff] }
 0x1b7   : > { %4488 = vmatpush.bf16.msrb.mxu1 %v21826_v34  ;;  %4454 = vmatmul.bf16.vlgmr.msra.gmra.mxu2 %v16683_v50  ;;  %v21791_v34 = vld [vmem:[%s23413_s28 + $0x24] sm:$0xf]  ;;  %v16695_v42 = vor.u32 %v21790_v32, %v16692_v33  ;;  %v16904_v33 = vld [vmem:[%s23413_s28 + $0xb0] sm:$0xf] }
 0x1b8   : > { %4502 = vmatpush.bf16.msrb.mxu2 %v21834_v46  ;;  %4468 = vmatmul.bf16.vlgmr.msra.gmra.mxu3 %v16687_v54  ;;  %v16703_v43 = vor.u32 %v21791_v34, %v16700_v35  ;;  %v21917_v46 = vld [vmem:[#allocation4 + $0x370] sm:$0xff]  ;;  %v21908_v54 = vld [vmem:[#allocation4 + $0x328] sm:$0xff] }
 0x1b9   : > { %4516 = vmatpush.bf16.msrb.mxu3 %v21842_v23  ;;  %v23618_v23 = vpop.f32.mrf.mxu0  ;;  %v21933_v50 = vld [vmem:[#allocation4 + $0x3f0] sm:$0xff]  ;;  %v21900_v34 = vld [vmem:[%s23413_s28 + $0xd4] sm:$0xf0]  ;;  %v16906_v35 = vld [vmem:[%s23413_s28 + $0xd8] sm:$0xf0] }
 0x1ba   : > { %4475 = vmatpush.bf16.msrb.mxu0 %v21817_v55  ;;  %v21916_v55 = vld [vmem:[#allocation4 + $0x368] sm:$0xff] }
 0x1bb   : > { %4489 = vmatpush.bf16.msrb.mxu1 %v21825_v11  ;;  %v23622_v11 = vpop.f32.mrf.mxu2 }
 0x1bc   : > { %4503 = vmatpush.bf16.msrb.mxu2 %v21833_v57  ;;  %v21924_v57 = vld [vmem:[#allocation4 + $0x3a8] sm:$0xff] }
 0x1bd   : > { %4517 = vmatpush.bf16.msrb.mxu3 %v21841_v58  ;;  %v21932_v58 = vld [vmem:[#allocation4 + $0x3e8] sm:$0xff] }
 0x1be   : > { %4476 = vmatpush.bf16.msrb.mxu0 %v21816_v21  ;;  %v23624_v21 = vpop.f32.mrf.mxu3 }
 0x1bf   : > { %4490 = vmatpush.bf16.msrb.mxu1 %v21824_v63  ;;  %v2546_v63 = vadd.f32 %v23585_v8, %v23580_v3  ;;  %v21922_v3 = vld [vmem:[#allocation4 + $0x398] sm:$0xff] }
 0x1c0   : > { %4504 = vmatpush.bf16.msrb.mxu2 %v21832_v0  ;;  %v21907_v0 = vld [vmem:[#allocation4 + $0x320] sm:$0xff]  ;;  %v21930_v8 = vld [vmem:[#allocation4 + $0x3d8] sm:$0xff] }
 0x1c1   : > { %4518 = vmatpush.bf16.msrb.mxu3 %v21840_v1  ;;  %v21915_v1 = vld [vmem:[#allocation4 + $0x360] sm:$0xff] }
 0x1c2   : > { %4477 = vmatpush.bf16.msrb.mxu0 %v21815_v12  ;;  %v21923_v12 = vld [vmem:[#allocation4 + $0x3a0] sm:$0xff] }
 0x1c3   : > { %4491 = vmatpush.bf16.msrb.mxu1 %v21823_v36  ;;  %v21931_v36 = vld [vmem:[#allocation4 + $0x3e0] sm:$0xff] }
 0x1c4   : > { %4505 = vmatpush.bf16.msrb.mxu2 %v21831_v4  ;;  %v23628_v4 = vpop.f32.mrf.mxu0 }
 0x1c5   : > { %4519 = vmatpush.bf16.msrb.mxu3 %v21839_v5  ;;  %v2560_v5 = vadd.f32 %v23594_v6, %v2546_v63  ;;  %v21913_v6 = vld [vmem:[#allocation4 + $0x350] sm:$0xff] }
 0x1c6   : > { %4478 = vmatpush.bf16.msrb.mxu0 %v21814_v9  ;;  %v23631_v9 = vpop.f32.mrf.mxu1  ;;  %v22017_v63 = vld [vmem:[#allocation4 + $0x1b0] sm:$0xff] }
 0x1c7   : > { %4492 = vmatpush.bf16.msrb.mxu1 %v21822_v10  ;;  %v21906_v10 = vld [vmem:[#allocation4 + $0x318] sm:$0xff] }
 0x1c8   : > { %4506 = vmatpush.bf16.msrb.mxu2 %v21830_v40  ;;  %v21914_v40 = vld [vmem:[#allocation4 + $0x358] sm:$0xff] }
 0x1c9   : > { %4520 = vmatpush.bf16.msrb.mxu3 %v21838_v53  ;;  %v23633_v53 = vpop.f32.mrf.mxu2 }
 0x1ca   : > { %4479 = vmatpush.bf16.msrb.mxu0 %v21813_v15  ;;  %v2574_v15 = vadd.f32 %v23596_v7, %v2560_v5  ;;  %v21904_v7 = vld [vmem:[#allocation4 + $0x308] sm:$0xff] }
 0x1cb   : > { %4493 = vmatpush.bf16.msrb.mxu1 %v21821_v37  ;;  %v23636_v37 = vpop.f32.mrf.mxu3  ;;  %v21940_v5 = vld [vmem:[#allocation4 + $0x428] sm:$0xff] }
 0x1cc   : > { %4507 = vmatpush.bf16.msrb.mxu2 %v21829_v17  ;;  %v21905_v17 = vld [vmem:[#allocation4 + $0x310] sm:$0xff] }
 0x1cd   : > { %4521 = vmatpush.bf16.msrb.mxu3 %v21837_v18  ;;  %v21921_v18 = vld [vmem:[#allocation4 + $0x390] sm:$0xff] }
 0x1ce   : > { %4480 = vmatpush.bf16.msrb.mxu0 %v21812_v47  ;;  %v21929_v47 = vld [vmem:[#allocation4 + $0x3d0] sm:$0xff] }
 0x1cf   : > { %4494 = vmatpush.bf16.msrb.mxu1 %v21820_v48  ;;  %v2548_v48 = vadd.f32 %v23592_v44, %v23590_v25  ;;  %v21911_v44 = vld [vmem:[#allocation4 + $0x340] sm:$0xff] }
 0x1d0   : > { %4508 = vmatpush.bf16.msrb.mxu2 %v21828_v51 }
 0x1d1   : > { %4522 = vmatpush.bf16.msrb.mxu3 %v21836_v19  ;;  %v2588_v19 = vadd.f32 %v23598_v13, %v2574_v15  ;;  %v2562_v25 = vadd.f32 %v23602_v61, %v2548_v48  ;;  %v21919_v13 = vld [vmem:[#allocation4 + $0x380] sm:$0xff] }
 0x1d2   : > { %4481 = vmatpush.bf16.msrb.mxu0 %v21811_v59  ;;  %v23640_v51 = vpop.f32.mrf.mxu0  ;;  %v21897_v61 = vld [vmem:[%s23413_s28 + $0xb4] sm:$0xf] }
 0x1d3   : > { %4495 = vmatpush.bf16.msrb.mxu1 %v21819_v24  ;;  %v23643_v59 = vpop.f32.mrf.mxu1  ;;  %v21912_v24 = vld [vmem:[#allocation4 + $0x348] sm:$0xff]  ;;  %v2602_v28 = vadd.f32 %v23600_v14, %v2588_v19  ;;  %v22015_v19 = vld [vmem:[#allocation4 + $0x1a0] sm:$0xff] }
 0x1d4   : > { %4509 = vmatpush.bf16.msrb.mxu2 %v21827_v60  ;;  %v21920_v60 = vld [vmem:[#allocation4 + $0x388] sm:$0xff] }
 0x1d5   : > { %4523 = vmatpush.bf16.msrb.mxu3 %v21835_v26  ;;  %4482 = vmatmul.bf16.vlgmr.msrb.gmra.mxu0 %v16691_v41  ;;  %v21928_v26 = vld [vmem:[#allocation4 + $0x3c8] sm:$0xff]  ;;  %v2934_v14 = vadd.f32 %v23618_v23, %v2602_v28  ;;  %v22025_v23 = vld [vmem:[#allocation4 + $0x1f0] sm:$0xff] }
 0x1d6   : > { %4950 = vmatpush.bf16.msra.mxu0 %v21910_v62  ;;  %4496 = vmatmul.bf16.vlgmr.msrb.gmra.mxu1 %v16695_v42  ;;  %v21903_v62 = vld [vmem:[#allocation4 + $0x300] sm:$0xff]  ;;  %v21898_v41 = vld [vmem:[%s23413_s28 + $0xbc] sm:$0xf]  ;;  %v2576_v42 = vadd.f32 %v23604_v22, %v2562_v25  ;;  %v21949_v22 = vld [vmem:[#allocation4 + $0x470] sm:$0xff] }
 0x1d7   : > { %4964 = vmatpush.bf16.msra.mxu1 %v21918_v27  ;;  %4510 = vmatmul.bf16.vlgmr.msrb.gmra.mxu2 %v16699_v16  ;;  %v21927_v27 = vld [vmem:[#allocation4 + $0x3c0] sm:$0xff]  ;;  %v22014_v25 = vld [vmem:[#allocation4 + $0x198] sm:$0xff] }
 0x1d8   : > { %4978 = vmatpush.bf16.msra.mxu2 %v21926_v38  ;;  %4524 = vmatmul.bf16.vlgmr.msrb.gmra.mxu3 %v16703_v43  ;;  %v16912_v38 = vld [vmem:[%s23413_s28 + $0xb8] sm:$0xf]  ;;  %v16914_v16 = vld [vmem:[%s23413_s28 + $0xe0] sm:$0xf0] }
 0x1d9   : > { %4992 = vmatpush.bf16.msra.mxu3 %v21934_v39  ;;  %v21901_v39 = vld [vmem:[%s23413_s28 + $0xdc] sm:$0xf0]  ;;  %v22018_v43 = vld [vmem:[#allocation4 + $0x1b8] sm:$0xff] }
 0x1da   : > { %4951 = vmatpush.bf16.msra.mxu0 %v21909_v45  ;;  %v3437_v2 = vpop.f32.mrf.mxu2  ;;  %v22026_v45 = vld [vmem:[#allocation4 + $0x1f8] sm:$0xff] }
 0x1db   : > { %4965 = vmatpush.bf16.msra.mxu1 %v21917_v46  ;;  %v3451_v32 = vpop.f32.mrf.mxu3  ;;  %v16905_v46 = vor.u32 %v21900_v34, %v16904_v33  ;;  %v22013_v34 = vld [vmem:[#allocation4 + $0x190] sm:$0xff] }
 0x1dc   : > { %4979 = vmatpush.bf16.msra.mxu2 %v21925_v49  ;;  %v16909_v49 = vor.u32 %v21897_v61, %v16906_v35  ;;  %v22021_v61 = vld [vmem:[#allocation4 + $0x1d0] sm:$0xff] }
 0x1dd   : > { %4993 = vmatpush.bf16.msra.mxu3 %v21933_v50  ;;  %v23657_v50 = vpop.f32.mrf.mxu0 }
 0x1de   : > { %4952 = vmatpush.bf16.msra.mxu0 %v21908_v54  ;;  %v16913_v54 = vor.u32 %v21901_v39, %v16912_v38 }
 0x1df   : > { %4966 = vmatpush.bf16.msra.mxu1 %v21916_v55  ;;  %v16917_v55 = vor.u32 %v21898_v41, %v16914_v16  ;;  %v21944_v16 = vld [vmem:[#allocation4 + $0x448] sm:$0xff] }
 0x1e0   : > { %4980 = vmatpush.bf16.msra.mxu2 %v21924_v57  ;;  %v23659_v57 = vpop.f32.mrf.mxu1 }
 0x1e1   : > { %4994 = vmatpush.bf16.msra.mxu3 %v21932_v58  ;;  %v21941_v58 = vld [vmem:[#allocation4 + $0x430] sm:$0xff] }
 0x1e2   : > { %4953 = vmatpush.bf16.msra.mxu0 %v21907_v0  ;;  %v2590_v0 = vadd.f32 %v23608_v29, %v2576_v42  ;;  %v22012_v42 = vld [vmem:[#allocation4 + $0x188] sm:$0xff] }
 0x1e3   : > { %4967 = vmatpush.bf16.msra.mxu1 %v21915_v1  ;;  %v2948_v1 = vadd.f32 %v23620_v52, %v2934_v14 }
 0x1e4   : > { %4981 = vmatpush.bf16.msra.mxu2 %v21923_v12  ;;  %v3439_v12 = vpop.f32.mrf.mxu2  ;;  %v2604_v15 = vadd.f32 %v23613_v20, %v2590_v0  ;;  %v22042_v0 = vld [vmem:[#allocation4 + $0x278] sm:$0xff] }
 0x1e5   : > { %4995 = vmatpush.bf16.msra.mxu3 %v21931_v36  ;;  %v3452_v36 = vadd.f32 %v3451_v32, %v3437_v2  ;;  %v2962_v29 = vadd.f32 %v23622_v11, %v2948_v1  ;;  %v16920_v1 = vld [vmem:[%s23413_s28 + $0xc0] sm:$0xf] }
 0x1e6   : > { %4954 = vmatpush.bf16.msra.mxu0 %v21906_v10  ;;  %v21948_v10 = vld [vmem:[#allocation4 + $0x468] sm:$0xff] }
 0x1e7   : > { %4968 = vmatpush.bf16.msra.mxu1 %v21914_v40  ;;  %v3453_v40 = vpop.f32.mrf.mxu3 }
 0x1e8   : > { %4982 = vmatpush.bf16.msra.mxu2 %v21922_v3  ;;  %v22016_v3 = vld [vmem:[#allocation4 + $0x1a8] sm:$0xff] }
 0x1e9   : > { %4996 = vmatpush.bf16.msra.mxu3 %v21930_v8  ;;  %v22024_v8 = vld [vmem:[#allocation4 + $0x1e8] sm:$0xff] }
 0x1ea   : > { %4955 = vmatpush.bf16.msra.mxu0 %v21905_v17  ;;  %v2936_v17 = vadd.f32 %v23628_v4, %v2604_v15  ;;  %v21938_v4 = vld [vmem:[#allocation4 + $0x418] sm:$0xff] }
 0x1eb   : > { %4969 = vmatpush.bf16.msra.mxu1 %v21913_v6  ;;  %v21939_v6 = vld [vmem:[#allocation4 + $0x420] sm:$0xff]  ;;  %v22050_v15 = vld [vmem:[#allocation4 + $0x2b8] sm:$0xff] }
 0x1ec   : > { %4983 = vmatpush.bf16.msra.mxu2 %v21921_v18  ;;  %v21947_v18 = vld [vmem:[#allocation4 + $0x460] sm:$0xff]  ;;  %v2950_v20 = vadd.f32 %v23631_v9, %v2936_v17 }
 0x1ed   : > { %4997 = vmatpush.bf16.msra.mxu3 %v21929_v47 }
 0x1ee   : > { %4956 = vmatpush.bf16.msra.mxu0 %v21904_v7  ;;  %v22023_v7 = vld [vmem:[#allocation4 + $0x1e0] sm:$0xff] }
 0x1ef   : > { %4970 = vmatpush.bf16.msra.mxu1 %v21912_v24  ;;  %v2976_v24 = vadd.f32 %v23624_v21, %v2962_v29  ;;  %v22058_v29 = vld [vmem:[#allocation4 + $0x2f8] sm:$0xff] }
 0x1f0   : > { %4984 = vmatpush.bf16.msra.mxu2 %v21920_v60 }
 0x1f1   : > { %4998 = vmatpush.bf16.msra.mxu3 %v21928_v26  ;;  %v2990_v11 = vadd.f32 %v23640_v51, %v2976_v24  ;;  %v3454_v26 = vadd.f32 %v3453_v40, %v3439_v12  ;;  %v21937_v51 = vld [vmem:[#allocation4 + $0x410] sm:$0xff]  ;;  %v21902_v12 = vld [vmem:[%s23413_s28 + $0xe4] sm:$0xf0] }
 0x1f2   : > { %4957 = vmatpush.bf16.msra.mxu0 %v21903_v62  ;;  %v3465_v52 = vpop.f32.mrf.mxu0  ;;  %v21946_v62 = vld [vmem:[#allocation4 + $0x458] sm:$0xff]  ;;  %v16921_v17 = vor.u32 %v21902_v12, %v16920_v1  ;;  %v22049_v24 = vld [vmem:[#allocation4 + $0x2b0] sm:$0xff] }
 0x1f3   : > { %4971 = vmatpush.bf16.msra.mxu1 %v21911_v44  ;;  %v3466_v47 = vadd.f32 %v3465_v52, %v3452_v36  ;;  %v3479_v48 = vpop.f32.mrf.mxu1  ;;  %v22022_v44 = vld [vmem:[#allocation4 + $0x1d8] sm:$0xff]  ;;  %v21899_v36 = vld [vmem:[%s23413_s28 + $0xc4] sm:$0xf] }
 0x1f4   : > { %4985 = vmatpush.bf16.msra.mxu2 %v21919_v13  ;;  %v22008_v40 = vld [vmem:[%s23413_s28 + $0xc4] sm:$0xf0]  ;;  %v21979_v1 = vld [vmem:[#allocation4 + $0xb0] sm:$0xff] }
 0x1f5   : > { %4999 = vmatpush.bf16.msra.mxu3 %v21927_v27  ;;  %4958 = vmatmul.bf16.vlgmr.msra.gmra.mxu0 %v16905_v46  ;;  %v3480_v60 = vadd.f32 %v3479_v48, %v3466_v47  ;;  %v2964_v27 = vadd.f32 %v23633_v53, %v2950_v20  ;;  %v21987_v12 = vld [vmem:[#allocation4 + $0xf0] sm:$0xff] }
 0x1f6   : > { %5006 = vmatpush.bf16.msrb.mxu0 %v21942_v30  ;;  %4972 = vmatmul.bf16.vlgmr.msra.gmra.mxu1 %v16909_v49  ;;  %v3004_v30 = vadd.f32 %v23643_v59, %v2990_v11  ;;  %v21936_v59 = vld [vmem:[#allocation4 + $0x408] sm:$0xff]  ;;  %v21935_v49 = vld [vmem:[#allocation4 + $0x400] sm:$0xff] }
 0x1f7   : > { %5020 = vmatpush.bf16.msrb.mxu1 %v21950_v31  ;;  %4986 = vmatmul.bf16.vlgmr.msra.gmra.mxu2 %v16913_v54  ;;  %v21945_v31 = vld [vmem:[#allocation4 + $0x450] sm:$0xff]  ;;  %v2978_v35 = vadd.f32 %v23636_v37, %v2964_v27  ;;  %v22011_v54 = vld [vmem:[#allocation4 + $0x180] sm:$0xff]  ;;  %v22040_v11 = vld [vmem:[#allocation4 + $0x268] sm:$0xff] }
 0x1f8   : > { %5566 = vmatpush.bf16.msrb.mxu2 %v22018_v43  ;;  %5000 = vmatmul.bf16.vlgmr.msra.gmra.mxu3 %v16917_v55  ;;  %v22020_v43 = vld [vmem:[#allocation4 + $0x1c8] sm:$0xff]  ;;  %v22019_v55 = vld [vmem:[#allocation4 + $0x1c0] sm:$0xff]  ;;  %v22030_v27 = vld [vmem:[#allocation4 + $0x218] sm:$0xff] }
 0x1f9   : > { %5580 = vmatpush.bf16.msrb.mxu3 %v22026_v45  ;;  %v2992_v39 = vadd.f32 %v23657_v50, %v2978_v35  ;;  %v21943_v50 = vld [vmem:[#allocation4 + $0x440] sm:$0xff] }
 0x1fa   : > { %5007 = vmatpush.bf16.msrb.mxu0 %v21941_v58  ;;  %v3493_v13 = vpop.f32.mrf.mxu2  ;;  %v3467_v21 = vpop.f32.mrf.mxu0  ;;  %v22027_v35 = vld [vmem:[#allocation4 + $0x200] sm:$0xff] }
 0x1fb   : > { %5021 = vmatpush.bf16.msrb.mxu1 %v21949_v22  ;;  %v3494_v2 = vadd.f32 %v3493_v13, %v3480_v60  ;;  %v3507_v28 = vpop.f32.mrf.mxu3  ;;  %v3468_v32 = vadd.f32 %v3467_v21, %v3454_v26  ;;  %v3481_v33 = vpop.f32.mrf.mxu1  ;;  %v3006_v58 = vadd.f32 %v23659_v57, %v2992_v39  ;;  %v17134_v57 = vld [vmem:[%s23413_s28 + $0xc8] sm:$0xf0]  ;;  %v22057_v60 = vld [vmem:[#allocation4 + $0x2f0] sm:$0xff]  ;;  %v22055_v13 = vld [vmem:[#allocation4 + $0x2e0] sm:$0xff] }
 0x1fc   : > { %5567 = vmatpush.bf16.msrb.mxu2 %v22017_v63  ;;  %v22048_v26 = vld [vmem:[#allocation4 + $0x2a8] sm:$0xff]  ;;  %v22054_v21 = vld [vmem:[#allocation4 + $0x2d8] sm:$0xff]  ;;  %v22051_v39 = vld [vmem:[#allocation4 + $0x2c0] sm:$0xff] }
 0x1fd   : > { %5581 = vmatpush.bf16.msrb.mxu3 %v22025_v23  ;;  %v3508_v9 = vadd.f32 %v3507_v28, %v3494_v2  ;;  %v3482_v53 = vadd.f32 %v3481_v33, %v3468_v32  ;;  %v22034_v23 = vld [vmem:[#allocation4 + $0x238] sm:$0xff]  ;;  %v22028_v32 = vld [vmem:[#allocation4 + $0x208] sm:$0xff] }
 0x1fe   : > { %5008 = vmatpush.bf16.msrb.mxu0 %v21940_v5  ;;  %v16922_v5 = vld [vmem:[%s23413_s28 + $0xe8] sm:$0xf0] }
 0x1ff   : > { %5022 = vmatpush.bf16.msrb.mxu1 %v21948_v10  ;;  %v3512_v38 = vadd.f32 %v3508_v9, %v3004_v30  ;;  %v17132_v10 = vld [vmem:[%s23413_s28 + $0xa0] sm:$0xf]  ;;  %v22038_v2 = vld [vmem:[#allocation4 + $0x258] sm:$0xff]  ;;  %v22036_v33 = vld [vmem:[#allocation4 + $0x248] sm:$0xff] }
 0x200   : > { %5568 = vmatpush.bf16.msrb.mxu2 %v22016_v3  ;;  %v22046_v28 = vld [vmem:[#allocation4 + $0x298] sm:$0xff]  ;;  %v22029_v30 = vld [vmem:[#allocation4 + $0x210] sm:$0xff] }
 0x201   : > { %5582 = vmatpush.bf16.msrb.mxu3 %v22024_v8  ;;  %v3514_v41 = vadd.f32 %v23563_v56, %v3512_v38  ;;  %v22005_v8 = vld [vmem:[%s23413_s28 + $0xa4] sm:$0xf] }
 0x202   : > { %5009 = vmatpush.bf16.msrb.mxu0 %v21939_v6  ;;  %v3495_v45 = vpop.f32.mrf.mxu2  ;;  %v16925_v6 = vor.u32 %v21899_v36, %v16922_v5  ;;  %v17137_v47 = vor.u32 %v22005_v8, %v17134_v57  ;;  %v22037_v9 = vld [vmem:[#allocation4 + $0x250] sm:$0xff]  ;;  %v22035_v38 = vld [vmem:[#allocation4 + $0x240] sm:$0xff]  ;;  %v21962_v36 = vld [vmem:[#allocation4 + $0x28] sm:$0xff] }
 0x203   : > { %5023 = vmatpush.bf16.msrb.mxu1 %v21947_v18  ;;  %v3516_v14 = vmax.f32 %v3514_v41, 0.0  ;;  %v3496_v37 = vadd.f32 %v3495_v45, %v3482_v53  ;;  %v3509_v46 = vpop.f32.mrf.mxu3  ;;  %v17133_v18 = vor.u32 %v22008_v40, %v17132_v10  ;;  %v22043_v53 = vld [vmem:[#allocation4 + $0x280] sm:$0xff]  ;;  %v21964_v41 = vld [vmem:[#allocation4 + $0x38] sm:$0xff]  ;;  %v21970_v5 = vld [vmem:[#allocation4 + $0x68] sm:$0xff] }
 0x204   : > { %5569 = vmatpush.bf16.msrb.mxu2 %v22015_v19  ;;  %v22033_v19 = vld [vmem:[#allocation4 + $0x230] sm:$0xff]  ;;  %v22010_v45 = vld [vmem:[%s23413_s28 + $0xd4] sm:$0xf0]  ;;  %v21969_v8 = vld [vmem:[#allocation4 + $0x60] sm:$0xff] }
 0x205   : > { %5583 = vmatpush.bf16.msrb.mxu3 %v22023_v7  ;;  %v3518_v22 = vpack.c.bf16 %v3516_v14, %v3516_v14  ;;  %v3510_v63 = vadd.f32 %v3509_v46, %v3496_v37  ;;  %v22041_v7 = vld [vmem:[#allocation4 + $0x270] sm:$0xff]  ;;  %v22006_v14 = vld [vmem:[%s23413_s28 + $0xac] sm:$0xf]  ;;  %v21977_v57 = vld [vmem:[#allocation4 + $0xa0] sm:$0xff] }
 0x206   : > { %5010 = vmatpush.bf16.msrb.mxu0 %v21938_v4  ;;  %v22056_v4 = vld [vmem:[#allocation4 + $0x2e8] sm:$0xff]  ;;  %v17142_v37 = vld [vmem:[%s23413_s28 + $0xd0] sm:$0xf0] }
 0x207   : > { %5024 = vmatpush.bf16.msrb.mxu1 %v21946_v62  ;;  %3520 = vst [vmem:[#allocation2 + $0x4] sm:$0xf] %v3518_v22  ;;  %v3513_v3 = vadd.f32 %v3510_v63, %v3006_v58  ;;  %v22031_v62 = vld [vmem:[#allocation4 + $0x220] sm:$0xff]  ;;  %v17145_v22 = vor.u32 %v22006_v14, %v17142_v37  ;;  %v21978_v10 = vld [vmem:[#allocation4 + $0xa8] sm:$0xff] }
 0x208   : > { %5570 = vmatpush.bf16.msrb.mxu2 %v22014_v25  ;;  %v22039_v25 = vld [vmem:[#allocation4 + $0x260] sm:$0xff]  ;;  %v21986_v40 = vld [vmem:[#allocation4 + $0xe8] sm:$0xff] }
 0x209   : > { %5584 = vmatpush.bf16.msrb.mxu3 %v22022_v44  ;;  %v3515_v52 = vadd.f32 %v23563_v56, %v3513_v3  ;;  %v22032_v56 = vld [vmem:[#allocation4 + $0x228] sm:$0xff]  ;;  %v22047_v44 = vld [vmem:[#allocation4 + $0x2a0] sm:$0xff] }
 0x20a   : > { %5011 = vmatpush.bf16.msrb.mxu0 %v21937_v51  ;;  %v22045_v51 = vld [vmem:[#allocation4 + $0x290] sm:$0xff]  ;;  %v21961_v3 = vld [vmem:[#allocation4 + $0x20] sm:$0xff]  ;;  %v22002_v14 = vld [vmem:[#allocation4 + $0x168] sm:$0xff] }
 0x20b   : > { %5025 = vmatpush.bf16.msrb.mxu1 %v21945_v31  ;;  %v3517_v48 = vmax.f32 %v3515_v52, 0.0  ;;  %v22053_v31 = vld [vmem:[#allocation4 + $0x2d0] sm:$0xff]  ;;  %v21968_v52 = vld [vmem:[#allocation4 + $0x58] sm:$0xff] }
 0x20c   : > { %5571 = vmatpush.bf16.msrb.mxu2 %v22013_v34  ;;  %v22044_v34 = vld [vmem:[#allocation4 + $0x288] sm:$0xff]  ;;  %v22007_v46 = vld [vmem:[%s23413_s28 + $0xb4] sm:$0xf] }
 0x20d   : > { %5585 = vmatpush.bf16.msrb.mxu3 %v22021_v61  ;;  %v3519_v20 = vpack.c.bf16 %v3517_v48, %v3517_v48  ;;  %v22052_v61 = vld [vmem:[#allocation4 + $0x2c8] sm:$0xff]  ;;  %v21975_v48 = vld [vmem:[#allocation4 + $0x90] sm:$0xff] }
 0x20e   : > { %5012 = vmatpush.bf16.msrb.mxu0 %v21936_v59  ;;  %v21972_v59 = vld [vmem:[#allocation4 + $0x78] sm:$0xff] }
 0x20f   : > { %5026 = vmatpush.bf16.msrb.mxu1 %v21944_v16  ;;  %3521 = vst [vmem:[#allocation2 + $0x28] sm:$0xf] %v3519_v20  ;;  %v17140_v16 = vld [vmem:[%s23413_s28 + $0xa8] sm:$0xf] }
 0x210   : > { %5572 = vmatpush.bf16.msrb.mxu2 %v22012_v42  ;;  %v22009_v42 = vld [vmem:[%s23413_s28 + $0xcc] sm:$0xf0] }
 0x211   : > { %5586 = vmatpush.bf16.msrb.mxu3 %v22020_v43  ;;  %v17148_v43 = vld [vmem:[%s23413_s28 + $0xb0] sm:$0xf] }
 0x212   : > { %5013 = vmatpush.bf16.msrb.mxu0 %v21935_v49  ;;  %v17150_v49 = vld [vmem:[%s23413_s28 + $0xd8] sm:$0xf0]  ;;  %v17149_v58 = vor.u32 %v22010_v45, %v17148_v43  ;;  %v22079_v43 = vld [vmem:[#allocation4 + $0x370] sm:$0xff] }
 0x213   : > { %5027 = vmatpush.bf16.msrb.mxu1 %v21943_v50  ;;  %v21980_v50 = vld [vmem:[#allocation4 + $0xb8] sm:$0xff]  ;;  %v17153_v63 = vor.u32 %v22007_v46, %v17150_v49  ;;  %v23694_v20 = vpop.f32.mrf.mxu1  ;;  %v21994_v45 = vld [vmem:[#allocation4 + $0x128] sm:$0xff] }
 0x214   : > { %5573 = vmatpush.bf16.msrb.mxu2 %v22011_v54  ;;  %v21988_v54 = vld [vmem:[#allocation4 + $0xf8] sm:$0xff]  ;;  %v22070_v46 = vld [vmem:[#allocation4 + $0x328] sm:$0xff] }
 0x215   : > { %5587 = vmatpush.bf16.msrb.mxu3 %v22019_v55  ;;  %5014 = vmatmul.bf16.vlgmr.msrb.gmra.mxu0 %v16921_v17  ;;  %v17141_v55 = vor.u32 %v22009_v42, %v17140_v16  ;;  %v21976_v17 = vld [vmem:[#allocation4 + $0x98] sm:$0xff]  ;;  %v22071_v42 = vld [vmem:[#allocation4 + $0x330] sm:$0xff]  ;;  %v22078_v49 = vld [vmem:[#allocation4 + $0x368] sm:$0xff] }
 0x216   : > { %5594 = vmatpush.bf16.msra.mxu0 %v22034_v23  ;;  %5028 = vmatmul.bf16.vlgmr.msrb.gmra.mxu1 %v16925_v6  ;;  %v21963_v23 = vld [vmem:[#allocation4 + $0x30] sm:$0xff]  ;;  %v21984_v6 = vld [vmem:[#allocation4 + $0xd8] sm:$0xff] }
 0x217   : > { %5608 = vmatpush.bf16.msra.mxu1 %v22042_v0  ;;  %5574 = vmatmul.bf16.vlgmr.msrb.gmra.mxu2 %v17133_v18  ;;  %v21971_v0 = vld [vmem:[#allocation4 + $0x70] sm:$0xff] }
 0x218   : > { %5622 = vmatpush.bf16.msra.mxu2 %v22050_v15  ;;  %5588 = vmatmul.bf16.vlgmr.msrb.gmra.mxu3 %v17137_v47  ;;  %v21985_v15 = vld [vmem:[#allocation4 + $0xe0] sm:$0xff]  ;;  %v21959_v18 = vld [vmem:[#allocation4 + $0x10] sm:$0xff] }
 0x219   : > { %5636 = vmatpush.bf16.msra.mxu3 %v22058_v29  ;;  %v21960_v29 = vld [vmem:[#allocation4 + $0x18] sm:$0xff]  ;;  %v21967_v47 = vld [vmem:[#allocation4 + $0x50] sm:$0xff] }
 0x21a   : > { %5595 = vmatpush.bf16.msra.mxu0 %v22033_v19  ;;  %v21983_v19 = vld [vmem:[#allocation4 + $0xd0] sm:$0xff] }
 0x21b   : > { %5609 = vmatpush.bf16.msra.mxu1 %v22041_v7  ;;  %v21958_v7 = vld [vmem:[#allocation4 + $0x8] sm:$0xff]  ;;  %v23708_v16 = vpop.f32.mrf.mxu1  ;;  %v23710_v37 = vpop.f32.mrf.mxu3 }
 0x21c   : > { %5623 = vmatpush.bf16.msra.mxu2 %v22049_v24  ;;  %v21966_v24 = vld [vmem:[#allocation4 + $0x48] sm:$0xff] }
 0x21d   : > { %5637 = vmatpush.bf16.msra.mxu3 %v22057_v60  ;;  %v23692_v60 = vpop.f32.mrf.mxu0 }
 0x21e   : > { %5596 = vmatpush.bf16.msra.mxu0 %v22032_v56  ;;  %v21974_v56 = vld [vmem:[#allocation4 + $0x88] sm:$0xff] }
 0x21f   : > { %5610 = vmatpush.bf16.msra.mxu1 %v22040_v11  ;;  %v21982_v11 = vld [vmem:[#allocation4 + $0xc8] sm:$0xff] }
 0x220   : > { %5624 = vmatpush.bf16.msra.mxu2 %v22048_v26  ;;  %v21957_v26 = vld [vmem:[#allocation4] sm:$0xff] }
 0x221   : > { %5638 = vmatpush.bf16.msra.mxu3 %v22056_v4  ;;  %v21965_v4 = vld [vmem:[#allocation4 + $0x40] sm:$0xff] }
 0x222   : > { %5597 = vmatpush.bf16.msra.mxu0 %v22031_v62  ;;  %v21973_v62 = vld [vmem:[#allocation4 + $0x80] sm:$0xff] }
 0x223   : > { %5611 = vmatpush.bf16.msra.mxu1 %v22039_v25  ;;  %v21981_v25 = vld [vmem:[#allocation4 + $0xc0] sm:$0xff] }
 0x224   : > { %5625 = vmatpush.bf16.msra.mxu2 %v22047_v44  ;;  %v21996_v44 = vld [vmem:[#allocation4 + $0x138] sm:$0xff] }
 0x225   : > { %5639 = vmatpush.bf16.msra.mxu3 %v22055_v13  ;;  %v22004_v13 = vld [vmem:[#allocation4 + $0x178] sm:$0xff] }
 0x226   : > { %5598 = vmatpush.bf16.msra.mxu0 %v22030_v27  ;;  %v17348_v27 = vld [vmem:[%s23413_s28 + $0x50] sm:$0xf] }
 0x227   : > { %5612 = vmatpush.bf16.msra.mxu1 %v22038_v2  ;;  %v21954_v2 = vld [vmem:[%s23413_s28 + $0x74] sm:$0xf0] }
 0x228   : > { %5626 = vmatpush.bf16.msra.mxu2 %v22046_v28  ;;  %v17356_v28 = vld [vmem:[%s23413_s28 + $0x58] sm:$0xf] }
 0x229   : > { %5640 = vmatpush.bf16.msra.mxu3 %v22054_v21  ;;  %v21955_v21 = vld [vmem:[%s23413_s28 + $0x7c] sm:$0xf0] }
 0x22a   : > { %5599 = vmatpush.bf16.msra.mxu0 %v22029_v30  ;;  %v21951_v30 = vld [vmem:[%s23413_s28 + $0x54] sm:$0xf] }
 0x22b   : > { %5613 = vmatpush.bf16.msra.mxu1 %v22037_v9  ;;  %v17350_v9 = vld [vmem:[%s23413_s28 + $0x78] sm:$0xf0] }
 0x22c   : > { %5627 = vmatpush.bf16.msra.mxu2 %v22045_v51  ;;  %v21952_v51 = vld [vmem:[%s23413_s28 + $0x5c] sm:$0xf] }
 0x22d   : > { %5641 = vmatpush.bf16.msra.mxu3 %v22053_v31  ;;  %v17358_v31 = vld [vmem:[%s23413_s28 + $0x80] sm:$0xf0] }
 0x22e   : > { %5600 = vmatpush.bf16.msra.mxu0 %v22028_v32  ;;  %v22072_v32 = vld [vmem:[#allocation4 + $0x338] sm:$0xff] }
 0x22f   : > { %5614 = vmatpush.bf16.msra.mxu1 %v22036_v33  ;;  %v22080_v33 = vld [vmem:[#allocation4 + $0x378] sm:$0xff] }
 0x230   : > { %5628 = vmatpush.bf16.msra.mxu2 %v22044_v34  ;;  %v17349_v34 = vor.u32 %v21954_v2, %v17348_v27  ;;  %v22059_v27 = vld [vmem:[%s23413_s28 + $0xf4] sm:$0xf]  ;;  %v17572_v2 = vld [vmem:[%s23413_s28 + $0x118] sm:$0xf0] }
 0x231   : > { %5642 = vmatpush.bf16.msra.mxu3 %v22052_v61  ;;  %v17357_v61 = vor.u32 %v21955_v21, %v17356_v28  ;;  %v22104_v28 = vld [vmem:[#allocation4 + $0x438] sm:$0xff] }
 0x232   : > { %5601 = vmatpush.bf16.msra.mxu0 %v22027_v35  ;;  %v17353_v35 = vor.u32 %v21951_v30, %v17350_v9  ;;  %v22112_v21 = vld [vmem:[#allocation4 + $0x478] sm:$0xff] }
 0x233   : > { %5615 = vmatpush.bf16.msra.mxu1 %v22035_v38  ;;  %v17361_v38 = vor.u32 %v21952_v51, %v17358_v31 }
 0x234   : > { %5629 = vmatpush.bf16.msra.mxu2 %v22043_v53  ;;  %v23704_v53 = vpop.f32.mrf.mxu2 }
 0x235   : > { %5643 = vmatpush.bf16.msra.mxu3 %v22051_v39  ;;  %5602 = vmatmul.bf16.vlgmr.msra.gmra.mxu0 %v17141_v55  ;;  %v21995_v39 = vld [vmem:[#allocation4 + $0x130] sm:$0xff]  ;;  %v22069_v55 = vld [vmem:[#allocation4 + $0x320] sm:$0xff] }
 0x236   : > { %5968 = vmatpush.bf16.msrb.mxu0 %v21964_v41  ;;  %5616 = vmatmul.bf16.vlgmr.msra.gmra.mxu1 %v17145_v22  ;;  %v22003_v41 = vld [vmem:[#allocation4 + $0x170] sm:$0xff] }
 0x237   : > { %5982 = vmatpush.bf16.msrb.mxu1 %v21972_v59  ;;  %5630 = vmatmul.bf16.vlgmr.msra.gmra.mxu2 %v17149_v58  ;;  %v23706_v59 = vpop.f32.mrf.mxu0  ;;  %v22077_v58 = vld [vmem:[#allocation4 + $0x360] sm:$0xff] }
 0x238   : > { %5996 = vmatpush.bf16.msrb.mxu2 %v21980_v50  ;;  %5644 = vmatmul.bf16.vlgmr.msra.gmra.mxu3 %v17153_v63  ;;  %v21993_v50 = vld [vmem:[#allocation4 + $0x120] sm:$0xff] }
 0x239   : > { %6010 = vmatpush.bf16.msrb.mxu3 %v21988_v54  ;;  %v22001_v54 = vld [vmem:[#allocation4 + $0x160] sm:$0xff] }
 0x23a   : > { %5969 = vmatpush.bf16.msrb.mxu0 %v21963_v23  ;;  %v23716_v23 = vpop.f32.mrf.mxu1 }
 0x23b   : > { %5983 = vmatpush.bf16.msrb.mxu1 %v21971_v0  ;;  %v21992_v0 = vld [vmem:[#allocation4 + $0x118] sm:$0xff] }
 0x23c   : > { %5997 = vmatpush.bf16.msrb.mxu2 %v21979_v1  ;;  %v23712_v22 = vpop.f32.mrf.mxu2  ;;  %v22000_v1 = vld [vmem:[#allocation4 + $0x158] sm:$0xff] }
 0x23d   : > { %6011 = vmatpush.bf16.msrb.mxu3 %v21987_v12  ;;  %v22068_v12 = vld [vmem:[#allocation4 + $0x318] sm:$0xff] }
 0x23e   : > { %5970 = vmatpush.bf16.msrb.mxu0 %v21962_v36  ;;  %v22076_v36 = vld [vmem:[#allocation4 + $0x358] sm:$0xff] }
 0x23f   : > { %5984 = vmatpush.bf16.msrb.mxu1 %v21970_v5  ;;  %v23714_v63 = vpop.f32.mrf.mxu0  ;;  %v23718_v5 = vpop.f32.mrf.mxu3 }
 0x240   : > { %5998 = vmatpush.bf16.msrb.mxu2 %v21978_v10  ;;  %v21991_v10 = vld [vmem:[#allocation4 + $0x110] sm:$0xff] }
 0x241   : > { %6012 = vmatpush.bf16.msrb.mxu3 %v21986_v40  ;;  %v21999_v40 = vld [vmem:[#allocation4 + $0x150] sm:$0xff] }
 0x242   : > { %5971 = vmatpush.bf16.msrb.mxu0 %v21961_v3  ;;  %v22067_v3 = vld [vmem:[#allocation4 + $0x310] sm:$0xff] }
 0x243   : > { %5985 = vmatpush.bf16.msrb.mxu1 %v21969_v8  ;;  %v22075_v8 = vld [vmem:[#allocation4 + $0x350] sm:$0xff] }
 0x244   : > { %5999 = vmatpush.bf16.msrb.mxu2 %v21977_v57  ;;  %v23720_v57 = vpop.f32.mrf.mxu2 }
 0x245   : > { %6013 = vmatpush.bf16.msrb.mxu3 %v21985_v15  ;;  %v21990_v15 = vld [vmem:[#allocation4 + $0x108] sm:$0xff] }
 0x246   : > { %5972 = vmatpush.bf16.msrb.mxu0 %v21960_v29  ;;  %v21998_v29 = vld [vmem:[#allocation4 + $0x148] sm:$0xff] }
 0x247   : > { %5986 = vmatpush.bf16.msrb.mxu1 %v21968_v52  ;;  %v23722_v52 = vpop.f32.mrf.mxu0 }
 0x248   : > { %6000 = vmatpush.bf16.msrb.mxu2 %v21976_v17  ;;  %v23724_v17 = vpop.f32.mrf.mxu1 }
 0x249   : > { %6014 = vmatpush.bf16.msrb.mxu3 %v21984_v6  ;;  %v22066_v6 = vld [vmem:[#allocation4 + $0x308] sm:$0xff] }
 0x24a   : > { %5973 = vmatpush.bf16.msrb.mxu0 %v21959_v18  ;;  %v22074_v18 = vld [vmem:[#allocation4 + $0x348] sm:$0xff] }
 0x24b   : > { %5987 = vmatpush.bf16.msrb.mxu1 %v21967_v47  ;;  %v21989_v47 = vld [vmem:[#allocation4 + $0x100] sm:$0xff] }
 0x24c   : > { %6001 = vmatpush.bf16.msrb.mxu2 %v21975_v48  ;;  %v21997_v48 = vld [vmem:[#allocation4 + $0x140] sm:$0xff] }
 0x24d   : > { %6015 = vmatpush.bf16.msrb.mxu3 %v21983_v19  ;;  %v22065_v19 = vld [vmem:[#allocation4 + $0x300] sm:$0xff] }
 0x24e   : > { %5974 = vmatpush.bf16.msrb.mxu0 %v21958_v7  ;;  %v22073_v7 = vld [vmem:[#allocation4 + $0x340] sm:$0xff] }
 0x24f   : > { %5988 = vmatpush.bf16.msrb.mxu1 %v21966_v24  ;;  %v22088_v24 = vld [vmem:[#allocation4 + $0x3b8] sm:$0xff] }
 0x250   : > { %6002 = vmatpush.bf16.msrb.mxu2 %v21974_v56  ;;  %v22096_v56 = vld [vmem:[#allocation4 + $0x3f8] sm:$0xff] }
 0x251   : > { %6016 = vmatpush.bf16.msrb.mxu3 %v21982_v11  ;;  %v17364_v11 = vld [vmem:[%s23413_s28 + $0x60] sm:$0xf] }
 0x252   : > { %5975 = vmatpush.bf16.msrb.mxu0 %v21957_v26  ;;  %v21956_v26 = vld [vmem:[%s23413_s28 + $0x84] sm:$0xf0]  ;;  %v23736_v51 = vpop.f32.mrf.mxu0 }
 0x253   : > { %5989 = vmatpush.bf16.msrb.mxu1 %v21965_v4  ;;  %v23728_v4 = vpop.f32.mrf.mxu3  ;;  %v17365_v30 = vor.u32 %v21956_v26, %v17364_v11  ;;  %v23738_v31 = vpop.f32.mrf.mxu1  ;;  %v22089_v26 = vld [vmem:[#allocation4 + $0x3c0] sm:$0xff] }
 0x254   : > { %6003 = vmatpush.bf16.msrb.mxu2 %v21973_v62  ;;  %v21953_v62 = vld [vmem:[%s23413_s28 + $0x64] sm:$0xf] }
 0x255   : > { %6017 = vmatpush.bf16.msrb.mxu3 %v21981_v25  ;;  %5976 = vmatmul.bf16.vlgmr.msrb.gmra.mxu0 %v17349_v34  ;;  %v17366_v25 = vld [vmem:[%s23413_s28 + $0x88] sm:$0xf0]  ;;  %v23740_v34 = vpop.f32.mrf.mxu2 }
 0x256   : > { %6024 = vmatpush.bf16.msra.mxu0 %v21996_v44  ;;  %5990 = vmatmul.bf16.vlgmr.msrb.gmra.mxu1 %v17353_v35  ;;  %v17570_v44 = vld [vmem:[%s23413_s28 + $0xf0] sm:$0xf]  ;;  %v17369_v9 = vor.u32 %v21953_v62, %v17366_v25 }
 0x257   : > { %6038 = vmatpush.bf16.msra.mxu1 %v22004_v13  ;;  %6004 = vmatmul.bf16.vlgmr.msrb.gmra.mxu2 %v17357_v61  ;;  %v22062_v13 = vld [vmem:[%s23413_s28 + $0x114] sm:$0xf0]  ;;  %v22087_v61 = vld [vmem:[#allocation4 + $0x3b0] sm:$0xff]  ;;  %v22105_v62 = vld [vmem:[#allocation4 + $0x440] sm:$0xff] }
 0x258   : > { %6473 = vmatpush.bf16.msra.mxu2 %v22072_v32  ;;  %6018 = vmatmul.bf16.vlgmr.msrb.gmra.mxu3 %v17361_v38  ;;  %v17571_v32 = vor.u32 %v22062_v13, %v17570_v44  ;;  %v22095_v35 = vld [vmem:[#allocation4 + $0x3f0] sm:$0xff]  ;;  %v22180_v44 = vld [vmem:[#allocation4 + $0x1b8] sm:$0xff] }
 0x259   : > { %6487 = vmatpush.bf16.msra.mxu3 %v22080_v33  ;;  %v17575_v33 = vor.u32 %v22059_v27, %v17572_v2  ;;  %v22103_v38 = vld [vmem:[#allocation4 + $0x430] sm:$0xff]  ;;  %v22188_v13 = vld [vmem:[#allocation4 + $0x1f8] sm:$0xff] }
 0x25a   : > { %6025 = vmatpush.bf16.msra.mxu0 %v21995_v39  ;;  %v22111_v39 = vld [vmem:[#allocation4 + $0x470] sm:$0xff]  ;;  %v22064_v2 = vld [vmem:[%s23413_s28 + $0x124] sm:$0xf0] }
 0x25b   : > { %6039 = vmatpush.bf16.msra.mxu1 %v22003_v41  ;;  %v4068_v41 = vadd.f32 %v23694_v20, %v23692_v60  ;;  %v23751_v60 = vpop.f32.mrf.mxu1  ;;  %v22101_v20 = vld [vmem:[#allocation4 + $0x420] sm:$0xff] }
 0x25c   : > { %6474 = vmatpush.bf16.msra.mxu2 %v22071_v42  ;;  %v22086_v42 = vld [vmem:[#allocation4 + $0x3a8] sm:$0xff]  ;;  %v17586_v27 = vld [vmem:[%s23413_s28 + $0x100] sm:$0xf] }
 0x25d   : > { %6488 = vmatpush.bf16.msra.mxu3 %v22079_v43  ;;  %v22094_v43 = vld [vmem:[#allocation4 + $0x3e8] sm:$0xff] }
 0x25e   : > { %6026 = vmatpush.bf16.msra.mxu0 %v21994_v45  ;;  %v23744_v45 = vpop.f32.mrf.mxu3 }
 0x25f   : > { %6040 = vmatpush.bf16.msra.mxu1 %v22002_v14  ;;  %v22102_v14 = vld [vmem:[#allocation4 + $0x428] sm:$0xff] }
 0x260   : > { %6475 = vmatpush.bf16.msra.mxu2 %v22070_v46  ;;  %v22110_v46 = vld [vmem:[#allocation4 + $0x468] sm:$0xff] }
 0x261   : > { %6489 = vmatpush.bf16.msra.mxu3 %v22078_v49  ;;  %v4082_v49 = vadd.f32 %v23704_v53, %v4068_v41  ;;  %v22092_v53 = vld [vmem:[#allocation4 + $0x3d8] sm:$0xff] }
 0x262   : > { %6027 = vmatpush.bf16.msra.mxu0 %v21993_v50  ;;  %v23747_v50 = vpop.f32.mrf.mxu2 }
 0x263   : > { %6041 = vmatpush.bf16.msra.mxu1 %v22001_v54  ;;  %v22085_v54 = vld [vmem:[#allocation4 + $0x3a0] sm:$0xff] }
 0x264   : > { %6476 = vmatpush.bf16.msra.mxu2 %v22069_v55  ;;  %v22093_v55 = vld [vmem:[#allocation4 + $0x3e0] sm:$0xff] }
 0x265   : > { %6490 = vmatpush.bf16.msra.mxu3 %v22077_v58  ;;  %v23749_v58 = vpop.f32.mrf.mxu0 }
 0x266   : > { %6028 = vmatpush.bf16.msra.mxu0 %v21992_v0  ;;  %v22109_v0 = vld [vmem:[#allocation4 + $0x460] sm:$0xff] }
 0x267   : > { %6042 = vmatpush.bf16.msra.mxu1 %v22000_v1  ;;  %v4096_v1 = vadd.f32 %v23710_v37, %v4082_v49  ;;  %v22099_v37 = vld [vmem:[#allocation4 + $0x410] sm:$0xff] }
 0x268   : > { %6477 = vmatpush.bf16.msra.mxu2 %v22068_v12  ;;  %v22084_v12 = vld [vmem:[#allocation4 + $0x398] sm:$0xff] }
 0x269   : > { %6491 = vmatpush.bf16.msra.mxu3 %v22076_v36  ;;  %v23754_v36 = vpop.f32.mrf.mxu3 }
 0x26a   : > { %6029 = vmatpush.bf16.msra.mxu0 %v21991_v10  ;;  %v22100_v10 = vld [vmem:[#allocation4 + $0x418] sm:$0xff] }
 0x26b   : > { %6043 = vmatpush.bf16.msra.mxu1 %v21999_v40  ;;  %v22108_v40 = vld [vmem:[#allocation4 + $0x458] sm:$0xff] }
 0x26c   : > { %6478 = vmatpush.bf16.msra.mxu2 %v22067_v3  ;;  %v4070_v3 = vadd.f32 %v23708_v16, %v23706_v59  ;;  %v22082_v59 = vld [vmem:[#allocation4 + $0x388] sm:$0xff] }
 0x26d   : > { %6492 = vmatpush.bf16.msra.mxu3 %v22075_v8  ;;  %v4110_v8 = vadd.f32 %v23714_v63, %v4096_v1  ;;  %v22090_v16 = vld [vmem:[#allocation4 + $0x3c8] sm:$0xff]  ;;  %v22203_v1 = vld [vmem:[#allocation4 + $0x270] sm:$0xff] }
 0x26e   : > { %6030 = vmatpush.bf16.msra.mxu0 %v21990_v15  ;;  %v22083_v15 = vld [vmem:[#allocation4 + $0x390] sm:$0xff]  ;;  %v22098_v63 = vld [vmem:[#allocation4 + $0x408] sm:$0xff] }
 0x26f   : > { %6044 = vmatpush.bf16.msra.mxu1 %v21998_v29  ;;  %v22091_v29 = vld [vmem:[#allocation4 + $0x3d0] sm:$0xff] }
 0x270   : > { %6479 = vmatpush.bf16.msra.mxu2 %v22066_v6  ;;  %v22107_v6 = vld [vmem:[#allocation4 + $0x450] sm:$0xff] }
 0x271   : > { %6493 = vmatpush.bf16.msra.mxu3 %v22074_v18  ;;  %v23763_v11 = vpop.f32.mrf.mxu3 }
 0x272   : > { %6031 = vmatpush.bf16.msra.mxu0 %v21989_v47  ;;  %v4959_v18 = vpop.f32.mrf.mxu0 }
 0x273   : > { %6045 = vmatpush.bf16.msra.mxu1 %v21997_v48  ;;  %v4973_v47 = vpop.f32.mrf.mxu1  ;;  %v23759_v48 = vpop.f32.mrf.mxu2 }
 0x274   : > { %6480 = vmatpush.bf16.msra.mxu2 %v22065_v19  ;;  %v4084_v19 = vadd.f32 %v23712_v22, %v4070_v3  ;;  %v22097_v22 = vld [vmem:[#allocation4 + $0x400] sm:$0xff]  ;;  %v22194_v3 = vld [vmem:[#allocation4 + $0x228] sm:$0xff] }
 0x275   : > { %6494 = vmatpush.bf16.msra.mxu3 %v22073_v7  ;;  %6032 = vmatmul.bf16.vlgmr.msra.gmra.mxu0 %v17365_v30  ;;  %v4124_v7 = vadd.f32 %v23716_v23, %v4110_v8  ;;  %v22061_v30 = vld [vmem:[%s23413_s28 + $0x104] sm:$0xf]  ;;  %v22202_v8 = vld [vmem:[#allocation4 + $0x268] sm:$0xff] }
 0x276   : > { %6501 = vmatpush.bf16.msrb.mxu0 %v22088_v24  ;;  %6046 = vmatmul.bf16.vlgmr.msra.gmra.mxu1 %v17369_v9  ;;  %v22106_v24 = vld [vmem:[#allocation4 + $0x448] sm:$0xff]  ;;  %v4098_v23 = vadd.f32 %v23718_v5, %v4084_v19  ;;  %v22177_v19 = vld [vmem:[#allocation4 + $0x1a0] sm:$0xff] }
 0x277   : > { %6515 = vmatpush.bf16.msrb.mxu1 %v22096_v56  ;;  %6481 = vmatmul.bf16.vlgmr.msra.gmra.mxu2 %v17571_v32  ;;  %v22081_v56 = vld [vmem:[#allocation4 + $0x380] sm:$0xff]  ;;  %v4456_v25 = vadd.f32 %v23720_v57, %v4124_v7  ;;  %v4974_v32 = vadd.f32 %v4973_v47, %v4959_v18 }
 0x278   : > { %6529 = vmatpush.bf16.msrb.mxu2 %v22104_v28  ;;  %6495 = vmatmul.bf16.vlgmr.msra.gmra.mxu3 %v17575_v33  ;;  %v17578_v28 = vld [vmem:[%s23413_s28 + $0xf8] sm:$0xf]  ;;  %v4112_v9 = vadd.f32 %v23722_v52, %v4098_v23  ;;  %v17588_v33 = vld [vmem:[%s23413_s28 + $0x128] sm:$0xf0]  ;;  %v17580_v57 = vld [vmem:[%s23413_s28 + $0x120] sm:$0xf0] }
 0x279   : > { %6543 = vmatpush.bf16.msrb.mxu3 %v22112_v21  ;;  %v22063_v21 = vld [vmem:[%s23413_s28 + $0x11c] sm:$0xf0]  ;;  %v22200_v23 = vld [vmem:[#allocation4 + $0x258] sm:$0xff] }
 0x27a   : > { %6502 = vmatpush.bf16.msrb.mxu0 %v22087_v61  ;;  %v22060_v61 = vld [vmem:[%s23413_s28 + $0xfc] sm:$0xf]  ;;  %v4126_v52 = vadd.f32 %v23724_v17, %v4112_v9  ;;  %v22185_v7 = vld [vmem:[#allocation4 + $0x1e0] sm:$0xff]  ;;  %v22191_v9 = vld [vmem:[#allocation4 + $0x210] sm:$0xff] }
 0x27b   : > { %6516 = vmatpush.bf16.msrb.mxu1 %v22095_v35  ;;  %v4987_v5 = vpop.f32.mrf.mxu2  ;;  %v22196_v35 = vld [vmem:[#allocation4 + $0x238] sm:$0xff]  ;;  %v4975_v41 = vpop.f32.mrf.mxu1  ;;  %v17583_v49 = vor.u32 %v22060_v61, %v17580_v57  ;;  %v22174_v57 = vld [vmem:[#allocation4 + $0x188] sm:$0xff] }
 0x27c   : > { %6530 = vmatpush.bf16.msrb.mxu2 %v22103_v38  ;;  %v22204_v38 = vld [vmem:[#allocation4 + $0x278] sm:$0xff] }
 0x27d   : > { %6544 = vmatpush.bf16.msrb.mxu3 %v22111_v39  ;;  %v4961_v39 = vpop.f32.mrf.mxu0 }
 0x27e   : > { %6503 = vmatpush.bf16.msrb.mxu0 %v22086_v42  ;;  %v4470_v42 = vadd.f32 %v23728_v4, %v4456_v25  ;;  %v22195_v4 = vld [vmem:[#allocation4 + $0x230] sm:$0xff] }
 0x27f   : > { %6517 = vmatpush.bf16.msrb.mxu1 %v22094_v43  ;;  %v17587_v43 = vor.u32 %v22064_v2, %v17586_v27 }
 0x280   : > { %6531 = vmatpush.bf16.msrb.mxu2 %v22102_v14  ;;  %v17579_v14 = vor.u32 %v22063_v21, %v17578_v28  ;;  %v22175_v21 = vld [vmem:[#allocation4 + $0x190] sm:$0xff] }
 0x281   : > { %6545 = vmatpush.bf16.msrb.mxu3 %v22110_v46  ;;  %v17591_v46 = vor.u32 %v22061_v30, %v17588_v33  ;;  %v22183_v30 = vld [vmem:[#allocation4 + $0x1d0] sm:$0xff] }
 0x282   : > { %6504 = vmatpush.bf16.msrb.mxu0 %v22085_v54  ;;  %v4484_v54 = vadd.f32 %v23736_v51, %v4470_v42  ;;  %v22181_v42 = vld [vmem:[#allocation4 + $0x1c0] sm:$0xff] }
 0x283   : > { %6518 = vmatpush.bf16.msrb.mxu1 %v22093_v55  ;;  %v4988_v55 = vadd.f32 %v4987_v5, %v4974_v32 }
 0x284   : > { %6532 = vmatpush.bf16.msrb.mxu2 %v22101_v20  ;;  %v22179_v20 = vld [vmem:[#allocation4 + $0x1b0] sm:$0xff]  ;;  %v4498_v17 = vadd.f32 %v23738_v31, %v4484_v54  ;;  %v17798_v54 = vld [vmem:[%s23413_s28 + $0xa8] sm:$0xf] }
 0x285   : > { %6546 = vmatpush.bf16.msrb.mxu3 %v22109_v0  ;;  %v22187_v0 = vld [vmem:[#allocation4 + $0x1f0] sm:$0xff] }
 0x286   : > { %6505 = vmatpush.bf16.msrb.mxu0 %v22084_v12  ;;  %v5001_v12 = vpop.f32.mrf.mxu3 }
 0x287   : > { %6519 = vmatpush.bf16.msrb.mxu1 %v22092_v53  ;;  %v4458_v53 = vadd.f32 %v23740_v34, %v4126_v52  ;;  %v5002_v51 = vadd.f32 %v5001_v12, %v4988_v55  ;;  %v4976_v34 = vadd.f32 %v4975_v41, %v4961_v39  ;;  %v22198_v39 = vld [vmem:[#allocation4 + $0x248] sm:$0xff]  ;;  %v22220_v52 = vld [vmem:[#allocation4 + $0x2f8] sm:$0xff]  ;;  %v22170_v55 = vld [vmem:[%s23413_s28 + $0xcc] sm:$0xf0] }
 0x288   : > { %6533 = vmatpush.bf16.msrb.mxu2 %v22100_v10  ;;  %v22178_v10 = vld [vmem:[#allocation4 + $0x1a8] sm:$0xff]  ;;  %v17800_v12 = vld [vmem:[%s23413_s28 + $0xd0] sm:$0xf0] }
 0x289   : > { %6547 = vmatpush.bf16.msrb.mxu3 %v22108_v40  ;;  %v22186_v40 = vld [vmem:[#allocation4 + $0x1e8] sm:$0xff] }
 0x28a   : > { %6506 = vmatpush.bf16.msrb.mxu0 %v22083_v15  ;;  %v4472_v15 = vadd.f32 %v23744_v45, %v4458_v53  ;;  %v22168_v53 = vld [vmem:[%s23413_s28 + $0xb4] sm:$0xf] }
 0x28b   : > { %6520 = vmatpush.bf16.msrb.mxu1 %v22091_v29  ;;  %v4512_v29 = vadd.f32 %v23747_v50, %v4498_v17  ;;  %v17808_v17 = vld [vmem:[%s23413_s28 + $0xd8] sm:$0xf0] }
 0x28c   : > { %6534 = vmatpush.bf16.msrb.mxu2 %v22099_v37  ;;  %v4989_v37 = vpop.f32.mrf.mxu2  ;;  %v4486_v47 = vadd.f32 %v23749_v58, %v4472_v15  ;;  %v22176_v58 = vld [vmem:[#allocation4 + $0x198] sm:$0xff]  ;;  %v17811_v15 = vor.u32 %v22168_v53, %v17808_v17  ;;  %v22139_v17 = vld [vmem:[#allocation4 + $0xa0] sm:$0xff] }
 0x28d   : > { %6548 = vmatpush.bf16.msrb.mxu3 %v22107_v6  ;;  %v4990_v45 = vadd.f32 %v4989_v37, %v4976_v34  ;;  %v22219_v34 = vld [vmem:[#allocation4 + $0x2f0] sm:$0xff] }
 0x28e   : > { %6507 = vmatpush.bf16.msrb.mxu0 %v22082_v59  ;;  %v22193_v59 = vld [vmem:[#allocation4 + $0x220] sm:$0xff]  ;;  %v5003_v50 = vpop.f32.mrf.mxu3  ;;  %v22125_v37 = vld [vmem:[#allocation4 + $0x30] sm:$0xff] }
 0x28f   : > { %6521 = vmatpush.bf16.msrb.mxu1 %v22090_v16  ;;  %v22201_v16 = vld [vmem:[#allocation4 + $0x260] sm:$0xff] }
 0x290   : > { %6535 = vmatpush.bf16.msrb.mxu2 %v22098_v63  ;;  %v4526_v63 = vadd.f32 %v23754_v36, %v4512_v29  ;;  %v23790_v36 = vld [vmem:[%s24634_s2] ss:$0 sm:$0xff]  ;;  %v22211_v29 = vld [vmem:[#allocation4 + $0x2b0] sm:$0xff] }
 0x291   : > { %6549 = vmatpush.bf16.msrb.mxu3 %v22106_v24 }
 0x292   : > { %6508 = vmatpush.bf16.msrb.mxu0 %v22081_v56  ;;  %v5015_v6 = vpop.f32.mrf.mxu0  ;;  %v4500_v56 = vadd.f32 %v23751_v60, %v4486_v47  ;;  %v22218_v47 = vld [vmem:[#allocation4 + $0x2e8] sm:$0xff] }
 0x293   : > { %6522 = vmatpush.bf16.msrb.mxu1 %v22089_v26  ;;  %v5029_v18 = vpop.f32.mrf.mxu1  ;;  %v5016_v31 = vadd.f32 %v5015_v6, %v5002_v51  ;;  %v22126_v51 = vld [vmem:[#allocation4 + $0x38] sm:$0xff]  ;;  %v22133_v6 = vld [vmem:[#allocation4 + $0x70] sm:$0xff] }
 0x294   : > { %6536 = vmatpush.bf16.msrb.mxu2 %v22097_v22  ;;  %v22184_v22 = vld [vmem:[#allocation4 + $0x1d8] sm:$0xff]  ;;  %v4514_v25 = vadd.f32 %v23759_v48, %v4500_v56  ;;  %v22199_v48 = vld [vmem:[#allocation4 + $0x250] sm:$0xff] }
 0x295   : > { %6550 = vmatpush.bf16.msrb.mxu3 %v22105_v62  ;;  %6509 = vmatmul.bf16.vlgmr.msrb.gmra.mxu0 %v17579_v14  ;;  %v5030_v24 = vadd.f32 %v5029_v18, %v5016_v31  ;;  %v22192_v62 = vld [vmem:[#allocation4 + $0x218] sm:$0xff]  ;;  %v22197_v14 = vld [vmem:[#allocation4 + $0x240] sm:$0xff]  ;;  %v22210_v18 = vld [vmem:[#allocation4 + $0x2a8] sm:$0xff] }
 0x296   : > { %7089 = vmatpush.bf16.msra.mxu0 %v22180_v44  ;;  %6523 = vmatmul.bf16.vlgmr.msrb.gmra.mxu1 %v17583_v49  ;;  %v5004_v44 = vadd.f32 %v5003_v50, %v4990_v45  ;;  %v4528_v32 = vadd.f32 %v23763_v11, %v4514_v25  ;;  %v22173_v11 = vld [vmem:[#allocation4 + $0x180] sm:$0xff]  ;;  %v22212_v49 = vld [vmem:[#allocation4 + $0x2b8] sm:$0xff]  ;;  %v22124_v31 = vld [vmem:[#allocation4 + $0x28] sm:$0xff] }
 0x297   : > { %7103 = vmatpush.bf16.msra.mxu1 %v22188_v13  ;;  %6537 = vmatmul.bf16.vlgmr.msrb.gmra.mxu2 %v17587_v43  ;;  %v5034_v26 = vadd.f32 %v5030_v24, %v4526_v63  ;;  %v22189_v43 = vld [vmem:[#allocation4 + $0x200] sm:$0xff]  ;;  %v22208_v45 = vld [vmem:[#allocation4 + $0x298] sm:$0xff]  ;;  %v22214_v25 = vld [vmem:[#allocation4 + $0x2c8] sm:$0xff] }
 0x298   : > { %7117 = vmatpush.bf16.msra.mxu2 %v22196_v35  ;;  %6551 = vmatmul.bf16.vlgmr.msrb.gmra.mxu3 %v17591_v46  ;;  %v22182_v35 = vld [vmem:[#allocation4 + $0x1c8] sm:$0xff]  ;;  %v22131_v63 = vld [vmem:[#allocation4 + $0x60] sm:$0xff]  ;;  %v22216_v24 = vld [vmem:[#allocation4 + $0x2d8] sm:$0xff] }
 0x299   : > { %7131 = vmatpush.bf16.msra.mxu3 %v22204_v38  ;;  %v5036_v13 = vadd.f32 %v23790_v36, %v5034_v26  ;;  %v22190_v38 = vld [vmem:[#allocation4 + $0x208] sm:$0xff]  ;;  %v22122_v50 = vld [vmem:[#allocation4 + $0x18] sm:$0xff]  ;;  %v22207_v26 = vld [vmem:[#allocation4 + $0x290] sm:$0xff] }
 0x29a   : > { %7090 = vmatpush.bf16.msra.mxu0 %v22179_v20  ;;  %v5017_v60 = vpop.f32.mrf.mxu0  ;;  %v17806_v20 = vld [vmem:[%s23413_s28 + $0xb0] sm:$0xf]  ;;  %v22130_v56 = vld [vmem:[#allocation4 + $0x58] sm:$0xff] }
 0x29b   : > { %7104 = vmatpush.bf16.msra.mxu1 %v22187_v0  ;;  %v5031_v27 = vpop.f32.mrf.mxu1  ;;  %v5038_v2 = vmax.f32 %v5036_v13, 0.0  ;;  %v5018_v28 = vadd.f32 %v5017_v60, %v5004_v44  ;;  %v22171_v0 = vld [vmem:[%s23413_s28 + $0xd4] sm:$0xf0]  ;;  %v22205_v60 = vld [vmem:[#allocation4 + $0x280] sm:$0xff] }
 0x29c   : > { %7118 = vmatpush.bf16.msra.mxu2 %v22195_v4  ;;  %v22167_v4 = vld [vmem:[%s23413_s28 + $0xac] sm:$0xf] }
 0x29d   : > { %7132 = vmatpush.bf16.msra.mxu3 %v22203_v1  ;;  %v5040_v5 = vpack.c.bf16 %v5038_v2, %v5038_v2  ;;  %v5032_v33 = vadd.f32 %v5031_v27, %v5018_v28  ;;  %v22120_v44 = vld [vmem:[#allocation4 + $0x8] sm:$0xff]  ;;  %v22213_v27 = vld [vmem:[#allocation4 + $0x2c0] sm:$0xff] }
 0x29e   : > { %7091 = vmatpush.bf16.msra.mxu0 %v22178_v10  ;;  %v22134_v10 = vld [vmem:[#allocation4 + $0x78] sm:$0xff]  ;;  %v22128_v13 = vld [vmem:[#allocation4 + $0x48] sm:$0xff]  ;;  %v22119_v2 = vld [vmem:[#allocation4] sm:$0xff] }
 0x29f   : > { %7105 = vmatpush.bf16.msra.mxu1 %v22186_v40  ;;  %5042 = vst [vmem:[#allocation2 + $0x8] sm:$0xf] %v5040_v5  ;;  %v5035_v61 = vadd.f32 %v5032_v33, %v4528_v32  ;;  %v17799_v40 = vor.u32 %v22170_v55, %v17798_v54  ;;  %v22127_v28 = vld [vmem:[#allocation4 + $0x40] sm:$0xff]  ;;  %v23805_v32 = vpop.f32.mrf.mxu2  ;;  %v18014_v5 = vld [vmem:[%s23413_s28 + $0x58] sm:$0xf]  ;;  %v22157_v54 = vld [vmem:[#allocation4 + $0x130] sm:$0xff] }
 0x2a0   : > { %7119 = vmatpush.bf16.msra.mxu2 %v22194_v3  ;;  %v17807_v3 = vor.u32 %v22171_v0, %v17806_v20  ;;  %v22116_v33 = vld [vmem:[%s23413_s28 + $0x7c] sm:$0xf0]  ;;  %v22140_v20 = vld [vmem:[#allocation4 + $0xa8] sm:$0xff] }
 0x2a1   : > { %7133 = vmatpush.bf16.msra.mxu3 %v22202_v8  ;;  %v5037_v41 = vadd.f32 %v23790_v36, %v5035_v61  ;;  %v17803_v8 = vor.u32 %v22167_v4, %v17800_v12  ;;  %v22169_v61 = vld [vmem:[%s23413_s28 + $0xbc] sm:$0xf]  ;;  %v22165_v55 = vld [vmem:[#allocation4 + $0x170] sm:$0xff] }
 0x2a2   : > { %7092 = vmatpush.bf16.msra.mxu0 %v22177_v19  ;;  %v22132_v19 = vld [vmem:[#allocation4 + $0x68] sm:$0xff] }
 0x2a3   : > { %7106 = vmatpush.bf16.msra.mxu1 %v22185_v7  ;;  %v5039_v46 = vmax.f32 %v5037_v41, 0.0  ;;  %v22209_v7 = vld [vmem:[#allocation4 + $0x2a0] sm:$0xff]  ;;  %v22158_v41 = vld [vmem:[#allocation4 + $0x138] sm:$0xff]  ;;  %v22148_v0 = vld [vmem:[#allocation4 + $0xe8] sm:$0xff] }
 0x2a4   : > { %7120 = vmatpush.bf16.msra.mxu2 %v22193_v59  ;;  %v22217_v59 = vld [vmem:[#allocation4 + $0x2e0] sm:$0xff]  ;;  %v22164_v12 = vld [vmem:[#allocation4 + $0x168] sm:$0xff] }
 0x2a5   : > { %7134 = vmatpush.bf16.msra.mxu3 %v22201_v16  ;;  %v5041_v1 = vpack.c.bf16 %v5039_v46, %v5039_v46  ;;  %v22123_v16 = vld [vmem:[#allocation4 + $0x20] sm:$0xff] }
 0x2a6   : > { %7093 = vmatpush.bf16.msra.mxu0 %v22176_v58  ;;  %v22215_v58 = vld [vmem:[#allocation4 + $0x2d0] sm:$0xff] }
 0x2a7   : > { %7107 = vmatpush.bf16.msra.mxu1 %v22184_v22  ;;  %5043 = vst [vmem:[#allocation2 + $0x2c] sm:$0xf] %v5041_v1  ;;  %v22121_v22 = vld [vmem:[#allocation4 + $0x10] sm:$0xff]  ;;  %v23815_v4 = vpop.f32.mrf.mxu2  ;;  %v22156_v1 = vld [vmem:[#allocation4 + $0x128] sm:$0xff] }
 0x2a8   : > { %7121 = vmatpush.bf16.msra.mxu2 %v22192_v62  ;;  %v22129_v62 = vld [vmem:[#allocation4 + $0x50] sm:$0xff] }
 0x2a9   : > { %7135 = vmatpush.bf16.msra.mxu3 %v22200_v23  ;;  %v22206_v23 = vld [vmem:[#allocation4 + $0x288] sm:$0xff] }
 0x2aa   : > { %7094 = vmatpush.bf16.msra.mxu0 %v22175_v21  ;;  %v22142_v21 = vld [vmem:[#allocation4 + $0xb8] sm:$0xff] }
 0x2ab   : > { %7108 = vmatpush.bf16.msra.mxu1 %v22183_v30  ;;  %v22150_v30 = vld [vmem:[#allocation4 + $0xf8] sm:$0xff] }
 0x2ac   : > { %7122 = vmatpush.bf16.msra.mxu2 %v22191_v9  ;;  %v17814_v9 = vld [vmem:[%s23413_s28 + $0xb8] sm:$0xf] }
 0x2ad   : > { %7136 = vmatpush.bf16.msra.mxu3 %v22199_v48  ;;  %v22172_v48 = vld [vmem:[%s23413_s28 + $0xdc] sm:$0xf0] }
 0x2ae   : > { %7095 = vmatpush.bf16.msra.mxu0 %v22174_v57  ;;  %v23810_v57 = vpop.f32.mrf.mxu3 }
 0x2af   : > { %7109 = vmatpush.bf16.msra.mxu1 %v22182_v35  ;;  %v17816_v35 = vld [vmem:[%s23413_s28 + $0xe0] sm:$0xf0] }
 0x2b0   : > { %7123 = vmatpush.bf16.msra.mxu2 %v22190_v38  ;;  %v22113_v38 = vld [vmem:[%s23413_s28 + $0x5c] sm:$0xf] }
 0x2b1   : > { %7137 = vmatpush.bf16.msra.mxu3 %v22198_v39  ;;  %v18016_v39 = vld [vmem:[%s23413_s28 + $0x80] sm:$0xf0] }
 0x2b2   : > { %7096 = vmatpush.bf16.msra.mxu0 %v22173_v11  ;;  %v22166_v11 = vld [vmem:[#allocation4 + $0x178] sm:$0xff]  ;;  %v18019_v46 = vor.u32 %v22113_v38, %v18016_v39  ;;  %v22233_v39 = vld [vmem:[#allocation4 + $0x330] sm:$0xff] }
 0x2b3   : > { %7110 = vmatpush.bf16.msra.mxu1 %v22181_v42  ;;  %v17815_v42 = vor.u32 %v22172_v48, %v17814_v9  ;;  %v18032_v9 = vld [vmem:[%s23413_s28 + $0x90] sm:$0xf0]  ;;  %v22250_v48 = vld [vmem:[#allocation4 + $0x3b8] sm:$0xff] }
 0x2b4   : > { %7124 = vmatpush.bf16.msra.mxu2 %v22189_v43  ;;  %v18015_v43 = vor.u32 %v22116_v33, %v18014_v5  ;;  %v22258_v5 = vld [vmem:[#allocation4 + $0x3f8] sm:$0xff] }
 0x2b5   : > { %7138 = vmatpush.bf16.msra.mxu3 %v22197_v14  ;;  %7097 = vmatmul.bf16.vlgmr.msra.gmra.mxu0 %v17799_v40  ;;  %v17819_v14 = vor.u32 %v22169_v61, %v17816_v35  ;;  %v22163_v40 = vld [vmem:[#allocation4 + $0x160] sm:$0xff] }
 0x2b6   : > { %7145 = vmatpush.bf16.msrb.mxu0 %v22212_v49  ;;  %7111 = vmatmul.bf16.vlgmr.msra.gmra.mxu1 %v17803_v8  ;;  %v22141_v49 = vld [vmem:[#allocation4 + $0xb0] sm:$0xff]  ;;  %v23817_v53 = vpop.f32.mrf.mxu3  ;;  %v23821_v8 = vpop.f32.mrf.mxu1 }
 0x2b7   : > { %7159 = vmatpush.bf16.msrb.mxu1 %v22220_v52  ;;  %7125 = vmatmul.bf16.vlgmr.msra.gmra.mxu2 %v17807_v3  ;;  %v22149_v52 = vld [vmem:[#allocation4 + $0xf0] sm:$0xff]  ;;  %v23819_v3 = vpop.f32.mrf.mxu0 }
 0x2b8   : > { %7491 = vmatpush.bf16.msrb.mxu2 %v22126_v51  ;;  %7139 = vmatmul.bf16.vlgmr.msra.gmra.mxu3 %v17811_v15  ;;  %v22147_v51 = vld [vmem:[#allocation4 + $0xe0] sm:$0xff]  ;;  %v22138_v15 = vld [vmem:[#allocation4 + $0x98] sm:$0xff] }
 0x2b9   : > { %7505 = vmatpush.bf16.msrb.mxu3 %v22134_v10  ;;  %v22155_v10 = vld [vmem:[#allocation4 + $0x120] sm:$0xff] }
 0x2ba   : > { %7146 = vmatpush.bf16.msrb.mxu0 %v22211_v29  ;;  %v22146_v29 = vld [vmem:[#allocation4 + $0xd8] sm:$0xff] }
 0x2bb   : > { %7160 = vmatpush.bf16.msrb.mxu1 %v22219_v34  ;;  %v22154_v34 = vld [vmem:[#allocation4 + $0x118] sm:$0xff] }
 0x2bc   : > { %7492 = vmatpush.bf16.msrb.mxu2 %v22125_v37  ;;  %v22162_v37 = vld [vmem:[#allocation4 + $0x158] sm:$0xff] }
 0x2bd   : > { %7506 = vmatpush.bf16.msrb.mxu3 %v22133_v6  ;;  %v23823_v6 = vpop.f32.mrf.mxu2 }
 0x2be   : > { %7147 = vmatpush.bf16.msrb.mxu0 %v22210_v18  ;;  %v23825_v18 = vpop.f32.mrf.mxu3 }
 0x2bf   : > { %7161 = vmatpush.bf16.msrb.mxu1 %v22218_v47  ;;  %v22137_v47 = vld [vmem:[#allocation4 + $0x90] sm:$0xff] }
 0x2c0   : > { %7493 = vmatpush.bf16.msrb.mxu2 %v22124_v31  ;;  %v22145_v31 = vld [vmem:[#allocation4 + $0xd0] sm:$0xff] }
 0x2c1   : > { %7507 = vmatpush.bf16.msrb.mxu3 %v22132_v19  ;;  %v22153_v19 = vld [vmem:[#allocation4 + $0x110] sm:$0xff] }
 0x2c2   : > { %7148 = vmatpush.bf16.msrb.mxu0 %v22209_v7  ;;  %v22161_v7 = vld [vmem:[#allocation4 + $0x150] sm:$0xff] }
 0x2c3   : > { %7162 = vmatpush.bf16.msrb.mxu1 %v22217_v59  ;;  %v22136_v59 = vld [vmem:[#allocation4 + $0x88] sm:$0xff] }
 0x2c4   : > { %7494 = vmatpush.bf16.msrb.mxu2 %v22123_v16  ;;  %v22144_v16 = vld [vmem:[#allocation4 + $0xc8] sm:$0xff] }
 0x2c5   : > { %7508 = vmatpush.bf16.msrb.mxu3 %v22131_v63  ;;  %v23827_v63 = vpop.f32.mrf.mxu0 }
 0x2c6   : > { %7149 = vmatpush.bf16.msrb.mxu0 %v22208_v45  ;;  %v22152_v45 = vld [vmem:[#allocation4 + $0x108] sm:$0xff] }
 0x2c7   : > { %7163 = vmatpush.bf16.msrb.mxu1 %v22216_v24  ;;  %v22160_v24 = vld [vmem:[#allocation4 + $0x148] sm:$0xff] }
 0x2c8   : > { %7495 = vmatpush.bf16.msrb.mxu2 %v22122_v50  ;;  %v23829_v50 = vpop.f32.mrf.mxu1 }
 0x2c9   : > { %7509 = vmatpush.bf16.msrb.mxu3 %v22130_v56  ;;  %v22135_v56 = vld [vmem:[#allocation4 + $0x80] sm:$0xff] }
 0x2ca   : > { %7150 = vmatpush.bf16.msrb.mxu0 %v22207_v26  ;;  %v22143_v26 = vld [vmem:[#allocation4 + $0xc0] sm:$0xff] }
 0x2cb   : > { %7164 = vmatpush.bf16.msrb.mxu1 %v22215_v58  ;;  %v22151_v58 = vld [vmem:[#allocation4 + $0x100] sm:$0xff] }
 0x2cc   : > { %7496 = vmatpush.bf16.msrb.mxu2 %v22121_v22  ;;  %v22159_v22 = vld [vmem:[#allocation4 + $0x140] sm:$0xff] }
 0x2cd   : > { %7510 = vmatpush.bf16.msrb.mxu3 %v22129_v62  ;;  %v22234_v62 = vld [vmem:[#allocation4 + $0x338] sm:$0xff] }
 0x2ce   : > { %7151 = vmatpush.bf16.msrb.mxu0 %v22206_v23  ;;  %v22242_v23 = vld [vmem:[#allocation4 + $0x378] sm:$0xff] }
 0x2cf   : > { %7165 = vmatpush.bf16.msrb.mxu1 %v22214_v25  ;;  %v18022_v25 = vld [vmem:[%s23413_s28 + $0x60] sm:$0xf] }
 0x2d0   : > { %7497 = vmatpush.bf16.msrb.mxu2 %v22120_v44  ;;  %v22117_v44 = vld [vmem:[%s23413_s28 + $0x84] sm:$0xf0] }
 0x2d1   : > { %7511 = vmatpush.bf16.msrb.mxu3 %v22128_v13  ;;  %v23833_v13 = vpop.f32.mrf.mxu2  ;;  %v18023_v33 = vor.u32 %v22117_v44, %v18022_v25 }
 0x2d2   : > { %7152 = vmatpush.bf16.msrb.mxu0 %v22205_v60  ;;  %v18030_v60 = vld [vmem:[%s23413_s28 + $0x68] sm:$0xf] }
 0x2d3   : > { %7166 = vmatpush.bf16.msrb.mxu1 %v22213_v27  ;;  %v22118_v27 = vld [vmem:[%s23413_s28 + $0x8c] sm:$0xf0] }
 0x2d4   : > { %7498 = vmatpush.bf16.msrb.mxu2 %v22119_v2  ;;  %v22114_v2 = vld [vmem:[%s23413_s28 + $0x64] sm:$0xf]  ;;  %v18031_v61 = vor.u32 %v22118_v27, %v18030_v60  ;;  %v22266_v60 = vld [vmem:[#allocation4 + $0x438] sm:$0xff] }
 0x2d5   : > { %7512 = vmatpush.bf16.msrb.mxu3 %v22127_v28  ;;  %7153 = vmatmul.bf16.vlgmr.msrb.gmra.mxu0 %v17815_v42  ;;  %v23838_v28 = vpop.f32.mrf.mxu3  ;;  %v22249_v42 = vld [vmem:[#allocation4 + $0x3b0] sm:$0xff]  ;;  %v22274_v27 = vld [vmem:[#allocation4 + $0x478] sm:$0xff] }
 0x2d6   : > { %7519 = vmatpush.bf16.msra.mxu0 %v22142_v21  ;;  %7167 = vmatmul.bf16.vlgmr.msrb.gmra.mxu1 %v17819_v14  ;;  %v18024_v21 = vld [vmem:[%s23413_s28 + $0x88] sm:$0xf0]  ;;  %v23845_v14 = vpop.f32.mrf.mxu1 }
 0x2d7   : > { %7533 = vmatpush.bf16.msra.mxu1 %v22150_v30  ;;  %7499 = vmatmul.bf16.vlgmr.msrb.gmra.mxu2 %v18015_v43  ;;  %v22115_v30 = vld [vmem:[%s23413_s28 + $0x6c] sm:$0xf]  ;;  %v18027_v35 = vor.u32 %v22114_v2, %v18024_v21  ;;  %v22257_v43 = vld [vmem:[#allocation4 + $0x3f0] sm:$0xff]  ;;  %v18236_v21 = vld [vmem:[%s23413_s28 + $0xf8] sm:$0xf] }
 0x2d8   : > { %7547 = vmatpush.bf16.msra.mxu2 %v22158_v41  ;;  %7513 = vmatmul.bf16.vlgmr.msrb.gmra.mxu3 %v18019_v46  ;;  %v18035_v38 = vor.u32 %v22115_v30, %v18032_v9  ;;  %v22241_v41 = vld [vmem:[#allocation4 + $0x370] sm:$0xff]  ;;  %v22232_v46 = vld [vmem:[#allocation4 + $0x328] sm:$0xff] }
 0x2d9   : > { %7561 = vmatpush.bf16.msra.mxu3 %v22166_v11  ;;  %v23843_v11 = vpop.f32.mrf.mxu0  ;;  %v22224_v30 = vld [vmem:[%s23413_s28 + $0x11c] sm:$0xf0]  ;;  %v18238_v9 = vld [vmem:[%s23413_s28 + $0x120] sm:$0xf0] }
 0x2da   : > { %7520 = vmatpush.bf16.msra.mxu0 %v22141_v49  ;;  %v22240_v49 = vld [vmem:[#allocation4 + $0x368] sm:$0xff] }
 0x2db   : > { %7534 = vmatpush.bf16.msra.mxu1 %v22149_v52  ;;  %v23847_v52 = vpop.f32.mrf.mxu2 }
 0x2dc   : > { %7548 = vmatpush.bf16.msra.mxu2 %v22157_v54  ;;  %v22248_v54 = vld [vmem:[#allocation4 + $0x3a8] sm:$0xff] }
 0x2dd   : > { %7562 = vmatpush.bf16.msra.mxu3 %v22165_v55  ;;  %v22256_v55 = vld [vmem:[#allocation4 + $0x3e8] sm:$0xff] }
 0x2de   : > { %7521 = vmatpush.bf16.msra.mxu0 %v22140_v20  ;;  %v23849_v20 = vpop.f32.mrf.mxu3 }
 0x2df   : > { %7535 = vmatpush.bf16.msra.mxu1 %v22148_v0  ;;  %v5590_v0 = vadd.f32 %v23810_v57, %v23805_v32  ;;  %v22246_v32 = vld [vmem:[#allocation4 + $0x398] sm:$0xff] }
 0x2e0   : > { %7549 = vmatpush.bf16.msra.mxu2 %v22156_v1  ;;  %v22231_v1 = vld [vmem:[#allocation4 + $0x320] sm:$0xff]  ;;  %v22254_v57 = vld [vmem:[#allocation4 + $0x3d8] sm:$0xff] }
 0x2e1   : > { %7563 = vmatpush.bf16.msra.mxu3 %v22164_v12  ;;  %v22239_v12 = vld [vmem:[#allocation4 + $0x360] sm:$0xff] }
 0x2e2   : > { %7522 = vmatpush.bf16.msra.mxu0 %v22139_v17  ;;  %v22247_v17 = vld [vmem:[#allocation4 + $0x3a0] sm:$0xff] }
 0x2e3   : > { %7536 = vmatpush.bf16.msra.mxu1 %v22147_v51  ;;  %v22255_v51 = vld [vmem:[#allocation4 + $0x3e0] sm:$0xff] }
 0x2e4   : > { %7550 = vmatpush.bf16.msra.mxu2 %v22155_v10  ;;  %v23853_v10 = vpop.f32.mrf.mxu0 }
 0x2e5   : > { %7564 = vmatpush.bf16.msra.mxu3 %v22163_v40  ;;  %v5604_v40 = vadd.f32 %v23819_v3, %v5590_v0  ;;  %v22237_v3 = vld [vmem:[#allocation4 + $0x350] sm:$0xff] }
 0x2e6   : > { %7523 = vmatpush.bf16.msra.mxu0 %v22138_v15  ;;  %v23856_v15 = vpop.f32.mrf.mxu1  ;;  %v22341_v0 = vld [vmem:[#allocation4 + $0x1b0] sm:$0xff] }
 0x2e7   : > { %7537 = vmatpush.bf16.msra.mxu1 %v22146_v29  ;;  %v22230_v29 = vld [vmem:[#allocation4 + $0x318] sm:$0xff] }
 0x2e8   : > { %7551 = vmatpush.bf16.msra.mxu2 %v22154_v34  ;;  %v22238_v34 = vld [vmem:[#allocation4 + $0x358] sm:$0xff] }
 0x2e9   : > { %7565 = vmatpush.bf16.msra.mxu3 %v22162_v37  ;;  %v23858_v37 = vpop.f32.mrf.mxu2 }
 0x2ea   : > { %7524 = vmatpush.bf16.msra.mxu0 %v22137_v47  ;;  %v5618_v47 = vadd.f32 %v23821_v8, %v5604_v40  ;;  %v22228_v8 = vld [vmem:[#allocation4 + $0x308] sm:$0xff] }
 0x2eb   : > { %7538 = vmatpush.bf16.msra.mxu1 %v22145_v31  ;;  %v23861_v31 = vpop.f32.mrf.mxu3  ;;  %v22264_v40 = vld [vmem:[#allocation4 + $0x428] sm:$0xff] }
 0x2ec   : > { %7552 = vmatpush.bf16.msra.mxu2 %v22153_v19  ;;  %v22229_v19 = vld [vmem:[#allocation4 + $0x310] sm:$0xff] }
 0x2ed   : > { %7566 = vmatpush.bf16.msra.mxu3 %v22161_v7  ;;  %v22245_v7 = vld [vmem:[#allocation4 + $0x390] sm:$0xff] }
 0x2ee   : > { %7525 = vmatpush.bf16.msra.mxu0 %v22136_v59  ;;  %v22253_v59 = vld [vmem:[#allocation4 + $0x3d0] sm:$0xff] }
 0x2ef   : > { %7539 = vmatpush.bf16.msra.mxu1 %v22144_v16  ;;  %v5592_v16 = vadd.f32 %v23817_v53, %v23815_v4  ;;  %v22235_v53 = vld [vmem:[#allocation4 + $0x340] sm:$0xff] }
 0x2f0   : > { %7553 = vmatpush.bf16.msra.mxu2 %v22152_v45 }
 0x2f1   : > { %7567 = vmatpush.bf16.msra.mxu3 %v22160_v24  ;;  %v5632_v24 = vadd.f32 %v23823_v6, %v5618_v47  ;;  %v5606_v4 = vadd.f32 %v23827_v63, %v5592_v16  ;;  %v22243_v6 = vld [vmem:[#allocation4 + $0x380] sm:$0xff]  ;;  %v22221_v63 = vld [vmem:[%s23413_s28 + $0xfc] sm:$0xf] }
 0x2f2   : > { %7526 = vmatpush.bf16.msra.mxu0 %v22135_v56  ;;  %v23865_v45 = vpop.f32.mrf.mxu0 }
 0x2f3   : > { %7540 = vmatpush.bf16.msra.mxu1 %v22143_v26  ;;  %v23868_v56 = vpop.f32.mrf.mxu1  ;;  %v22236_v26 = vld [vmem:[#allocation4 + $0x348] sm:$0xff]  ;;  %v5646_v44 = vadd.f32 %v23825_v18, %v5632_v24  ;;  %v22339_v24 = vld [vmem:[#allocation4 + $0x1a0] sm:$0xff] }
 0x2f4   : > { %7554 = vmatpush.bf16.msra.mxu2 %v22151_v58  ;;  %v22244_v58 = vld [vmem:[#allocation4 + $0x388] sm:$0xff] }
 0x2f5   : > { %7568 = vmatpush.bf16.msra.mxu3 %v22159_v22  ;;  %7527 = vmatmul.bf16.vlgmr.msra.gmra.mxu0 %v18023_v33  ;;  %v22252_v22 = vld [vmem:[#allocation4 + $0x3c8] sm:$0xff]  ;;  %v22222_v33 = vld [vmem:[%s23413_s28 + $0x104] sm:$0xf]  ;;  %v5978_v18 = vadd.f32 %v23843_v11, %v5646_v44 }
 0x2f6   : > { %7995 = vmatpush.bf16.msrb.mxu0 %v22234_v62  ;;  %7541 = vmatmul.bf16.vlgmr.msra.gmra.mxu1 %v18027_v35  ;;  %v22227_v62 = vld [vmem:[#allocation4 + $0x300] sm:$0xff]  ;;  %v5620_v35 = vadd.f32 %v23829_v50, %v5606_v4  ;;  %v22273_v50 = vld [vmem:[#allocation4 + $0x470] sm:$0xff]  ;;  %v22338_v4 = vld [vmem:[#allocation4 + $0x198] sm:$0xff] }
 0x2f7   : > { %8009 = vmatpush.bf16.msrb.mxu1 %v22242_v23  ;;  %7555 = vmatmul.bf16.vlgmr.msra.gmra.mxu2 %v18031_v61  ;;  %v22251_v23 = vld [vmem:[#allocation4 + $0x3c0] sm:$0xff]  ;;  %v18246_v61 = vld [vmem:[%s23413_s28 + $0x128] sm:$0xf0]  ;;  %v22349_v11 = vld [vmem:[#allocation4 + $0x1f0] sm:$0xff] }
 0x2f8   : > { %8023 = vmatpush.bf16.msrb.mxu2 %v22250_v48  ;;  %7569 = vmatmul.bf16.vlgmr.msra.gmra.mxu3 %v18035_v38  ;;  %v18244_v48 = vld [vmem:[%s23413_s28 + $0x100] sm:$0xf]  ;;  %v22342_v38 = vld [vmem:[#allocation4 + $0x1b8] sm:$0xff] }
 0x2f9   : > { %8037 = vmatpush.bf16.msrb.mxu3 %v22258_v5  ;;  %v22225_v5 = vld [vmem:[%s23413_s28 + $0x124] sm:$0xf0] }
 0x2fa   : > { %7996 = vmatpush.bf16.msrb.mxu0 %v22233_v39  ;;  %v6482_v25 = vpop.f32.mrf.mxu2  ;;  %v22350_v39 = vld [vmem:[#allocation4 + $0x1f8] sm:$0xff] }
 0x2fb   : > { %8010 = vmatpush.bf16.msrb.mxu1 %v22241_v41  ;;  %v6496_v2 = vpop.f32.mrf.mxu3  ;;  %v18237_v41 = vor.u32 %v22224_v30, %v18236_v21  ;;  %v22337_v30 = vld [vmem:[#allocation4 + $0x190] sm:$0xff] }
 0x2fc   : > { %8024 = vmatpush.bf16.msrb.mxu2 %v22249_v42  ;;  %v18241_v42 = vor.u32 %v22221_v63, %v18238_v9  ;;  %v22345_v63 = vld [vmem:[#allocation4 + $0x1d0] sm:$0xff] }
 0x2fd   : > { %8038 = vmatpush.bf16.msrb.mxu3 %v22257_v43  ;;  %v23882_v43 = vpop.f32.mrf.mxu0 }
 0x2fe   : > { %7997 = vmatpush.bf16.msrb.mxu0 %v22232_v46  ;;  %v18245_v46 = vor.u32 %v22225_v5, %v18244_v48 }
 0x2ff   : > { %8011 = vmatpush.bf16.msrb.mxu1 %v22240_v49  ;;  %v18249_v49 = vor.u32 %v22222_v33, %v18246_v61  ;;  %v22268_v61 = vld [vmem:[#allocation4 + $0x448] sm:$0xff] }
 0x300   : > { %8025 = vmatpush.bf16.msrb.mxu2 %v22248_v54  ;;  %v23884_v54 = vpop.f32.mrf.mxu1 }
 0x301   : > { %8039 = vmatpush.bf16.msrb.mxu3 %v22256_v55  ;;  %v22265_v55 = vld [vmem:[#allocation4 + $0x430] sm:$0xff] }
 0x302   : > { %7998 = vmatpush.bf16.msrb.mxu0 %v22231_v1  ;;  %v5634_v1 = vadd.f32 %v23833_v13, %v5620_v35  ;;  %v22336_v35 = vld [vmem:[#allocation4 + $0x188] sm:$0xff] }
 0x303   : > { %8012 = vmatpush.bf16.msrb.mxu1 %v22239_v12  ;;  %v5992_v12 = vadd.f32 %v23845_v14, %v5978_v18 }
 0x304   : > { %8026 = vmatpush.bf16.msrb.mxu2 %v22247_v17  ;;  %v6484_v17 = vpop.f32.mrf.mxu2  ;;  %v5648_v47 = vadd.f32 %v23838_v28, %v5634_v1  ;;  %v22366_v1 = vld [vmem:[#allocation4 + $0x278] sm:$0xff] }
 0x305   : > { %8040 = vmatpush.bf16.msrb.mxu3 %v22255_v51  ;;  %v6497_v51 = vadd.f32 %v6496_v2, %v6482_v25  ;;  %v6006_v13 = vadd.f32 %v23847_v52, %v5992_v12  ;;  %v18252_v12 = vld [vmem:[%s23413_s28 + $0x108] sm:$0xf] }
 0x306   : > { %7999 = vmatpush.bf16.msrb.mxu0 %v22230_v29  ;;  %v22272_v29 = vld [vmem:[#allocation4 + $0x468] sm:$0xff] }
 0x307   : > { %8013 = vmatpush.bf16.msrb.mxu1 %v22238_v34  ;;  %v6498_v34 = vpop.f32.mrf.mxu3 }
 0x308   : > { %8027 = vmatpush.bf16.msrb.mxu2 %v22246_v32  ;;  %v22340_v32 = vld [vmem:[#allocation4 + $0x1a8] sm:$0xff] }
 0x309   : > { %8041 = vmatpush.bf16.msrb.mxu3 %v22254_v57  ;;  %v22348_v57 = vld [vmem:[#allocation4 + $0x1e8] sm:$0xff] }
 0x30a   : > { %8000 = vmatpush.bf16.msrb.mxu0 %v22229_v19  ;;  %v5980_v19 = vadd.f32 %v23853_v10, %v5648_v47  ;;  %v22262_v10 = vld [vmem:[#allocation4 + $0x418] sm:$0xff] }
 0x30b   : > { %8014 = vmatpush.bf16.msrb.mxu1 %v22237_v3  ;;  %v22263_v3 = vld [vmem:[#allocation4 + $0x420] sm:$0xff]  ;;  %v22374_v47 = vld [vmem:[#allocation4 + $0x2b8] sm:$0xff] }
 0x30c   : > { %8028 = vmatpush.bf16.msrb.mxu2 %v22245_v7  ;;  %v22271_v7 = vld [vmem:[#allocation4 + $0x460] sm:$0xff]  ;;  %v5994_v28 = vadd.f32 %v23856_v15, %v5980_v19 }
 0x30d   : > { %8042 = vmatpush.bf16.msrb.mxu3 %v22253_v59 }
 0x30e   : > { %8001 = vmatpush.bf16.msrb.mxu0 %v22228_v8  ;;  %v22347_v8 = vld [vmem:[#allocation4 + $0x1e0] sm:$0xff] }
 0x30f   : > { %8015 = vmatpush.bf16.msrb.mxu1 %v22236_v26  ;;  %v6020_v26 = vadd.f32 %v23849_v20, %v6006_v13  ;;  %v22382_v13 = vld [vmem:[#allocation4 + $0x2f8] sm:$0xff] }
 0x310   : > { %8029 = vmatpush.bf16.msrb.mxu2 %v22244_v58 }
 0x311   : > { %8043 = vmatpush.bf16.msrb.mxu3 %v22252_v22  ;;  %v6034_v52 = vadd.f32 %v23865_v45, %v6020_v26  ;;  %v6499_v22 = vadd.f32 %v6498_v34, %v6484_v17  ;;  %v22261_v45 = vld [vmem:[#allocation4 + $0x410] sm:$0xff]  ;;  %v22332_v34 = vld [vmem:[%s23413_s28 + $0xd4] sm:$0xf0] }
 0x312   : > { %8002 = vmatpush.bf16.msrb.mxu0 %v22227_v62  ;;  %v6510_v14 = vpop.f32.mrf.mxu0  ;;  %v22270_v62 = vld [vmem:[#allocation4 + $0x458] sm:$0xff]  ;;  %v22226_v17 = vld [vmem:[%s23413_s28 + $0x12c] sm:$0xf0] }
 0x313   : > { %8016 = vmatpush.bf16.msrb.mxu1 %v22235_v53  ;;  %v6511_v59 = vadd.f32 %v6510_v14, %v6497_v51  ;;  %v6524_v16 = vpop.f32.mrf.mxu1  ;;  %v22346_v53 = vld [vmem:[#allocation4 + $0x1d8] sm:$0xff]  ;;  %v18253_v19 = vor.u32 %v22226_v17, %v18252_v12  ;;  %v22373_v26 = vld [vmem:[#allocation4 + $0x2b0] sm:$0xff] }
 0x314   : > { %8030 = vmatpush.bf16.msrb.mxu2 %v22243_v6  ;;  %v22223_v51 = vld [vmem:[%s23413_s28 + $0x10c] sm:$0xf]  ;;  %v22303_v12 = vld [vmem:[#allocation4 + $0xb0] sm:$0xff] }
 0x315   : > { %8044 = vmatpush.bf16.msrb.mxu3 %v22251_v23  ;;  %8003 = vmatmul.bf16.vlgmr.msrb.gmra.mxu0 %v18237_v41  ;;  %v6525_v58 = vadd.f32 %v6524_v16, %v6511_v59  ;;  %v6008_v23 = vadd.f32 %v23858_v37, %v5994_v28  ;;  %v22311_v17 = vld [vmem:[#allocation4 + $0xf0] sm:$0xff] }
 0x316   : > { %8051 = vmatpush.bf16.msra.mxu0 %v22266_v60  ;;  %8017 = vmatmul.bf16.vlgmr.msrb.gmra.mxu1 %v18241_v42  ;;  %v6048_v60 = vadd.f32 %v23868_v56, %v6034_v52  ;;  %v22260_v56 = vld [vmem:[#allocation4 + $0x408] sm:$0xff]  ;;  %v22259_v42 = vld [vmem:[#allocation4 + $0x400] sm:$0xff] }
 0x317   : > { %8065 = vmatpush.bf16.msra.mxu1 %v22274_v27  ;;  %8031 = vmatmul.bf16.vlgmr.msrb.gmra.mxu2 %v18245_v46  ;;  %v22269_v27 = vld [vmem:[#allocation4 + $0x450] sm:$0xff]  ;;  %v6022_v9 = vadd.f32 %v23861_v31, %v6008_v23  ;;  %v22335_v46 = vld [vmem:[#allocation4 + $0x180] sm:$0xff]  ;;  %v22364_v52 = vld [vmem:[#allocation4 + $0x268] sm:$0xff] }
 0x318   : > { %8611 = vmatpush.bf16.msra.mxu2 %v22342_v38  ;;  %8045 = vmatmul.bf16.vlgmr.msrb.gmra.mxu3 %v18249_v49  ;;  %v22344_v38 = vld [vmem:[#allocation4 + $0x1c8] sm:$0xff]  ;;  %v22343_v49 = vld [vmem:[#allocation4 + $0x1c0] sm:$0xff]  ;;  %v22354_v23 = vld [vmem:[#allocation4 + $0x218] sm:$0xff] }
 0x319   : > { %8625 = vmatpush.bf16.msra.mxu3 %v22350_v39  ;;  %v6036_v5 = vadd.f32 %v23882_v43, %v6022_v9  ;;  %v22267_v43 = vld [vmem:[#allocation4 + $0x440] sm:$0xff] }
 0x31a   : > { %8052 = vmatpush.bf16.msra.mxu0 %v22265_v55  ;;  %v6538_v6 = vpop.f32.mrf.mxu2  ;;  %v6512_v20 = vpop.f32.mrf.mxu0  ;;  %v22351_v9 = vld [vmem:[#allocation4 + $0x200] sm:$0xff] }
 0x31b   : > { %8066 = vmatpush.bf16.msra.mxu1 %v22273_v50  ;;  %v6539_v25 = vadd.f32 %v6538_v6, %v6525_v58  ;;  %v6552_v44 = vpop.f32.mrf.mxu3  ;;  %v6513_v2 = vadd.f32 %v6512_v20, %v6499_v22  ;;  %v6526_v21 = vpop.f32.mrf.mxu1  ;;  %v6050_v55 = vadd.f32 %v23884_v54, %v6036_v5  ;;  %v18466_v54 = vld [vmem:[%s23413_s28 + $0xd8] sm:$0xf0]  ;;  %v22381_v58 = vld [vmem:[#allocation4 + $0x2f0] sm:$0xff]  ;;  %v22379_v6 = vld [vmem:[#allocation4 + $0x2e0] sm:$0xff] }
 0x31c   : > { %8612 = vmatpush.bf16.msra.mxu2 %v22341_v0  ;;  %v22372_v22 = vld [vmem:[#allocation4 + $0x2a8] sm:$0xff]  ;;  %v22378_v20 = vld [vmem:[#allocation4 + $0x2d8] sm:$0xff]  ;;  %v22375_v5 = vld [vmem:[#allocation4 + $0x2c0] sm:$0xff] }
 0x31d   : > { %8626 = vmatpush.bf16.msra.mxu3 %v22349_v11  ;;  %v6553_v15 = vadd.f32 %v6552_v44, %v6539_v25  ;;  %v6527_v37 = vadd.f32 %v6526_v21, %v6513_v2  ;;  %v22358_v11 = vld [vmem:[#allocation4 + $0x238] sm:$0xff]  ;;  %v22352_v2 = vld [vmem:[#allocation4 + $0x208] sm:$0xff] }
 0x31e   : > { %8053 = vmatpush.bf16.msra.mxu0 %v22264_v40  ;;  %v18254_v40 = vld [vmem:[%s23413_s28 + $0x130] sm:$0xf0]  ;;  %v22362_v25 = vld [vmem:[#allocation4 + $0x258] sm:$0xff]  ;;  %v22360_v21 = vld [vmem:[#allocation4 + $0x248] sm:$0xff] }
 0x31f   : > { %8067 = vmatpush.bf16.msra.mxu1 %v22272_v29  ;;  %v6557_v48 = vadd.f32 %v6553_v15, %v6048_v60  ;;  %v18464_v29 = vld [vmem:[%s23413_s28 + $0xb0] sm:$0xf]  ;;  %v22370_v44 = vld [vmem:[#allocation4 + $0x298] sm:$0xff] }
 0x320   : > { %8613 = vmatpush.bf16.msra.mxu2 %v22340_v32  ;;  %v22353_v60 = vld [vmem:[#allocation4 + $0x210] sm:$0xff] }
 0x321   : > { %8627 = vmatpush.bf16.msra.mxu3 %v22348_v57  ;;  %v6559_v33 = vadd.f32 %v23790_v36, %v6557_v48  ;;  %v22329_v57 = vld [vmem:[%s23413_s28 + $0xb4] sm:$0xf] }
 0x322   : > { %8054 = vmatpush.bf16.msra.mxu0 %v22263_v3  ;;  %v6540_v39 = vpop.f32.mrf.mxu2  ;;  %v18257_v3 = vor.u32 %v22223_v51, %v18254_v40  ;;  %v18469_v59 = vor.u32 %v22329_v57, %v18466_v54  ;;  %v22361_v15 = vld [vmem:[#allocation4 + $0x250] sm:$0xff]  ;;  %v22359_v48 = vld [vmem:[#allocation4 + $0x240] sm:$0xff]  ;;  %v22286_v51 = vld [vmem:[#allocation4 + $0x28] sm:$0xff] }
 0x323   : > { %8068 = vmatpush.bf16.msra.mxu1 %v22271_v7  ;;  %v6561_v18 = vmax.f32 %v6559_v33, 0.0  ;;  %v6541_v31 = vadd.f32 %v6540_v39, %v6527_v37  ;;  %v6554_v41 = vpop.f32.mrf.mxu3  ;;  %v18465_v7 = vor.u32 %v22332_v34, %v18464_v29  ;;  %v22367_v37 = vld [vmem:[#allocation4 + $0x280] sm:$0xff]  ;;  %v22288_v33 = vld [vmem:[#allocation4 + $0x38] sm:$0xff]  ;;  %v22294_v40 = vld [vmem:[#allocation4 + $0x68] sm:$0xff] }
 0x324   : > { %8614 = vmatpush.bf16.msra.mxu2 %v22339_v24  ;;  %v22357_v24 = vld [vmem:[#allocation4 + $0x230] sm:$0xff]  ;;  %v22334_v39 = vld [vmem:[%s23413_s28 + $0xe4] sm:$0xf0]  ;;  %v22293_v57 = vld [vmem:[#allocation4 + $0x60] sm:$0xff] }
 0x325   : > { %8628 = vmatpush.bf16.msra.mxu3 %v22347_v8  ;;  %v6563_v50 = vpack.c.bf16 %v6561_v18, %v6561_v18  ;;  %v6555_v0 = vadd.f32 %v6554_v41, %v6541_v31  ;;  %v22365_v8 = vld [vmem:[#allocation4 + $0x270] sm:$0xff]  ;;  %v22330_v18 = vld [vmem:[%s23413_s28 + $0xbc] sm:$0xf]  ;;  %v22301_v54 = vld [vmem:[#allocation4 + $0xa0] sm:$0xff] }
 0x326   : > { %8055 = vmatpush.bf16.msra.mxu0 %v22262_v10  ;;  %v22380_v10 = vld [vmem:[#allocation4 + $0x2e8] sm:$0xff]  ;;  %v18474_v31 = vld [vmem:[%s23413_s28 + $0xe0] sm:$0xf0] }
 0x327   : > { %8069 = vmatpush.bf16.msra.mxu1 %v22270_v62  ;;  %6565 = vst [vmem:[#allocation2 + $0xc] sm:$0xf] %v6563_v50  ;;  %v6558_v32 = vadd.f32 %v6555_v0, %v6050_v55  ;;  %v22355_v62 = vld [vmem:[#allocation4 + $0x220] sm:$0xff]  ;;  %v18477_v50 = vor.u32 %v22330_v18, %v18474_v31  ;;  %v22302_v29 = vld [vmem:[#allocation4 + $0xa8] sm:$0xff] }
 0x328   : > { %8615 = vmatpush.bf16.msra.mxu2 %v22338_v4  ;;  %v22363_v4 = vld [vmem:[#allocation4 + $0x260] sm:$0xff]  ;;  %v22310_v34 = vld [vmem:[#allocation4 + $0xe8] sm:$0xff] }
 0x329   : > { %8629 = vmatpush.bf16.msra.mxu3 %v22346_v53  ;;  %v6560_v14 = vadd.f32 %v23790_v36, %v6558_v32  ;;  %v22356_v36 = vld [vmem:[#allocation4 + $0x228] sm:$0xff]  ;;  %v22371_v53 = vld [vmem:[#allocation4 + $0x2a0] sm:$0xff] }
 0x32a   : > { %8056 = vmatpush.bf16.msra.mxu0 %v22261_v45  ;;  %v22369_v45 = vld [vmem:[#allocation4 + $0x290] sm:$0xff]  ;;  %v22285_v32 = vld [vmem:[#allocation4 + $0x20] sm:$0xff]  ;;  %v22326_v18 = vld [vmem:[#allocation4 + $0x168] sm:$0xff] }
 0x32b   : > { %8070 = vmatpush.bf16.msra.mxu1 %v22269_v27  ;;  %v6562_v16 = vmax.f32 %v6560_v14, 0.0  ;;  %v22377_v27 = vld [vmem:[#allocation4 + $0x2d0] sm:$0xff]  ;;  %v22292_v14 = vld [vmem:[#allocation4 + $0x58] sm:$0xff] }
 0x32c   : > { %8616 = vmatpush.bf16.msra.mxu2 %v22337_v30  ;;  %v22368_v30 = vld [vmem:[#allocation4 + $0x288] sm:$0xff]  ;;  %v22331_v41 = vld [vmem:[%s23413_s28 + $0xc4] sm:$0xf] }
 0x32d   : > { %8630 = vmatpush.bf16.msra.mxu3 %v22345_v63  ;;  %v6564_v28 = vpack.c.bf16 %v6562_v16, %v6562_v16  ;;  %v22376_v63 = vld [vmem:[#allocation4 + $0x2c8] sm:$0xff]  ;;  %v22299_v16 = vld [vmem:[#allocation4 + $0x90] sm:$0xff] }
 0x32e   : > { %8057 = vmatpush.bf16.msra.mxu0 %v22260_v56  ;;  %v22296_v56 = vld [vmem:[#allocation4 + $0x78] sm:$0xff] }
 0x32f   : > { %8071 = vmatpush.bf16.msra.mxu1 %v22268_v61  ;;  %6566 = vst [vmem:[#allocation2 + $0x30] sm:$0xf] %v6564_v28  ;;  %v18472_v61 = vld [vmem:[%s23413_s28 + $0xb8] sm:$0xf] }
 0x330   : > { %8617 = vmatpush.bf16.msra.mxu2 %v22336_v35  ;;  %v22333_v35 = vld [vmem:[%s23413_s28 + $0xdc] sm:$0xf0] }
 0x331   : > { %8631 = vmatpush.bf16.msra.mxu3 %v22344_v38  ;;  %v18480_v38 = vld [vmem:[%s23413_s28 + $0xc0] sm:$0xf] }
 0x332   : > { %8058 = vmatpush.bf16.msra.mxu0 %v22259_v42  ;;  %v18482_v42 = vld [vmem:[%s23413_s28 + $0xe8] sm:$0xf0]  ;;  %v18481_v55 = vor.u32 %v22334_v39, %v18480_v38  ;;  %v22403_v38 = vld [vmem:[#allocation4 + $0x370] sm:$0xff] }
 0x333   : > { %8072 = vmatpush.bf16.msra.mxu1 %v22267_v43  ;;  %v22304_v43 = vld [vmem:[#allocation4 + $0xb8] sm:$0xff]  ;;  %v18485_v0 = vor.u32 %v22331_v41, %v18482_v42  ;;  %v23919_v28 = vpop.f32.mrf.mxu1  ;;  %v22318_v39 = vld [vmem:[#allocation4 + $0x128] sm:$0xff] }
 0x334   : > { %8618 = vmatpush.bf16.msra.mxu2 %v22335_v46  ;;  %v22312_v46 = vld [vmem:[#allocation4 + $0xf8] sm:$0xff]  ;;  %v22394_v41 = vld [vmem:[#allocation4 + $0x328] sm:$0xff] }
 0x335   : > { %8632 = vmatpush.bf16.msra.mxu3 %v22343_v49  ;;  %8059 = vmatmul.bf16.vlgmr.msra.gmra.mxu0 %v18253_v19  ;;  %v18473_v49 = vor.u32 %v22333_v35, %v18472_v61  ;;  %v22300_v19 = vld [vmem:[#allocation4 + $0x98] sm:$0xff]  ;;  %v22395_v35 = vld [vmem:[#allocation4 + $0x330] sm:$0xff]  ;;  %v22402_v42 = vld [vmem:[#allocation4 + $0x368] sm:$0xff] }
 0x336   : > { %8639 = vmatpush.bf16.msrb.mxu0 %v22358_v11  ;;  %8073 = vmatmul.bf16.vlgmr.msra.gmra.mxu1 %v18257_v3  ;;  %v22287_v11 = vld [vmem:[#allocation4 + $0x30] sm:$0xff]  ;;  %v22308_v3 = vld [vmem:[#allocation4 + $0xd8] sm:$0xff] }
 0x337   : > { %8653 = vmatpush.bf16.msrb.mxu1 %v22366_v1  ;;  %8619 = vmatmul.bf16.vlgmr.msra.gmra.mxu2 %v18465_v7  ;;  %v22295_v1 = vld [vmem:[#allocation4 + $0x70] sm:$0xff] }
 0x338   : > { %8667 = vmatpush.bf16.msrb.mxu2 %v22374_v47  ;;  %8633 = vmatmul.bf16.vlgmr.msra.gmra.mxu3 %v18469_v59  ;;  %v22309_v47 = vld [vmem:[#allocation4 + $0xe0] sm:$0xff]  ;;  %v22283_v7 = vld [vmem:[#allocation4 + $0x10] sm:$0xff] }
 0x339   : > { %8681 = vmatpush.bf16.msrb.mxu3 %v22382_v13  ;;  %v22284_v13 = vld [vmem:[#allocation4 + $0x18] sm:$0xff]  ;;  %v22291_v59 = vld [vmem:[#allocation4 + $0x50] sm:$0xff] }
 0x33a   : > { %8640 = vmatpush.bf16.msrb.mxu0 %v22357_v24  ;;  %v22307_v24 = vld [vmem:[#allocation4 + $0xd0] sm:$0xff] }
 0x33b   : > { %8654 = vmatpush.bf16.msrb.mxu1 %v22365_v8  ;;  %v22282_v8 = vld [vmem:[#allocation4 + $0x8] sm:$0xff]  ;;  %v23933_v61 = vpop.f32.mrf.mxu1  ;;  %v23935_v31 = vpop.f32.mrf.mxu3 }
 0x33c   : > { %8668 = vmatpush.bf16.msrb.mxu2 %v22373_v26  ;;  %v22290_v26 = vld [vmem:[#allocation4 + $0x48] sm:$0xff] }
 0x33d   : > { %8682 = vmatpush.bf16.msrb.mxu3 %v22381_v58  ;;  %v23917_v58 = vpop.f32.mrf.mxu0 }
 0x33e   : > { %8641 = vmatpush.bf16.msrb.mxu0 %v22356_v36  ;;  %v22298_v36 = vld [vmem:[#allocation4 + $0x88] sm:$0xff] }
 0x33f   : > { %8655 = vmatpush.bf16.msrb.mxu1 %v22364_v52  ;;  %v22306_v52 = vld [vmem:[#allocation4 + $0xc8] sm:$0xff] }
 0x340   : > { %8669 = vmatpush.bf16.msrb.mxu2 %v22372_v22  ;;  %v22281_v22 = vld [vmem:[#allocation4] sm:$0xff] }
 0x341   : > { %8683 = vmatpush.bf16.msrb.mxu3 %v22380_v10  ;;  %v22289_v10 = vld [vmem:[#allocation4 + $0x40] sm:$0xff] }
 0x342   : > { %8642 = vmatpush.bf16.msrb.mxu0 %v22355_v62  ;;  %v22297_v62 = vld [vmem:[#allocation4 + $0x80] sm:$0xff] }
 0x343   : > { %8656 = vmatpush.bf16.msrb.mxu1 %v22363_v4  ;;  %v22305_v4 = vld [vmem:[#allocation4 + $0xc0] sm:$0xff] }
 0x344   : > { %8670 = vmatpush.bf16.msrb.mxu2 %v22371_v53  ;;  %v22320_v53 = vld [vmem:[#allocation4 + $0x138] sm:$0xff] }
 0x345   : > { %8684 = vmatpush.bf16.msrb.mxu3 %v22379_v6  ;;  %v22328_v6 = vld [vmem:[#allocation4 + $0x178] sm:$0xff] }
 0x346   : > { %8643 = vmatpush.bf16.msrb.mxu0 %v22354_v23  ;;  %v18680_v23 = vld [vmem:[%s23413_s28 + $0x60] sm:$0xf] }
 0x347   : > { %8657 = vmatpush.bf16.msrb.mxu1 %v22362_v25  ;;  %v22278_v25 = vld [vmem:[%s23413_s28 + $0x84] sm:$0xf0] }
 0x348   : > { %8671 = vmatpush.bf16.msrb.mxu2 %v22370_v44  ;;  %v18688_v44 = vld [vmem:[%s23413_s28 + $0x68] sm:$0xf] }
 0x349   : > { %8685 = vmatpush.bf16.msrb.mxu3 %v22378_v20  ;;  %v22279_v20 = vld [vmem:[%s23413_s28 + $0x8c] sm:$0xf0] }
 0x34a   : > { %8644 = vmatpush.bf16.msrb.mxu0 %v22353_v60  ;;  %v22275_v60 = vld [vmem:[%s23413_s28 + $0x64] sm:$0xf] }
 0x34b   : > { %8658 = vmatpush.bf16.msrb.mxu1 %v22361_v15  ;;  %v18682_v15 = vld [vmem:[%s23413_s28 + $0x88] sm:$0xf0] }
 0x34c   : > { %8672 = vmatpush.bf16.msrb.mxu2 %v22369_v45  ;;  %v22276_v45 = vld [vmem:[%s23413_s28 + $0x6c] sm:$0xf] }
 0x34d   : > { %8686 = vmatpush.bf16.msrb.mxu3 %v22377_v27  ;;  %v18690_v27 = vld [vmem:[%s23413_s28 + $0x90] sm:$0xf0] }
 0x34e   : > { %8645 = vmatpush.bf16.msrb.mxu0 %v22352_v2  ;;  %v22396_v2 = vld [vmem:[#allocation4 + $0x338] sm:$0xff] }
 0x34f   : > { %8659 = vmatpush.bf16.msrb.mxu1 %v22360_v21  ;;  %v22404_v21 = vld [vmem:[#allocation4 + $0x378] sm:$0xff] }
 0x350   : > { %8673 = vmatpush.bf16.msrb.mxu2 %v22368_v30  ;;  %v18681_v30 = vor.u32 %v22278_v25, %v18680_v23  ;;  %v22383_v23 = vld [vmem:[%s23413_s28 + $0x104] sm:$0xf]  ;;  %v18904_v25 = vld [vmem:[%s23413_s28 + $0x128] sm:$0xf0] }
 0x351   : > { %8687 = vmatpush.bf16.msrb.mxu3 %v22376_v63  ;;  %v18689_v63 = vor.u32 %v22279_v20, %v18688_v44  ;;  %v22428_v44 = vld [vmem:[#allocation4 + $0x438] sm:$0xff] }
 0x352   : > { %8646 = vmatpush.bf16.msrb.mxu0 %v22351_v9  ;;  %v18685_v9 = vor.u32 %v22275_v60, %v18682_v15  ;;  %v22436_v20 = vld [vmem:[#allocation4 + $0x478] sm:$0xff] }
 0x353   : > { %8660 = vmatpush.bf16.msrb.mxu1 %v22359_v48  ;;  %v18693_v48 = vor.u32 %v22276_v45, %v18690_v27 }
 0x354   : > { %8674 = vmatpush.bf16.msrb.mxu2 %v22367_v37  ;;  %v23929_v37 = vpop.f32.mrf.mxu2 }
 0x355   : > { %8688 = vmatpush.bf16.msrb.mxu3 %v22375_v5  ;;  %8647 = vmatmul.bf16.vlgmr.msrb.gmra.mxu0 %v18473_v49  ;;  %v22319_v5 = vld [vmem:[#allocation4 + $0x130] sm:$0xff]  ;;  %v22393_v49 = vld [vmem:[#allocation4 + $0x320] sm:$0xff] }
 0x356   : > { %9013 = vmatpush.bf16.msra.mxu0 %v22288_v33  ;;  %8661 = vmatmul.bf16.vlgmr.msrb.gmra.mxu1 %v18477_v50  ;;  %v22327_v33 = vld [vmem:[#allocation4 + $0x170] sm:$0xff] }
 0x357   : > { %9027 = vmatpush.bf16.msra.mxu1 %v22296_v56  ;;  %8675 = vmatmul.bf16.vlgmr.msrb.gmra.mxu2 %v18481_v55  ;;  %v23931_v56 = vpop.f32.mrf.mxu0  ;;  %v22401_v55 = vld [vmem:[#allocation4 + $0x360] sm:$0xff] }
 0x358   : > { %9041 = vmatpush.bf16.msra.mxu2 %v22304_v43  ;;  %8689 = vmatmul.bf16.vlgmr.msrb.gmra.mxu3 %v18485_v0  ;;  %v22317_v43 = vld [vmem:[#allocation4 + $0x120] sm:$0xff] }
 0x359   : > { %9055 = vmatpush.bf16.msra.mxu3 %v22312_v46  ;;  %v22325_v46 = vld [vmem:[#allocation4 + $0x160] sm:$0xff] }
 0x35a   : > { %9014 = vmatpush.bf16.msra.mxu0 %v22287_v11  ;;  %v23941_v11 = vpop.f32.mrf.mxu1 }
 0x35b   : > { %9028 = vmatpush.bf16.msra.mxu1 %v22295_v1  ;;  %v22316_v1 = vld [vmem:[#allocation4 + $0x118] sm:$0xff] }
 0x35c   : > { %9042 = vmatpush.bf16.msra.mxu2 %v22303_v12  ;;  %v23937_v50 = vpop.f32.mrf.mxu2  ;;  %v22324_v12 = vld [vmem:[#allocation4 + $0x158] sm:$0xff] }
 0x35d   : > { %9056 = vmatpush.bf16.msra.mxu3 %v22311_v17  ;;  %v22392_v17 = vld [vmem:[#allocation4 + $0x318] sm:$0xff] }
 0x35e   : > { %9015 = vmatpush.bf16.msra.mxu0 %v22286_v51  ;;  %v22400_v51 = vld [vmem:[#allocation4 + $0x358] sm:$0xff] }
 0x35f   : > { %9029 = vmatpush.bf16.msra.mxu1 %v22294_v40  ;;  %v23939_v0 = vpop.f32.mrf.mxu0  ;;  %v23943_v40 = vpop.f32.mrf.mxu3 }
 0x360   : > { %9043 = vmatpush.bf16.msra.mxu2 %v22302_v29  ;;  %v22315_v29 = vld [vmem:[#allocation4 + $0x110] sm:$0xff] }
 0x361   : > { %9057 = vmatpush.bf16.msra.mxu3 %v22310_v34  ;;  %v22323_v34 = vld [vmem:[#allocation4 + $0x150] sm:$0xff] }
 0x362   : > { %9016 = vmatpush.bf16.msra.mxu0 %v22285_v32  ;;  %v22391_v32 = vld [vmem:[#allocation4 + $0x310] sm:$0xff] }
 0x363   : > { %9030 = vmatpush.bf16.msra.mxu1 %v22293_v57  ;;  %v22399_v57 = vld [vmem:[#allocation4 + $0x350] sm:$0xff] }
 0x364   : > { %9044 = vmatpush.bf16.msra.mxu2 %v22301_v54  ;;  %v23945_v54 = vpop.f32.mrf.mxu2 }
 0x365   : > { %9058 = vmatpush.bf16.msra.mxu3 %v22309_v47  ;;  %v22314_v47 = vld [vmem:[#allocation4 + $0x108] sm:$0xff] }
 0x366   : > { %9017 = vmatpush.bf16.msra.mxu0 %v22284_v13  ;;  %v22322_v13 = vld [vmem:[#allocation4 + $0x148] sm:$0xff] }
 0x367   : > { %9031 = vmatpush.bf16.msra.mxu1 %v22292_v14  ;;  %v23947_v14 = vpop.f32.mrf.mxu0 }
 0x368   : > { %9045 = vmatpush.bf16.msra.mxu2 %v22300_v19  ;;  %v23949_v19 = vpop.f32.mrf.mxu1 }
 0x369   : > { %9059 = vmatpush.bf16.msra.mxu3 %v22308_v3  ;;  %v22390_v3 = vld [vmem:[#allocation4 + $0x308] sm:$0xff] }
 0x36a   : > { %9018 = vmatpush.bf16.msra.mxu0 %v22283_v7  ;;  %v22398_v7 = vld [vmem:[#allocation4 + $0x348] sm:$0xff] }
 0x36b   : > { %9032 = vmatpush.bf16.msra.mxu1 %v22291_v59  ;;  %v22313_v59 = vld [vmem:[#allocation4 + $0x100] sm:$0xff] }
 0x36c   : > { %9046 = vmatpush.bf16.msra.mxu2 %v22299_v16  ;;  %v22321_v16 = vld [vmem:[#allocation4 + $0x140] sm:$0xff] }
 0x36d   : > { %9060 = vmatpush.bf16.msra.mxu3 %v22307_v24  ;;  %v22389_v24 = vld [vmem:[#allocation4 + $0x300] sm:$0xff] }
 0x36e   : > { %9019 = vmatpush.bf16.msra.mxu0 %v22282_v8  ;;  %v22397_v8 = vld [vmem:[#allocation4 + $0x340] sm:$0xff] }
 0x36f   : > { %9033 = vmatpush.bf16.msra.mxu1 %v22290_v26  ;;  %v22412_v26 = vld [vmem:[#allocation4 + $0x3b8] sm:$0xff] }
 0x370   : > { %9047 = vmatpush.bf16.msra.mxu2 %v22298_v36  ;;  %v22420_v36 = vld [vmem:[#allocation4 + $0x3f8] sm:$0xff] }
 0x371   : > { %9061 = vmatpush.bf16.msra.mxu3 %v22306_v52  ;;  %v18696_v52 = vld [vmem:[%s23413_s28 + $0x70] sm:$0xf] }
 0x372   : > { %9020 = vmatpush.bf16.msra.mxu0 %v22281_v22  ;;  %v22280_v22 = vld [vmem:[%s23413_s28 + $0x94] sm:$0xf0]  ;;  %v23961_v45 = vpop.f32.mrf.mxu0 }
 0x373   : > { %9034 = vmatpush.bf16.msra.mxu1 %v22289_v10  ;;  %v23953_v10 = vpop.f32.mrf.mxu3  ;;  %v18697_v60 = vor.u32 %v22280_v22, %v18696_v52  ;;  %v23963_v27 = vpop.f32.mrf.mxu1  ;;  %v22413_v22 = vld [vmem:[#allocation4 + $0x3c0] sm:$0xff] }
 0x374   : > { %9048 = vmatpush.bf16.msra.mxu2 %v22297_v62  ;;  %v22277_v62 = vld [vmem:[%s23413_s28 + $0x74] sm:$0xf] }
 0x375   : > { %9062 = vmatpush.bf16.msra.mxu3 %v22305_v4  ;;  %9021 = vmatmul.bf16.vlgmr.msra.gmra.mxu0 %v18681_v30  ;;  %v18698_v4 = vld [vmem:[%s23413_s28 + $0x98] sm:$0xf0]  ;;  %v23965_v30 = vpop.f32.mrf.mxu2 }
 0x376   : > { %9069 = vmatpush.bf16.msrb.mxu0 %v22320_v53  ;;  %9035 = vmatmul.bf16.vlgmr.msra.gmra.mxu1 %v18685_v9  ;;  %v18902_v53 = vld [vmem:[%s23413_s28 + $0x100] sm:$0xf]  ;;  %v18701_v15 = vor.u32 %v22277_v62, %v18698_v4 }
 0x377   : > { %9083 = vmatpush.bf16.msrb.mxu1 %v22328_v6  ;;  %9049 = vmatmul.bf16.vlgmr.msra.gmra.mxu2 %v18689_v63  ;;  %v22386_v6 = vld [vmem:[%s23413_s28 + $0x124] sm:$0xf0]  ;;  %v22411_v63 = vld [vmem:[#allocation4 + $0x3b0] sm:$0xff]  ;;  %v22429_v62 = vld [vmem:[#allocation4 + $0x440] sm:$0xff] }
 0x378   : > { %9517 = vmatpush.bf16.msrb.mxu2 %v22396_v2  ;;  %9063 = vmatmul.bf16.vlgmr.msra.gmra.mxu3 %v18693_v48  ;;  %v18903_v2 = vor.u32 %v22386_v6, %v18902_v53  ;;  %v22419_v9 = vld [vmem:[#allocation4 + $0x3f0] sm:$0xff]  ;;  %v22504_v53 = vld [vmem:[#allocation4 + $0x1b8] sm:$0xff] }
 0x379   : > { %9531 = vmatpush.bf16.msrb.mxu3 %v22404_v21  ;;  %v18907_v21 = vor.u32 %v22383_v23, %v18904_v25  ;;  %v22427_v48 = vld [vmem:[#allocation4 + $0x430] sm:$0xff]  ;;  %v22512_v6 = vld [vmem:[#allocation4 + $0x1f8] sm:$0xff] }
 0x37a   : > { %9070 = vmatpush.bf16.msrb.mxu0 %v22319_v5  ;;  %v22435_v5 = vld [vmem:[#allocation4 + $0x470] sm:$0xff]  ;;  %v22388_v25 = vld [vmem:[%s23413_s28 + $0x134] sm:$0xf0] }
 0x37b   : > { %9084 = vmatpush.bf16.msrb.mxu1 %v22327_v33  ;;  %v7113_v33 = vadd.f32 %v23919_v28, %v23917_v58  ;;  %v23976_v58 = vpop.f32.mrf.mxu1  ;;  %v22425_v28 = vld [vmem:[#allocation4 + $0x420] sm:$0xff] }
 0x37c   : > { %9518 = vmatpush.bf16.msrb.mxu2 %v22395_v35  ;;  %v22410_v35 = vld [vmem:[#allocation4 + $0x3a8] sm:$0xff]  ;;  %v18918_v23 = vld [vmem:[%s23413_s28 + $0x110] sm:$0xf] }
 0x37d   : > { %9532 = vmatpush.bf16.msrb.mxu3 %v22403_v38  ;;  %v22418_v38 = vld [vmem:[#allocation4 + $0x3e8] sm:$0xff] }
 0x37e   : > { %9071 = vmatpush.bf16.msrb.mxu0 %v22318_v39  ;;  %v23969_v39 = vpop.f32.mrf.mxu3 }
 0x37f   : > { %9085 = vmatpush.bf16.msrb.mxu1 %v22326_v18  ;;  %v22426_v18 = vld [vmem:[#allocation4 + $0x428] sm:$0xff] }
 0x380   : > { %9519 = vmatpush.bf16.msrb.mxu2 %v22394_v41  ;;  %v22434_v41 = vld [vmem:[#allocation4 + $0x468] sm:$0xff] }
 0x381   : > { %9533 = vmatpush.bf16.msrb.mxu3 %v22402_v42  ;;  %v7127_v42 = vadd.f32 %v23929_v37, %v7113_v33  ;;  %v22416_v37 = vld [vmem:[#allocation4 + $0x3d8] sm:$0xff] }
 0x382   : > { %9072 = vmatpush.bf16.msrb.mxu0 %v22317_v43  ;;  %v23972_v43 = vpop.f32.mrf.mxu2 }
 0x383   : > { %9086 = vmatpush.bf16.msrb.mxu1 %v22325_v46  ;;  %v22409_v46 = vld [vmem:[#allocation4 + $0x3a0] sm:$0xff] }
 0x384   : > { %9520 = vmatpush.bf16.msrb.mxu2 %v22393_v49  ;;  %v22417_v49 = vld [vmem:[#allocation4 + $0x3e0] sm:$0xff] }
 0x385   : > { %9534 = vmatpush.bf16.msrb.mxu3 %v22401_v55  ;;  %v23974_v55 = vpop.f32.mrf.mxu0 }
 0x386   : > { %9073 = vmatpush.bf16.msrb.mxu0 %v22316_v1  ;;  %v22433_v1 = vld [vmem:[#allocation4 + $0x460] sm:$0xff] }
 0x387   : > { %9087 = vmatpush.bf16.msrb.mxu1 %v22324_v12  ;;  %v7141_v12 = vadd.f32 %v23935_v31, %v7127_v42  ;;  %v22423_v31 = vld [vmem:[#allocation4 + $0x410] sm:$0xff] }
 0x388   : > { %9521 = vmatpush.bf16.msrb.mxu2 %v22392_v17  ;;  %v22408_v17 = vld [vmem:[#allocation4 + $0x398] sm:$0xff] }
 0x389   : > { %9535 = vmatpush.bf16.msrb.mxu3 %v22400_v51  ;;  %v23979_v51 = vpop.f32.mrf.mxu3 }
 0x38a   : > { %9074 = vmatpush.bf16.msrb.mxu0 %v22315_v29  ;;  %v22424_v29 = vld [vmem:[#allocation4 + $0x418] sm:$0xff] }
 0x38b   : > { %9088 = vmatpush.bf16.msrb.mxu1 %v22323_v34  ;;  %v22432_v34 = vld [vmem:[#allocation4 + $0x458] sm:$0xff] }
 0x38c   : > { %9522 = vmatpush.bf16.msrb.mxu2 %v22391_v32  ;;  %v7115_v32 = vadd.f32 %v23933_v61, %v23931_v56  ;;  %v22406_v56 = vld [vmem:[#allocation4 + $0x388] sm:$0xff] }
 0x38d   : > { %9536 = vmatpush.bf16.msrb.mxu3 %v22399_v57  ;;  %v7155_v57 = vadd.f32 %v23939_v0, %v7141_v12  ;;  %v22414_v61 = vld [vmem:[#allocation4 + $0x3c8] sm:$0xff]  ;;  %v22527_v12 = vld [vmem:[#allocation4 + $0x270] sm:$0xff] }
 0x38e   : > { %9075 = vmatpush.bf16.msrb.mxu0 %v22314_v47  ;;  %v22407_v47 = vld [vmem:[#allocation4 + $0x390] sm:$0xff]  ;;  %v22422_v0 = vld [vmem:[#allocation4 + $0x408] sm:$0xff] }
 0x38f   : > { %9089 = vmatpush.bf16.msrb.mxu1 %v22322_v13  ;;  %v22415_v13 = vld [vmem:[#allocation4 + $0x3d0] sm:$0xff] }
 0x390   : > { %9523 = vmatpush.bf16.msrb.mxu2 %v22390_v3  ;;  %v22431_v3 = vld [vmem:[#allocation4 + $0x450] sm:$0xff] }
 0x391   : > { %9537 = vmatpush.bf16.msrb.mxu3 %v22398_v7  ;;  %v23988_v52 = vpop.f32.mrf.mxu3 }
 0x392   : > { %9076 = vmatpush.bf16.msrb.mxu0 %v22313_v59  ;;  %v8004_v7 = vpop.f32.mrf.mxu0 }
 0x393   : > { %9090 = vmatpush.bf16.msrb.mxu1 %v22321_v16  ;;  %v8018_v59 = vpop.f32.mrf.mxu1  ;;  %v23984_v16 = vpop.f32.mrf.mxu2 }
 0x394   : > { %9524 = vmatpush.bf16.msrb.mxu2 %v22389_v24  ;;  %v7129_v24 = vadd.f32 %v23937_v50, %v7115_v32  ;;  %v22421_v50 = vld [vmem:[#allocation4 + $0x400] sm:$0xff]  ;;  %v22518_v32 = vld [vmem:[#allocation4 + $0x228] sm:$0xff] }
 0x395   : > { %9538 = vmatpush.bf16.msrb.mxu3 %v22397_v8  ;;  %9077 = vmatmul.bf16.vlgmr.msrb.gmra.mxu0 %v18697_v60  ;;  %v7169_v8 = vadd.f32 %v23941_v11, %v7155_v57  ;;  %v22385_v60 = vld [vmem:[%s23413_s28 + $0x114] sm:$0xf]  ;;  %v22526_v57 = vld [vmem:[#allocation4 + $0x268] sm:$0xff] }
 0x396   : > { %9545 = vmatpush.bf16.msra.mxu0 %v22412_v26  ;;  %9091 = vmatmul.bf16.vlgmr.msrb.gmra.mxu1 %v18701_v15  ;;  %v22430_v26 = vld [vmem:[#allocation4 + $0x448] sm:$0xff]  ;;  %v7143_v11 = vadd.f32 %v23943_v40, %v7129_v24  ;;  %v22501_v24 = vld [vmem:[#allocation4 + $0x1a0] sm:$0xff] }
 0x397   : > { %9559 = vmatpush.bf16.msra.mxu1 %v22420_v36  ;;  %9525 = vmatmul.bf16.vlgmr.msrb.gmra.mxu2 %v18903_v2  ;;  %v22405_v36 = vld [vmem:[#allocation4 + $0x380] sm:$0xff]  ;;  %v7501_v4 = vadd.f32 %v23945_v54, %v7169_v8  ;;  %v8019_v2 = vadd.f32 %v8018_v59, %v8004_v7 }
 0x398   : > { %9573 = vmatpush.bf16.msra.mxu2 %v22428_v44  ;;  %9539 = vmatmul.bf16.vlgmr.msrb.gmra.mxu3 %v18907_v21  ;;  %v18910_v44 = vld [vmem:[%s23413_s28 + $0x108] sm:$0xf]  ;;  %v7157_v15 = vadd.f32 %v23947_v14, %v7143_v11  ;;  %v18920_v21 = vld [vmem:[%s23413_s28 + $0x138] sm:$0xf0]  ;;  %v18912_v54 = vld [vmem:[%s23413_s28 + $0x130] sm:$0xf0] }
 0x399   : > { %9587 = vmatpush.bf16.msra.mxu3 %v22436_v20  ;;  %v22387_v20 = vld [vmem:[%s23413_s28 + $0x12c] sm:$0xf0]  ;;  %v22524_v11 = vld [vmem:[#allocation4 + $0x258] sm:$0xff] }
 0x39a   : > { %9546 = vmatpush.bf16.msra.mxu0 %v22411_v63  ;;  %v22384_v63 = vld [vmem:[%s23413_s28 + $0x10c] sm:$0xf]  ;;  %v7171_v14 = vadd.f32 %v23949_v19, %v7157_v15  ;;  %v22509_v8 = vld [vmem:[#allocation4 + $0x1e0] sm:$0xff]  ;;  %v22515_v15 = vld [vmem:[#allocation4 + $0x210] sm:$0xff] }
 0x39b   : > { %9560 = vmatpush.bf16.msra.mxu1 %v22419_v9  ;;  %v8032_v40 = vpop.f32.mrf.mxu2  ;;  %v22520_v9 = vld [vmem:[#allocation4 + $0x238] sm:$0xff]  ;;  %v8020_v33 = vpop.f32.mrf.mxu1  ;;  %v18915_v42 = vor.u32 %v22384_v63, %v18912_v54  ;;  %v22498_v54 = vld [vmem:[#allocation4 + $0x188] sm:$0xff] }
 0x39c   : > { %9574 = vmatpush.bf16.msra.mxu2 %v22427_v48  ;;  %v22528_v48 = vld [vmem:[#allocation4 + $0x278] sm:$0xff] }
 0x39d   : > { %9588 = vmatpush.bf16.msra.mxu3 %v22435_v5  ;;  %v8006_v5 = vpop.f32.mrf.mxu0 }
 0x39e   : > { %9547 = vmatpush.bf16.msra.mxu0 %v22410_v35  ;;  %v7515_v35 = vadd.f32 %v23953_v10, %v7501_v4  ;;  %v22519_v10 = vld [vmem:[#allocation4 + $0x230] sm:$0xff] }
 0x39f   : > { %9561 = vmatpush.bf16.msra.mxu1 %v22418_v38  ;;  %v18919_v38 = vor.u32 %v22388_v25, %v18918_v23 }
 0x3a0   : > { %9575 = vmatpush.bf16.msra.mxu2 %v22426_v18  ;;  %v18911_v18 = vor.u32 %v22387_v20, %v18910_v44  ;;  %v22499_v20 = vld [vmem:[#allocation4 + $0x190] sm:$0xff] }
 0x3a1   : > { %9589 = vmatpush.bf16.msra.mxu3 %v22434_v41  ;;  %v18923_v41 = vor.u32 %v22385_v60, %v18920_v21  ;;  %v22507_v60 = vld [vmem:[#allocation4 + $0x1d0] sm:$0xff] }
 0x3a2   : > { %9548 = vmatpush.bf16.msra.mxu0 %v22409_v46  ;;  %v7529_v46 = vadd.f32 %v23961_v45, %v7515_v35  ;;  %v22505_v35 = vld [vmem:[#allocation4 + $0x1c0] sm:$0xff] }
 0x3a3   : > { %9562 = vmatpush.bf16.msra.mxu1 %v22417_v49  ;;  %v8033_v49 = vadd.f32 %v8032_v40, %v8019_v2 }
 0x3a4   : > { %9576 = vmatpush.bf16.msra.mxu2 %v22425_v28  ;;  %v22503_v28 = vld [vmem:[#allocation4 + $0x1b0] sm:$0xff]  ;;  %v7543_v19 = vadd.f32 %v23963_v27, %v7529_v46 }
 0x3a5   : > { %9590 = vmatpush.bf16.msra.mxu3 %v22433_v1  ;;  %v22511_v1 = vld [vmem:[#allocation4 + $0x1f0] sm:$0xff] }
 0x3a6   : > { %9549 = vmatpush.bf16.msra.mxu0 %v22408_v17  ;;  %v8046_v17 = vpop.f32.mrf.mxu3  ;;  %v19130_v46 = vld [vmem:[%s23413_s28 + $0xf0] sm:$0xf] }
 0x3a7   : > { %9563 = vmatpush.bf16.msra.mxu1 %v22416_v37  ;;  %v7503_v37 = vadd.f32 %v23965_v30, %v7171_v14  ;;  %v8047_v45 = vadd.f32 %v8046_v17, %v8033_v49  ;;  %v8021_v30 = vadd.f32 %v8020_v33, %v8006_v5  ;;  %v22522_v5 = vld [vmem:[#allocation4 + $0x248] sm:$0xff]  ;;  %v22544_v14 = vld [vmem:[#allocation4 + $0x2f8] sm:$0xff] }
 0x3a8   : > { %9577 = vmatpush.bf16.msra.mxu2 %v22424_v29  ;;  %v22502_v29 = vld [vmem:[#allocation4 + $0x1a8] sm:$0xff] }
 0x3a9   : > { %9591 = vmatpush.bf16.msra.mxu3 %v22432_v34  ;;  %v22510_v34 = vld [vmem:[#allocation4 + $0x1e8] sm:$0xff] }
 0x3aa   : > { %9550 = vmatpush.bf16.msra.mxu0 %v22407_v47  ;;  %v7517_v47 = vadd.f32 %v23969_v39, %v7503_v37  ;;  %v22494_v49 = vld [vmem:[%s23413_s28 + $0x114] sm:$0xf0]  ;;  %v19132_v17 = vld [vmem:[%s23413_s28 + $0x118] sm:$0xf0] }
 0x3ab   : > { %9564 = vmatpush.bf16.msra.mxu1 %v22415_v13  ;;  %v7557_v13 = vadd.f32 %v23972_v43, %v7543_v19  ;;  %v22492_v37 = vld [vmem:[%s23413_s28 + $0xfc] sm:$0xf]  ;;  %v19140_v19 = vld [vmem:[%s23413_s28 + $0x120] sm:$0xf0] }
 0x3ac   : > { %9578 = vmatpush.bf16.msra.mxu2 %v22423_v31  ;;  %v8034_v31 = vpop.f32.mrf.mxu2  ;;  %v7531_v59 = vadd.f32 %v23974_v55, %v7517_v47  ;;  %v22500_v55 = vld [vmem:[#allocation4 + $0x198] sm:$0xff]  ;;  %v19143_v47 = vor.u32 %v22492_v37, %v19140_v19  ;;  %v22463_v19 = vld [vmem:[#allocation4 + $0xa0] sm:$0xff] }
 0x3ad   : > { %9592 = vmatpush.bf16.msra.mxu3 %v22431_v3  ;;  %v8035_v39 = vadd.f32 %v8034_v31, %v8021_v30  ;;  %v22543_v30 = vld [vmem:[#allocation4 + $0x2f0] sm:$0xff] }
 0x3ae   : > { %9551 = vmatpush.bf16.msra.mxu0 %v22406_v56  ;;  %v22517_v56 = vld [vmem:[#allocation4 + $0x220] sm:$0xff]  ;;  %v8048_v43 = vpop.f32.mrf.mxu3  ;;  %v22449_v31 = vld [vmem:[#allocation4 + $0x30] sm:$0xff] }
 0x3af   : > { %9565 = vmatpush.bf16.msra.mxu1 %v22414_v61  ;;  %v22525_v61 = vld [vmem:[#allocation4 + $0x260] sm:$0xff] }
 0x3b0   : > { %9579 = vmatpush.bf16.msra.mxu2 %v22422_v0  ;;  %v7571_v0 = vadd.f32 %v23979_v51, %v7557_v13  ;;  %v24015_v51 = vld [vmem:[%s24634_s2] ss:$0 sm:$0xff]  ;;  %v22535_v13 = vld [vmem:[#allocation4 + $0x2b0] sm:$0xff] }
 0x3b1   : > { %9593 = vmatpush.bf16.msra.mxu3 %v22430_v26 }
 0x3b2   : > { %9552 = vmatpush.bf16.msra.mxu0 %v22405_v36  ;;  %v8060_v3 = vpop.f32.mrf.mxu0  ;;  %v7545_v36 = vadd.f32 %v23976_v58, %v7531_v59  ;;  %v22542_v59 = vld [vmem:[#allocation4 + $0x2e8] sm:$0xff] }
 0x3b3   : > { %9566 = vmatpush.bf16.msra.mxu1 %v22413_v22  ;;  %v8074_v7 = vpop.f32.mrf.mxu1  ;;  %v8061_v27 = vadd.f32 %v8060_v3, %v8047_v45  ;;  %v22450_v45 = vld [vmem:[#allocation4 + $0x38] sm:$0xff]  ;;  %v22457_v3 = vld [vmem:[#allocation4 + $0x70] sm:$0xff] }
 0x3b4   : > { %9580 = vmatpush.bf16.msra.mxu2 %v22421_v50  ;;  %v22508_v50 = vld [vmem:[#allocation4 + $0x1d8] sm:$0xff]  ;;  %v7559_v4 = vadd.f32 %v23984_v16, %v7545_v36  ;;  %v22523_v16 = vld [vmem:[#allocation4 + $0x250] sm:$0xff] }
 0x3b5   : > { %9594 = vmatpush.bf16.msra.mxu3 %v22429_v62  ;;  %9553 = vmatmul.bf16.vlgmr.msra.gmra.mxu0 %v18911_v18  ;;  %v8075_v26 = vadd.f32 %v8074_v7, %v8061_v27  ;;  %v22516_v62 = vld [vmem:[#allocation4 + $0x218] sm:$0xff]  ;;  %v22521_v18 = vld [vmem:[#allocation4 + $0x240] sm:$0xff]  ;;  %v22534_v7 = vld [vmem:[#allocation4 + $0x2a8] sm:$0xff] }
 0x3b6   : > { %10133 = vmatpush.bf16.msrb.mxu0 %v22504_v53  ;;  %9567 = vmatmul.bf16.vlgmr.msra.gmra.mxu1 %v18915_v42  ;;  %v8049_v53 = vadd.f32 %v8048_v43, %v8035_v39  ;;  %v7573_v2 = vadd.f32 %v23988_v52, %v7559_v4  ;;  %v22497_v52 = vld [vmem:[#allocation4 + $0x180] sm:$0xff]  ;;  %v22536_v42 = vld [vmem:[#allocation4 + $0x2b8] sm:$0xff]  ;;  %v22448_v27 = vld [vmem:[#allocation4 + $0x28] sm:$0xff] }
 0x3b7   : > { %10147 = vmatpush.bf16.msrb.mxu1 %v22512_v6  ;;  %9581 = vmatmul.bf16.vlgmr.msra.gmra.mxu2 %v18919_v38  ;;  %v8079_v22 = vadd.f32 %v8075_v26, %v7571_v0  ;;  %v22513_v38 = vld [vmem:[#allocation4 + $0x200] sm:$0xff]  ;;  %v22532_v39 = vld [vmem:[#allocation4 + $0x298] sm:$0xff]  ;;  %v22538_v4 = vld [vmem:[#allocation4 + $0x2c8] sm:$0xff] }
 0x3b8   : > { %10161 = vmatpush.bf16.msrb.mxu2 %v22520_v9  ;;  %9595 = vmatmul.bf16.vlgmr.msra.gmra.mxu3 %v18923_v41  ;;  %v22506_v9 = vld [vmem:[#allocation4 + $0x1c8] sm:$0xff]  ;;  %v22455_v0 = vld [vmem:[#allocation4 + $0x60] sm:$0xff]  ;;  %v22540_v26 = vld [vmem:[#allocation4 + $0x2d8] sm:$0xff] }
 0x3b9   : > { %10175 = vmatpush.bf16.msrb.mxu3 %v22528_v48  ;;  %v8081_v6 = vadd.f32 %v24015_v51, %v8079_v22  ;;  %v22514_v48 = vld [vmem:[#allocation4 + $0x208] sm:$0xff]  ;;  %v22446_v43 = vld [vmem:[#allocation4 + $0x18] sm:$0xff]  ;;  %v22531_v22 = vld [vmem:[#allocation4 + $0x290] sm:$0xff] }
 0x3ba   : > { %10134 = vmatpush.bf16.msrb.mxu0 %v22503_v28  ;;  %v8062_v58 = vpop.f32.mrf.mxu0  ;;  %v19138_v28 = vld [vmem:[%s23413_s28 + $0xf8] sm:$0xf] }
 0x3bb   : > { %10148 = vmatpush.bf16.msrb.mxu1 %v22511_v1  ;;  %v8076_v23 = vpop.f32.mrf.mxu1  ;;  %v8083_v25 = vmax.f32 %v8081_v6, 0.0  ;;  %v8063_v44 = vadd.f32 %v8062_v58, %v8049_v53  ;;  %v22495_v1 = vld [vmem:[%s23413_s28 + $0x11c] sm:$0xf0]  ;;  %v22454_v36 = vld [vmem:[#allocation4 + $0x58] sm:$0xff]  ;;  %v22444_v53 = vld [vmem:[#allocation4 + $0x8] sm:$0xff] }
 0x3bc   : > { %10162 = vmatpush.bf16.msrb.mxu2 %v22519_v10  ;;  %v22491_v10 = vld [vmem:[%s23413_s28 + $0xf4] sm:$0xf]  ;;  %v22452_v6 = vld [vmem:[#allocation4 + $0x48] sm:$0xff] }
 0x3bd   : > { %10176 = vmatpush.bf16.msrb.mxu3 %v22527_v12  ;;  %v8085_v40 = vpack.c.bf16 %v8083_v25, %v8083_v25  ;;  %v8077_v21 = vadd.f32 %v8076_v23, %v8063_v44  ;;  %v22529_v58 = vld [vmem:[#allocation4 + $0x280] sm:$0xff] }
 0x3be   : > { %10135 = vmatpush.bf16.msrb.mxu0 %v22502_v29  ;;  %v22458_v29 = vld [vmem:[#allocation4 + $0x78] sm:$0xff]  ;;  %v22537_v23 = vld [vmem:[#allocation4 + $0x2c0] sm:$0xff] }
 0x3bf   : > { %10149 = vmatpush.bf16.msrb.mxu1 %v22510_v34  ;;  %8087 = vst [vmem:[#allocation2 + $0x10] sm:$0xf] %v8085_v40  ;;  %v8080_v63 = vadd.f32 %v8077_v21, %v7573_v2  ;;  %v19131_v34 = vor.u32 %v22494_v49, %v19130_v46  ;;  %v22443_v25 = vld [vmem:[#allocation4] sm:$0xff]  ;;  %v24030_v2 = vpop.f32.mrf.mxu2  ;;  %v22440_v21 = vld [vmem:[%s23413_s28 + $0xc4] sm:$0xf0]  ;;  %v22481_v46 = vld [vmem:[#allocation4 + $0x130] sm:$0xff] }
 0x3c0   : > { %10163 = vmatpush.bf16.msrb.mxu2 %v22518_v32  ;;  %v19139_v32 = vor.u32 %v22495_v1, %v19138_v28  ;;  %v22451_v44 = vld [vmem:[#allocation4 + $0x40] sm:$0xff]  ;;  %v22489_v49 = vld [vmem:[#allocation4 + $0x170] sm:$0xff]  ;;  %v22464_v28 = vld [vmem:[#allocation4 + $0xa8] sm:$0xff] }
 0x3c1   : > { %10177 = vmatpush.bf16.msrb.mxu3 %v22526_v57  ;;  %v8082_v33 = vadd.f32 %v24015_v51, %v8080_v63  ;;  %v19135_v57 = vor.u32 %v22491_v10, %v19132_v17  ;;  %v19346_v40 = vld [vmem:[%s23413_s28 + $0xa0] sm:$0xf]  ;;  %v22493_v63 = vld [vmem:[%s23413_s28 + $0x104] sm:$0xf]  ;;  %v22472_v1 = vld [vmem:[#allocation4 + $0xe8] sm:$0xff] }
 0x3c2   : > { %10136 = vmatpush.bf16.msrb.mxu0 %v22501_v24  ;;  %v22456_v24 = vld [vmem:[#allocation4 + $0x68] sm:$0xff] }
 0x3c3   : > { %10150 = vmatpush.bf16.msrb.mxu1 %v22509_v8  ;;  %v8084_v41 = vmax.f32 %v8082_v33, 0.0  ;;  %v22533_v8 = vld [vmem:[#allocation4 + $0x2a0] sm:$0xff]  ;;  %v22482_v33 = vld [vmem:[#allocation4 + $0x138] sm:$0xff]  ;;  %v22488_v17 = vld [vmem:[#allocation4 + $0x168] sm:$0xff] }
 0x3c4   : > { %10164 = vmatpush.bf16.msrb.mxu2 %v22517_v56  ;;  %v22541_v56 = vld [vmem:[#allocation4 + $0x2e0] sm:$0xff] }
 0x3c5   : > { %10178 = vmatpush.bf16.msrb.mxu3 %v22525_v61  ;;  %v8086_v12 = vpack.c.bf16 %v8084_v41, %v8084_v41  ;;  %v22447_v61 = vld [vmem:[#allocation4 + $0x20] sm:$0xff] }
 0x3c6   : > { %10137 = vmatpush.bf16.msrb.mxu0 %v22500_v55  ;;  %v22539_v55 = vld [vmem:[#allocation4 + $0x2d0] sm:$0xff] }
 0x3c7   : > { %10151 = vmatpush.bf16.msrb.mxu1 %v22508_v50  ;;  %8088 = vst [vmem:[#allocation2 + $0x34] sm:$0xf] %v8086_v12  ;;  %v22445_v50 = vld [vmem:[#allocation4 + $0x10] sm:$0xff]  ;;  %v24040_v10 = vpop.f32.mrf.mxu2  ;;  %v22480_v12 = vld [vmem:[#allocation4 + $0x128] sm:$0xff] }
 0x3c8   : > { %10165 = vmatpush.bf16.msrb.mxu2 %v22516_v62  ;;  %v22453_v62 = vld [vmem:[#allocation4 + $0x50] sm:$0xff] }
 0x3c9   : > { %10179 = vmatpush.bf16.msrb.mxu3 %v22524_v11  ;;  %v22530_v11 = vld [vmem:[#allocation4 + $0x288] sm:$0xff] }
 0x3ca   : > { %10138 = vmatpush.bf16.msrb.mxu0 %v22499_v20  ;;  %v22466_v20 = vld [vmem:[#allocation4 + $0xb8] sm:$0xff] }
 0x3cb   : > { %10152 = vmatpush.bf16.msrb.mxu1 %v22507_v60  ;;  %v22474_v60 = vld [vmem:[#allocation4 + $0xf8] sm:$0xff] }
 0x3cc   : > { %10166 = vmatpush.bf16.msrb.mxu2 %v22515_v15  ;;  %v19146_v15 = vld [vmem:[%s23413_s28 + $0x100] sm:$0xf] }
 0x3cd   : > { %10180 = vmatpush.bf16.msrb.mxu3 %v22523_v16  ;;  %v22496_v16 = vld [vmem:[%s23413_s28 + $0x124] sm:$0xf0] }
 0x3ce   : > { %10139 = vmatpush.bf16.msrb.mxu0 %v22498_v54  ;;  %v24035_v54 = vpop.f32.mrf.mxu3 }
 0x3cf   : > { %10153 = vmatpush.bf16.msrb.mxu1 %v22506_v9  ;;  %v19148_v9 = vld [vmem:[%s23413_s28 + $0x128] sm:$0xf0] }
 0x3d0   : > { %10167 = vmatpush.bf16.msrb.mxu2 %v22514_v48  ;;  %v22437_v48 = vld [vmem:[%s23413_s28 + $0xa4] sm:$0xf] }
 0x3d1   : > { %10181 = vmatpush.bf16.msrb.mxu3 %v22522_v5  ;;  %v19348_v5 = vld [vmem:[%s23413_s28 + $0xc8] sm:$0xf0] }
 0x3d2   : > { %10140 = vmatpush.bf16.msrb.mxu0 %v22497_v52  ;;  %v22490_v52 = vld [vmem:[#allocation4 + $0x178] sm:$0xff]  ;;  %v19351_v41 = vor.u32 %v22437_v48, %v19348_v5  ;;  %v22557_v5 = vld [vmem:[#allocation4 + $0x330] sm:$0xff] }
 0x3d3   : > { %10154 = vmatpush.bf16.msrb.mxu1 %v22505_v35  ;;  %v19147_v35 = vor.u32 %v22496_v16, %v19146_v15  ;;  %v19364_v15 = vld [vmem:[%s23413_s28 + $0xd8] sm:$0xf0] }
 0x3d4   : > { %10168 = vmatpush.bf16.msrb.mxu2 %v22513_v38  ;;  %v19347_v38 = vor.u32 %v22440_v21, %v19346_v40  ;;  %v22574_v16 = vld [vmem:[#allocation4 + $0x3b8] sm:$0xff] }
 0x3d5   : > { %10182 = vmatpush.bf16.msrb.mxu3 %v22521_v18  ;;  %10141 = vmatmul.bf16.vlgmr.msrb.gmra.mxu0 %v19131_v34  ;;  %v19151_v18 = vor.u32 %v22493_v63, %v19148_v9  ;;  %v22487_v34 = vld [vmem:[#allocation4 + $0x160] sm:$0xff]  ;;  %v22582_v40 = vld [vmem:[#allocation4 + $0x3f8] sm:$0xff] }
 0x3d6   : > { %10189 = vmatpush.bf16.msra.mxu0 %v22536_v42  ;;  %10155 = vmatmul.bf16.vlgmr.msrb.gmra.mxu1 %v19135_v57  ;;  %v22465_v42 = vld [vmem:[#allocation4 + $0xb0] sm:$0xff]  ;;  %v24042_v37 = vpop.f32.mrf.mxu3  ;;  %v24046_v57 = vpop.f32.mrf.mxu1 }
 0x3d7   : > { %10203 = vmatpush.bf16.msra.mxu1 %v22544_v14  ;;  %10169 = vmatmul.bf16.vlgmr.msrb.gmra.mxu2 %v19139_v32  ;;  %v22473_v14 = vld [vmem:[#allocation4 + $0xf0] sm:$0xff]  ;;  %v24044_v32 = vpop.f32.mrf.mxu0 }
 0x3d8   : > { %10535 = vmatpush.bf16.msra.mxu2 %v22450_v45  ;;  %10183 = vmatmul.bf16.vlgmr.msrb.gmra.mxu3 %v19143_v47  ;;  %v22471_v45 = vld [vmem:[#allocation4 + $0xe0] sm:$0xff]  ;;  %v22462_v47 = vld [vmem:[#allocation4 + $0x98] sm:$0xff] }
 0x3d9   : > { %10549 = vmatpush.bf16.msra.mxu3 %v22458_v29  ;;  %v22479_v29 = vld [vmem:[#allocation4 + $0x120] sm:$0xff] }
 0x3da   : > { %10190 = vmatpush.bf16.msra.mxu0 %v22535_v13  ;;  %v22470_v13 = vld [vmem:[#allocation4 + $0xd8] sm:$0xff] }
 0x3db   : > { %10204 = vmatpush.bf16.msra.mxu1 %v22543_v30  ;;  %v22478_v30 = vld [vmem:[#allocation4 + $0x118] sm:$0xff] }
 0x3dc   : > { %10536 = vmatpush.bf16.msra.mxu2 %v22449_v31  ;;  %v22486_v31 = vld [vmem:[#allocation4 + $0x158] sm:$0xff] }
 0x3dd   : > { %10550 = vmatpush.bf16.msra.mxu3 %v22457_v3  ;;  %v24048_v3 = vpop.f32.mrf.mxu2 }
 0x3de   : > { %10191 = vmatpush.bf16.msra.mxu0 %v22534_v7  ;;  %v24050_v7 = vpop.f32.mrf.mxu3 }
 0x3df   : > { %10205 = vmatpush.bf16.msra.mxu1 %v22542_v59  ;;  %v22461_v59 = vld [vmem:[#allocation4 + $0x90] sm:$0xff] }
 0x3e0   : > { %10537 = vmatpush.bf16.msra.mxu2 %v22448_v27  ;;  %v22469_v27 = vld [vmem:[#allocation4 + $0xd0] sm:$0xff] }
 0x3e1   : > { %10551 = vmatpush.bf16.msra.mxu3 %v22456_v24  ;;  %v22477_v24 = vld [vmem:[#allocation4 + $0x110] sm:$0xff] }
 0x3e2   : > { %10192 = vmatpush.bf16.msra.mxu0 %v22533_v8  ;;  %v22485_v8 = vld [vmem:[#allocation4 + $0x150] sm:$0xff] }
 0x3e3   : > { %10206 = vmatpush.bf16.msra.mxu1 %v22541_v56  ;;  %v22460_v56 = vld [vmem:[#allocation4 + $0x88] sm:$0xff] }
 0x3e4   : > { %10538 = vmatpush.bf16.msra.mxu2 %v22447_v61  ;;  %v22468_v61 = vld [vmem:[#allocation4 + $0xc8] sm:$0xff] }
 0x3e5   : > { %10552 = vmatpush.bf16.msra.mxu3 %v22455_v0  ;;  %v24052_v0 = vpop.f32.mrf.mxu0 }
 0x3e6   : > { %10193 = vmatpush.bf16.msra.mxu0 %v22532_v39  ;;  %v22476_v39 = vld [vmem:[#allocation4 + $0x108] sm:$0xff] }
 0x3e7   : > { %10207 = vmatpush.bf16.msra.mxu1 %v22540_v26  ;;  %v22484_v26 = vld [vmem:[#allocation4 + $0x148] sm:$0xff] }
 0x3e8   : > { %10539 = vmatpush.bf16.msra.mxu2 %v22446_v43  ;;  %v24054_v43 = vpop.f32.mrf.mxu1 }
 0x3e9   : > { %10553 = vmatpush.bf16.msra.mxu3 %v22454_v36  ;;  %v22459_v36 = vld [vmem:[#allocation4 + $0x80] sm:$0xff] }
 0x3ea   : > { %10194 = vmatpush.bf16.msra.mxu0 %v22531_v22  ;;  %v22467_v22 = vld [vmem:[#allocation4 + $0xc0] sm:$0xff] }
 0x3eb   : > { %10208 = vmatpush.bf16.msra.mxu1 %v22539_v55  ;;  %v22475_v55 = vld [vmem:[#allocation4 + $0x100] sm:$0xff] }
 0x3ec   : > { %10540 = vmatpush.bf16.msra.mxu2 %v22445_v50  ;;  %v22483_v50 = vld [vmem:[#allocation4 + $0x140] sm:$0xff] }
 0x3ed   : > { %10554 = vmatpush.bf16.msra.mxu3 %v22453_v62  ;;  %v22558_v62 = vld [vmem:[#allocation4 + $0x338] sm:$0xff] }
 0x3ee   : > { %10195 = vmatpush.bf16.msra.mxu0 %v22530_v11  ;;  %v22566_v11 = vld [vmem:[#allocation4 + $0x378] sm:$0xff] }
 0x3ef   : > { %10209 = vmatpush.bf16.msra.mxu1 %v22538_v4  ;;  %v19354_v4 = vld [vmem:[%s23413_s28 + $0xa8] sm:$0xf] }
 0x3f0   : > { %10541 = vmatpush.bf16.msra.mxu2 %v22444_v53  ;;  %v22441_v53 = vld [vmem:[%s23413_s28 + $0xcc] sm:$0xf0] }
 0x3f1   : > { %10555 = vmatpush.bf16.msra.mxu3 %v22452_v6  ;;  %v24058_v6 = vpop.f32.mrf.mxu2  ;;  %v19355_v21 = vor.u32 %v22441_v53, %v19354_v4 }
 0x3f2   : > { %10196 = vmatpush.bf16.msra.mxu0 %v22529_v58  ;;  %v19362_v58 = vld [vmem:[%s23413_s28 + $0xb0] sm:$0xf] }
 0x3f3   : > { %10210 = vmatpush.bf16.msra.mxu1 %v22537_v23  ;;  %v22442_v23 = vld [vmem:[%s23413_s28 + $0xd4] sm:$0xf0] }
 0x3f4   : > { %10542 = vmatpush.bf16.msra.mxu2 %v22443_v25  ;;  %v22438_v25 = vld [vmem:[%s23413_s28 + $0xac] sm:$0xf]  ;;  %v19363_v63 = vor.u32 %v22442_v23, %v19362_v58 }
 0x3f5   : > { %10556 = vmatpush.bf16.msra.mxu3 %v22451_v44  ;;  %10197 = vmatmul.bf16.vlgmr.msra.gmra.mxu0 %v19147_v35  ;;  %v24063_v44 = vpop.f32.mrf.mxu3  ;;  %v22573_v35 = vld [vmem:[#allocation4 + $0x3b0] sm:$0xff]  ;;  %v22590_v58 = vld [vmem:[#allocation4 + $0x438] sm:$0xff] }
 0x3f6   : > { %10563 = vmatpush.bf16.msrb.mxu0 %v22466_v20  ;;  %10211 = vmatmul.bf16.vlgmr.msra.gmra.mxu1 %v19151_v18  ;;  %v19356_v20 = vld [vmem:[%s23413_s28 + $0xd0] sm:$0xf0]  ;;  %v24070_v18 = vpop.f32.mrf.mxu1  ;;  %v22598_v23 = vld [vmem:[#allocation4 + $0x478] sm:$0xff] }
 0x3f7   : > { %10577 = vmatpush.bf16.msrb.mxu1 %v22474_v60  ;;  %10543 = vmatmul.bf16.vlgmr.msra.gmra.mxu2 %v19347_v38  ;;  %v22439_v60 = vld [vmem:[%s23413_s28 + $0xb4] sm:$0xf]  ;;  %v19359_v9 = vor.u32 %v22438_v25, %v19356_v20  ;;  %v19568_v20 = vld [vmem:[%s23413_s28 + $0x140] sm:$0xf] }
 0x3f8   : > { %10591 = vmatpush.bf16.msrb.mxu2 %v22482_v33  ;;  %10557 = vmatmul.bf16.vlgmr.msra.gmra.mxu3 %v19351_v41  ;;  %v19367_v48 = vor.u32 %v22439_v60, %v19364_v15  ;;  %v22565_v33 = vld [vmem:[#allocation4 + $0x370] sm:$0xff]  ;;  %v22556_v41 = vld [vmem:[#allocation4 + $0x328] sm:$0xff] }
 0x3f9   : > { %10605 = vmatpush.bf16.msrb.mxu3 %v22490_v52  ;;  %v24068_v52 = vpop.f32.mrf.mxu0  ;;  %v22581_v38 = vld [vmem:[#allocation4 + $0x3f0] sm:$0xff]  ;;  %v22548_v60 = vld [vmem:[%s23413_s28 + $0x164] sm:$0xf0]  ;;  %v19570_v15 = vld [vmem:[%s23413_s28 + $0x168] sm:$0xf0] }
 0x3fa   : > { %10564 = vmatpush.bf16.msrb.mxu0 %v22465_v42  ;;  %v22564_v42 = vld [vmem:[#allocation4 + $0x368] sm:$0xff] }
 0x3fb   : > { %10578 = vmatpush.bf16.msrb.mxu1 %v22473_v14  ;;  %v24072_v14 = vpop.f32.mrf.mxu2 }
 0x3fc   : > { %10592 = vmatpush.bf16.msrb.mxu2 %v22481_v46  ;;  %v22572_v46 = vld [vmem:[#allocation4 + $0x3a8] sm:$0xff] }
 0x3fd   : > { %10606 = vmatpush.bf16.msrb.mxu3 %v22489_v49  ;;  %v22580_v49 = vld [vmem:[#allocation4 + $0x3e8] sm:$0xff] }
 0x3fe   : > { %10565 = vmatpush.bf16.msrb.mxu0 %v22464_v28  ;;  %v24074_v28 = vpop.f32.mrf.mxu3 }
 0x3ff   : > { %10579 = vmatpush.bf16.msrb.mxu1 %v22472_v1  ;;  %v8635_v1 = vadd.f32 %v24035_v54, %v24030_v2  ;;  %v22570_v2 = vld [vmem:[#allocation4 + $0x398] sm:$0xff] }
 0x400   : > { %10593 = vmatpush.bf16.msrb.mxu2 %v22480_v12  ;;  %v22555_v12 = vld [vmem:[#allocation4 + $0x320] sm:$0xff]  ;;  %v22578_v54 = vld [vmem:[#allocation4 + $0x3d8] sm:$0xff] }
 0x401   : > { %10607 = vmatpush.bf16.msrb.mxu3 %v22488_v17  ;;  %v22563_v17 = vld [vmem:[#allocation4 + $0x360] sm:$0xff] }
 0x402   : > { %10566 = vmatpush.bf16.msrb.mxu0 %v22463_v19  ;;  %v22571_v19 = vld [vmem:[#allocation4 + $0x3a0] sm:$0xff] }
 0x403   : > { %10580 = vmatpush.bf16.msrb.mxu1 %v22471_v45  ;;  %v22579_v45 = vld [vmem:[#allocation4 + $0x3e0] sm:$0xff] }
 0x404   : > { %10594 = vmatpush.bf16.msrb.mxu2 %v22479_v29  ;;  %v24078_v29 = vpop.f32.mrf.mxu0 }
 0x405   : > { %10608 = vmatpush.bf16.msrb.mxu3 %v22487_v34  ;;  %v8649_v34 = vadd.f32 %v24044_v32, %v8635_v1  ;;  %v22561_v32 = vld [vmem:[#allocation4 + $0x350] sm:$0xff] }
 0x406   : > { %10567 = vmatpush.bf16.msrb.mxu0 %v22462_v47  ;;  %v24081_v47 = vpop.f32.mrf.mxu1  ;;  %v22665_v1 = vld [vmem:[#allocation4 + $0x1b0] sm:$0xff] }
 0x407   : > { %10581 = vmatpush.bf16.msrb.mxu1 %v22470_v13  ;;  %v22554_v13 = vld [vmem:[#allocation4 + $0x318] sm:$0xff] }
 0x408   : > { %10595 = vmatpush.bf16.msrb.mxu2 %v22478_v30  ;;  %v22562_v30 = vld [vmem:[#allocation4 + $0x358] sm:$0xff] }
 0x409   : > { %10609 = vmatpush.bf16.msrb.mxu3 %v22486_v31  ;;  %v24083_v31 = vpop.f32.mrf.mxu2 }
 0x40a   : > { %10568 = vmatpush.bf16.msrb.mxu0 %v22461_v59  ;;  %v8663_v59 = vadd.f32 %v24046_v57, %v8649_v34  ;;  %v22552_v57 = vld [vmem:[#allocation4 + $0x308] sm:$0xff] }
 0x40b   : > { %10582 = vmatpush.bf16.msrb.mxu1 %v22469_v27  ;;  %v24086_v27 = vpop.f32.mrf.mxu3  ;;  %v22588_v34 = vld [vmem:[#allocation4 + $0x428] sm:$0xff] }
 0x40c   : > { %10596 = vmatpush.bf16.msrb.mxu2 %v22477_v24  ;;  %v22553_v24 = vld [vmem:[#allocation4 + $0x310] sm:$0xff] }
 0x40d   : > { %10610 = vmatpush.bf16.msrb.mxu3 %v22485_v8  ;;  %v22569_v8 = vld [vmem:[#allocation4 + $0x390] sm:$0xff] }
 0x40e   : > { %10569 = vmatpush.bf16.msrb.mxu0 %v22460_v56  ;;  %v22577_v56 = vld [vmem:[#allocation4 + $0x3d0] sm:$0xff] }
 0x40f   : > { %10583 = vmatpush.bf16.msrb.mxu1 %v22468_v61  ;;  %v8637_v61 = vadd.f32 %v24042_v37, %v24040_v10  ;;  %v22559_v37 = vld [vmem:[#allocation4 + $0x340] sm:$0xff] }
 0x410   : > { %10597 = vmatpush.bf16.msrb.mxu2 %v22476_v39 }
 0x411   : > { %10611 = vmatpush.bf16.msrb.mxu3 %v22484_v26  ;;  %v8677_v26 = vadd.f32 %v24048_v3, %v8663_v59  ;;  %v8651_v10 = vadd.f32 %v24052_v0, %v8637_v61  ;;  %v22567_v3 = vld [vmem:[#allocation4 + $0x380] sm:$0xff] }
 0x412   : > { %10570 = vmatpush.bf16.msrb.mxu0 %v22459_v36  ;;  %v24090_v39 = vpop.f32.mrf.mxu0  ;;  %v22545_v0 = vld [vmem:[%s23413_s28 + $0x144] sm:$0xf] }
 0x413   : > { %10584 = vmatpush.bf16.msrb.mxu1 %v22467_v22  ;;  %v24093_v36 = vpop.f32.mrf.mxu1  ;;  %v22560_v22 = vld [vmem:[#allocation4 + $0x348] sm:$0xff]  ;;  %v8691_v53 = vadd.f32 %v24050_v7, %v8677_v26  ;;  %v22663_v26 = vld [vmem:[#allocation4 + $0x1a0] sm:$0xff] }
 0x414   : > { %10598 = vmatpush.bf16.msrb.mxu2 %v22475_v55  ;;  %v22568_v55 = vld [vmem:[#allocation4 + $0x388] sm:$0xff] }
 0x415   : > { %10612 = vmatpush.bf16.msrb.mxu3 %v22483_v50  ;;  %10571 = vmatmul.bf16.vlgmr.msrb.gmra.mxu0 %v19355_v21  ;;  %v22576_v50 = vld [vmem:[#allocation4 + $0x3c8] sm:$0xff]  ;;  %v9023_v7 = vadd.f32 %v24068_v52, %v8691_v53  ;;  %v22673_v52 = vld [vmem:[#allocation4 + $0x1f0] sm:$0xff] }
 0x416   : > { %11040 = vmatpush.bf16.msra.mxu0 %v22558_v62  ;;  %10585 = vmatmul.bf16.vlgmr.msrb.gmra.mxu1 %v19359_v9  ;;  %v22551_v62 = vld [vmem:[#allocation4 + $0x300] sm:$0xff]  ;;  %v22546_v21 = vld [vmem:[%s23413_s28 + $0x14c] sm:$0xf]  ;;  %v8665_v9 = vadd.f32 %v24054_v43, %v8651_v10  ;;  %v22597_v43 = vld [vmem:[#allocation4 + $0x470] sm:$0xff] }
 0x417   : > { %11054 = vmatpush.bf16.msra.mxu1 %v22566_v11  ;;  %10599 = vmatmul.bf16.vlgmr.msrb.gmra.mxu2 %v19363_v63  ;;  %v22575_v11 = vld [vmem:[#allocation4 + $0x3c0] sm:$0xff]  ;;  %v22662_v10 = vld [vmem:[#allocation4 + $0x198] sm:$0xff] }
 0x418   : > { %11068 = vmatpush.bf16.msra.mxu2 %v22574_v16  ;;  %10613 = vmatmul.bf16.vlgmr.msrb.gmra.mxu3 %v19367_v48  ;;  %v19576_v16 = vld [vmem:[%s23413_s28 + $0x148] sm:$0xf]  ;;  %v19578_v63 = vld [vmem:[%s23413_s28 + $0x170] sm:$0xf0] }
 0x419   : > { %11082 = vmatpush.bf16.msra.mxu3 %v22582_v40  ;;  %v22549_v40 = vld [vmem:[%s23413_s28 + $0x16c] sm:$0xf0]  ;;  %v22666_v48 = vld [vmem:[#allocation4 + $0x1b8] sm:$0xff] }
 0x41a   : > { %11041 = vmatpush.bf16.msra.mxu0 %v22557_v5  ;;  %v9526_v4 = vpop.f32.mrf.mxu2  ;;  %v22674_v5 = vld [vmem:[#allocation4 + $0x1f8] sm:$0xff] }
 0x41b   : > { %11055 = vmatpush.bf16.msra.mxu1 %v22565_v33  ;;  %v9540_v25 = vpop.f32.mrf.mxu3  ;;  %v19569_v33 = vor.u32 %v22548_v60, %v19568_v20  ;;  %v22661_v60 = vld [vmem:[#allocation4 + $0x190] sm:$0xff] }
 0x41c   : > { %11069 = vmatpush.bf16.msra.mxu2 %v22573_v35  ;;  %v19573_v35 = vor.u32 %v22545_v0, %v19570_v15  ;;  %v22669_v0 = vld [vmem:[#allocation4 + $0x1d0] sm:$0xff] }
 0x41d   : > { %11083 = vmatpush.bf16.msra.mxu3 %v22581_v38  ;;  %v24107_v38 = vpop.f32.mrf.mxu0 }
 0x41e   : > { %11042 = vmatpush.bf16.msra.mxu0 %v22556_v41  ;;  %v19577_v41 = vor.u32 %v22549_v40, %v19576_v16 }
 0x41f   : > { %11056 = vmatpush.bf16.msra.mxu1 %v22564_v42  ;;  %v19581_v42 = vor.u32 %v22546_v21, %v19578_v63  ;;  %v22592_v63 = vld [vmem:[#allocation4 + $0x448] sm:$0xff] }
 0x420   : > { %11070 = vmatpush.bf16.msra.mxu2 %v22572_v46  ;;  %v24109_v46 = vpop.f32.mrf.mxu1 }
 0x421   : > { %11084 = vmatpush.bf16.msra.mxu3 %v22580_v49  ;;  %v22589_v49 = vld [vmem:[#allocation4 + $0x430] sm:$0xff] }
 0x422   : > { %11043 = vmatpush.bf16.msra.mxu0 %v22555_v12  ;;  %v8679_v12 = vadd.f32 %v24058_v6, %v8665_v9  ;;  %v22660_v9 = vld [vmem:[#allocation4 + $0x188] sm:$0xff] }
 0x423   : > { %11057 = vmatpush.bf16.msra.mxu1 %v22563_v17  ;;  %v9037_v17 = vadd.f32 %v24070_v18, %v9023_v7 }
 0x424   : > { %11071 = vmatpush.bf16.msra.mxu2 %v22571_v19  ;;  %v9528_v19 = vpop.f32.mrf.mxu2  ;;  %v8693_v59 = vadd.f32 %v24063_v44, %v8679_v12  ;;  %v22690_v12 = vld [vmem:[#allocation4 + $0x278] sm:$0xff] }
 0x425   : > { %11085 = vmatpush.bf16.msra.mxu3 %v22579_v45  ;;  %v9541_v45 = vadd.f32 %v9540_v25, %v9526_v4  ;;  %v9051_v6 = vadd.f32 %v24072_v14, %v9037_v17  ;;  %v19584_v17 = vld [vmem:[%s23413_s28 + $0x150] sm:$0xf] }
 0x426   : > { %11044 = vmatpush.bf16.msra.mxu0 %v22554_v13  ;;  %v22596_v13 = vld [vmem:[#allocation4 + $0x468] sm:$0xff] }
 0x427   : > { %11058 = vmatpush.bf16.msra.mxu1 %v22562_v30  ;;  %v9542_v30 = vpop.f32.mrf.mxu3 }
 0x428   : > { %11072 = vmatpush.bf16.msra.mxu2 %v22570_v2  ;;  %v22664_v2 = vld [vmem:[#allocation4 + $0x1a8] sm:$0xff] }
 0x429   : > { %11086 = vmatpush.bf16.msra.mxu3 %v22578_v54  ;;  %v22672_v54 = vld [vmem:[#allocation4 + $0x1e8] sm:$0xff] }
 0x42a   : > { %11045 = vmatpush.bf16.msra.mxu0 %v22553_v24  ;;  %v9025_v24 = vadd.f32 %v24078_v29, %v8693_v59  ;;  %v22586_v29 = vld [vmem:[#allocation4 + $0x418] sm:$0xff] }
 0x42b   : > { %11059 = vmatpush.bf16.msra.mxu1 %v22561_v32  ;;  %v22587_v32 = vld [vmem:[#allocation4 + $0x420] sm:$0xff]  ;;  %v22698_v59 = vld [vmem:[#allocation4 + $0x2b8] sm:$0xff] }
 0x42c   : > { %11073 = vmatpush.bf16.msra.mxu2 %v22569_v8  ;;  %v22595_v8 = vld [vmem:[#allocation4 + $0x460] sm:$0xff]  ;;  %v9039_v44 = vadd.f32 %v24081_v47, %v9025_v24 }
 0x42d   : > { %11087 = vmatpush.bf16.msra.mxu3 %v22577_v56 }
 0x42e   : > { %11046 = vmatpush.bf16.msra.mxu0 %v22552_v57  ;;  %v22671_v57 = vld [vmem:[#allocation4 + $0x1e0] sm:$0xff] }
 0x42f   : > { %11060 = vmatpush.bf16.msra.mxu1 %v22560_v22  ;;  %v9065_v22 = vadd.f32 %v24074_v28, %v9051_v6  ;;  %v22706_v6 = vld [vmem:[#allocation4 + $0x2f8] sm:$0xff] }
 0x430   : > { %11074 = vmatpush.bf16.msra.mxu2 %v22568_v55 }
 0x431   : > { %11088 = vmatpush.bf16.msra.mxu3 %v22576_v50  ;;  %v9079_v14 = vadd.f32 %v24090_v39, %v9065_v22  ;;  %v9543_v50 = vadd.f32 %v9542_v30, %v9528_v19  ;;  %v22585_v39 = vld [vmem:[#allocation4 + $0x410] sm:$0xff]  ;;  %v22550_v19 = vld [vmem:[%s23413_s28 + $0x174] sm:$0xf0] }
 0x432   : > { %11047 = vmatpush.bf16.msra.mxu0 %v22551_v62  ;;  %v9554_v18 = vpop.f32.mrf.mxu0  ;;  %v22594_v62 = vld [vmem:[#allocation4 + $0x458] sm:$0xff]  ;;  %v22656_v30 = vld [vmem:[%s23413_s28 + $0x11c] sm:$0xf0]  ;;  %v19585_v24 = vor.u32 %v22550_v19, %v19584_v17 }
 0x433   : > { %11061 = vmatpush.bf16.msra.mxu1 %v22559_v37  ;;  %v9555_v56 = vadd.f32 %v9554_v18, %v9541_v45  ;;  %v9568_v61 = vpop.f32.mrf.mxu1  ;;  %v22670_v37 = vld [vmem:[#allocation4 + $0x1d8] sm:$0xff]  ;;  %v22547_v45 = vld [vmem:[%s23413_s28 + $0x154] sm:$0xf] }
 0x434   : > { %11075 = vmatpush.bf16.msra.mxu2 %v22567_v3  ;;  %v22697_v22 = vld [vmem:[#allocation4 + $0x2b0] sm:$0xff] }
 0x435   : > { %11089 = vmatpush.bf16.msra.mxu3 %v22575_v11  ;;  %11048 = vmatmul.bf16.vlgmr.msra.gmra.mxu0 %v19569_v33  ;;  %v9569_v55 = vadd.f32 %v9568_v61, %v9555_v56  ;;  %v9053_v11 = vadd.f32 %v24083_v31, %v9039_v44  ;;  %v22627_v17 = vld [vmem:[#allocation4 + $0xb0] sm:$0xff] }
 0x436   : > { %11096 = vmatpush.bf16.msrb.mxu0 %v22590_v58  ;;  %11062 = vmatmul.bf16.vlgmr.msra.gmra.mxu1 %v19573_v35  ;;  %v9093_v58 = vadd.f32 %v24093_v36, %v9079_v14  ;;  %v22584_v36 = vld [vmem:[#allocation4 + $0x408] sm:$0xff]  ;;  %v22583_v35 = vld [vmem:[#allocation4 + $0x400] sm:$0xff]  ;;  %v22635_v19 = vld [vmem:[#allocation4 + $0xf0] sm:$0xff] }
 0x437   : > { %11110 = vmatpush.bf16.msrb.mxu1 %v22598_v23  ;;  %11076 = vmatmul.bf16.vlgmr.msra.gmra.mxu2 %v19577_v41  ;;  %v22593_v23 = vld [vmem:[#allocation4 + $0x450] sm:$0xff]  ;;  %v9067_v15 = vadd.f32 %v24086_v27, %v9053_v11  ;;  %v22659_v41 = vld [vmem:[#allocation4 + $0x180] sm:$0xff]  ;;  %v22688_v14 = vld [vmem:[#allocation4 + $0x268] sm:$0xff] }
 0x438   : > { %11656 = vmatpush.bf16.msrb.mxu2 %v22666_v48  ;;  %11090 = vmatmul.bf16.vlgmr.msra.gmra.mxu3 %v19581_v42  ;;  %v22668_v48 = vld [vmem:[#allocation4 + $0x1c8] sm:$0xff]  ;;  %v22667_v42 = vld [vmem:[#allocation4 + $0x1c0] sm:$0xff]  ;;  %v22678_v11 = vld [vmem:[#allocation4 + $0x218] sm:$0xff] }
 0x439   : > { %11670 = vmatpush.bf16.msrb.mxu3 %v22674_v5  ;;  %v9081_v40 = vadd.f32 %v24107_v38, %v9067_v15  ;;  %v22591_v38 = vld [vmem:[#allocation4 + $0x440] sm:$0xff] }
 0x43a   : > { %11097 = vmatpush.bf16.msrb.mxu0 %v22589_v49  ;;  %v9582_v3 = vpop.f32.mrf.mxu2  ;;  %v9556_v28 = vpop.f32.mrf.mxu0  ;;  %v22675_v15 = vld [vmem:[#allocation4 + $0x200] sm:$0xff] }
 0x43b   : > { %11111 = vmatpush.bf16.msrb.mxu1 %v22597_v43  ;;  %v9583_v4 = vadd.f32 %v9582_v3, %v9569_v55  ;;  %v9596_v53 = vpop.f32.mrf.mxu3  ;;  %v9557_v25 = vadd.f32 %v9556_v28, %v9543_v50  ;;  %v9570_v20 = vpop.f32.mrf.mxu1  ;;  %v9095_v49 = vadd.f32 %v24109_v46, %v9081_v40  ;;  %v19798_v46 = vld [vmem:[%s23413_s28 + $0x120] sm:$0xf0]  ;;  %v22696_v50 = vld [vmem:[#allocation4 + $0x2a8] sm:$0xff]  ;;  %v22702_v28 = vld [vmem:[#allocation4 + $0x2d8] sm:$0xff] }
 0x43c   : > { %11657 = vmatpush.bf16.msrb.mxu2 %v22665_v1  ;;  %v22705_v55 = vld [vmem:[#allocation4 + $0x2f0] sm:$0xff]  ;;  %v22703_v3 = vld [vmem:[#allocation4 + $0x2e0] sm:$0xff] }
 0x43d   : > { %11671 = vmatpush.bf16.msrb.mxu3 %v22673_v52  ;;  %v9597_v47 = vadd.f32 %v9596_v53, %v9583_v4  ;;  %v9571_v31 = vadd.f32 %v9570_v20, %v9557_v25  ;;  %v22682_v52 = vld [vmem:[#allocation4 + $0x238] sm:$0xff]  ;;  %v22676_v25 = vld [vmem:[#allocation4 + $0x208] sm:$0xff]  ;;  %v22699_v40 = vld [vmem:[#allocation4 + $0x2c0] sm:$0xff] }
 0x43e   : > { %11098 = vmatpush.bf16.msrb.mxu0 %v22588_v34  ;;  %v19586_v34 = vld [vmem:[%s23413_s28 + $0x178] sm:$0xf0] }
 0x43f   : > { %11112 = vmatpush.bf16.msrb.mxu1 %v22596_v13  ;;  %v9601_v16 = vadd.f32 %v9597_v47, %v9093_v58  ;;  %v19796_v13 = vld [vmem:[%s23413_s28 + $0xf8] sm:$0xf]  ;;  %v22677_v58 = vld [vmem:[#allocation4 + $0x210] sm:$0xff] }
 0x440   : > { %11658 = vmatpush.bf16.msrb.mxu2 %v22664_v2  ;;  %v22686_v4 = vld [vmem:[#allocation4 + $0x258] sm:$0xff]  ;;  %v22685_v47 = vld [vmem:[#allocation4 + $0x250] sm:$0xff]  ;;  %v22684_v20 = vld [vmem:[#allocation4 + $0x248] sm:$0xff] }
 0x441   : > { %11672 = vmatpush.bf16.msrb.mxu3 %v22672_v54  ;;  %v9603_v21 = vadd.f32 %v24015_v51, %v9601_v16  ;;  %v22653_v54 = vld [vmem:[%s23413_s28 + $0xfc] sm:$0xf]  ;;  %v22683_v16 = vld [vmem:[#allocation4 + $0x240] sm:$0xff] }
 0x442   : > { %11099 = vmatpush.bf16.msrb.mxu0 %v22587_v32  ;;  %v9584_v5 = vpop.f32.mrf.mxu2  ;;  %v19589_v32 = vor.u32 %v22547_v45, %v19586_v34  ;;  %v19801_v56 = vor.u32 %v22653_v54, %v19798_v46  ;;  %v22694_v53 = vld [vmem:[#allocation4 + $0x298] sm:$0xff]  ;;  %v22610_v45 = vld [vmem:[#allocation4 + $0x28] sm:$0xff]  ;;  %v22617_v54 = vld [vmem:[#allocation4 + $0x60] sm:$0xff] }
 0x443   : > { %11113 = vmatpush.bf16.msrb.mxu1 %v22595_v8  ;;  %v9605_v7 = vmax.f32 %v9603_v21, 0.0  ;;  %v9585_v27 = vadd.f32 %v9584_v5, %v9571_v31  ;;  %v9598_v33 = vpop.f32.mrf.mxu3  ;;  %v19797_v8 = vor.u32 %v22656_v30, %v19796_v13  ;;  %v22691_v31 = vld [vmem:[#allocation4 + $0x280] sm:$0xff]  ;;  %v22612_v21 = vld [vmem:[#allocation4 + $0x38] sm:$0xff]  ;;  %v22618_v34 = vld [vmem:[#allocation4 + $0x68] sm:$0xff] }
 0x444   : > { %11659 = vmatpush.bf16.msrb.mxu2 %v22663_v26  ;;  %v22681_v26 = vld [vmem:[#allocation4 + $0x230] sm:$0xff]  ;;  %v22626_v13 = vld [vmem:[#allocation4 + $0xa8] sm:$0xff]  ;;  %v22625_v46 = vld [vmem:[#allocation4 + $0xa0] sm:$0xff] }
 0x445   : > { %11673 = vmatpush.bf16.msrb.mxu3 %v22671_v57  ;;  %v9607_v43 = vpack.c.bf16 %v9605_v7, %v9605_v7  ;;  %v9599_v1 = vadd.f32 %v9598_v33, %v9585_v27  ;;  %v22689_v57 = vld [vmem:[#allocation4 + $0x270] sm:$0xff]  ;;  %v19806_v27 = vld [vmem:[%s23413_s28 + $0x128] sm:$0xf0] }
 0x446   : > { %11100 = vmatpush.bf16.msrb.mxu0 %v22586_v29  ;;  %v22704_v29 = vld [vmem:[#allocation4 + $0x2e8] sm:$0xff]  ;;  %v22658_v5 = vld [vmem:[%s23413_s28 + $0x12c] sm:$0xf0]  ;;  %v22654_v7 = vld [vmem:[%s23413_s28 + $0x104] sm:$0xf] }
 0x447   : > { %11114 = vmatpush.bf16.msrb.mxu1 %v22594_v62  ;;  %9609 = vst [vmem:[#allocation2 + $0x14] sm:$0xf] %v9607_v43  ;;  %v9602_v2 = vadd.f32 %v9599_v1, %v9095_v49  ;;  %v22679_v62 = vld [vmem:[#allocation4 + $0x220] sm:$0xff]  ;;  %v22655_v33 = vld [vmem:[%s23413_s28 + $0x10c] sm:$0xf]  ;;  %v19809_v43 = vor.u32 %v22654_v7, %v19806_v27 }
 0x448   : > { %11660 = vmatpush.bf16.msrb.mxu2 %v22662_v10  ;;  %v22687_v10 = vld [vmem:[#allocation4 + $0x260] sm:$0xff]  ;;  %v22634_v30 = vld [vmem:[#allocation4 + $0xe8] sm:$0xff] }
 0x449   : > { %11674 = vmatpush.bf16.msrb.mxu3 %v22670_v37  ;;  %v9604_v18 = vadd.f32 %v24015_v51, %v9602_v2  ;;  %v22680_v51 = vld [vmem:[#allocation4 + $0x228] sm:$0xff]  ;;  %v22695_v37 = vld [vmem:[#allocation4 + $0x2a0] sm:$0xff] }
 0x44a   : > { %11101 = vmatpush.bf16.msrb.mxu0 %v22585_v39  ;;  %v22693_v39 = vld [vmem:[#allocation4 + $0x290] sm:$0xff]  ;;  %v22609_v2 = vld [vmem:[#allocation4 + $0x20] sm:$0xff]  ;;  %v22650_v7 = vld [vmem:[#allocation4 + $0x168] sm:$0xff] }
 0x44b   : > { %11115 = vmatpush.bf16.msrb.mxu1 %v22593_v23  ;;  %v9606_v61 = vmax.f32 %v9604_v18, 0.0  ;;  %v22701_v23 = vld [vmem:[#allocation4 + $0x2d0] sm:$0xff]  ;;  %v22616_v18 = vld [vmem:[#allocation4 + $0x58] sm:$0xff] }
 0x44c   : > { %11661 = vmatpush.bf16.msrb.mxu2 %v22661_v60  ;;  %v22692_v60 = vld [vmem:[#allocation4 + $0x288] sm:$0xff] }
 0x44d   : > { %11675 = vmatpush.bf16.msrb.mxu3 %v22669_v0  ;;  %v9608_v44 = vpack.c.bf16 %v9606_v61, %v9606_v61  ;;  %v22700_v0 = vld [vmem:[#allocation4 + $0x2c8] sm:$0xff]  ;;  %v22623_v61 = vld [vmem:[#allocation4 + $0x90] sm:$0xff] }
 0x44e   : > { %11102 = vmatpush.bf16.msrb.mxu0 %v22584_v36  ;;  %v22620_v36 = vld [vmem:[#allocation4 + $0x78] sm:$0xff] }
 0x44f   : > { %11116 = vmatpush.bf16.msrb.mxu1 %v22592_v63  ;;  %9610 = vst [vmem:[#allocation2 + $0x38] sm:$0xf] %v9608_v44  ;;  %v19804_v63 = vld [vmem:[%s23413_s28 + $0x100] sm:$0xf] }
 0x450   : > { %11662 = vmatpush.bf16.msrb.mxu2 %v22660_v9  ;;  %v22657_v9 = vld [vmem:[%s23413_s28 + $0x124] sm:$0xf0] }
 0x451   : > { %11676 = vmatpush.bf16.msrb.mxu3 %v22668_v48  ;;  %v19812_v48 = vld [vmem:[%s23413_s28 + $0x108] sm:$0xf] }
 0x452   : > { %11103 = vmatpush.bf16.msrb.mxu0 %v22583_v35  ;;  %v19814_v35 = vld [vmem:[%s23413_s28 + $0x130] sm:$0xf0]  ;;  %v19813_v49 = vor.u32 %v22658_v5, %v19812_v48  ;;  %v22642_v5 = vld [vmem:[#allocation4 + $0x128] sm:$0xff] }
 0x453   : > { %11117 = vmatpush.bf16.msrb.mxu1 %v22591_v38  ;;  %v22628_v38 = vld [vmem:[#allocation4 + $0xb8] sm:$0xff]  ;;  %v19817_v1 = vor.u32 %v22655_v33, %v19814_v35  ;;  %v24144_v44 = vpop.f32.mrf.mxu1  ;;  %v22727_v48 = vld [vmem:[#allocation4 + $0x370] sm:$0xff]  ;;  %v22718_v33 = vld [vmem:[#allocation4 + $0x328] sm:$0xff] }
 0x454   : > { %11663 = vmatpush.bf16.msrb.mxu2 %v22659_v41  ;;  %v22636_v41 = vld [vmem:[#allocation4 + $0xf8] sm:$0xff]  ;;  %v22726_v35 = vld [vmem:[#allocation4 + $0x368] sm:$0xff] }
 0x455   : > { %11677 = vmatpush.bf16.msrb.mxu3 %v22667_v42  ;;  %11104 = vmatmul.bf16.vlgmr.msrb.gmra.mxu0 %v19585_v24  ;;  %v19805_v42 = vor.u32 %v22657_v9, %v19804_v63  ;;  %v22624_v24 = vld [vmem:[#allocation4 + $0x98] sm:$0xff]  ;;  %v22719_v9 = vld [vmem:[#allocation4 + $0x330] sm:$0xff] }
 0x456   : > { %11684 = vmatpush.bf16.msra.mxu0 %v22682_v52  ;;  %11118 = vmatmul.bf16.vlgmr.msrb.gmra.mxu1 %v19589_v32  ;;  %v22611_v52 = vld [vmem:[#allocation4 + $0x30] sm:$0xff]  ;;  %v22632_v32 = vld [vmem:[#allocation4 + $0xd8] sm:$0xff] }
 0x457   : > { %11698 = vmatpush.bf16.msra.mxu1 %v22690_v12  ;;  %11664 = vmatmul.bf16.vlgmr.msrb.gmra.mxu2 %v19797_v8  ;;  %v22619_v12 = vld [vmem:[#allocation4 + $0x70] sm:$0xff] }
 0x458   : > { %11712 = vmatpush.bf16.msra.mxu2 %v22698_v59  ;;  %11678 = vmatmul.bf16.vlgmr.msrb.gmra.mxu3 %v19801_v56  ;;  %v22633_v59 = vld [vmem:[#allocation4 + $0xe0] sm:$0xff]  ;;  %v22607_v8 = vld [vmem:[#allocation4 + $0x10] sm:$0xff] }
 0x459   : > { %11726 = vmatpush.bf16.msra.mxu3 %v22706_v6  ;;  %v22608_v6 = vld [vmem:[#allocation4 + $0x18] sm:$0xff]  ;;  %v22615_v56 = vld [vmem:[#allocation4 + $0x50] sm:$0xff] }
 0x45a   : > { %11685 = vmatpush.bf16.msra.mxu0 %v22681_v26  ;;  %v22631_v26 = vld [vmem:[#allocation4 + $0xd0] sm:$0xff] }
 0x45b   : > { %11699 = vmatpush.bf16.msra.mxu1 %v22689_v57  ;;  %v22606_v57 = vld [vmem:[#allocation4 + $0x8] sm:$0xff]  ;;  %v24158_v63 = vpop.f32.mrf.mxu1  ;;  %v24160_v27 = vpop.f32.mrf.mxu3 }
 0x45c   : > { %11713 = vmatpush.bf16.msra.mxu2 %v22697_v22  ;;  %v22614_v22 = vld [vmem:[#allocation4 + $0x48] sm:$0xff] }
 0x45d   : > { %11727 = vmatpush.bf16.msra.mxu3 %v22705_v55  ;;  %v24142_v55 = vpop.f32.mrf.mxu0 }
 0x45e   : > { %11686 = vmatpush.bf16.msra.mxu0 %v22680_v51  ;;  %v22622_v51 = vld [vmem:[#allocation4 + $0x88] sm:$0xff] }
 0x45f   : > { %11700 = vmatpush.bf16.msra.mxu1 %v22688_v14  ;;  %v22630_v14 = vld [vmem:[#allocation4 + $0xc8] sm:$0xff] }
 0x460   : > { %11714 = vmatpush.bf16.msra.mxu2 %v22696_v50  ;;  %v22605_v50 = vld [vmem:[#allocation4] sm:$0xff] }
 0x461   : > { %11728 = vmatpush.bf16.msra.mxu3 %v22704_v29  ;;  %v22613_v29 = vld [vmem:[#allocation4 + $0x40] sm:$0xff] }
 0x462   : > { %11687 = vmatpush.bf16.msra.mxu0 %v22679_v62  ;;  %v22621_v62 = vld [vmem:[#allocation4 + $0x80] sm:$0xff] }
 0x463   : > { %11701 = vmatpush.bf16.msra.mxu1 %v22687_v10  ;;  %v22629_v10 = vld [vmem:[#allocation4 + $0xc0] sm:$0xff] }
 0x464   : > { %11715 = vmatpush.bf16.msra.mxu2 %v22695_v37  ;;  %v22644_v37 = vld [vmem:[#allocation4 + $0x138] sm:$0xff] }
 0x465   : > { %11729 = vmatpush.bf16.msra.mxu3 %v22703_v3  ;;  %v22652_v3 = vld [vmem:[#allocation4 + $0x178] sm:$0xff] }
 0x466   : > { %11688 = vmatpush.bf16.msra.mxu0 %v22678_v11  ;;  %v20012_v11 = vld [vmem:[%s23413_s28 + $0xa8] sm:$0xf] }
 0x467   : > { %11702 = vmatpush.bf16.msra.mxu1 %v22686_v4  ;;  %v22602_v4 = vld [vmem:[%s23413_s28 + $0xcc] sm:$0xf0] }
 0x468   : > { %11716 = vmatpush.bf16.msra.mxu2 %v22694_v53  ;;  %v20020_v53 = vld [vmem:[%s23413_s28 + $0xb0] sm:$0xf] }
 0x469   : > { %11730 = vmatpush.bf16.msra.mxu3 %v22702_v28  ;;  %v22603_v28 = vld [vmem:[%s23413_s28 + $0xd4] sm:$0xf0] }
 0x46a   : > { %11689 = vmatpush.bf16.msra.mxu0 %v22677_v58  ;;  %v22599_v58 = vld [vmem:[%s23413_s28 + $0xac] sm:$0xf] }
 0x46b   : > { %11703 = vmatpush.bf16.msra.mxu1 %v22685_v47  ;;  %v20014_v47 = vld [vmem:[%s23413_s28 + $0xd0] sm:$0xf0] }
 0x46c   : > { %11717 = vmatpush.bf16.msra.mxu2 %v22693_v39  ;;  %v22600_v39 = vld [vmem:[%s23413_s28 + $0xb4] sm:$0xf] }
 0x46d   : > { %11731 = vmatpush.bf16.msra.mxu3 %v22701_v23  ;;  %v20022_v23 = vld [vmem:[%s23413_s28 + $0xd8] sm:$0xf0] }
 0x46e   : > { %11690 = vmatpush.bf16.msra.mxu0 %v22676_v25  ;;  %v22720_v25 = vld [vmem:[#allocation4 + $0x338] sm:$0xff] }
 0x46f   : > { %11704 = vmatpush.bf16.msra.mxu1 %v22684_v20  ;;  %v22728_v20 = vld [vmem:[#allocation4 + $0x378] sm:$0xff] }
 0x470   : > { %11718 = vmatpush.bf16.msra.mxu2 %v22692_v60  ;;  %v20013_v60 = vor.u32 %v22602_v4, %v20012_v11  ;;  %v22707_v11 = vld [vmem:[%s23413_s28 + $0x14c] sm:$0xf]  ;;  %v20236_v4 = vld [vmem:[%s23413_s28 + $0x170] sm:$0xf0] }
 0x471   : > { %11732 = vmatpush.bf16.msra.mxu3 %v22700_v0  ;;  %v20021_v0 = vor.u32 %v22603_v28, %v20020_v53  ;;  %v22752_v53 = vld [vmem:[#allocation4 + $0x438] sm:$0xff] }
 0x472   : > { %11691 = vmatpush.bf16.msra.mxu0 %v22675_v15  ;;  %v20017_v15 = vor.u32 %v22599_v58, %v20014_v47  ;;  %v22760_v28 = vld [vmem:[#allocation4 + $0x478] sm:$0xff] }
 0x473   : > { %11705 = vmatpush.bf16.msra.mxu1 %v22683_v16  ;;  %v20025_v16 = vor.u32 %v22600_v39, %v20022_v23 }
 0x474   : > { %11719 = vmatpush.bf16.msra.mxu2 %v22691_v31  ;;  %v24154_v31 = vpop.f32.mrf.mxu2 }
 0x475   : > { %11733 = vmatpush.bf16.msra.mxu3 %v22699_v40  ;;  %11692 = vmatmul.bf16.vlgmr.msra.gmra.mxu0 %v19805_v42  ;;  %v22643_v40 = vld [vmem:[#allocation4 + $0x130] sm:$0xff]  ;;  %v22717_v42 = vld [vmem:[#allocation4 + $0x320] sm:$0xff] }
 0x476   : > { %12058 = vmatpush.bf16.msrb.mxu0 %v22612_v21  ;;  %11706 = vmatmul.bf16.vlgmr.msra.gmra.mxu1 %v19809_v43  ;;  %v22651_v21 = vld [vmem:[#allocation4 + $0x170] sm:$0xff] }
 0x477   : > { %12072 = vmatpush.bf16.msrb.mxu1 %v22620_v36  ;;  %11720 = vmatmul.bf16.vlgmr.msra.gmra.mxu2 %v19813_v49  ;;  %v24156_v36 = vpop.f32.mrf.mxu0  ;;  %v22725_v49 = vld [vmem:[#allocation4 + $0x360] sm:$0xff] }
 0x478   : > { %12086 = vmatpush.bf16.msrb.mxu2 %v22628_v38  ;;  %11734 = vmatmul.bf16.vlgmr.msra.gmra.mxu3 %v19817_v1  ;;  %v22641_v38 = vld [vmem:[#allocation4 + $0x120] sm:$0xff] }
 0x479   : > { %12100 = vmatpush.bf16.msrb.mxu3 %v22636_v41  ;;  %v22649_v41 = vld [vmem:[#allocation4 + $0x160] sm:$0xff] }
 0x47a   : > { %12059 = vmatpush.bf16.msrb.mxu0 %v22611_v52  ;;  %v24166_v52 = vpop.f32.mrf.mxu1 }
 0x47b   : > { %12073 = vmatpush.bf16.msrb.mxu1 %v22619_v12  ;;  %v22640_v12 = vld [vmem:[#allocation4 + $0x118] sm:$0xff] }
 0x47c   : > { %12087 = vmatpush.bf16.msrb.mxu2 %v22627_v17  ;;  %v24162_v43 = vpop.f32.mrf.mxu2  ;;  %v22648_v17 = vld [vmem:[#allocation4 + $0x158] sm:$0xff] }
 0x47d   : > { %12101 = vmatpush.bf16.msrb.mxu3 %v22635_v19  ;;  %v22716_v19 = vld [vmem:[#allocation4 + $0x318] sm:$0xff] }
 0x47e   : > { %12060 = vmatpush.bf16.msrb.mxu0 %v22610_v45  ;;  %v22724_v45 = vld [vmem:[#allocation4 + $0x358] sm:$0xff] }
 0x47f   : > { %12074 = vmatpush.bf16.msrb.mxu1 %v22618_v34  ;;  %v24164_v1 = vpop.f32.mrf.mxu0  ;;  %v24168_v34 = vpop.f32.mrf.mxu3 }
 0x480   : > { %12088 = vmatpush.bf16.msrb.mxu2 %v22626_v13  ;;  %v22639_v13 = vld [vmem:[#allocation4 + $0x110] sm:$0xff] }
 0x481   : > { %12102 = vmatpush.bf16.msrb.mxu3 %v22634_v30  ;;  %v22647_v30 = vld [vmem:[#allocation4 + $0x150] sm:$0xff] }
 0x482   : > { %12061 = vmatpush.bf16.msrb.mxu0 %v22609_v2  ;;  %v22715_v2 = vld [vmem:[#allocation4 + $0x310] sm:$0xff] }
 0x483   : > { %12075 = vmatpush.bf16.msrb.mxu1 %v22617_v54  ;;  %v22723_v54 = vld [vmem:[#allocation4 + $0x350] sm:$0xff] }
 0x484   : > { %12089 = vmatpush.bf16.msrb.mxu2 %v22625_v46  ;;  %v24170_v46 = vpop.f32.mrf.mxu2 }
 0x485   : > { %12103 = vmatpush.bf16.msrb.mxu3 %v22633_v59  ;;  %v22638_v59 = vld [vmem:[#allocation4 + $0x108] sm:$0xff] }
 0x486   : > { %12062 = vmatpush.bf16.msrb.mxu0 %v22608_v6  ;;  %v22646_v6 = vld [vmem:[#allocation4 + $0x148] sm:$0xff] }
 0x487   : > { %12076 = vmatpush.bf16.msrb.mxu1 %v22616_v18  ;;  %v24172_v18 = vpop.f32.mrf.mxu0 }
 0x488   : > { %12090 = vmatpush.bf16.msrb.mxu2 %v22624_v24  ;;  %v24174_v24 = vpop.f32.mrf.mxu1 }
 0x489   : > { %12104 = vmatpush.bf16.msrb.mxu3 %v22632_v32  ;;  %v22714_v32 = vld [vmem:[#allocation4 + $0x308] sm:$0xff] }
 0x48a   : > { %12063 = vmatpush.bf16.msrb.mxu0 %v22607_v8  ;;  %v22722_v8 = vld [vmem:[#allocation4 + $0x348] sm:$0xff] }
 0x48b   : > { %12077 = vmatpush.bf16.msrb.mxu1 %v22615_v56  ;;  %v22637_v56 = vld [vmem:[#allocation4 + $0x100] sm:$0xff] }
 0x48c   : > { %12091 = vmatpush.bf16.msrb.mxu2 %v22623_v61  ;;  %v22645_v61 = vld [vmem:[#allocation4 + $0x140] sm:$0xff] }
 0x48d   : > { %12105 = vmatpush.bf16.msrb.mxu3 %v22631_v26  ;;  %v22713_v26 = vld [vmem:[#allocation4 + $0x300] sm:$0xff] }
 0x48e   : > { %12064 = vmatpush.bf16.msrb.mxu0 %v22606_v57  ;;  %v22721_v57 = vld [vmem:[#allocation4 + $0x340] sm:$0xff] }
 0x48f   : > { %12078 = vmatpush.bf16.msrb.mxu1 %v22614_v22  ;;  %v22736_v22 = vld [vmem:[#allocation4 + $0x3b8] sm:$0xff] }
 0x490   : > { %12092 = vmatpush.bf16.msrb.mxu2 %v22622_v51  ;;  %v22744_v51 = vld [vmem:[#allocation4 + $0x3f8] sm:$0xff] }
 0x491   : > { %12106 = vmatpush.bf16.msrb.mxu3 %v22630_v14  ;;  %v20028_v14 = vld [vmem:[%s23413_s28 + $0xb8] sm:$0xf] }
 0x492   : > { %12065 = vmatpush.bf16.msrb.mxu0 %v22605_v50  ;;  %v22604_v50 = vld [vmem:[%s23413_s28 + $0xdc] sm:$0xf0]  ;;  %v24186_v39 = vpop.f32.mrf.mxu0 }
 0x493   : > { %12079 = vmatpush.bf16.msrb.mxu1 %v22613_v29  ;;  %v24178_v29 = vpop.f32.mrf.mxu3  ;;  %v20029_v58 = vor.u32 %v22604_v50, %v20028_v14  ;;  %v24188_v23 = vpop.f32.mrf.mxu1  ;;  %v22737_v50 = vld [vmem:[#allocation4 + $0x3c0] sm:$0xff] }
 0x494   : > { %12093 = vmatpush.bf16.msrb.mxu2 %v22621_v62  ;;  %v22601_v62 = vld [vmem:[%s23413_s28 + $0xbc] sm:$0xf] }
 0x495   : > { %12107 = vmatpush.bf16.msrb.mxu3 %v22629_v10  ;;  %12066 = vmatmul.bf16.vlgmr.msrb.gmra.mxu0 %v20013_v60  ;;  %v20030_v10 = vld [vmem:[%s23413_s28 + $0xe0] sm:$0xf0]  ;;  %v24190_v60 = vpop.f32.mrf.mxu2 }
 0x496   : > { %12114 = vmatpush.bf16.msra.mxu0 %v22644_v37  ;;  %12080 = vmatmul.bf16.vlgmr.msrb.gmra.mxu1 %v20017_v15  ;;  %v20234_v37 = vld [vmem:[%s23413_s28 + $0x148] sm:$0xf]  ;;  %v20033_v47 = vor.u32 %v22601_v62, %v20030_v10  ;;  %v22743_v15 = vld [vmem:[#allocation4 + $0x3f0] sm:$0xff]  ;;  %v22753_v62 = vld [vmem:[#allocation4 + $0x440] sm:$0xff] }
 0x497   : > { %12128 = vmatpush.bf16.msra.mxu1 %v22652_v3  ;;  %12094 = vmatmul.bf16.vlgmr.msrb.gmra.mxu2 %v20021_v0  ;;  %v22710_v3 = vld [vmem:[%s23413_s28 + $0x16c] sm:$0xf0] }
 0x498   : > { %12562 = vmatpush.bf16.msra.mxu2 %v22720_v25  ;;  %12108 = vmatmul.bf16.vlgmr.msrb.gmra.mxu3 %v20025_v16  ;;  %v20235_v25 = vor.u32 %v22710_v3, %v20234_v37  ;;  %v22735_v0 = vld [vmem:[#allocation4 + $0x3b0] sm:$0xff]  ;;  %v22828_v37 = vld [vmem:[#allocation4 + $0x1b8] sm:$0xff] }
 0x499   : > { %12576 = vmatpush.bf16.msra.mxu3 %v22728_v20  ;;  %v20239_v20 = vor.u32 %v22707_v11, %v20236_v4  ;;  %v22751_v16 = vld [vmem:[#allocation4 + $0x430] sm:$0xff]  ;;  %v22836_v3 = vld [vmem:[#allocation4 + $0x1f8] sm:$0xff] }
 0x49a   : > { %12115 = vmatpush.bf16.msra.mxu0 %v22643_v40  ;;  %v22759_v40 = vld [vmem:[#allocation4 + $0x470] sm:$0xff]  ;;  %v20250_v11 = vld [vmem:[%s23413_s28 + $0x158] sm:$0xf] }
 0x49b   : > { %12129 = vmatpush.bf16.msra.mxu1 %v22651_v21  ;;  %v10157_v21 = vadd.f32 %v24144_v44, %v24142_v55  ;;  %v24201_v55 = vpop.f32.mrf.mxu1  ;;  %v22749_v44 = vld [vmem:[#allocation4 + $0x420] sm:$0xff] }
 0x49c   : > { %12563 = vmatpush.bf16.msra.mxu2 %v22719_v9  ;;  %v22734_v9 = vld [vmem:[#allocation4 + $0x3a8] sm:$0xff]  ;;  %v22712_v4 = vld [vmem:[%s23413_s28 + $0x17c] sm:$0xf0] }
 0x49d   : > { %12577 = vmatpush.bf16.msra.mxu3 %v22727_v48  ;;  %v22742_v48 = vld [vmem:[#allocation4 + $0x3e8] sm:$0xff] }
 0x49e   : > { %12116 = vmatpush.bf16.msra.mxu0 %v22642_v5  ;;  %v24194_v5 = vpop.f32.mrf.mxu3 }
 0x49f   : > { %12130 = vmatpush.bf16.msra.mxu1 %v22650_v7  ;;  %v22750_v7 = vld [vmem:[#allocation4 + $0x428] sm:$0xff] }
 0x4a0   : > { %12564 = vmatpush.bf16.msra.mxu2 %v22718_v33  ;;  %v22758_v33 = vld [vmem:[#allocation4 + $0x468] sm:$0xff] }
 0x4a1   : > { %12578 = vmatpush.bf16.msra.mxu3 %v22726_v35  ;;  %v10171_v35 = vadd.f32 %v24154_v31, %v10157_v21  ;;  %v22740_v31 = vld [vmem:[#allocation4 + $0x3d8] sm:$0xff] }
 0x4a2   : > { %12117 = vmatpush.bf16.msra.mxu0 %v22641_v38  ;;  %v24197_v38 = vpop.f32.mrf.mxu2 }
 0x4a3   : > { %12131 = vmatpush.bf16.msra.mxu1 %v22649_v41  ;;  %v22733_v41 = vld [vmem:[#allocation4 + $0x3a0] sm:$0xff] }
 0x4a4   : > { %12565 = vmatpush.bf16.msra.mxu2 %v22717_v42  ;;  %v22741_v42 = vld [vmem:[#allocation4 + $0x3e0] sm:$0xff] }
 0x4a5   : > { %12579 = vmatpush.bf16.msra.mxu3 %v22725_v49  ;;  %v24199_v49 = vpop.f32.mrf.mxu0 }
 0x4a6   : > { %12118 = vmatpush.bf16.msra.mxu0 %v22640_v12  ;;  %v22757_v12 = vld [vmem:[#allocation4 + $0x460] sm:$0xff] }
 0x4a7   : > { %12132 = vmatpush.bf16.msra.mxu1 %v22648_v17  ;;  %v10185_v17 = vadd.f32 %v24160_v27, %v10171_v35  ;;  %v22747_v27 = vld [vmem:[#allocation4 + $0x410] sm:$0xff] }
 0x4a8   : > { %12566 = vmatpush.bf16.msra.mxu2 %v22716_v19  ;;  %v22732_v19 = vld [vmem:[#allocation4 + $0x398] sm:$0xff] }
 0x4a9   : > { %12580 = vmatpush.bf16.msra.mxu3 %v22724_v45  ;;  %v24204_v45 = vpop.f32.mrf.mxu3 }
 0x4aa   : > { %12119 = vmatpush.bf16.msra.mxu0 %v22639_v13  ;;  %v22748_v13 = vld [vmem:[#allocation4 + $0x418] sm:$0xff] }
 0x4ab   : > { %12133 = vmatpush.bf16.msra.mxu1 %v22647_v30  ;;  %v22756_v30 = vld [vmem:[#allocation4 + $0x458] sm:$0xff] }
 0x4ac   : > { %12567 = vmatpush.bf16.msra.mxu2 %v22715_v2  ;;  %v10159_v2 = vadd.f32 %v24158_v63, %v24156_v36  ;;  %v22730_v36 = vld [vmem:[#allocation4 + $0x388] sm:$0xff] }
 0x4ad   : > { %12581 = vmatpush.bf16.msra.mxu3 %v22723_v54  ;;  %v10199_v54 = vadd.f32 %v24164_v1, %v10185_v17  ;;  %v22738_v63 = vld [vmem:[#allocation4 + $0x3c8] sm:$0xff]  ;;  %v22851_v17 = vld [vmem:[#allocation4 + $0x270] sm:$0xff] }
 0x4ae   : > { %12120 = vmatpush.bf16.msra.mxu0 %v22638_v59  ;;  %v22731_v59 = vld [vmem:[#allocation4 + $0x390] sm:$0xff]  ;;  %v22746_v1 = vld [vmem:[#allocation4 + $0x408] sm:$0xff] }
 0x4af   : > { %12134 = vmatpush.bf16.msra.mxu1 %v22646_v6  ;;  %v22739_v6 = vld [vmem:[#allocation4 + $0x3d0] sm:$0xff] }
 0x4b0   : > { %12568 = vmatpush.bf16.msra.mxu2 %v22714_v32  ;;  %v22755_v32 = vld [vmem:[#allocation4 + $0x450] sm:$0xff] }
 0x4b1   : > { %12582 = vmatpush.bf16.msra.mxu3 %v22722_v8  ;;  %v24213_v14 = vpop.f32.mrf.mxu3 }
 0x4b2   : > { %12121 = vmatpush.bf16.msra.mxu0 %v22637_v56  ;;  %v11049_v8 = vpop.f32.mrf.mxu0 }
 0x4b3   : > { %12135 = vmatpush.bf16.msra.mxu1 %v22645_v61  ;;  %v11063_v56 = vpop.f32.mrf.mxu1  ;;  %v24209_v61 = vpop.f32.mrf.mxu2 }
 0x4b4   : > { %12569 = vmatpush.bf16.msra.mxu2 %v22713_v26  ;;  %v10173_v26 = vadd.f32 %v24162_v43, %v10159_v2  ;;  %v22745_v43 = vld [vmem:[#allocation4 + $0x400] sm:$0xff]  ;;  %v22842_v2 = vld [vmem:[#allocation4 + $0x228] sm:$0xff] }
 0x4b5   : > { %12583 = vmatpush.bf16.msra.mxu3 %v22721_v57  ;;  %12122 = vmatmul.bf16.vlgmr.msra.gmra.mxu0 %v20029_v58  ;;  %v10213_v57 = vadd.f32 %v24166_v52, %v10199_v54  ;;  %v22709_v58 = vld [vmem:[%s23413_s28 + $0x15c] sm:$0xf] }
 0x4b6   : > { %12590 = vmatpush.bf16.msrb.mxu0 %v22736_v22  ;;  %12136 = vmatmul.bf16.vlgmr.msra.gmra.mxu1 %v20033_v47  ;;  %v22754_v22 = vld [vmem:[#allocation4 + $0x448] sm:$0xff]  ;;  %v10187_v52 = vadd.f32 %v24168_v34, %v10173_v26  ;;  %v22825_v26 = vld [vmem:[#allocation4 + $0x1a0] sm:$0xff] }
 0x4b7   : > { %12604 = vmatpush.bf16.msrb.mxu1 %v22744_v51  ;;  %12570 = vmatmul.bf16.vlgmr.msra.gmra.mxu2 %v20235_v25  ;;  %v22729_v51 = vld [vmem:[#allocation4 + $0x380] sm:$0xff]  ;;  %v10545_v10 = vadd.f32 %v24170_v46, %v10213_v57  ;;  %v11064_v25 = vadd.f32 %v11063_v56, %v11049_v8  ;;  %v20244_v46 = vld [vmem:[%s23413_s28 + $0x178] sm:$0xf0] }
 0x4b8   : > { %12618 = vmatpush.bf16.msrb.mxu2 %v22752_v53  ;;  %12584 = vmatmul.bf16.vlgmr.msra.gmra.mxu3 %v20239_v20  ;;  %v20242_v53 = vld [vmem:[%s23413_s28 + $0x150] sm:$0xf]  ;;  %v10201_v47 = vadd.f32 %v24172_v18, %v10187_v52  ;;  %v20252_v20 = vld [vmem:[%s23413_s28 + $0x180] sm:$0xf0]  ;;  %v22850_v54 = vld [vmem:[#allocation4 + $0x268] sm:$0xff] }
 0x4b9   : > { %12632 = vmatpush.bf16.msrb.mxu3 %v22760_v28  ;;  %v22711_v28 = vld [vmem:[%s23413_s28 + $0x174] sm:$0xf0]  ;;  %v22833_v57 = vld [vmem:[#allocation4 + $0x1e0] sm:$0xff] }
 0x4ba   : > { %12591 = vmatpush.bf16.msrb.mxu0 %v22735_v0  ;;  %v22708_v0 = vld [vmem:[%s23413_s28 + $0x154] sm:$0xf]  ;;  %v10215_v18 = vadd.f32 %v24174_v24, %v10201_v47  ;;  %v22848_v52 = vld [vmem:[#allocation4 + $0x258] sm:$0xff] }
 0x4bb   : > { %12605 = vmatpush.bf16.msrb.mxu1 %v22743_v15  ;;  %v11077_v34 = vpop.f32.mrf.mxu2  ;;  %v22844_v15 = vld [vmem:[#allocation4 + $0x238] sm:$0xff]  ;;  %v11065_v21 = vpop.f32.mrf.mxu1  ;;  %v20247_v35 = vor.u32 %v22708_v0, %v20244_v46  ;;  %v22839_v47 = vld [vmem:[#allocation4 + $0x210] sm:$0xff]  ;;  %v22822_v46 = vld [vmem:[#allocation4 + $0x188] sm:$0xff] }
 0x4bc   : > { %12619 = vmatpush.bf16.msrb.mxu2 %v22751_v16  ;;  %v22852_v16 = vld [vmem:[#allocation4 + $0x278] sm:$0xff] }
 0x4bd   : > { %12633 = vmatpush.bf16.msrb.mxu3 %v22759_v40  ;;  %v11051_v40 = vpop.f32.mrf.mxu0 }
 0x4be   : > { %12592 = vmatpush.bf16.msrb.mxu0 %v22734_v9  ;;  %v10559_v9 = vadd.f32 %v24178_v29, %v10545_v10  ;;  %v22843_v29 = vld [vmem:[#allocation4 + $0x230] sm:$0xff] }
 0x4bf   : > { %12606 = vmatpush.bf16.msrb.mxu1 %v22742_v48  ;;  %v20251_v48 = vor.u32 %v22712_v4, %v20250_v11 }
 0x4c0   : > { %12620 = vmatpush.bf16.msrb.mxu2 %v22750_v7  ;;  %v20243_v7 = vor.u32 %v22711_v28, %v20242_v53  ;;  %v22823_v28 = vld [vmem:[#allocation4 + $0x190] sm:$0xff] }
 0x4c1   : > { %12634 = vmatpush.bf16.msrb.mxu3 %v22758_v33  ;;  %v20255_v33 = vor.u32 %v22709_v58, %v20252_v20  ;;  %v22831_v58 = vld [vmem:[#allocation4 + $0x1d0] sm:$0xff] }
 0x4c2   : > { %12593 = vmatpush.bf16.msrb.mxu0 %v22733_v41  ;;  %v10573_v41 = vadd.f32 %v24186_v39, %v10559_v9  ;;  %v22829_v9 = vld [vmem:[#allocation4 + $0x1c0] sm:$0xff] }
 0x4c3   : > { %12607 = vmatpush.bf16.msrb.mxu1 %v22741_v42  ;;  %v11078_v42 = vadd.f32 %v11077_v34, %v11064_v25 }
 0x4c4   : > { %12621 = vmatpush.bf16.msrb.mxu2 %v22749_v44  ;;  %v22827_v44 = vld [vmem:[#allocation4 + $0x1b0] sm:$0xff]  ;;  %v10587_v24 = vadd.f32 %v24188_v23, %v10573_v41 }
 0x4c5   : > { %12635 = vmatpush.bf16.msrb.mxu3 %v22757_v12  ;;  %v22835_v12 = vld [vmem:[#allocation4 + $0x1f0] sm:$0xff] }
 0x4c6   : > { %12594 = vmatpush.bf16.msrb.mxu0 %v22732_v19  ;;  %v11091_v19 = vpop.f32.mrf.mxu3  ;;  %v20462_v41 = vld [vmem:[%s23413_s28 + $0x100] sm:$0xf] }
 0x4c7   : > { %12608 = vmatpush.bf16.msrb.mxu1 %v22740_v31  ;;  %v10547_v31 = vadd.f32 %v24190_v60, %v10215_v18  ;;  %v11092_v39 = vadd.f32 %v11091_v19, %v11078_v42  ;;  %v11066_v60 = vadd.f32 %v11065_v21, %v11051_v40  ;;  %v22846_v40 = vld [vmem:[#allocation4 + $0x248] sm:$0xff]  ;;  %v22868_v18 = vld [vmem:[#allocation4 + $0x2f8] sm:$0xff] }
 0x4c8   : > { %12622 = vmatpush.bf16.msrb.mxu2 %v22748_v13  ;;  %v22826_v13 = vld [vmem:[#allocation4 + $0x1a8] sm:$0xff] }
 0x4c9   : > { %12636 = vmatpush.bf16.msrb.mxu3 %v22756_v30  ;;  %v22834_v30 = vld [vmem:[#allocation4 + $0x1e8] sm:$0xff] }
 0x4ca   : > { %12595 = vmatpush.bf16.msrb.mxu0 %v22731_v59  ;;  %v10561_v59 = vadd.f32 %v24194_v5, %v10547_v31  ;;  %v22818_v42 = vld [vmem:[%s23413_s28 + $0x124] sm:$0xf0]  ;;  %v20464_v19 = vld [vmem:[%s23413_s28 + $0x128] sm:$0xf0] }
 0x4cb   : > { %12609 = vmatpush.bf16.msrb.mxu1 %v22739_v6  ;;  %v10601_v6 = vadd.f32 %v24197_v38, %v10587_v24  ;;  %v22816_v31 = vld [vmem:[%s23413_s28 + $0x10c] sm:$0xf]  ;;  %v20472_v24 = vld [vmem:[%s23413_s28 + $0x130] sm:$0xf0] }
 0x4cc   : > { %12623 = vmatpush.bf16.msrb.mxu2 %v22747_v27  ;;  %v11079_v27 = vpop.f32.mrf.mxu2  ;;  %v10575_v56 = vadd.f32 %v24199_v49, %v10561_v59  ;;  %v22824_v49 = vld [vmem:[#allocation4 + $0x198] sm:$0xff]  ;;  %v20475_v59 = vor.u32 %v22816_v31, %v20472_v24  ;;  %v22787_v24 = vld [vmem:[#allocation4 + $0xa0] sm:$0xff] }
 0x4cd   : > { %12637 = vmatpush.bf16.msrb.mxu3 %v22755_v32  ;;  %v11080_v5 = vadd.f32 %v11079_v27, %v11066_v60  ;;  %v22867_v60 = vld [vmem:[#allocation4 + $0x2f0] sm:$0xff] }
 0x4ce   : > { %12596 = vmatpush.bf16.msrb.mxu0 %v22730_v36  ;;  %v22841_v36 = vld [vmem:[#allocation4 + $0x220] sm:$0xff]  ;;  %v11093_v38 = vpop.f32.mrf.mxu3  ;;  %v22773_v27 = vld [vmem:[#allocation4 + $0x30] sm:$0xff] }
 0x4cf   : > { %12610 = vmatpush.bf16.msrb.mxu1 %v22738_v63  ;;  %v22849_v63 = vld [vmem:[#allocation4 + $0x260] sm:$0xff] }
 0x4d0   : > { %12624 = vmatpush.bf16.msrb.mxu2 %v22746_v1  ;;  %v10615_v1 = vadd.f32 %v24204_v45, %v10601_v6  ;;  %v24240_v45 = vld [vmem:[%s24634_s2] ss:$0 sm:$0xff]  ;;  %v22859_v6 = vld [vmem:[#allocation4 + $0x2b0] sm:$0xff] }
 0x4d1   : > { %12638 = vmatpush.bf16.msrb.mxu3 %v22754_v22 }
 0x4d2   : > { %12597 = vmatpush.bf16.msrb.mxu0 %v22729_v51  ;;  %v11105_v32 = vpop.f32.mrf.mxu0  ;;  %v10589_v51 = vadd.f32 %v24201_v55, %v10575_v56  ;;  %v22866_v56 = vld [vmem:[#allocation4 + $0x2e8] sm:$0xff] }
 0x4d3   : > { %12611 = vmatpush.bf16.msrb.mxu1 %v22737_v50  ;;  %v11119_v8 = vpop.f32.mrf.mxu1  ;;  %v11106_v23 = vadd.f32 %v11105_v32, %v11092_v39  ;;  %v22774_v39 = vld [vmem:[#allocation4 + $0x38] sm:$0xff]  ;;  %v22781_v32 = vld [vmem:[#allocation4 + $0x70] sm:$0xff] }
 0x4d4   : > { %12625 = vmatpush.bf16.msrb.mxu2 %v22745_v43  ;;  %v22832_v43 = vld [vmem:[#allocation4 + $0x1d8] sm:$0xff]  ;;  %v10603_v10 = vadd.f32 %v24209_v61, %v10589_v51  ;;  %v22847_v61 = vld [vmem:[#allocation4 + $0x250] sm:$0xff] }
 0x4d5   : > { %12639 = vmatpush.bf16.msrb.mxu3 %v22753_v62  ;;  %12598 = vmatmul.bf16.vlgmr.msrb.gmra.mxu0 %v20243_v7  ;;  %v11120_v22 = vadd.f32 %v11119_v8, %v11106_v23  ;;  %v22840_v62 = vld [vmem:[#allocation4 + $0x218] sm:$0xff]  ;;  %v22845_v7 = vld [vmem:[#allocation4 + $0x240] sm:$0xff]  ;;  %v22858_v8 = vld [vmem:[#allocation4 + $0x2a8] sm:$0xff] }
 0x4d6   : > { %13178 = vmatpush.bf16.msra.mxu0 %v22828_v37  ;;  %12612 = vmatmul.bf16.vlgmr.msrb.gmra.mxu1 %v20247_v35  ;;  %v11094_v37 = vadd.f32 %v11093_v38, %v11080_v5  ;;  %v10617_v25 = vadd.f32 %v24213_v14, %v10603_v10  ;;  %v22821_v14 = vld [vmem:[#allocation4 + $0x180] sm:$0xff]  ;;  %v22860_v35 = vld [vmem:[#allocation4 + $0x2b8] sm:$0xff]  ;;  %v22772_v23 = vld [vmem:[#allocation4 + $0x28] sm:$0xff] }
 0x4d7   : > { %13192 = vmatpush.bf16.msra.mxu1 %v22836_v3  ;;  %12626 = vmatmul.bf16.vlgmr.msrb.gmra.mxu2 %v20251_v48  ;;  %v11124_v50 = vadd.f32 %v11120_v22, %v10615_v1  ;;  %v22837_v48 = vld [vmem:[#allocation4 + $0x200] sm:$0xff]  ;;  %v22856_v5 = vld [vmem:[#allocation4 + $0x298] sm:$0xff]  ;;  %v22862_v10 = vld [vmem:[#allocation4 + $0x2c8] sm:$0xff] }
 0x4d8   : > { %13206 = vmatpush.bf16.msra.mxu2 %v22844_v15  ;;  %12640 = vmatmul.bf16.vlgmr.msrb.gmra.mxu3 %v20255_v33  ;;  %v22830_v15 = vld [vmem:[#allocation4 + $0x1c8] sm:$0xff]  ;;  %v22779_v1 = vld [vmem:[#allocation4 + $0x60] sm:$0xff]  ;;  %v22864_v22 = vld [vmem:[#allocation4 + $0x2d8] sm:$0xff] }
 0x4d9   : > { %13220 = vmatpush.bf16.msra.mxu3 %v22852_v16  ;;  %v11126_v3 = vadd.f32 %v24240_v45, %v11124_v50  ;;  %v22838_v16 = vld [vmem:[#allocation4 + $0x208] sm:$0xff]  ;;  %v22770_v38 = vld [vmem:[#allocation4 + $0x18] sm:$0xff]  ;;  %v22855_v50 = vld [vmem:[#allocation4 + $0x290] sm:$0xff] }
 0x4da   : > { %13179 = vmatpush.bf16.msra.mxu0 %v22827_v44  ;;  %v11107_v55 = vpop.f32.mrf.mxu0  ;;  %v20470_v44 = vld [vmem:[%s23413_s28 + $0x108] sm:$0xf] }
 0x4db   : > { %13193 = vmatpush.bf16.msra.mxu1 %v22835_v12  ;;  %v11121_v11 = vpop.f32.mrf.mxu1  ;;  %v11128_v4 = vmax.f32 %v11126_v3, 0.0  ;;  %v11108_v53 = vadd.f32 %v11107_v55, %v11094_v37  ;;  %v22819_v12 = vld [vmem:[%s23413_s28 + $0x12c] sm:$0xf0]  ;;  %v22778_v51 = vld [vmem:[#allocation4 + $0x58] sm:$0xff]  ;;  %v22768_v37 = vld [vmem:[#allocation4 + $0x8] sm:$0xff] }
 0x4dc   : > { %13207 = vmatpush.bf16.msra.mxu2 %v22843_v29  ;;  %v22815_v29 = vld [vmem:[%s23413_s28 + $0x104] sm:$0xf]  ;;  %v22776_v3 = vld [vmem:[#allocation4 + $0x48] sm:$0xff] }
 0x4dd   : > { %13221 = vmatpush.bf16.msra.mxu3 %v22851_v17  ;;  %v11130_v34 = vpack.c.bf16 %v11128_v4, %v11128_v4  ;;  %v11122_v20 = vadd.f32 %v11121_v11, %v11108_v53  ;;  %v22853_v55 = vld [vmem:[#allocation4 + $0x280] sm:$0xff] }
 0x4de   : > { %13180 = vmatpush.bf16.msra.mxu0 %v22826_v13  ;;  %v22782_v13 = vld [vmem:[#allocation4 + $0x78] sm:$0xff]  ;;  %v22861_v11 = vld [vmem:[#allocation4 + $0x2c0] sm:$0xff] }
 0x4df   : > { %13194 = vmatpush.bf16.msra.mxu1 %v22834_v30  ;;  %11132 = vst [vmem:[#allocation2 + $0x18] sm:$0xf] %v11130_v34  ;;  %v11125_v0 = vadd.f32 %v11122_v20, %v10617_v25  ;;  %v20463_v30 = vor.u32 %v22818_v42, %v20462_v41  ;;  %v22767_v4 = vld [vmem:[#allocation4] sm:$0xff]  ;;  %v24255_v25 = vpop.f32.mrf.mxu2  ;;  %v22764_v20 = vld [vmem:[%s23413_s28 + $0xd4] sm:$0xf0]  ;;  %v22805_v41 = vld [vmem:[#allocation4 + $0x130] sm:$0xff] }
 0x4e0   : > { %13208 = vmatpush.bf16.msra.mxu2 %v22842_v2  ;;  %v20471_v2 = vor.u32 %v22819_v12, %v20470_v44  ;;  %v22775_v53 = vld [vmem:[#allocation4 + $0x40] sm:$0xff]  ;;  %v22813_v42 = vld [vmem:[#allocation4 + $0x170] sm:$0xff]  ;;  %v22788_v44 = vld [vmem:[#allocation4 + $0xa8] sm:$0xff] }
 0x4e1   : > { %13222 = vmatpush.bf16.msra.mxu3 %v22850_v54  ;;  %v11127_v21 = vadd.f32 %v24240_v45, %v11125_v0  ;;  %v20467_v54 = vor.u32 %v22815_v29, %v20464_v19  ;;  %v20678_v34 = vld [vmem:[%s23413_s28 + $0xb0] sm:$0xf]  ;;  %v22817_v0 = vld [vmem:[%s23413_s28 + $0x114] sm:$0xf]  ;;  %v22796_v12 = vld [vmem:[#allocation4 + $0xe8] sm:$0xff] }
 0x4e2   : > { %13181 = vmatpush.bf16.msra.mxu0 %v22825_v26  ;;  %v22780_v26 = vld [vmem:[#allocation4 + $0x68] sm:$0xff] }
 0x4e3   : > { %13195 = vmatpush.bf16.msra.mxu1 %v22833_v57  ;;  %v11129_v33 = vmax.f32 %v11127_v21, 0.0  ;;  %v22857_v57 = vld [vmem:[#allocation4 + $0x2a0] sm:$0xff]  ;;  %v22806_v21 = vld [vmem:[#allocation4 + $0x138] sm:$0xff]  ;;  %v22812_v19 = vld [vmem:[#allocation4 + $0x168] sm:$0xff] }
 0x4e4   : > { %13209 = vmatpush.bf16.msra.mxu2 %v22841_v36  ;;  %v22865_v36 = vld [vmem:[#allocation4 + $0x2e0] sm:$0xff] }
 0x4e5   : > { %13223 = vmatpush.bf16.msra.mxu3 %v22849_v63  ;;  %v11131_v17 = vpack.c.bf16 %v11129_v33, %v11129_v33  ;;  %v22771_v63 = vld [vmem:[#allocation4 + $0x20] sm:$0xff] }
 0x4e6   : > { %13182 = vmatpush.bf16.msra.mxu0 %v22824_v49  ;;  %v22863_v49 = vld [vmem:[#allocation4 + $0x2d0] sm:$0xff] }
 0x4e7   : > { %13196 = vmatpush.bf16.msra.mxu1 %v22832_v43  ;;  %11133 = vst [vmem:[#allocation2 + $0x3c] sm:$0xf] %v11131_v17  ;;  %v22769_v43 = vld [vmem:[#allocation4 + $0x10] sm:$0xff]  ;;  %v24265_v29 = vpop.f32.mrf.mxu2  ;;  %v22804_v17 = vld [vmem:[#allocation4 + $0x128] sm:$0xff] }
 0x4e8   : > { %13210 = vmatpush.bf16.msra.mxu2 %v22840_v62  ;;  %v22777_v62 = vld [vmem:[#allocation4 + $0x50] sm:$0xff] }
 0x4e9   : > { %13224 = vmatpush.bf16.msra.mxu3 %v22848_v52  ;;  %v22854_v52 = vld [vmem:[#allocation4 + $0x288] sm:$0xff] }
 0x4ea   : > { %13183 = vmatpush.bf16.msra.mxu0 %v22823_v28  ;;  %v22790_v28 = vld [vmem:[#allocation4 + $0xb8] sm:$0xff] }
 0x4eb   : > { %13197 = vmatpush.bf16.msra.mxu1 %v22831_v58  ;;  %v22798_v58 = vld [vmem:[#allocation4 + $0xf8] sm:$0xff] }
 0x4ec   : > { %13211 = vmatpush.bf16.msra.mxu2 %v22839_v47  ;;  %v20478_v47 = vld [vmem:[%s23413_s28 + $0x110] sm:$0xf] }
 0x4ed   : > { %13225 = vmatpush.bf16.msra.mxu3 %v22847_v61  ;;  %v22820_v61 = vld [vmem:[%s23413_s28 + $0x134] sm:$0xf0] }
 0x4ee   : > { %13184 = vmatpush.bf16.msra.mxu0 %v22822_v46  ;;  %v24260_v46 = vpop.f32.mrf.mxu3 }
 0x4ef   : > { %13198 = vmatpush.bf16.msra.mxu1 %v22830_v15  ;;  %v20480_v15 = vld [vmem:[%s23413_s28 + $0x138] sm:$0xf0] }
 0x4f0   : > { %13212 = vmatpush.bf16.msra.mxu2 %v22838_v16  ;;  %v22761_v16 = vld [vmem:[%s23413_s28 + $0xb4] sm:$0xf] }
 0x4f1   : > { %13226 = vmatpush.bf16.msra.mxu3 %v22846_v40  ;;  %v20680_v40 = vld [vmem:[%s23413_s28 + $0xd8] sm:$0xf0] }
 0x4f2   : > { %13185 = vmatpush.bf16.msra.mxu0 %v22821_v14  ;;  %v22814_v14 = vld [vmem:[#allocation4 + $0x178] sm:$0xff]  ;;  %v20683_v33 = vor.u32 %v22761_v16, %v20680_v40  ;;  %v22881_v40 = vld [vmem:[#allocation4 + $0x330] sm:$0xff] }
 0x4f3   : > { %13199 = vmatpush.bf16.msra.mxu1 %v22829_v9  ;;  %v20479_v9 = vor.u32 %v22820_v61, %v20478_v47  ;;  %v20696_v47 = vld [vmem:[%s23413_s28 + $0xe8] sm:$0xf0] }
 0x4f4   : > { %13213 = vmatpush.bf16.msra.mxu2 %v22837_v48  ;;  %v20679_v48 = vor.u32 %v22764_v20, %v20678_v34  ;;  %v22898_v61 = vld [vmem:[#allocation4 + $0x3b8] sm:$0xff] }
 0x4f5   : > { %13227 = vmatpush.bf16.msra.mxu3 %v22845_v7  ;;  %13186 = vmatmul.bf16.vlgmr.msra.gmra.mxu0 %v20463_v30  ;;  %v20483_v7 = vor.u32 %v22817_v0, %v20480_v15  ;;  %v22811_v30 = vld [vmem:[#allocation4 + $0x160] sm:$0xff]  ;;  %v22906_v34 = vld [vmem:[#allocation4 + $0x3f8] sm:$0xff] }
 0x4f6   : > { %13234 = vmatpush.bf16.msrb.mxu0 %v22860_v35  ;;  %13200 = vmatmul.bf16.vlgmr.msra.gmra.mxu1 %v20467_v54  ;;  %v22789_v35 = vld [vmem:[#allocation4 + $0xb0] sm:$0xff]  ;;  %v24267_v31 = vpop.f32.mrf.mxu3  ;;  %v24271_v54 = vpop.f32.mrf.mxu1 }
 0x4f7   : > { %13248 = vmatpush.bf16.msrb.mxu1 %v22868_v18  ;;  %13214 = vmatmul.bf16.vlgmr.msra.gmra.mxu2 %v20471_v2  ;;  %v22797_v18 = vld [vmem:[#allocation4 + $0xf0] sm:$0xff]  ;;  %v24269_v2 = vpop.f32.mrf.mxu0 }
 0x4f8   : > { %13580 = vmatpush.bf16.msrb.mxu2 %v22774_v39  ;;  %13228 = vmatmul.bf16.vlgmr.msra.gmra.mxu3 %v20475_v59  ;;  %v22795_v39 = vld [vmem:[#allocation4 + $0xe0] sm:$0xff]  ;;  %v22786_v59 = vld [vmem:[#allocation4 + $0x98] sm:$0xff] }
 0x4f9   : > { %13594 = vmatpush.bf16.msrb.mxu3 %v22782_v13  ;;  %v22803_v13 = vld [vmem:[#allocation4 + $0x120] sm:$0xff] }
 0x4fa   : > { %13235 = vmatpush.bf16.msrb.mxu0 %v22859_v6  ;;  %v22794_v6 = vld [vmem:[#allocation4 + $0xd8] sm:$0xff] }
 0x4fb   : > { %13249 = vmatpush.bf16.msrb.mxu1 %v22867_v60  ;;  %v22802_v60 = vld [vmem:[#allocation4 + $0x118] sm:$0xff] }
 0x4fc   : > { %13581 = vmatpush.bf16.msrb.mxu2 %v22773_v27  ;;  %v22810_v27 = vld [vmem:[#allocation4 + $0x158] sm:$0xff] }
 0x4fd   : > { %13595 = vmatpush.bf16.msrb.mxu3 %v22781_v32  ;;  %v24273_v32 = vpop.f32.mrf.mxu2 }
 0x4fe   : > { %13236 = vmatpush.bf16.msrb.mxu0 %v22858_v8  ;;  %v24275_v8 = vpop.f32.mrf.mxu3 }
 0x4ff   : > { %13250 = vmatpush.bf16.msrb.mxu1 %v22866_v56  ;;  %v22785_v56 = vld [vmem:[#allocation4 + $0x90] sm:$0xff] }
 0x500   : > { %13582 = vmatpush.bf16.msrb.mxu2 %v22772_v23  ;;  %v22793_v23 = vld [vmem:[#allocation4 + $0xd0] sm:$0xff] }
 0x501   : > { %13596 = vmatpush.bf16.msrb.mxu3 %v22780_v26  ;;  %v22801_v26 = vld [vmem:[#allocation4 + $0x110] sm:$0xff] }
 0x502   : > { %13237 = vmatpush.bf16.msrb.mxu0 %v22857_v57  ;;  %v22809_v57 = vld [vmem:[#allocation4 + $0x150] sm:$0xff] }
 0x503   : > { %13251 = vmatpush.bf16.msrb.mxu1 %v22865_v36  ;;  %v22784_v36 = vld [vmem:[#allocation4 + $0x88] sm:$0xff] }
 0x504   : > { %13583 = vmatpush.bf16.msrb.mxu2 %v22771_v63  ;;  %v22792_v63 = vld [vmem:[#allocation4 + $0xc8] sm:$0xff] }
 0x505   : > { %13597 = vmatpush.bf16.msrb.mxu3 %v22779_v1  ;;  %v24277_v1 = vpop.f32.mrf.mxu0 }
 0x506   : > { %13238 = vmatpush.bf16.msrb.mxu0 %v22856_v5  ;;  %v22800_v5 = vld [vmem:[#allocation4 + $0x108] sm:$0xff] }
 0x507   : > { %13252 = vmatpush.bf16.msrb.mxu1 %v22864_v22  ;;  %v22808_v22 = vld [vmem:[#allocation4 + $0x148] sm:$0xff] }
 0x508   : > { %13584 = vmatpush.bf16.msrb.mxu2 %v22770_v38  ;;  %v24279_v38 = vpop.f32.mrf.mxu1 }
 0x509   : > { %13598 = vmatpush.bf16.msrb.mxu3 %v22778_v51  ;;  %v22783_v51 = vld [vmem:[#allocation4 + $0x80] sm:$0xff] }
 0x50a   : > { %13239 = vmatpush.bf16.msrb.mxu0 %v22855_v50  ;;  %v22791_v50 = vld [vmem:[#allocation4 + $0xc0] sm:$0xff] }
 0x50b   : > { %13253 = vmatpush.bf16.msrb.mxu1 %v22863_v49  ;;  %v22799_v49 = vld [vmem:[#allocation4 + $0x100] sm:$0xff] }
 0x50c   : > { %13585 = vmatpush.bf16.msrb.mxu2 %v22769_v43  ;;  %v22807_v43 = vld [vmem:[#allocation4 + $0x140] sm:$0xff] }
 0x50d   : > { %13599 = vmatpush.bf16.msrb.mxu3 %v22777_v62  ;;  %v22882_v62 = vld [vmem:[#allocation4 + $0x338] sm:$0xff] }
 0x50e   : > { %13240 = vmatpush.bf16.msrb.mxu0 %v22854_v52  ;;  %v22890_v52 = vld [vmem:[#allocation4 + $0x378] sm:$0xff] }
 0x50f   : > { %13254 = vmatpush.bf16.msrb.mxu1 %v22862_v10  ;;  %v20686_v10 = vld [vmem:[%s23413_s28 + $0xb8] sm:$0xf] }
 0x510   : > { %13586 = vmatpush.bf16.msrb.mxu2 %v22768_v37  ;;  %v22765_v37 = vld [vmem:[%s23413_s28 + $0xdc] sm:$0xf0] }
 0x511   : > { %13600 = vmatpush.bf16.msrb.mxu3 %v22776_v3  ;;  %v24283_v3 = vpop.f32.mrf.mxu2  ;;  %v20687_v20 = vor.u32 %v22765_v37, %v20686_v10 }
 0x512   : > { %13241 = vmatpush.bf16.msrb.mxu0 %v22853_v55  ;;  %v20694_v55 = vld [vmem:[%s23413_s28 + $0xc0] sm:$0xf] }
 0x513   : > { %13255 = vmatpush.bf16.msrb.mxu1 %v22861_v11  ;;  %v22766_v11 = vld [vmem:[%s23413_s28 + $0xe4] sm:$0xf0] }
 0x514   : > { %13587 = vmatpush.bf16.msrb.mxu2 %v22767_v4  ;;  %v22762_v4 = vld [vmem:[%s23413_s28 + $0xbc] sm:$0xf]  ;;  %v20695_v0 = vor.u32 %v22766_v11, %v20694_v55 }
 0x515   : > { %13601 = vmatpush.bf16.msrb.mxu3 %v22775_v53  ;;  %13242 = vmatmul.bf16.vlgmr.msrb.gmra.mxu0 %v20479_v9  ;;  %v24288_v53 = vpop.f32.mrf.mxu3  ;;  %v22897_v9 = vld [vmem:[#allocation4 + $0x3b0] sm:$0xff]  ;;  %v22914_v55 = vld [vmem:[#allocation4 + $0x438] sm:$0xff] }
 0x516   : > { %13608 = vmatpush.bf16.msra.mxu0 %v22790_v28  ;;  %13256 = vmatmul.bf16.vlgmr.msrb.gmra.mxu1 %v20483_v7  ;;  %v20688_v28 = vld [vmem:[%s23413_s28 + $0xe0] sm:$0xf0]  ;;  %v24295_v7 = vpop.f32.mrf.mxu1  ;;  %v22922_v11 = vld [vmem:[#allocation4 + $0x478] sm:$0xff] }
 0x517   : > { %13622 = vmatpush.bf16.msra.mxu1 %v22798_v58  ;;  %13588 = vmatmul.bf16.vlgmr.msrb.gmra.mxu2 %v20679_v48  ;;  %v22763_v58 = vld [vmem:[%s23413_s28 + $0xc4] sm:$0xf]  ;;  %v20691_v15 = vor.u32 %v22762_v4, %v20688_v28  ;;  %v20908_v28 = vld [vmem:[%s23413_s28 + $0x158] sm:$0xf] }
 0x518   : > { %13636 = vmatpush.bf16.msra.mxu2 %v22806_v21  ;;  %13602 = vmatmul.bf16.vlgmr.msrb.gmra.mxu3 %v20683_v33  ;;  %v20699_v16 = vor.u32 %v22763_v58, %v20696_v47  ;;  %v22889_v21 = vld [vmem:[#allocation4 + $0x370] sm:$0xff]  ;;  %v22880_v33 = vld [vmem:[#allocation4 + $0x328] sm:$0xff] }
 0x519   : > { %13650 = vmatpush.bf16.msra.mxu3 %v22814_v14  ;;  %v24293_v14 = vpop.f32.mrf.mxu0  ;;  %v22905_v48 = vld [vmem:[#allocation4 + $0x3f0] sm:$0xff] }
 0x51a   : > { %13609 = vmatpush.bf16.msra.mxu0 %v22789_v35  ;;  %v22888_v35 = vld [vmem:[#allocation4 + $0x368] sm:$0xff]  ;;  %v22873_v58 = vld [vmem:[%s23413_s28 + $0x17c] sm:$0xf0]  ;;  %v20910_v47 = vld [vmem:[%s23413_s28 + $0x180] sm:$0xf0] }
 0x51b   : > { %13623 = vmatpush.bf16.msra.mxu1 %v22797_v18  ;;  %v24297_v18 = vpop.f32.mrf.mxu2 }
 0x51c   : > { %13637 = vmatpush.bf16.msra.mxu2 %v22805_v41  ;;  %v22896_v41 = vld [vmem:[#allocation4 + $0x3a8] sm:$0xff] }
 0x51d   : > { %13651 = vmatpush.bf16.msra.mxu3 %v22813_v42  ;;  %v22904_v42 = vld [vmem:[#allocation4 + $0x3e8] sm:$0xff] }
 0x51e   : > { %13610 = vmatpush.bf16.msra.mxu0 %v22788_v44  ;;  %v24299_v44 = vpop.f32.mrf.mxu3 }
 0x51f   : > { %13624 = vmatpush.bf16.msra.mxu1 %v22796_v12  ;;  %v11680_v12 = vadd.f32 %v24260_v46, %v24255_v25  ;;  %v22894_v25 = vld [vmem:[#allocation4 + $0x398] sm:$0xff] }
 0x520   : > { %13638 = vmatpush.bf16.msra.mxu2 %v22804_v17  ;;  %v22879_v17 = vld [vmem:[#allocation4 + $0x320] sm:$0xff]  ;;  %v22902_v46 = vld [vmem:[#allocation4 + $0x3d8] sm:$0xff] }
 0x521   : > { %13652 = vmatpush.bf16.msra.mxu3 %v22812_v19  ;;  %v22887_v19 = vld [vmem:[#allocation4 + $0x360] sm:$0xff] }
 0x522   : > { %13611 = vmatpush.bf16.msra.mxu0 %v22787_v24  ;;  %v22895_v24 = vld [vmem:[#allocation4 + $0x3a0] sm:$0xff] }
 0x523   : > { %13625 = vmatpush.bf16.msra.mxu1 %v22795_v39  ;;  %v22903_v39 = vld [vmem:[#allocation4 + $0x3e0] sm:$0xff] }
 0x524   : > { %13639 = vmatpush.bf16.msra.mxu2 %v22803_v13  ;;  %v24303_v13 = vpop.f32.mrf.mxu0 }
 0x525   : > { %13653 = vmatpush.bf16.msra.mxu3 %v22811_v30  ;;  %v11694_v30 = vadd.f32 %v24269_v2, %v11680_v12  ;;  %v22885_v2 = vld [vmem:[#allocation4 + $0x350] sm:$0xff]  ;;  %v22946_v12 = vld [vmem:[%s24635_s3 + $0x70] sm:$0xff] }
 0x526   : > { %13612 = vmatpush.bf16.msra.mxu0 %v22786_v59  ;;  %v24306_v59 = vpop.f32.mrf.mxu1 }
 0x527   : > { %13626 = vmatpush.bf16.msra.mxu1 %v22794_v6  ;;  %v22878_v6 = vld [vmem:[#allocation4 + $0x318] sm:$0xff] }
 0x528   : > { %13640 = vmatpush.bf16.msra.mxu2 %v22802_v60  ;;  %v22886_v60 = vld [vmem:[#allocation4 + $0x358] sm:$0xff] }
 0x529   : > { %13654 = vmatpush.bf16.msra.mxu3 %v22810_v27  ;;  %v24308_v27 = vpop.f32.mrf.mxu2 }
 0x52a   : > { %13613 = vmatpush.bf16.msra.mxu0 %v22785_v56  ;;  %v11708_v56 = vadd.f32 %v24271_v54, %v11694_v30  ;;  %v22876_v54 = vld [vmem:[#allocation4 + $0x308] sm:$0xff] }
 0x52b   : > { %13627 = vmatpush.bf16.msra.mxu1 %v22793_v23  ;;  %v24311_v23 = vpop.f32.mrf.mxu3  ;;  %v22912_v30 = vld [vmem:[#allocation4 + $0x428] sm:$0xff] }
 0x52c   : > { %13641 = vmatpush.bf16.msra.mxu2 %v22801_v26  ;;  %v22877_v26 = vld [vmem:[#allocation4 + $0x310] sm:$0xff] }
 0x52d   : > { %13655 = vmatpush.bf16.msra.mxu3 %v22809_v57  ;;  %v22893_v57 = vld [vmem:[#allocation4 + $0x390] sm:$0xff] }
 0x52e   : > { %13614 = vmatpush.bf16.msra.mxu0 %v22784_v36  ;;  %v22901_v36 = vld [vmem:[#allocation4 + $0x3d0] sm:$0xff] }
 0x52f   : > { %13628 = vmatpush.bf16.msra.mxu1 %v22792_v63  ;;  %v11682_v63 = vadd.f32 %v24267_v31, %v24265_v29  ;;  %v22883_v31 = vld [vmem:[#allocation4 + $0x340] sm:$0xff] }
 0x530   : > { %13642 = vmatpush.bf16.msra.mxu2 %v22800_v5 }
 0x531   : > { %13656 = vmatpush.bf16.msra.mxu3 %v22808_v22  ;;  %v11722_v22 = vadd.f32 %v24273_v32, %v11708_v56  ;;  %v11696_v29 = vadd.f32 %v24277_v1, %v11682_v63  ;;  %v22891_v32 = vld [vmem:[#allocation4 + $0x380] sm:$0xff]  ;;  %v22870_v1 = vld [vmem:[%s23413_s28 + $0x15c] sm:$0xf] }
 0x532   : > { %13615 = vmatpush.bf16.msra.mxu0 %v22783_v51  ;;  %v24315_v5 = vpop.f32.mrf.mxu0 }
 0x533   : > { %13629 = vmatpush.bf16.msra.mxu1 %v22791_v50  ;;  %v24318_v51 = vpop.f32.mrf.mxu1  ;;  %v22884_v50 = vld [vmem:[#allocation4 + $0x348] sm:$0xff]  ;;  %v11736_v37 = vadd.f32 %v24275_v8, %v11722_v22  ;;  %v22939_v8 = vld [vmem:[%s24635_s3 + $0x38] sm:$0xff]  ;;  %v22936_v22 = vld [vmem:[%s24635_s3 + $0x20] sm:$0xff] }
 0x534   : > { %13643 = vmatpush.bf16.msra.mxu2 %v22799_v49  ;;  %v22892_v49 = vld [vmem:[#allocation4 + $0x388] sm:$0xff] }
 0x535   : > { %13657 = vmatpush.bf16.msra.mxu3 %v22807_v43  ;;  %13616 = vmatmul.bf16.vlgmr.msra.gmra.mxu0 %v20687_v20  ;;  %v22900_v43 = vld [vmem:[#allocation4 + $0x3c8] sm:$0xff]  ;;  %v22869_v20 = vld [vmem:[%s23413_s28 + $0x154] sm:$0xf] }
 0x536   : > { %14084 = vmatpush.bf16.msrb.mxu0 %v22882_v62  ;;  %13630 = vmatmul.bf16.vlgmr.msra.gmra.mxu1 %v20691_v15  ;;  %v22875_v62 = vld [vmem:[#allocation4 + $0x300] sm:$0xff]  ;;  %v11710_v15 = vadd.f32 %v24279_v38, %v11696_v29  ;;  %v22935_v29 = vld [vmem:[%s24635_s3 + $0x18] sm:$0xff] }
 0x537   : > { %14098 = vmatpush.bf16.msrb.mxu1 %v22890_v52  ;;  %13644 = vmatmul.bf16.vlgmr.msra.gmra.mxu2 %v20695_v0  ;;  %v22899_v52 = vld [vmem:[#allocation4 + $0x3c0] sm:$0xff]  ;;  %v20902_v0 = vld [vmem:[%s23413_s28 + $0x178] sm:$0xf0] }
 0x538   : > { %14112 = vmatpush.bf16.msrb.mxu2 %v22898_v61  ;;  %13658 = vmatmul.bf16.vlgmr.msra.gmra.mxu3 %v20699_v16  ;;  %v20900_v61 = vld [vmem:[%s23413_s28 + $0x150] sm:$0xf]  ;;  %v20905_v38 = vor.u32 %v22869_v20, %v20902_v0  ;;  %v22908_v20 = vld [vmem:[#allocation4 + $0x408] sm:$0xff] }
 0x539   : > { %14126 = vmatpush.bf16.msrb.mxu3 %v22906_v34  ;;  %v22872_v34 = vld [vmem:[%s23413_s28 + $0x174] sm:$0xf0]  ;;  %v22947_v16 = vld [vmem:[%s24635_s3 + $0x78] sm:$0xff] }
 0x53a   : > { %14085 = vmatpush.bf16.msrb.mxu0 %v22881_v40  ;;  %v12571_v10 = vpop.f32.mrf.mxu2  ;;  %v12068_v40 = vadd.f32 %v24293_v14, %v11736_v37  ;;  %v22938_v14 = vld [vmem:[%s24635_s3 + $0x30] sm:$0xff] }
 0x53b   : > { %14099 = vmatpush.bf16.msrb.mxu1 %v22889_v21  ;;  %v12585_v4 = vpop.f32.mrf.mxu3  ;;  %v20909_v21 = vor.u32 %v22873_v58, %v20908_v28  ;;  %v22934_v58 = vld [vmem:[%s24635_s3 + $0x10] sm:$0xff] }
 0x53c   : > { %14113 = vmatpush.bf16.msrb.mxu2 %v22897_v9  ;;  %v20913_v9 = vor.u32 %v22870_v1, %v20910_v47  ;;  %v22916_v0 = vld [vmem:[#allocation4 + $0x448] sm:$0xff] }
 0x53d   : > { %14127 = vmatpush.bf16.msrb.mxu3 %v22905_v48  ;;  %v24338_v48 = vpop.f32.mrf.mxu0 }
 0x53e   : > { %14086 = vmatpush.bf16.msrb.mxu0 %v22880_v33  ;;  %v20901_v33 = vor.u32 %v22872_v34, %v20900_v61 }
 0x53f   : > { %14100 = vmatpush.bf16.msrb.mxu1 %v22888_v35  ;;  %v24340_v35 = vpop.f32.mrf.mxu1 }
 0x540   : > { %14114 = vmatpush.bf16.msrb.mxu2 %v22896_v41  ;;  %v22913_v41 = vld [vmem:[#allocation4 + $0x430] sm:$0xff] }
 0x541   : > { %14128 = vmatpush.bf16.msrb.mxu3 %v22904_v42  ;;  %v22921_v42 = vld [vmem:[#allocation4 + $0x470] sm:$0xff] }
 0x542   : > { %14087 = vmatpush.bf16.msrb.mxu0 %v22879_v17  ;;  %v11724_v17 = vadd.f32 %v24283_v3, %v11710_v15  ;;  %v22945_v3 = vld [vmem:[%s24635_s3 + $0x68] sm:$0xff] }
 0x543   : > { %14101 = vmatpush.bf16.msrb.mxu1 %v22887_v19  ;;  %v12082_v19 = vadd.f32 %v24295_v7, %v12068_v40  ;;  %v22933_v15 = vld [vmem:[%s24635_s3 + $0x8] sm:$0xff] }
 0x544   : > { %14115 = vmatpush.bf16.msrb.mxu2 %v22895_v24  ;;  %v12573_v24 = vpop.f32.mrf.mxu2  ;;  %v11738_v7 = vadd.f32 %v24288_v53, %v11724_v17  ;;  %v22944_v53 = vld [vmem:[%s24635_s3 + $0x60] sm:$0xff] }
 0x545   : > { %14129 = vmatpush.bf16.msrb.mxu3 %v22903_v39  ;;  %v12586_v39 = vadd.f32 %v12585_v4, %v12571_v10  ;;  %v22874_v17 = vld [vmem:[%s23413_s28 + $0x184] sm:$0xf0] }
 0x546   : > { %14088 = vmatpush.bf16.msrb.mxu0 %v22878_v6  ;;  %v22920_v6 = vld [vmem:[#allocation4 + $0x468] sm:$0xff] }
 0x547   : > { %14102 = vmatpush.bf16.msrb.mxu1 %v22886_v60  ;;  %v12587_v60 = vpop.f32.mrf.mxu3 }
 0x548   : > { %14116 = vmatpush.bf16.msrb.mxu2 %v22894_v25  ;;  %v22937_v25 = vld [vmem:[%s24635_s3 + $0x28] sm:$0xff] }
 0x549   : > { %14130 = vmatpush.bf16.msrb.mxu3 %v22902_v46  ;;  %v12096_v46 = vadd.f32 %v24297_v18, %v12082_v19  ;;  %v22871_v19 = vld [vmem:[%s23413_s28 + $0x164] sm:$0xf] }
 0x54a   : > { %14089 = vmatpush.bf16.msrb.mxu0 %v22877_v26  ;;  %v12070_v26 = vadd.f32 %v24303_v13, %v11738_v7 }
 0x54b   : > { %14103 = vmatpush.bf16.msrb.mxu1 %v22885_v2  ;;  %v22911_v2 = vld [vmem:[#allocation4 + $0x420] sm:$0xff]  ;;  %v12110_v18 = vadd.f32 %v24299_v44, %v12096_v46  ;;  %v22943_v44 = vld [vmem:[%s24635_s3 + $0x58] sm:$0xff]  ;;  %v22927_v46 = vld [vmem:[#allocation2 + $0x20] sm:$0xf0] }
 0x54c   : > { %14117 = vmatpush.bf16.msrb.mxu2 %v22893_v57  ;;  %v22919_v57 = vld [vmem:[#allocation4 + $0x460] sm:$0xff]  ;;  %v12084_v13 = vadd.f32 %v24306_v59, %v12070_v26  ;;  %v21116_v26 = vld [vmem:[#allocation2] sm:$0xf] }
 0x54d   : > { %14131 = vmatpush.bf16.msrb.mxu3 %v22901_v36 }
 0x54e   : > { %14090 = vmatpush.bf16.msrb.mxu0 %v22876_v54  ;;  %v12098_v59 = vadd.f32 %v24308_v27, %v12084_v13  ;;  %v22942_v27 = vld [vmem:[%s24635_s3 + $0x50] sm:$0xff]  ;;  %v22953_v13 = vld [vmem:[%s24635_s3 + $0xa8] sm:$0xff] }
 0x54f   : > { %14104 = vmatpush.bf16.msrb.mxu1 %v22884_v50  ;;  %v12124_v50 = vadd.f32 %v24315_v5, %v12110_v18  ;;  %v22978_v18 = vld [vmem:[%s24635_s3 + $0x170] sm:$0xff] }
 0x550   : > { %14118 = vmatpush.bf16.msrb.mxu2 %v22892_v49  ;;  %v12588_v49 = vadd.f32 %v12587_v60, %v12573_v24  ;;  %v12112_v1 = vadd.f32 %v24311_v23, %v12098_v59  ;;  %v22941_v23 = vld [vmem:[%s24635_s3 + $0x48] sm:$0xff]  ;;  %v20918_v24 = vld [vmem:[%s23413_s28 + $0x188] sm:$0xf0]  ;;  %v22979_v60 = vld [vmem:[%s24635_s3 + $0x178] sm:$0xff] }
 0x551   : > { %14132 = vmatpush.bf16.msrb.mxu3 %v22900_v43  ;;  %v22910_v43 = vld [vmem:[#allocation4 + $0x418] sm:$0xff]  ;;  %v12138_v10 = vadd.f32 %v24318_v51, %v12124_v50  ;;  %v20921_v7 = vor.u32 %v22871_v19, %v20918_v24  ;;  %v22961_v50 = vld [vmem:[%s24635_s3 + $0xe8] sm:$0xff]  ;;  %v22951_v59 = vld [vmem:[%s24635_s3 + $0x98] sm:$0xff] }
 0x552   : > { %14091 = vmatpush.bf16.msrb.mxu0 %v22875_v62  ;;  %v12599_v56 = vpop.f32.mrf.mxu0  ;;  %v22918_v62 = vld [vmem:[#allocation4 + $0x458] sm:$0xff]  ;;  %v12126_v61 = vadd.f32 %v24338_v48, %v12112_v1  ;;  %v22915_v48 = vld [vmem:[#allocation4 + $0x440] sm:$0xff] }
 0x553   : > { %14105 = vmatpush.bf16.msrb.mxu1 %v22883_v31  ;;  %v12600_v36 = vadd.f32 %v12599_v56, %v12586_v39  ;;  %v12613_v63 = vpop.f32.mrf.mxu1  ;;  %v22955_v39 = vld [vmem:[%s24635_s3 + $0xb8] sm:$0xff]  ;;  %v21118_v56 = vld [vmem:[#allocation2 + $0x24] sm:$0xf0]  ;;  %v22948_v1 = vld [vmem:[%s24635_s3 + $0x80] sm:$0xff] }
 0x554   : > { %14119 = vmatpush.bf16.msrb.mxu2 %v22891_v32  ;;  %v22984_v19 = vld [vmem:[%s24635_s3 + $0x1a0] sm:$0xff] }
 0x555   : > { %14133 = vmatpush.bf16.msrb.mxu3 %v22899_v52  ;;  %14092 = vmatmul.bf16.vlgmr.msrb.gmra.mxu0 %v20901_v33  ;;  %v12614_v54 = vadd.f32 %v12613_v63, %v12600_v36  ;;  %v12140_v33 = vadd.f32 %v24340_v35, %v12126_v61  ;;  %v22954_v36 = vld [vmem:[%s24635_s3 + $0xb0] sm:$0xff]  ;;  %v21117_v63 = vor.u32 %v22927_v46, %v21116_v26  ;;  %v22972_v61 = vld [vmem:[%s24635_s3 + $0x140] sm:$0xff]  ;;  %v22930_v26 = vld [vmem:[#allocation2 + $0x38] sm:$0xf0] }
 0x556   : > { %14140 = vmatpush.bf16.msra.mxu0 %v22914_v55  ;;  %14106 = vmatmul.bf16.vlgmr.msrb.gmra.mxu1 %v20905_v38  ;;  %v22909_v55 = vld [vmem:[#allocation4 + $0x410] sm:$0xff]  ;;  %v22992_v24 = vld [vmem:[%s24635_s3 + $0x1e0] sm:$0xff] }
 0x557   : > { %14154 = vmatpush.bf16.msra.mxu1 %v22922_v11  ;;  %14120 = vmatmul.bf16.vlgmr.msrb.gmra.mxu2 %v20909_v21  ;;  %v22917_v11 = vld [vmem:[#allocation4 + $0x450] sm:$0xff]  ;;  %v22980_v46 = vld [vmem:[%s24635_s3 + $0x180] sm:$0xff] }
 0x558   : > { %14814 = vmatpush.bf16.msra.mxu2 %v22939_v8  ;;  %14134 = vmatmul.bf16.vlgmr.msrb.gmra.mxu3 %v20913_v9  ;;  %v22907_v9 = vld [vmem:[#allocation4 + $0x400] sm:$0xff] }
 0x559   : > { %14828 = vmatpush.bf16.msra.mxu3 %v22947_v16 }
 0x55a   : > { %14141 = vmatpush.bf16.msra.mxu0 %v22913_v41  ;;  %v12627_v31 = vpop.f32.mrf.mxu2  ;;  %v12601_v52 = vpop.f32.mrf.mxu0 }
 0x55b   : > { %14155 = vmatpush.bf16.msra.mxu1 %v22921_v42  ;;  %v12628_v32 = vadd.f32 %v12627_v31, %v12614_v54  ;;  %v12641_v5 = vpop.f32.mrf.mxu3  ;;  %v12602_v4 = vadd.f32 %v12601_v52, %v12588_v49  ;;  %v12615_v28 = vpop.f32.mrf.mxu1  ;;  %v22932_v42 = vld [vmem:[%s24635_s3] sm:$0xff]  ;;  %v22969_v49 = vld [vmem:[%s24635_s3 + $0x128] sm:$0xff]  ;;  %v22975_v52 = vld [vmem:[%s24635_s3 + $0x158] sm:$0xff] }
 0x55c   : > { %14815 = vmatpush.bf16.msra.mxu2 %v22938_v14  ;;  %v22940_v14 = vld [vmem:[%s24635_s3 + $0x40] sm:$0xff] }
 0x55d   : > { %14829 = vmatpush.bf16.msra.mxu3 %v22946_v12  ;;  %v12642_v37 = vadd.f32 %v12641_v5, %v12628_v32  ;;  %v12616_v47 = vadd.f32 %v12615_v28, %v12602_v4  ;;  %v20916_v12 = vld [vmem:[%s23413_s28 + $0x160] sm:$0xf]  ;;  %v22976_v31 = vld [vmem:[%s24635_s3 + $0x160] sm:$0xff]  ;;  %s23119_s28 = sshra.s32 %s15048_s23, 4  ;;  %s23120_s28 = int_to_ptr.hbm [resolvable:$true] %s23119_s28 }
 0x55e   : > { %14142 = vmatpush.bf16.msra.mxu0 %v22912_v30  ;;  %v22963_v30 = vld [vmem:[%s24635_s3 + $0xf8] sm:$0xff]  ;;  %v22949_v4 = vld [vmem:[%s24635_s3 + $0x88] sm:$0xff]  ;;  %s23121_s13 = scalar_lea.hbm %s23120_s28, 16  ;;  %p23126_p5 = scmp.lt.s32.totalorder %s23120_s28, %s24641_s9 }
 0x55f   : > { %14156 = vmatpush.bf16.msra.mxu1 %v22920_v6  ;;  %v12646_v51 = vadd.f32 %v12642_v37, %v12138_v10  ;;  %v22971_v6 = vld [vmem:[%s24635_s3 + $0x138] sm:$0xff]  ;;  %v22950_v10 = vld [vmem:[%s24635_s3 + $0x90] sm:$0xff]  ;;  %v22957_v28 = vld [vmem:[%s24635_s3 + $0xc8] sm:$0xff]  ;;  %p23122_p2 = scmp.ne.s32.totalorder %s23120_s28, %s23121_s13  ;;  %p23127_p7 = scmp.lt.s32.totalorder %s23125_s26, %s23121_s13 }
 0x560   : > { %14816 = vmatpush.bf16.msra.mxu2 %v22937_v25  ;;  %v22959_v32 = vld [vmem:[%s24635_s3 + $0xd8] sm:$0xff]  ;;  %v22958_v37 = vld [vmem:[%s24635_s3 + $0xd0] sm:$0xff] }
 0x561   : > { %14830 = vmatpush.bf16.msra.mxu3 %v22945_v3  ;;  %v12648_v34 = vadd.f32 %v24240_v45, %v12646_v51  ;;  %v20917_v3 = vor.u32 %v22874_v17, %v20916_v12  ;;  %v22967_v5 = vld [vmem:[%s24635_s3 + $0x118] sm:$0xff]  ;;  %v22956_v51 = vld [vmem:[%s24635_s3 + $0xc0] sm:$0xff]  ;;  %v22985_v12 = vld [vmem:[%s24635_s3 + $0x1a8] sm:$0xff]  ;;  %p23123_p3 = pnand %p23122_p2, %p23271_p6  ;;  %p23128_p8 = por %p23127_p7, %p23126_p5 }
 0x562   : > { %14143 = vmatpush.bf16.msra.mxu0 %v22911_v2  ;;  %v12629_v8 = vpop.f32.mrf.mxu2  ;;  %v22993_v17 = vld [vmem:[%s24635_s3 + $0x1e8] sm:$0xff] }
 0x563   : > { %14157 = vmatpush.bf16.msra.mxu1 %v22919_v57  ;;  %v12650_v16 = vmax.f32 %v12648_v34, 0.0  ;;  %v12630_v40 = vadd.f32 %v12629_v8, %v12616_v47  ;;  %v12643_v21 = vpop.f32.mrf.mxu3  ;;  %v22923_v57 = vld [vmem:[#allocation2 + $0x4] sm:$0xf]  ;;  %v22928_v34 = vld [vmem:[#allocation2 + $0x28] sm:$0xf0]  ;;  %p23124_p4 = pneg %p23123_p3 }
 0x564   : > { %14817 = vmatpush.bf16.msra.mxu2 %v22936_v22  ;;  %v21121_v22 = vor.u32 %v22923_v57, %v21118_v56  ;;  %v22964_v47 = vld [vmem:[%s24635_s3 + $0x100] sm:$0xff]  ;;  %v21134_v8 = vld [vmem:[#allocation2 + $0x34] sm:$0xf0] }
 0x565   : > { %14831 = vmatpush.bf16.msra.mxu3 %v22944_v53  ;;  %v12652_v38 = vpack.c.bf16 %v12650_v16, %v12650_v16  ;;  %v12644_v41 = vadd.f32 %v12643_v21, %v12630_v40  ;;  %v22970_v53 = vld [vmem:[%s24635_s3 + $0x130] sm:$0xff]  ;;  %v21124_v16 = vld [vmem:[#allocation2 + $0x8] sm:$0xf]  ;;  %v22924_v40 = vld [vmem:[#allocation2 + $0xc] sm:$0xf]  ;;  %p23129_p9 = pnand %p23128_p8, %p23124_p4 }
 0x566   : > { %14144 = vmatpush.bf16.msra.mxu0 %v22910_v43  ;;  %v22977_v43 = vld [vmem:[%s24635_s3 + $0x168] sm:$0xff]  ;;  %v21125_v21 = vor.u32 %v22928_v34, %v21124_v16  ;;  %v22988_v56 = vld [vmem:[%s24635_s3 + $0x1c0] sm:$0xff]  ;;  %v21140_v57 = vld [vmem:[#allocation2 + $0x18] sm:$0xf] }
 0x567   : > { %14158 = vmatpush.bf16.msra.mxu1 %v22918_v62  ;;  %12654 = vst [vmem:[#allocation2 + $0x1c] sm:$0xf] %v12652_v38  ;;  %v12647_v35 = vadd.f32 %v12644_v41, %v12140_v33  ;;  %v22952_v62 = vld [vmem:[%s24635_s3 + $0xa0] sm:$0xff]  ;;  %v22925_v33 = vld [vmem:[#allocation2 + $0x14] sm:$0xf]  ;;  %v22999_v16 = vld [vmem:[%s24635_s3 + $0x218] sm:$0xff] }
 0x568   : > { %14818 = vmatpush.bf16.msra.mxu2 %v22935_v29  ;;  %v22960_v29 = vld [vmem:[%s24635_s3 + $0xe0] sm:$0xff]  ;;  %v21137_v41 = vor.u32 %v22925_v33, %v21134_v8 }
 0x569   : > { %14832 = vmatpush.bf16.msra.mxu3 %v22943_v44  ;;  %v12649_v25 = vadd.f32 %v24240_v45, %v12647_v35  ;;  %v22962_v45 = vld [vmem:[%s24635_s3 + $0xf0] sm:$0xff]  ;;  %v22968_v44 = vld [vmem:[%s24635_s3 + $0x120] sm:$0xff]  ;;  %v22983_v35 = vld [vmem:[%s24635_s3 + $0x198] sm:$0xff] }
 0x56a   : > { %14145 = vmatpush.bf16.msra.mxu0 %v22909_v55  ;;  %v22966_v55 = vld [vmem:[%s24635_s3 + $0x110] sm:$0xff]  ;;  %v23000_v34 = vld [vmem:[%s24635_s3 + $0x220] sm:$0xff] }
 0x56b   : > { %14159 = vmatpush.bf16.msra.mxu1 %v22917_v11  ;;  %v12651_v2 = vmax.f32 %v12649_v25, 0.0  ;;  %v22974_v11 = vld [vmem:[%s24635_s3 + $0x150] sm:$0xff]  ;;  %v22989_v25 = vld [vmem:[%s24635_s3 + $0x1c8] sm:$0xff] }
 0x56c   : > { %14819 = vmatpush.bf16.msra.mxu2 %v22934_v58  ;;  %v22965_v58 = vld [vmem:[%s24635_s3 + $0x108] sm:$0xff] }
 0x56d   : > { %14833 = vmatpush.bf16.msra.mxu3 %v22942_v27  ;;  %v12653_v54 = vpack.c.bf16 %v12651_v2, %v12651_v2  ;;  %v22973_v27 = vld [vmem:[%s24635_s3 + $0x148] sm:$0xff] }
 0x56e   : > { %14146 = vmatpush.bf16.msra.mxu0 %v22908_v20  ;;  %v22987_v20 = vld [vmem:[%s24635_s3 + $0x1b8] sm:$0xff] }
 0x56f   : > { %14160 = vmatpush.bf16.msra.mxu1 %v22916_v0  ;;  %12655 = vst [vmem:[#allocation2 + $0x40] sm:$0xf] %v12653_v54  ;;  %v22995_v0 = vld [vmem:[%s24635_s3 + $0x1f8] sm:$0xff] }
 0x570   : > { %14820 = vmatpush.bf16.msra.mxu2 %v22933_v15  ;;  %v21126_v15 = vld [vmem:[#allocation2 + $0x2c] sm:$0xf0] }
 0x571   : > { %14834 = vmatpush.bf16.msra.mxu3 %v22941_v23  ;;  %v22929_v23 = vld [vmem:[#allocation2 + $0x30] sm:$0xf0] }
 0x572   : > { %14147 = vmatpush.bf16.msra.mxu0 %v22907_v9  ;;  %v21129_v9 = vor.u32 %v22924_v40, %v21126_v15 }
 0x573   : > { %14161 = vmatpush.bf16.msra.mxu1 %v22915_v48  ;;  %v21132_v48 = vld [vmem:[#allocation2 + $0x10] sm:$0xf] }
 0x574   : > { %14821 = vmatpush.bf16.msra.mxu2 %v22932_v42  ;;  %v21133_v38 = vor.u32 %v22929_v23, %v21132_v48  ;;  %v22986_v42 = vld [vmem:[%s24635_s3 + $0x1b0] sm:$0xff] }
 0x575   : > { %14835 = vmatpush.bf16.msra.mxu3 %v22940_v14  ;;  %14148 = vmatmul.bf16.vlgmr.msra.gmra.mxu0 %v20917_v3  ;;  %v22994_v14 = vld [vmem:[%s24635_s3 + $0x1f0] sm:$0xff]  ;;  %v13187_v3 = vpop.f32.mrf.mxu0 }
 0x576   : > { %14842 = vmatpush.bf16.msrb.mxu0 %v22955_v39  ;;  %14162 = vmatmul.bf16.vlgmr.msra.gmra.mxu1 %v20921_v7  ;;  %v22991_v39 = vld [vmem:[%s24635_s3 + $0x1d8] sm:$0xff]  ;;  %v13201_v7 = vpop.f32.mrf.mxu1  ;;  %v21142_v2 = vld [vmem:[#allocation2 + $0x3c] sm:$0xf0]  ;;  %v22998_v48 = vld [vmem:[%s24635_s3 + $0x210] sm:$0xff] }
 0x577   : > { %14856 = vmatpush.bf16.msrb.mxu1 %v22963_v30  ;;  %14822 = vmatmul.bf16.vlgmr.msra.gmra.mxu2 %v21117_v63  ;;  %v22982_v30 = vld [vmem:[%s24635_s3 + $0x190] sm:$0xff] }
 0x578   : > { %14870 = vmatpush.bf16.msrb.mxu2 %v22971_v6  ;;  %14836 = vmatmul.bf16.vlgmr.msra.gmra.mxu3 %v21121_v22  ;;  %v22990_v6 = vld [vmem:[%s24635_s3 + $0x1d0] sm:$0xff] }
 0x579   : > { %14884 = vmatpush.bf16.msrb.mxu3 %v22979_v60  ;;  %v22981_v60 = vld [vmem:[%s24635_s3 + $0x188] sm:$0xff] }
 0x57a   : > { %14843 = vmatpush.bf16.msrb.mxu0 %v22954_v36  ;;  %v22926_v36 = vld [vmem:[#allocation2 + $0x1c] sm:$0xf]  ;;  %v13215_v22 = vpop.f32.mrf.mxu2 }
 0x57b   : > { %14857 = vmatpush.bf16.msrb.mxu1 %v22962_v45  ;;  %v21141_v45 = vor.u32 %v22930_v26, %v21140_v57  ;;  %v21145_v63 = vor.u32 %v22926_v36, %v21142_v2  ;;  %v13229_v54 = vpop.f32.mrf.mxu3 }
 0x57c   : > { %14871 = vmatpush.bf16.msrb.mxu2 %v22970_v53 }
 0x57d   : > { %14885 = vmatpush.bf16.msrb.mxu3 %v22978_v18  ;;  %v13189_v53 = vpop.f32.mrf.mxu0 }
 0x57e   : > { %14844 = vmatpush.bf16.msrb.mxu0 %v22953_v13  ;;  %v13203_v18 = vpop.f32.mrf.mxu1 }
 0x57f   : > { %14858 = vmatpush.bf16.msrb.mxu1 %v22961_v50 }
 0x580   : > { %14872 = vmatpush.bf16.msrb.mxu2 %v22969_v49 }
 0x581   : > { %14886 = vmatpush.bf16.msrb.mxu3 %v22977_v43 }
 0x582   : > { %14845 = vmatpush.bf16.msrb.mxu0 %v22952_v62  ;;  %v13217_v13 = vpop.f32.mrf.mxu2 }
 0x583   : > { %14859 = vmatpush.bf16.msrb.mxu1 %v22960_v29  ;;  %v13231_v43 = vpop.f32.mrf.mxu3 }
 0x584   : > { %14873 = vmatpush.bf16.msrb.mxu2 %v22968_v44 }
 0x585   : > { %14887 = vmatpush.bf16.msrb.mxu3 %v22976_v31 }
 0x586   : > { %14846 = vmatpush.bf16.msrb.mxu0 %v22951_v59 }
 0x587   : > { %14860 = vmatpush.bf16.msrb.mxu1 %v22959_v32 }
 0x588   : > { %14874 = vmatpush.bf16.msrb.mxu2 %v22967_v5 }
 0x589   : > { %14888 = vmatpush.bf16.msrb.mxu3 %v22975_v52  ;;  %v13202_v52 = vadd.f32 %v13201_v7, %v13187_v3 }
 0x58a   : > { %14847 = vmatpush.bf16.msrb.mxu0 %v22950_v10  ;;  %v23003_v10 = vld [vmem:[%s24635_s3 + $0x238] sm:$0xff] }
 0x58b   : > { %14861 = vmatpush.bf16.msrb.mxu1 %v22958_v37 }
 0x58c   : > { %14875 = vmatpush.bf16.msrb.mxu2 %v22966_v55  ;;  %v13216_v55 = vadd.f32 %v13215_v22, %v13202_v52 }
 0x58d   : > { %14889 = vmatpush.bf16.msrb.mxu3 %v22974_v11 }
 0x58e   : > { %14848 = vmatpush.bf16.msrb.mxu0 %v22949_v4  ;;  %v23002_v4 = vld [vmem:[%s24635_s3 + $0x230] sm:$0xff] }
 0x58f   : > { %14862 = vmatpush.bf16.msrb.mxu1 %v22957_v28 }
 0x590   : > { %14876 = vmatpush.bf16.msrb.mxu2 %v22965_v58 }
 0x591   : > { %14890 = vmatpush.bf16.msrb.mxu3 %v22973_v27  ;;  %v13230_v27 = vadd.f32 %v13229_v54, %v13216_v55 }
 0x592   : > { %14849 = vmatpush.bf16.msrb.mxu0 %v22948_v1  ;;  %v13243_v50 = vpop.f32.mrf.mxu0  ;;  %v23001_v1 = vld [vmem:[%s24635_s3 + $0x228] sm:$0xff] }
 0x593   : > { %14863 = vmatpush.bf16.msrb.mxu1 %v22956_v51  ;;  %v13257_v49 = vpop.f32.mrf.mxu1 }
 0x594   : > { %14877 = vmatpush.bf16.msrb.mxu2 %v22964_v47  ;;  %v13204_v47 = vadd.f32 %v13203_v18, %v13189_v53 }
 0x595   : > { %14891 = vmatpush.bf16.msrb.mxu3 %v22972_v61  ;;  %14850 = vmatmul.bf16.vlgmr.msrb.gmra.mxu0 %v21125_v21  ;;  %v13244_v61 = vadd.f32 %v13243_v50, %v13230_v27 }
 0x596   : > { %14898 = vmatpush.bf16.msra.mxu0 %v22987_v20  ;;  %14864 = vmatmul.bf16.vlgmr.msrb.gmra.mxu1 %v21129_v9  ;;  %v13218_v23 = vadd.f32 %v13217_v13, %v13204_v47 }
 0x597   : > { %14912 = vmatpush.bf16.msra.mxu1 %v22995_v0  ;;  %14878 = vmatmul.bf16.vlgmr.msrb.gmra.mxu2 %v21133_v38  ;;  %v13258_v8 = vadd.f32 %v13257_v49, %v13244_v61  ;;  %v23074_v49 = vld [vmem:[%s24634_s2] ss:$0 sm:$0xff]  ;;  %v23005_v61 = vld [vmem:[%s24637_s5 + $0x8] sm:$0xff] }
 0x598   : > { %14892 = vmatmul.bf16.vlgmr.msrb.gmra.mxu3 %v21137_v41  ;;  %14926 = vmatpush.bf16.msra.mxu2 %v23003_v10  ;;  %v13232_v21 = vadd.f32 %v13231_v43, %v13218_v23  ;;  %v22997_v41 = vld [vmem:[%s24635_s3 + $0x208] sm:$0xff] }
 0x59a   : > { %14899 = vmatpush.bf16.msra.mxu0 %v22986_v42  ;;  %v13589_v62 = vpop.f32.mrf.mxu2  ;;  %v13245_v29 = vpop.f32.mrf.mxu0 }
 0x59b   : > { %14913 = vmatpush.bf16.msra.mxu1 %v22994_v14  ;;  %v13259_v44 = vpop.f32.mrf.mxu1  ;;  %v13603_v31 = vpop.f32.mrf.mxu3  ;;  %v13590_v9 = vadd.f32 %v13589_v62, %v13258_v8  ;;  %v13246_v33 = vadd.f32 %v13245_v29, %v13232_v21  ;;  %v23008_v21 = vld [vmem:[%s24639_s7] sm:$0xff] }
 0x59c   : > { %14927 = vmatpush.bf16.msra.mxu2 %v23002_v4 }
 0x59d   : > { %v13604_v42 = vadd.f32 %v13603_v31, %v13590_v9 }
 0x59e   : > { %14900 = vmatpush.bf16.msra.mxu0 %v22985_v12 }
 0x59f   : > { %14914 = vmatpush.bf16.msra.mxu1 %v22993_v17 }
 0x5a0   : > { %14928 = vmatpush.bf16.msra.mxu2 %v23001_v1 }
 0x5a2   : > { %14901 = vmatpush.bf16.msra.mxu0 %v22984_v19  ;;  %v13591_v59 = vpop.f32.mrf.mxu2  ;;  %v13260_v19 = vadd.f32 %v13259_v44, %v13246_v33 }
 0x5a3   : > { %14915 = vmatpush.bf16.msra.mxu1 %v22992_v24  ;;  %v13605_v37 = vpop.f32.mrf.mxu3 }
 0x5a4   : > { %14929 = vmatpush.bf16.msra.mxu2 %v23000_v34 }
 0x5a6   : > { %14902 = vmatpush.bf16.msra.mxu0 %v22983_v35  ;;  %v22996_v35 = vld [vmem:[%s24635_s3 + $0x200] sm:$0xff] }
 0x5a7   : > { %14916 = vmatpush.bf16.msra.mxu1 %v22991_v39 }
 0x5a8   : > { %14930 = vmatpush.bf16.msra.mxu2 %v22999_v16 }
 0x5aa   : > { %14903 = vmatpush.bf16.msra.mxu0 %v22982_v30  ;;  %v13592_v30 = vadd.f32 %v13591_v59, %v13260_v19 }
 0x5ab   : > { %14917 = vmatpush.bf16.msra.mxu1 %v22990_v6 }
 0x5ac   : > { %14931 = vmatpush.bf16.msra.mxu2 %v22998_v48 }
 0x5ae   : > { %14904 = vmatpush.bf16.msra.mxu0 %v22981_v60 }
 0x5af   : > { %14918 = vmatpush.bf16.msra.mxu1 %v22989_v25  ;;  %v13606_v25 = vadd.f32 %v13605_v37, %v13592_v30 }
 0x5b0   : > { %14932 = vmatpush.bf16.msra.mxu2 %v22997_v41 }
 0x5b2   : > { %14905 = vmatpush.bf16.msra.mxu0 %v22980_v46  ;;  %v13617_v32 = vpop.f32.mrf.mxu0 }
 0x5b3   : > { %14919 = vmatpush.bf16.msra.mxu1 %v22988_v56  ;;  %v13631_v5 = vpop.f32.mrf.mxu1  ;;  %v13618_v24 = vadd.f32 %v13617_v32, %v13604_v42 }
 0x5b4   : > { %14933 = vmatpush.bf16.msra.mxu2 %v22996_v35 }
 0x5b5   : > { %14906 = vmatmul.bf16.vlgmr.msra.gmra.mxu0 %v21141_v45  ;;  %v13632_v60 = vadd.f32 %v13631_v5, %v13618_v24 }
 0x5b6   : > { %14920 = vmatmul.bf16.vlgmr.msra.gmra.mxu1 %v21145_v63 }
 0x5ba   : > { %v13645_v11 = vpop.f32.mrf.mxu2  ;;  %v13619_v28 = vpop.f32.mrf.mxu0 }
 0x5bb   : > { %v13633_v58 = vpop.f32.mrf.mxu1  ;;  %v13659_v51 = vpop.f32.mrf.mxu3  ;;  %v13646_v3 = vadd.f32 %v13645_v11, %v13632_v60  ;;  %v13620_v57 = vadd.f32 %v13619_v28, %v13606_v25 }
 0x5bd   : > { %v13660_v45 = vadd.f32 %v13659_v51, %v13646_v3  ;;  %v13634_v18 = vadd.f32 %v13633_v58, %v13620_v57  ;;  %v23007_v58 = vld [vmem:[%s24637_s5 + $0x18] sm:$0xff]  ;;  %v23006_v51 = vld [vmem:[%s24637_s5 + $0x10] sm:$0xff] }
 0x5be   : > { %14987 = vmatpush.bf16.msra.mxu3 %v23007_v58 }
 0x5c2   : > { %v13647_v20 = vpop.f32.mrf.mxu2  ;;  %14988 = vmatpush.bf16.msra.mxu3 %v23006_v51 }
 0x5c3   : > { %v13661_v40 = vpop.f32.mrf.mxu3  ;;  %v13648_v13 = vadd.f32 %v13647_v20, %v13634_v18 }
 0x5c5   : > { %v13662_v59 = vadd.f32 %v13661_v40, %v13648_v13  ;;  %v23069_v13 = vld [vmem:[%s24638_s6] ss:$0 sm:$0xff] }
 0x5c6   : > { %14989 = vmatpush.bf16.msra.mxu3 %v23005_v61 }
 0x5d2   : > { %v14093_v0 = vpop.f32.mrf.mxu0 }
 0x5d3   : > { %v14107_v15 = vpop.f32.mrf.mxu1 }
 0x5d4   : > { %v14108_v14 = vadd.f32 %v14107_v15, %v14093_v0  ;;  %v23068_v0 = vld [vmem:[%s24636_s4] ss:$0 sm:$0xff] }
 0x5d5   : > { %v23004_v15 = vld [vmem:[%s24637_s5] sm:$0xff] }
 0x5d6   : > { %14990 = vmatpush.bf16.msra.mxu3 %v23004_v15 }
 0x5da   : > { %v14121_v38 = vpop.f32.mrf.mxu2  ;;  %v14095_v12 = vpop.f32.mrf.mxu0  ;;  %15023 = vmatpush.bf16.msrb.mxu3 %v23008_v21 }
 0x5db   : > { %v14109_v17 = vpop.f32.mrf.mxu1  ;;  %v14135_v39 = vpop.f32.mrf.mxu3  ;;  %v14122_v6 = vadd.f32 %v14121_v38, %v14108_v14 }
 0x5dc   : > { %v14110_v46 = vadd.f32 %v14109_v17, %v14095_v12 }
 0x5dd   : > { %v14136_v7 = vadd.f32 %v14135_v39, %v14122_v6 }
 0x5e2   : > { %v14123_v56 = vpop.f32.mrf.mxu2 }
 0x5e3   : > { %v14124_v63 = vadd.f32 %v14123_v56, %v14110_v46  ;;  %v14137_v53 = vpop.f32.mrf.mxu3 }
 0x5e5   : > { %v14138_v50 = vadd.f32 %v14137_v53, %v14124_v63 }
 0x5f2   : > { %v14149_v26 = vpop.f32.mrf.mxu0 }
 0x5f3   : > { %v14163_v2 = vpop.f32.mrf.mxu1  ;;  %v14150_v36 = vadd.f32 %v14149_v26, %v14136_v7 }
 0x5f5   : > { %v14164_v22 = vadd.f32 %v14163_v2, %v14150_v36 }
 0x5f7   : > { %v14168_v54 = vadd.f32 %v14164_v22, %v13660_v45 }
 0x5f9   : > { %v14170_v43 = vadd.f32 %v23074_v49, %v14168_v54 }
 0x5fa   : > { %v14151_v62 = vpop.f32.mrf.mxu0  ;;  %v14823_v27 = vpop.f32.mrf.mxu2 }
 0x5fb   : > { %v14172_v29 = vmax.f32 %v14170_v43, 0.0  ;;  %v14152_v44 = vadd.f32 %v14151_v62, %v14138_v50  ;;  %v14165_v31 = vpop.f32.mrf.mxu1  ;;  %v14837_v1 = vpop.f32.mrf.mxu3  ;;  %v14824_v40 = vadd.f32 %v23068_v0, %v14823_v27 }
 0x5fd   : > { %v14174_v32 = vpack.c.bf16 %v14172_v29, %v14172_v29  ;;  %v14166_v5 = vadd.f32 %v14165_v31, %v14152_v44  ;;  %v14838_v48 = vadd.f32 %v14837_v1, %v14824_v40  ;;  %v23070_v31 = vld [vmem:[%s24640_s8] ss:$0 sm:$0xff] }
 0x5ff   : > { %14176 = vst [vmem:[#allocation2 + $0x20] sm:$0xf] %v14174_v32  ;;  %v14169_v52 = vadd.f32 %v14166_v5, %v13662_v59 }
 0x601   : > { %v14171_v10 = vadd.f32 %v23074_v49, %v14169_v52 }
 0x602   : > { %v14825_v34 = vpop.f32.mrf.mxu2 }
 0x603   : > { %v14173_v37 = vmax.f32 %v14171_v10, 0.0  ;;  %v14839_v23 = vpop.f32.mrf.mxu3  ;;  %v14826_v9 = vadd.f32 %v23068_v0, %v14825_v34 }
 0x605   : > { %v14175_v55 = vpack.c.bf16 %v14173_v37, %v14173_v37  ;;  %v14840_v38 = vadd.f32 %v14839_v23, %v14826_v9 }
 0x606   : > { %v21148_v11 = vld [vmem:[#allocation2 + $0x20] sm:$0xf] }
 0x607   : > { %14177 = vst [vmem:[#allocation2 + $0x44] sm:$0xf] %v14175_v55 }
 0x60e   : > { %v22931_v4 = vld [vmem:[#allocation2 + $0x40] sm:$0xf0] }
 0x60f   : > { %v21149_v28 = vor.u32 %v22931_v4, %v21148_v11 }
 0x611   : > { %14934 = vmatmul.bf16.vlgmr.msra.gmra.mxu2 %v21149_v28 }
 0x612   : > { %v14851_v47 = vpop.f32.mrf.mxu0 }
 0x613   : > { %v14865_v20 = vpop.f32.mrf.mxu1  ;;  %v14852_v41 = vadd.f32 %v14851_v47, %v14838_v48 }
 0x615   : > { %v14866_v19 = vadd.f32 %v14865_v20, %v14852_v41 }
 0x61a   : > { %v14879_v8 = vpop.f32.mrf.mxu2  ;;  %v14853_v16 = vpop.f32.mrf.mxu0 }
 0x61b   : > { %v14867_v33 = vpop.f32.mrf.mxu1  ;;  %v14893_v42 = vpop.f32.mrf.mxu3  ;;  %v14854_v12 = vadd.f32 %v14853_v16, %v14840_v38  ;;  %v14880_v24 = vadd.f32 %v14879_v8, %v14866_v19 }
 0x61d   : > { %v14868_v35 = vadd.f32 %v14867_v33, %v14854_v12  ;;  %v14894_v6 = vadd.f32 %v14893_v42, %v14880_v24 }
 0x622   : > { %v14881_v17 = vpop.f32.mrf.mxu2 }
 0x623   : > { %v14882_v30 = vadd.f32 %v14881_v17, %v14868_v35  ;;  %v14895_v60 = vpop.f32.mrf.mxu3 }
 0x625   : > { %v14896_v7 = vadd.f32 %v14895_v60, %v14882_v30 }
 0x632   : > { %v14907_v14 = vpop.f32.mrf.mxu0 }
 0x633   : > { %v14921_v39 = vpop.f32.mrf.mxu1  ;;  %v14908_v46 = vadd.f32 %v14907_v14, %v14894_v6 }
 0x635   : > { %v14922_v26 = vadd.f32 %v14921_v39, %v14908_v46 }
 0x63a   : > { %v14909_v25 = vpop.f32.mrf.mxu0 }
 0x63b   : > { %v14910_v56 = vadd.f32 %v14909_v25, %v14896_v7  ;;  %v14923_v2 = vpop.f32.mrf.mxu1 }
 0x63d   : > { %v14924_v57 = vadd.f32 %v14923_v2, %v14910_v56 }
 0x694   : > { %v14935_v3 = vpop.f32.mrf.mxu2 }
 0x695   : > { %v14936_v36 = vadd.f32 %v14935_v3, %v14922_v26 }
 0x697   : > { %v14940_v22 = vmax.f32 %v14936_v36, 0.0 }
 0x69c   : > { %v14937_v45 = vpop.f32.mrf.mxu2 }
 0x69d   : > { %v14938_v63 = vadd.f32 %v14937_v45, %v14924_v57 }
 0x69f   : > { %v14941_v53 = vmax.f32 %v14938_v63, 0.0 }
 0x6a1   : > { %v14942_v18 = vpack.c.bf16 %v14941_v53, %v14940_v22 }
 0x6a3   : > { %21454 = vmatmul.msk.bf16.vlgmr.msra.gmra.mxu3 %vm14979_vm0, %v14942_v18 }
 0x726   : > { %v14992_v54 = vpop.f32.mrf.mxu3 }
 0x727   : > { %v14993_v50 = vadd.f32 %v23069_v13, %v14992_v54 }
 0x729   : > { %v14997_v62 = vmax.f32 %v14993_v50, 0.0 }
 0x72e   : > { %v14994_v49 = vpop.f32.mrf.mxu3 }
 0x72f   : > { %v14995_v43 = vadd.f32 %v23069_v13, %v14994_v49 }
 0x731   : > { %v14998_v29 = vmax.f32 %v14995_v43, 0.0 }
 0x733   : > { %v14999_v44 = vpack.c.bf16 %v14998_v29, %v14997_v62 }
 0x735   : > { %21459 = vmatmul.msk.bf16.vlgmr.msrb.gmra.mxu3 %vm15012_vm1, %v14999_v44 }
 0x7b8   : > { %v15025_v59 = vpop.f32.mrf.mxu3 }
 0x7b9   : > { %v15026_v32 = vadd.f32 %v23070_v31, %v15025_v59 }
 0x7bb   : > { %15030 = vst [vmem:[%s466_s16] sm:$0xff] %v15026_v32 }
 0x7c0   : > { %v15027_v5 = vpop.f32.mrf.mxu3 }
 0x7c1   : > { %v15028_v52 = vadd.f32 %v23070_v31, %v15027_v5 }
 0x7c3   : > { %15031 = vst [vmem:[%s466_s16 + $0x8] sm:$0xff] %v15028_v52 }
 0x7c4   : > { %23132 = shalt.err (!%p23129_p9)
}
 0x7c5   : > { %s23176_s25 = smov 128   ;;  %s23177_s14 = smov 8  }
 0x7c6   : > { %23017 = dma.vmem_to_hbm [thread:$0]  (%p23271_p6), %s15046_s17, 256, %s15048_s23, %s15033_s24, %s23176_s25, %s23176_s25, %s23177_s14  }
 0x7c7 PF: > { %s15062_s16 = sand.u32 1, %s23159_s30   ;;  %p23024_p11 = pnand %p15131_p1, %p23277_p10 }
 0x7c8   : > { %s15063_s19 = scalar_lea.sflag [#allocation6], %s15062_s16 }
 0x7c9   : > { %p23025_p12 = pneg %p23024_p11 }
 0x7cb   : > { %23154 = dma.done.wait (%p23025_p12), %s15063_s19, 256  }
 0x7cc   : > { %23156 = vsyncadd (%p23025_p12), %s15063_s19, 4294967040  ;;  %p20_p13 = scmp.ge.s32.totalorder %s23253_s15, 4   ;;  %s24646_s30 = smov %s23163_s10 }
 0x7cd   : > { %s24647_s10 = smov %s23167_s11  ;;  %s24648_s11 = smov %s23265_s18 }
 0x7ce   : > { %s24649_s12 = smov %s23253_s15  ;;  %22 = sbr.rel (!%p20_p13) target bundleno = 4 (0x4), region = 130 }
 0x7d3   :  { %15069 = vsyncpa [#allocation5], 1 }
 0x7d4   :  { %15071 = vsyncpa [#allocation5 + $0x1], 1 }
 0x7d5   :  { %15072 = vsyncpa [#allocation6], 1 }
 0x7d6   :  { %15074 = vsyncpa [#allocation6 + $0x1], 1 }

</bundles_post_ra>
